<compile_context>
chip_gen: v7x
topology: tpu7x:2x2x1
jax: 0.10.0
libtpu: 0.0.40
codegen_flags: <defaults>
</compile_context>

<pallas_src>
import functools

import jax
import jax.numpy as jnp
from jax.experimental import pallas as pl
from jax.experimental.pallas import tpu as pltpu

NEG_SLOPE = 0.2
TCO = 128  # lane-aligned out-channel tile (weight-HBM bound layers; see notes)


# ------------------------------- kernel ------------------------------------

def _conv_as_matmul_kernel(x_ref, w_ref, b_ref, o_ref, acc_ref):
    """One cout tile x one 3x3-tap reduction step of conv + bias + LeakyReLU.

    x_ref:   (9, M, Cin)   bf16 im2col tap slab (VMEM-resident, constant index)
    w_ref:   (1, Cin, TCO) bf16 weight tile for tap k
    b_ref:   (1, TCO)      f32  bias tile
    o_ref:   (M, TCO)      bf16 output tile (batch+spatial rows flattened)
    acc_ref: (M, TCO)      f32  accumulator scratch
    """
    k = pl.program_id(1)

    @pl.when(k == 0)
    def _():
        acc_ref[...] = jnp.zeros_like(acc_ref)

    acc_ref[...] += jnp.dot(x_ref[k], w_ref[0],
                            preferred_element_type=jnp.float32)

    @pl.when(k == pl.num_programs(1) - 1)
    def _():
        y = acc_ref[...] + b_ref[...]
        y = jnp.maximum(y, NEG_SLOPE * y)          # LeakyReLU(0.2), f32 tile
        o_ref[...] = y.astype(o_ref.dtype)


# ------------------------------- wrapper ------------------------------------

def conv3x3_lrelu(x_nhwc, w, b, stride=1):
    """3x3 conv (pad=1, stride 1|2) + bias + LeakyReLU(0.2). NHWC, bf16 I/O."""
    bsz, h, wdim, cin = x_nhwc.shape
    cout = w.shape[-1]
    assert w.shape == (3, 3, cin, cout)
    assert cout % TCO == 0, "out channels must be lane-aligned"
    assert stride in (1, 2)
    # TODO(synk): odd H/W with stride 2 (ceil-mode output) is not supported.
    assert h % stride == 0 and wdim % stride == 0

    s = stride
    ho, wo = h // s, wdim // s
    m = bsz * ho * wo

    # Wrapper-side im2col: one contiguous (M, Cin) slab per 3x3 tap, so the
    # kernel does a single big-K dot per reduction step.
    x_bf = x_nhwc.astype(jnp.bfloat16)
    xp = jnp.pad(x_bf, ((0, 0), (1, 1), (1, 1), (0, 0)))
    taps = []
    for ky in range(3):
        for kx in range(3):
            t = xp[:, ky:ky + s * (ho - 1) + 1:s,
                   kx:kx + s * (wo - 1) + 1:s, :]          # (B, Ho, Wo, Cin)
            taps.append(t.reshape(m, cin))
    x_taps = jnp.stack(taps, axis=0)                       # (9, M, Cin)

    w_taps = w.reshape(9, cin, cout).astype(jnp.bfloat16)  # (9, Cin, Cout)
    b2 = b.reshape(1, cout).astype(jnp.float32)

    cost = pl.CostEstimate(
        flops=2 * 9 * m * cin * cout,
        transcendentals=0,
        bytes_accessed=int(9 * m * cin * 2 + 9 * cin * cout * 2
                           + m * cout * 2 + cout * 4),
    )

    out_flat = pl.pallas_call(
        _conv_as_matmul_kernel,
        out_shape=jax.ShapeDtypeStruct((m, cout), jnp.bfloat16),
        grid_spec=pltpu.PrefetchScalarGridSpec(
            num_scalar_prefetch=0,
            grid=(cout // TCO, 9),              # cout tiles x 9-tap reduction
            in_specs=[
                # Activation slab: constant block index -> DMA'd once and kept
                # VMEM-resident across the whole grid (no per-tile re-read).
                pl.BlockSpec((9, m, cin), lambda co, k: (0, 0, 0)),
                # Weights stream tap-by-tap: 9 pipeline stages per cout tile,
                # each weight block read from HBM exactly once.
                pl.BlockSpec((1, cin, TCO), lambda co, k: (k, 0, co)),
                pl.BlockSpec((1, TCO), lambda co, k: (0, co)),
            ],
            out_specs=pl.BlockSpec((m, TCO), lambda co, k: (0, co)),
            scratch_shapes=[pltpu.VMEM((m, TCO), jnp.float32)],
        ),
        compiler_params=pltpu.CompilerParams(
            dimension_semantics=("parallel", "arbitrary")),
        cost_estimate=cost,
    )(x_taps, w_taps, b2)

    return out_flat.reshape(bsz, ho, wo, cout)


# ----------------------------- parameters -----------------------------------

_LAYERS = [
    # name,      cin,  cout, stride
    ("conv3_1",  288,  256, 1),
    ("conv4",    256,  512, 2),
    ("conv4_1",  512,  512, 1),
    ("conv5",    512,  512, 2),
    ("conv5_1",  512,  512, 1),
    ("conv6",    512, 1024, 2),
    ("conv6_1", 1024, 1024, 1),
]


def init_params(key):
    params = {}
    for name, cin, cout, _ in _LAYERS:
        key, k_w, k_b = jax.random.split(key, 3)
        std = (2.0 / (cin * 9)) ** 0.5
        w = jax.random.normal(k_w, (3, 3, cin, cout), jnp.float32) * std
        bias = jax.random.normal(k_b, (cout,), jnp.float32) * 0.01
        # bf16 weights halve the dominant HBM weight traffic; bias stays f32.
        params[name] = (w.astype(jnp.bfloat16), bias.astype(jnp.float32))
    return params


# ------------------------------- forward ------------------------------------

def dispnet_costvolume_encoder(params, corr_nchw, ctx_nchw):
    """Mirrors DispnetCostvolumeEncoder.forward. Inputs/outputs in NCHW."""
    def to_nhwc(x):
        return jnp.transpose(x, (0, 2, 3, 1))

    def to_nchw(x):
        return jnp.transpose(x, (0, 3, 1, 2))

    corr = to_nhwc(corr_nchw)
    ctx = to_nhwc(ctx_nchw)

    merged = jnp.concatenate([ctx, corr], axis=-1)       # cat([ctx, corr], 1)

    feats = {"merged": merged}
    x = merged.astype(jnp.bfloat16)
    for name, _, _, stride in _LAYERS:
        w, b = params[name]
        x = conv3x3_lrelu(x, w, b, stride=stride)
        feats[name] = x

    all_enc = {k: to_nchw(v) for k, v in feats.items()}
    return all_enc, all_enc["conv6_1"]


# --------------------------- reference check --------------------------------

def _ref_forward(params, corr_nchw, ctx_nchw):
    """XLA reference with identical bf16 quantization points."""
    corr = jnp.transpose(corr_nchw, (0, 2, 3, 1))
    ctx = jnp.transpose(ctx_nchw, (0, 2, 3, 1))
    x = jnp.concatenate([ctx, corr], axis=-1).astype(jnp.bfloat16)
    for name, _, _, stride in _LAYERS:
        w, b = params[name]
        y = jax.lax.conv_general_dilated(
            x, w.astype(jnp.bfloat16),
            window_strides=(stride, stride), padding=((1, 1), (1, 1)),
            dimension_numbers=("NHWC", "HWIO", "NHWC"),
            preferred_element_type=jnp.float32)
        y = y + b[None, None, None, :].astype(jnp.float32)
        y = jnp.maximum(y, NEG_SLOPE * y)
        x = y.astype(jnp.bfloat16)
    return jnp.transpose(x, (0, 3, 1, 2))


# --------------------------------- main --------------------------------------

if __name__ == "__main__":
    key = jax.random.PRNGKey(0)
    k_params, k_corr, k_ctx = jax.random.split(key, 3)

    params = init_params(k_params)

    B, H, W = 2, 16, 16
    corr = jax.random.normal(k_corr, (B, 256, H, W), jnp.float32)  # NCHW
    ctx = jax.random.normal(k_ctx, (B, 32, H, W), jnp.float32)     # NCHW

    fwd = jax.jit(functools.partial(dispnet_costvolume_encoder, params))
    all_enc, conv6_1 = fwd(corr, ctx)
    jax.block_until_ready(conv6_1)

    # shape sanity (matches PyTorch NCHW conventions)
    assert all_enc["merged"].shape == (B, 288, H, W)
    assert all_enc["conv3_1"].shape == (B, 256, H, W)
    assert all_enc["conv4"].shape == (B, 512, H // 2, W // 2)
    assert all_enc["conv4_1"].shape == (B, 512, H // 2, W // 2)
    assert all_enc["conv5"].shape == (B, 512, H // 4, W // 4)
    assert all_enc["conv5_1"].shape == (B, 512, H // 4, W // 4)
    assert all_enc["conv6"].shape == (B, 1024, H // 8, W // 8)
    assert all_enc["conv6_1"].shape == (B, 1024, H // 8, W // 8)
    assert conv6_1.shape == (B, 1024, H // 8, W // 8)

    # numerical check against XLA reference conv (same bf16 quantization)
    ref = jax.block_until_ready(_ref_forward(params, corr, ctx))
    out_f32 = conv6_1.astype(jnp.float32)
    ref_f32 = ref.astype(jnp.float32)
    denom = jnp.maximum(jnp.max(jnp.abs(ref_f32)), 1e-6)
    rel_err = float(jnp.max(jnp.abs(out_f32 - ref_f32)) / denom)
    assert rel_err < 1e-2, f"relative error too high: {rel_err}"

    print("KERNEL_OK")
</pallas_src>

<mosaic_0001>
module attributes {stable_mosaic.version = 11 : i64} {
  func.func @_conv_as_matmul_kernel(%arg0: i32, %arg1: i32, %arg2: memref<9x512x288xbf16, #tpu.memory_space<vmem>>, %arg3: memref<1x288x128xbf16, #tpu.memory_space<vmem>>, %arg4: memref<1x128xf32, #tpu.memory_space<vmem>>, %arg5: memref<512x128xbf16, #tpu.memory_space<vmem>>, %arg6: memref<512x128xf32, #tpu.memory_space<vmem>>) attributes {dimension_semantics = [#tpu.dimension_semantics<parallel>, #tpu.dimension_semantics<arbitrary>], iteration_bounds = array<i64: 2, 9>, scalar_prefetch = 0 : i64, scratch_operands = 1 : i64, tpu.core_type = #tpu.core_type<tc>, window_params = [{pipeline_mode = #tpu.pipeline_mode<synchronous>, transform_indices = @transform_0, window_bounds = array<i64: 9, 512, 288>}, {transform_indices = @transform_1, window_bounds = array<i64: 1, 288, 128>}, {transform_indices = @transform_2, window_bounds = array<i64: 1, 128>}, {transform_indices = @transform_3, window_bounds = array<i64: 512, 128>}]} {
    %c0_i32 = arith.constant 0 : i32
    %0 = arith.cmpi eq, %arg1, %c0_i32 : i32
    %1 = arith.extui %0 : i1 to i32
    %c0_i32_0 = arith.constant 0 : i32
    %2 = arith.cmpi ne, %1, %c0_i32_0 : i32
    scf.if %2 {
      %cst_10 = arith.constant 0.000000e+00 : f32
      %15 = vector.broadcast %cst_10 : f32 to vector<512x128xf32>
      %c0_11 = arith.constant 0 : index
      %c0_12 = arith.constant 0 : index
      %16 = vector.load %arg6[%c0_11, %c0_12] : memref<512x128xf32, #tpu.memory_space<vmem>>, vector<512x128xf32>
      tpu.vector_store %arg6[%c0_11, %c0_12], %15 {strides = array<i32>} : memref<512x128xf32, #tpu.memory_space<vmem>>, vector<512x128xf32>,
    } else {
    }
    %c0 = arith.constant 0 : index
    %c0_1 = arith.constant 0 : index
    %3 = vector.load %arg6[%c0, %c0_1] : memref<512x128xf32, #tpu.memory_space<vmem>>, vector<512x128xf32>
    %4 = arith.index_cast %arg1 : i32 to index
    %c0_2 = arith.constant 0 : index
    %c0_3 = arith.constant 0 : index
    %5 = vector.load %arg2[%4, %c0_2, %c0_3] : memref<9x512x288xbf16, #tpu.memory_space<vmem>>, vector<1x512x288xbf16>
    %6 = vector.shape_cast %5 : vector<1x512x288xbf16> to vector<512x288xbf16>
    %c0_4 = arith.constant 0 : index
    %c0_5 = arith.constant 0 : index
    %c0_6 = arith.constant 0 : index
    %7 = vector.load %arg3[%c0_4, %c0_5, %c0_6] : memref<1x288x128xbf16, #tpu.memory_space<vmem>>, vector<1x288x128xbf16>
    %8 = vector.shape_cast %7 : vector<1x288x128xbf16> to vector<288x128xbf16>
    %cst = arith.constant dense<0.000000e+00> : vector<512x128xf32>
    %9 = tpu.matmul %6, %8, %cst {dimension_numbers = #tpu.dot_dimension_numbers<[1], [0], [0], [1], [0, 0, 1, 1], [], []>} : vector<512x288xbf16>, vector<288x128xbf16>, vector<512x128xf32> -> vector<512x128xf32>
    %10 = arith.addf %3, %9 : vector<512x128xf32>
    %c0_7 = arith.constant 0 : index
    %c0_8 = arith.constant 0 : index
    %11 = vector.load %arg6[%c0_7, %c0_8] : memref<512x128xf32, #tpu.memory_space<vmem>>, vector<512x128xf32>
    tpu.vector_store %arg6[%c0_7, %c0_8], %10 {strides = array<i32>} : memref<512x128xf32, #tpu.memory_space<vmem>>, vector<512x128xf32>,
    %c8_i32 = arith.constant 8 : i32
    %12 = arith.cmpi eq, %arg1, %c8_i32 : i32
    %13 = arith.extui %12 : i1 to i32
    %c0_i32_9 = arith.constant 0 : i32
    %14 = arith.cmpi ne, %13, %c0_i32_9 : i32
    scf.if %14 {
      %c0_10 = arith.constant 0 : index
      %c0_11 = arith.constant 0 : index
      %15 = vector.load %arg6[%c0_10, %c0_11] : memref<512x128xf32, #tpu.memory_space<vmem>>, vector<512x128xf32>
      %c0_12 = arith.constant 0 : index
      %c0_13 = arith.constant 0 : index
      %16 = vector.load %arg4[%c0_12, %c0_13] : memref<1x128xf32, #tpu.memory_space<vmem>>, vector<1x128xf32>
      %17 = vector.broadcast %16 : vector<1x128xf32> to vector<512x128xf32>
      %18 = arith.addf %15, %17 : vector<512x128xf32>
      %cst_14 = arith.constant 2.000000e-01 : f32
      %19 = vector.broadcast %cst_14 : f32 to vector<512x128xf32>
      %20 = arith.mulf %19, %18 : vector<512x128xf32>
      %21 = arith.maximumf %18, %20 : vector<512x128xf32>
      %22 = arith.truncf %21 : vector<512x128xf32> to vector<512x128xbf16>
      %c0_15 = arith.constant 0 : index
      %c0_16 = arith.constant 0 : index
      %23 = vector.load %arg5[%c0_15, %c0_16] : memref<512x128xbf16, #tpu.memory_space<vmem>>, vector<512x128xbf16>
      tpu.vector_store %arg5[%c0_15, %c0_16], %22 {strides = array<i32>} : memref<512x128xbf16, #tpu.memory_space<vmem>>, vector<512x128xbf16>,
    } else {
    }
    return
  }
  func.func @transform_0(%arg0: i32, %arg1: i32) -> (i32, i32, i32) {
    %c0_i32 = arith.constant 0 : i32
    %c0_i32_0 = arith.constant 0 : i32
    %c0_i32_1 = arith.constant 0 : i32
    %c0_i32_2 = arith.constant 0 : i32
    return %c0_i32, %c0_i32_0, %c0_i32_1 : i32, i32, i32
  }
  func.func @transform_1(%arg0: i32, %arg1: i32) -> (i32, i32, i32) {
    %c0_i32 = arith.constant 0 : i32
    %c0_i32_0 = arith.constant 0 : i32
    return %arg1, %c0_i32, %arg0 : i32, i32, i32
  }
  func.func @transform_2(%arg0: i32, %arg1: i32) -> (i32, i32) {
    %c0_i32 = arith.constant 0 : i32
    %c0_i32_0 = arith.constant 0 : i32
    return %c0_i32, %arg0 : i32, i32
  }
  func.func @transform_3(%arg0: i32, %arg1: i32) -> (i32, i32) {
    %c0_i32 = arith.constant 0 : i32
    %c0_i32_0 = arith.constant 0 : i32
    return %c0_i32, %arg0 : i32, i32
  }
}

module attributes {stable_mosaic.version = 11 : i64} {
  func.func @_conv_as_matmul_kernel(%arg0: i32, %arg1: i32, %arg2: memref<9x128x256xbf16, #tpu.memory_space<vmem>>, %arg3: memref<1x256x128xbf16, #tpu.memory_space<vmem>>, %arg4: memref<1x128xf32, #tpu.memory_space<vmem>>, %arg5: memref<128x128xbf16, #tpu.memory_space<vmem>>, %arg6: memref<128x128xf32, #tpu.memory_space<vmem>>) attributes {dimension_semantics = [#tpu.dimension_semantics<parallel>, #tpu.dimension_semantics<arbitrary>], iteration_bounds = array<i64: 4, 9>, scalar_prefetch = 0 : i64, scratch_operands = 1 : i64, tpu.core_type = #tpu.core_type<tc>, window_params = [{pipeline_mode = #tpu.pipeline_mode<synchronous>, transform_indices = @transform_0, window_bounds = array<i64: 9, 128, 256>}, {transform_indices = @transform_1, window_bounds = array<i64: 1, 256, 128>}, {transform_indices = @transform_2, window_bounds = array<i64: 1, 128>}, {transform_indices = @transform_3, window_bounds = array<i64: 128, 128>}]} {
    %c0_i32 = arith.constant 0 : i32
    %0 = arith.cmpi eq, %arg1, %c0_i32 : i32
    %1 = arith.extui %0 : i1 to i32
    %c0_i32_0 = arith.constant 0 : i32
    %2 = arith.cmpi ne, %1, %c0_i32_0 : i32
    scf.if %2 {
      %cst_10 = arith.constant 0.000000e+00 : f32
      %15 = vector.broadcast %cst_10 : f32 to vector<128x128xf32>
      %c0_11 = arith.constant 0 : index
      %c0_12 = arith.constant 0 : index
      %16 = vector.load %arg6[%c0_11, %c0_12] : memref<128x128xf32, #tpu.memory_space<vmem>>, vector<128x128xf32>
      tpu.vector_store %arg6[%c0_11, %c0_12], %15 {strides = array<i32>} : memref<128x128xf32, #tpu.memory_space<vmem>>, vector<128x128xf32>,
    } else {
    }
    %c0 = arith.constant 0 : index
    %c0_1 = arith.constant 0 : index
    %3 = vector.load %arg6[%c0, %c0_1] : memref<128x128xf32, #tpu.memory_space<vmem>>, vector<128x128xf32>
    %4 = arith.index_cast %arg1 : i32 to index
    %c0_2 = arith.constant 0 : index
    %c0_3 = arith.constant 0 : index
    %5 = vector.load %arg2[%4, %c0_2, %c0_3] : memref<9x128x256xbf16, #tpu.memory_space<vmem>>, vector<1x128x256xbf16>
    %6 = vector.shape_cast %5 : vector<1x128x256xbf16> to vector<128x256xbf16>
    %c0_4 = arith.constant 0 : index
    %c0_5 = arith.constant 0 : index
    %c0_6 = arith.constant 0 : index
    %7 = vector.load %arg3[%c0_4, %c0_5, %c0_6] : memref<1x256x128xbf16, #tpu.memory_space<vmem>>, vector<1x256x128xbf16>
    %8 = vector.shape_cast %7 : vector<1x256x128xbf16> to vector<256x128xbf16>
    %cst = arith.constant dense<0.000000e+00> : vector<128x128xf32>
    %9 = tpu.matmul %6, %8, %cst {dimension_numbers = #tpu.dot_dimension_numbers<[1], [0], [0], [1], [0, 0, 1, 1], [], []>} : vector<128x256xbf16>, vector<256x128xbf16>, vector<128x128xf32> -> vector<128x128xf32>
    %10 = arith.addf %3, %9 : vector<128x128xf32>
    %c0_7 = arith.constant 0 : index
    %c0_8 = arith.constant 0 : index
    %11 = vector.load %arg6[%c0_7, %c0_8] : memref<128x128xf32, #tpu.memory_space<vmem>>, vector<128x128xf32>
    tpu.vector_store %arg6[%c0_7, %c0_8], %10 {strides = array<i32>} : memref<128x128xf32, #tpu.memory_space<vmem>>, vector<128x128xf32>,
    %c8_i32 = arith.constant 8 : i32
    %12 = arith.cmpi eq, %arg1, %c8_i32 : i32
    %13 = arith.extui %12 : i1 to i32
    %c0_i32_9 = arith.constant 0 : i32
    %14 = arith.cmpi ne, %13, %c0_i32_9 : i32
    scf.if %14 {
      %c0_10 = arith.constant 0 : index
      %c0_11 = arith.constant 0 : index
      %15 = vector.load %arg6[%c0_10, %c0_11] : memref<128x128xf32, #tpu.memory_space<vmem>>, vector<128x128xf32>
      %c0_12 = arith.constant 0 : index
      %c0_13 = arith.constant 0 : index
      %16 = vector.load %arg4[%c0_12, %c0_13] : memref<1x128xf32, #tpu.memory_space<vmem>>, vector<1x128xf32>
      %17 = vector.broadcast %16 : vector<1x128xf32> to vector<128x128xf32>
      %18 = arith.addf %15, %17 : vector<128x128xf32>
      %cst_14 = arith.constant 2.000000e-01 : f32
      %19 = vector.broadcast %cst_14 : f32 to vector<128x128xf32>
      %20 = arith.mulf %19, %18 : vector<128x128xf32>
      %21 = arith.maximumf %18, %20 : vector<128x128xf32>
      %22 = arith.truncf %21 : vector<128x128xf32> to vector<128x128xbf16>
      %c0_15 = arith.constant 0 : index
      %c0_16 = arith.constant 0 : index
      %23 = vector.load %arg5[%c0_15, %c0_16] : memref<128x128xbf16, #tpu.memory_space<vmem>>, vector<128x128xbf16>
      tpu.vector_store %arg5[%c0_15, %c0_16], %22 {strides = array<i32>} : memref<128x128xbf16, #tpu.memory_space<vmem>>, vector<128x128xbf16>,
    } else {
    }
    return
  }
  func.func @transform_0(%arg0: i32, %arg1: i32) -> (i32, i32, i32) {
    %c0_i32 = arith.constant 0 : i32
    %c0_i32_0 = arith.constant 0 : i32
    %c0_i32_1 = arith.constant 0 : i32
    %c0_i32_2 = arith.constant 0 : i32
    return %c0_i32, %c0_i32_0, %c0_i32_1 : i32, i32, i32
  }
  func.func @transform_1(%arg0: i32, %arg1: i32) -> (i32, i32, i32) {
    %c0_i32 = arith.constant 0 : i32
    %c0_i32_0 = arith.constant 0 : i32
    return %arg1, %c0_i32, %arg0 : i32, i32, i32
  }
  func.func @transform_2(%arg0: i32, %arg1: i32) -> (i32, i32) {
    %c0_i32 = arith.constant 0 : i32
    %c0_i32_0 = arith.constant 0 : i32
    return %c0_i32, %arg0 : i32, i32
  }
  func.func @transform_3(%arg0: i32, %arg1: i32) -> (i32, i32) {
    %c0_i32 = arith.constant 0 : i32
    %c0_i32_0 = arith.constant 0 : i32
    return %c0_i32, %arg0 : i32, i32
  }
}

module attributes {stable_mosaic.version = 11 : i64} {
  func.func @_conv_as_matmul_kernel(%arg0: i32, %arg1: i32, %arg2: memref<9x128x512xbf16, #tpu.memory_space<vmem>>, %arg3: memref<1x512x128xbf16, #tpu.memory_space<vmem>>, %arg4: memref<1x128xf32, #tpu.memory_space<vmem>>, %arg5: memref<128x128xbf16, #tpu.memory_space<vmem>>, %arg6: memref<128x128xf32, #tpu.memory_space<vmem>>) attributes {dimension_semantics = [#tpu.dimension_semantics<parallel>, #tpu.dimension_semantics<arbitrary>], iteration_bounds = array<i64: 4, 9>, scalar_prefetch = 0 : i64, scratch_operands = 1 : i64, tpu.core_type = #tpu.core_type<tc>, window_params = [{pipeline_mode = #tpu.pipeline_mode<synchronous>, transform_indices = @transform_0, window_bounds = array<i64: 9, 128, 512>}, {transform_indices = @transform_1, window_bounds = array<i64: 1, 512, 128>}, {transform_indices = @transform_2, window_bounds = array<i64: 1, 128>}, {transform_indices = @transform_3, window_bounds = array<i64: 128, 128>}]} {
    %c0_i32 = arith.constant 0 : i32
    %0 = arith.cmpi eq, %arg1, %c0_i32 : i32
    %1 = arith.extui %0 : i1 to i32
    %c0_i32_0 = arith.constant 0 : i32
    %2 = arith.cmpi ne, %1, %c0_i32_0 : i32
    scf.if %2 {
      %cst_10 = arith.constant 0.000000e+00 : f32
      %15 = vector.broadcast %cst_10 : f32 to vector<128x128xf32>
      %c0_11 = arith.constant 0 : index
      %c0_12 = arith.constant 0 : index
      %16 = vector.load %arg6[%c0_11, %c0_12] : memref<128x128xf32, #tpu.memory_space<vmem>>, vector<128x128xf32>
      tpu.vector_store %arg6[%c0_11, %c0_12], %15 {strides = array<i32>} : memref<128x128xf32, #tpu.memory_space<vmem>>, vector<128x128xf32>,
    } else {
    }
    %c0 = arith.constant 0 : index
    %c0_1 = arith.constant 0 : index
    %3 = vector.load %arg6[%c0, %c0_1] : memref<128x128xf32, #tpu.memory_space<vmem>>, vector<128x128xf32>
    %4 = arith.index_cast %arg1 : i32 to index
    %c0_2 = arith.constant 0 : index
    %c0_3 = arith.constant 0 : index
    %5 = vector.load %arg2[%4, %c0_2, %c0_3] : memref<9x128x512xbf16, #tpu.memory_space<vmem>>, vector<1x128x512xbf16>
    %6 = vector.shape_cast %5 : vector<1x128x512xbf16> to vector<128x512xbf16>
    %c0_4 = arith.constant 0 : index
    %c0_5 = arith.constant 0 : index
    %c0_6 = arith.constant 0 : index
    %7 = vector.load %arg3[%c0_4, %c0_5, %c0_6] : memref<1x512x128xbf16, #tpu.memory_space<vmem>>, vector<1x512x128xbf16>
    %8 = vector.shape_cast %7 : vector<1x512x128xbf16> to vector<512x128xbf16>
    %cst = arith.constant dense<0.000000e+00> : vector<128x128xf32>
    %9 = tpu.matmul %6, %8, %cst {dimension_numbers = #tpu.dot_dimension_numbers<[1], [0], [0], [1], [0, 0, 1, 1], [], []>} : vector<128x512xbf16>, vector<512x128xbf16>, vector<128x128xf32> -> vector<128x128xf32>
    %10 = arith.addf %3, %9 : vector<128x128xf32>
    %c0_7 = arith.constant 0 : index
    %c0_8 = arith.constant 0 : index
    %11 = vector.load %arg6[%c0_7, %c0_8] : memref<128x128xf32, #tpu.memory_space<vmem>>, vector<128x128xf32>
    tpu.vector_store %arg6[%c0_7, %c0_8], %10 {strides = array<i32>} : memref<128x128xf32, #tpu.memory_space<vmem>>, vector<128x128xf32>,
    %c8_i32 = arith.constant 8 : i32
    %12 = arith.cmpi eq, %arg1, %c8_i32 : i32
    %13 = arith.extui %12 : i1 to i32
    %c0_i32_9 = arith.constant 0 : i32
    %14 = arith.cmpi ne, %13, %c0_i32_9 : i32
    scf.if %14 {
      %c0_10 = arith.constant 0 : index
      %c0_11 = arith.constant 0 : index
      %15 = vector.load %arg6[%c0_10, %c0_11] : memref<128x128xf32, #tpu.memory_space<vmem>>, vector<128x128xf32>
      %c0_12 = arith.constant 0 : index
      %c0_13 = arith.constant 0 : index
      %16 = vector.load %arg4[%c0_12, %c0_13] : memref<1x128xf32, #tpu.memory_space<vmem>>, vector<1x128xf32>
      %17 = vector.broadcast %16 : vector<1x128xf32> to vector<128x128xf32>
      %18 = arith.addf %15, %17 : vector<128x128xf32>
      %cst_14 = arith.constant 2.000000e-01 : f32
      %19 = vector.broadcast %cst_14 : f32 to vector<128x128xf32>
      %20 = arith.mulf %19, %18 : vector<128x128xf32>
      %21 = arith.maximumf %18, %20 : vector<128x128xf32>
      %22 = arith.truncf %21 : vector<128x128xf32> to vector<128x128xbf16>
      %c0_15 = arith.constant 0 : index
      %c0_16 = arith.constant 0 : index
      %23 = vector.load %arg5[%c0_15, %c0_16] : memref<128x128xbf16, #tpu.memory_space<vmem>>, vector<128x128xbf16>
      tpu.vector_store %arg5[%c0_15, %c0_16], %22 {strides = array<i32>} : memref<128x128xbf16, #tpu.memory_space<vmem>>, vector<128x128xbf16>,
    } else {
    }
    return
  }
  func.func @transform_0(%arg0: i32, %arg1: i32) -> (i32, i32, i32) {
    %c0_i32 = arith.constant 0 : i32
    %c0_i32_0 = arith.constant 0 : i32
    %c0_i32_1 = arith.constant 0 : i32
    %c0_i32_2 = arith.constant 0 : i32
    return %c0_i32, %c0_i32_0, %c0_i32_1 : i32, i32, i32
  }
  func.func @transform_1(%arg0: i32, %arg1: i32) -> (i32, i32, i32) {
    %c0_i32 = arith.constant 0 : i32
    %c0_i32_0 = arith.constant 0 : i32
    return %arg1, %c0_i32, %arg0 : i32, i32, i32
  }
  func.func @transform_2(%arg0: i32, %arg1: i32) -> (i32, i32) {
    %c0_i32 = arith.constant 0 : i32
    %c0_i32_0 = arith.constant 0 : i32
    return %c0_i32, %arg0 : i32, i32
  }
  func.func @transform_3(%arg0: i32, %arg1: i32) -> (i32, i32) {
    %c0_i32 = arith.constant 0 : i32
    %c0_i32_0 = arith.constant 0 : i32
    return %c0_i32, %arg0 : i32, i32
  }
}

module attributes {stable_mosaic.version = 11 : i64} {
  func.func @_conv_as_matmul_kernel(%arg0: i32, %arg1: i32, %arg2: memref<9x32x512xbf16, #tpu.memory_space<vmem>>, %arg3: memref<1x512x128xbf16, #tpu.memory_space<vmem>>, %arg4: memref<1x128xf32, #tpu.memory_space<vmem>>, %arg5: memref<32x128xbf16, #tpu.memory_space<vmem>>, %arg6: memref<32x128xf32, #tpu.memory_space<vmem>>) attributes {dimension_semantics = [#tpu.dimension_semantics<parallel>, #tpu.dimension_semantics<arbitrary>], iteration_bounds = array<i64: 4, 9>, scalar_prefetch = 0 : i64, scratch_operands = 1 : i64, tpu.core_type = #tpu.core_type<tc>, window_params = [{pipeline_mode = #tpu.pipeline_mode<synchronous>, transform_indices = @transform_0, window_bounds = array<i64: 9, 32, 512>}, {transform_indices = @transform_1, window_bounds = array<i64: 1, 512, 128>}, {transform_indices = @transform_2, window_bounds = array<i64: 1, 128>}, {transform_indices = @transform_3, window_bounds = array<i64: 32, 128>}]} {
    %c0_i32 = arith.constant 0 : i32
    %0 = arith.cmpi eq, %arg1, %c0_i32 : i32
    %1 = arith.extui %0 : i1 to i32
    %c0_i32_0 = arith.constant 0 : i32
    %2 = arith.cmpi ne, %1, %c0_i32_0 : i32
    scf.if %2 {
      %cst_10 = arith.constant 0.000000e+00 : f32
      %15 = vector.broadcast %cst_10 : f32 to vector<32x128xf32>
      %c0_11 = arith.constant 0 : index
      %c0_12 = arith.constant 0 : index
      %16 = vector.load %arg6[%c0_11, %c0_12] : memref<32x128xf32, #tpu.memory_space<vmem>>, vector<32x128xf32>
      tpu.vector_store %arg6[%c0_11, %c0_12], %15 {strides = array<i32>} : memref<32x128xf32, #tpu.memory_space<vmem>>, vector<32x128xf32>,
    } else {
    }
    %c0 = arith.constant 0 : index
    %c0_1 = arith.constant 0 : index
    %3 = vector.load %arg6[%c0, %c0_1] : memref<32x128xf32, #tpu.memory_space<vmem>>, vector<32x128xf32>
    %4 = arith.index_cast %arg1 : i32 to index
    %c0_2 = arith.constant 0 : index
    %c0_3 = arith.constant 0 : index
    %5 = vector.load %arg2[%4, %c0_2, %c0_3] : memref<9x32x512xbf16, #tpu.memory_space<vmem>>, vector<1x32x512xbf16>
    %6 = vector.shape_cast %5 : vector<1x32x512xbf16> to vector<32x512xbf16>
    %c0_4 = arith.constant 0 : index
    %c0_5 = arith.constant 0 : index
    %c0_6 = arith.constant 0 : index
    %7 = vector.load %arg3[%c0_4, %c0_5, %c0_6] : memref<1x512x128xbf16, #tpu.memory_space<vmem>>, vector<1x512x128xbf16>
    %8 = vector.shape_cast %7 : vector<1x512x128xbf16> to vector<512x128xbf16>
    %cst = arith.constant dense<0.000000e+00> : vector<32x128xf32>
    %9 = tpu.matmul %6, %8, %cst {dimension_numbers = #tpu.dot_dimension_numbers<[1], [0], [0], [1], [0, 0, 1, 1], [], []>} : vector<32x512xbf16>, vector<512x128xbf16>, vector<32x128xf32> -> vector<32x128xf32>
    %10 = arith.addf %3, %9 : vector<32x128xf32>
    %c0_7 = arith.constant 0 : index
    %c0_8 = arith.constant 0 : index
    %11 = vector.load %arg6[%c0_7, %c0_8] : memref<32x128xf32, #tpu.memory_space<vmem>>, vector<32x128xf32>
    tpu.vector_store %arg6[%c0_7, %c0_8], %10 {strides = array<i32>} : memref<32x128xf32, #tpu.memory_space<vmem>>, vector<32x128xf32>,
    %c8_i32 = arith.constant 8 : i32
    %12 = arith.cmpi eq, %arg1, %c8_i32 : i32
    %13 = arith.extui %12 : i1 to i32
    %c0_i32_9 = arith.constant 0 : i32
    %14 = arith.cmpi ne, %13, %c0_i32_9 : i32
    scf.if %14 {
      %c0_10 = arith.constant 0 : index
      %c0_11 = arith.constant 0 : index
      %15 = vector.load %arg6[%c0_10, %c0_11] : memref<32x128xf32, #tpu.memory_space<vmem>>, vector<32x128xf32>
      %c0_12 = arith.constant 0 : index
      %c0_13 = arith.constant 0 : index
      %16 = vector.load %arg4[%c0_12, %c0_13] : memref<1x128xf32, #tpu.memory_space<vmem>>, vector<1x128xf32>
      %17 = vector.broadcast %16 : vector<1x128xf32> to vector<32x128xf32>
      %18 = arith.addf %15, %17 : vector<32x128xf32>
      %cst_14 = arith.constant 2.000000e-01 : f32
      %19 = vector.broadcast %cst_14 : f32 to vector<32x128xf32>
      %20 = arith.mulf %19, %18 : vector<32x128xf32>
      %21 = arith.maximumf %18, %20 : vector<32x128xf32>
      %22 = arith.truncf %21 : vector<32x128xf32> to vector<32x128xbf16>
      %c0_15 = arith.constant 0 : index
      %c0_16 = arith.constant 0 : index
      %23 = vector.load %arg5[%c0_15, %c0_16] : memref<32x128xbf16, #tpu.memory_space<vmem>>, vector<32x128xbf16>
      tpu.vector_store %arg5[%c0_15, %c0_16], %22 {strides = array<i32>} : memref<32x128xbf16, #tpu.memory_space<vmem>>, vector<32x128xbf16>,
    } else {
    }
    return
  }
  func.func @transform_0(%arg0: i32, %arg1: i32) -> (i32, i32, i32) {
    %c0_i32 = arith.constant 0 : i32
    %c0_i32_0 = arith.constant 0 : i32
    %c0_i32_1 = arith.constant 0 : i32
    %c0_i32_2 = arith.constant 0 : i32
    return %c0_i32, %c0_i32_0, %c0_i32_1 : i32, i32, i32
  }
  func.func @transform_1(%arg0: i32, %arg1: i32) -> (i32, i32, i32) {
    %c0_i32 = arith.constant 0 : i32
    %c0_i32_0 = arith.constant 0 : i32
    return %arg1, %c0_i32, %arg0 : i32, i32, i32
  }
  func.func @transform_2(%arg0: i32, %arg1: i32) -> (i32, i32) {
    %c0_i32 = arith.constant 0 : i32
    %c0_i32_0 = arith.constant 0 : i32
    return %c0_i32, %arg0 : i32, i32
  }
  func.func @transform_3(%arg0: i32, %arg1: i32) -> (i32, i32) {
    %c0_i32 = arith.constant 0 : i32
    %c0_i32_0 = arith.constant 0 : i32
    return %c0_i32, %arg0 : i32, i32
  }
}

module attributes {stable_mosaic.version = 11 : i64} {
  func.func @_conv_as_matmul_kernel(%arg0: i32, %arg1: i32, %arg2: memref<9x8x512xbf16, #tpu.memory_space<vmem>>, %arg3: memref<1x512x128xbf16, #tpu.memory_space<vmem>>, %arg4: memref<1x128xf32, #tpu.memory_space<vmem>>, %arg5: memref<8x128xbf16, #tpu.memory_space<vmem>>, %arg6: memref<8x128xf32, #tpu.memory_space<vmem>>) attributes {dimension_semantics = [#tpu.dimension_semantics<parallel>, #tpu.dimension_semantics<arbitrary>], iteration_bounds = array<i64: 8, 9>, scalar_prefetch = 0 : i64, scratch_operands = 1 : i64, tpu.core_type = #tpu.core_type<tc>, window_params = [{pipeline_mode = #tpu.pipeline_mode<synchronous>, transform_indices = @transform_0, window_bounds = array<i64: 9, 8, 512>}, {transform_indices = @transform_1, window_bounds = array<i64: 1, 512, 128>}, {transform_indices = @transform_2, window_bounds = array<i64: 1, 128>}, {transform_indices = @transform_3, window_bounds = array<i64: 8, 128>}]} {
    %c0_i32 = arith.constant 0 : i32
    %0 = arith.cmpi eq, %arg1, %c0_i32 : i32
    %1 = arith.extui %0 : i1 to i32
    %c0_i32_0 = arith.constant 0 : i32
    %2 = arith.cmpi ne, %1, %c0_i32_0 : i32
    scf.if %2 {
      %cst_10 = arith.constant 0.000000e+00 : f32
      %15 = vector.broadcast %cst_10 : f32 to vector<8x128xf32>
      %c0_11 = arith.constant 0 : index
      %c0_12 = arith.constant 0 : index
      %16 = vector.load %arg6[%c0_11, %c0_12] : memref<8x128xf32, #tpu.memory_space<vmem>>, vector<8x128xf32>
      tpu.vector_store %arg6[%c0_11, %c0_12], %15 {strides = array<i32>} : memref<8x128xf32, #tpu.memory_space<vmem>>, vector<8x128xf32>,
    } else {
    }
    %c0 = arith.constant 0 : index
    %c0_1 = arith.constant 0 : index
    %3 = vector.load %arg6[%c0, %c0_1] : memref<8x128xf32, #tpu.memory_space<vmem>>, vector<8x128xf32>
    %4 = arith.index_cast %arg1 : i32 to index
    %c0_2 = arith.constant 0 : index
    %c0_3 = arith.constant 0 : index
    %5 = vector.load %arg2[%4, %c0_2, %c0_3] : memref<9x8x512xbf16, #tpu.memory_space<vmem>>, vector<1x8x512xbf16>
    %6 = vector.shape_cast %5 : vector<1x8x512xbf16> to vector<8x512xbf16>
    %c0_4 = arith.constant 0 : index
    %c0_5 = arith.constant 0 : index
    %c0_6 = arith.constant 0 : index
    %7 = vector.load %arg3[%c0_4, %c0_5, %c0_6] : memref<1x512x128xbf16, #tpu.memory_space<vmem>>, vector<1x512x128xbf16>
    %8 = vector.shape_cast %7 : vector<1x512x128xbf16> to vector<512x128xbf16>
    %cst = arith.constant dense<0.000000e+00> : vector<8x128xf32>
    %9 = tpu.matmul %6, %8, %cst {dimension_numbers = #tpu.dot_dimension_numbers<[1], [0], [0], [1], [0, 0, 1, 1], [], []>} : vector<8x512xbf16>, vector<512x128xbf16>, vector<8x128xf32> -> vector<8x128xf32>
    %10 = arith.addf %3, %9 : vector<8x128xf32>
    %c0_7 = arith.constant 0 : index
    %c0_8 = arith.constant 0 : index
    %11 = vector.load %arg6[%c0_7, %c0_8] : memref<8x128xf32, #tpu.memory_space<vmem>>, vector<8x128xf32>
    tpu.vector_store %arg6[%c0_7, %c0_8], %10 {strides = array<i32>} : memref<8x128xf32, #tpu.memory_space<vmem>>, vector<8x128xf32>,
    %c8_i32 = arith.constant 8 : i32
    %12 = arith.cmpi eq, %arg1, %c8_i32 : i32
    %13 = arith.extui %12 : i1 to i32
    %c0_i32_9 = arith.constant 0 : i32
    %14 = arith.cmpi ne, %13, %c0_i32_9 : i32
    scf.if %14 {
      %c0_10 = arith.constant 0 : index
      %c0_11 = arith.constant 0 : index
      %15 = vector.load %arg6[%c0_10, %c0_11] : memref<8x128xf32, #tpu.memory_space<vmem>>, vector<8x128xf32>
      %c0_12 = arith.constant 0 : index
      %c0_13 = arith.constant 0 : index
      %16 = vector.load %arg4[%c0_12, %c0_13] : memref<1x128xf32, #tpu.memory_space<vmem>>, vector<1x128xf32>
      %17 = vector.broadcast %16 : vector<1x128xf32> to vector<8x128xf32>
      %18 = arith.addf %15, %17 : vector<8x128xf32>
      %cst_14 = arith.constant 2.000000e-01 : f32
      %19 = vector.broadcast %cst_14 : f32 to vector<8x128xf32>
      %20 = arith.mulf %19, %18 : vector<8x128xf32>
      %21 = arith.maximumf %18, %20 : vector<8x128xf32>
      %22 = arith.truncf %21 : vector<8x128xf32> to vector<8x128xbf16>
      %c0_15 = arith.constant 0 : index
      %c0_16 = arith.constant 0 : index
      %23 = vector.load %arg5[%c0_15, %c0_16] : memref<8x128xbf16, #tpu.memory_space<vmem>>, vector<8x128xbf16>
      tpu.vector_store %arg5[%c0_15, %c0_16], %22 {strides = array<i32>} : memref<8x128xbf16, #tpu.memory_space<vmem>>, vector<8x128xbf16>,
    } else {
    }
    return
  }
  func.func @transform_0(%arg0: i32, %arg1: i32) -> (i32, i32, i32) {
    %c0_i32 = arith.constant 0 : i32
    %c0_i32_0 = arith.constant 0 : i32
    %c0_i32_1 = arith.constant 0 : i32
    %c0_i32_2 = arith.constant 0 : i32
    return %c0_i32, %c0_i32_0, %c0_i32_1 : i32, i32, i32
  }
  func.func @transform_1(%arg0: i32, %arg1: i32) -> (i32, i32, i32) {
    %c0_i32 = arith.constant 0 : i32
    %c0_i32_0 = arith.constant 0 : i32
    return %arg1, %c0_i32, %arg0 : i32, i32, i32
  }
  func.func @transform_2(%arg0: i32, %arg1: i32) -> (i32, i32) {
    %c0_i32 = arith.constant 0 : i32
    %c0_i32_0 = arith.constant 0 : i32
    return %c0_i32, %arg0 : i32, i32
  }
  func.func @transform_3(%arg0: i32, %arg1: i32) -> (i32, i32) {
    %c0_i32 = arith.constant 0 : i32
    %c0_i32_0 = arith.constant 0 : i32
    return %c0_i32, %arg0 : i32, i32
  }
}

module attributes {stable_mosaic.version = 11 : i64} {
  func.func @_conv_as_matmul_kernel(%arg0: i32, %arg1: i32, %arg2: memref<9x8x1024xbf16, #tpu.memory_space<vmem>>, %arg3: memref<1x1024x128xbf16, #tpu.memory_space<vmem>>, %arg4: memref<1x128xf32, #tpu.memory_space<vmem>>, %arg5: memref<8x128xbf16, #tpu.memory_space<vmem>>, %arg6: memref<8x128xf32, #tpu.memory_space<vmem>>) attributes {dimension_semantics = [#tpu.dimension_semantics<parallel>, #tpu.dimension_semantics<arbitrary>], iteration_bounds = array<i64: 8, 9>, scalar_prefetch = 0 : i64, scratch_operands = 1 : i64, tpu.core_type = #tpu.core_type<tc>, window_params = [{pipeline_mode = #tpu.pipeline_mode<synchronous>, transform_indices = @transform_0, window_bounds = array<i64: 9, 8, 1024>}, {transform_indices = @transform_1, window_bounds = array<i64: 1, 1024, 128>}, {transform_indices = @transform_2, window_bounds = array<i64: 1, 128>}, {transform_indices = @transform_3, window_bounds = array<i64: 8, 128>}]} {
    %c0_i32 = arith.constant 0 : i32
    %0 = arith.cmpi eq, %arg1, %c0_i32 : i32
    %1 = arith.extui %0 : i1 to i32
    %c0_i32_0 = arith.constant 0 : i32
    %2 = arith.cmpi ne, %1, %c0_i32_0 : i32
    scf.if %2 {
      %cst_10 = arith.constant 0.000000e+00 : f32
      %15 = vector.broadcast %cst_10 : f32 to vector<8x128xf32>
      %c0_11 = arith.constant 0 : index
      %c0_12 = arith.constant 0 : index
      %16 = vector.load %arg6[%c0_11, %c0_12] : memref<8x128xf32, #tpu.memory_space<vmem>>, vector<8x128xf32>
      tpu.vector_store %arg6[%c0_11, %c0_12], %15 {strides = array<i32>} : memref<8x128xf32, #tpu.memory_space<vmem>>, vector<8x128xf32>,
    } else {
    }
    %c0 = arith.constant 0 : index
    %c0_1 = arith.constant 0 : index
    %3 = vector.load %arg6[%c0, %c0_1] : memref<8x128xf32, #tpu.memory_space<vmem>>, vector<8x128xf32>
    %4 = arith.index_cast %arg1 : i32 to index
    %c0_2 = arith.constant 0 : index
    %c0_3 = arith.constant 0 : index
    %5 = vector.load %arg2[%4, %c0_2, %c0_3] : memref<9x8x1024xbf16, #tpu.memory_space<vmem>>, vector<1x8x1024xbf16>
    %6 = vector.shape_cast %5 : vector<1x8x1024xbf16> to vector<8x1024xbf16>
    %c0_4 = arith.constant 0 : index
    %c0_5 = arith.constant 0 : index
    %c0_6 = arith.constant 0 : index
    %7 = vector.load %arg3[%c0_4, %c0_5, %c0_6] : memref<1x1024x128xbf16, #tpu.memory_space<vmem>>, vector<1x1024x128xbf16>
    %8 = vector.shape_cast %7 : vector<1x1024x128xbf16> to vector<1024x128xbf16>
    %cst = arith.constant dense<0.000000e+00> : vector<8x128xf32>
    %9 = tpu.matmul %6, %8, %cst {dimension_numbers = #tpu.dot_dimension_numbers<[1], [0], [0], [1], [0, 0, 1, 1], [], []>} : vector<8x1024xbf16>, vector<1024x128xbf16>, vector<8x128xf32> -> vector<8x128xf32>
    %10 = arith.addf %3, %9 : vector<8x128xf32>
    %c0_7 = arith.constant 0 : index
    %c0_8 = arith.constant 0 : index
    %11 = vector.load %arg6[%c0_7, %c0_8] : memref<8x128xf32, #tpu.memory_space<vmem>>, vector<8x128xf32>
    tpu.vector_store %arg6[%c0_7, %c0_8], %10 {strides = array<i32>} : memref<8x128xf32, #tpu.memory_space<vmem>>, vector<8x128xf32>,
    %c8_i32 = arith.constant 8 : i32
    %12 = arith.cmpi eq, %arg1, %c8_i32 : i32
    %13 = arith.extui %12 : i1 to i32
    %c0_i32_9 = arith.constant 0 : i32
    %14 = arith.cmpi ne, %13, %c0_i32_9 : i32
    scf.if %14 {
      %c0_10 = arith.constant 0 : index
      %c0_11 = arith.constant 0 : index
      %15 = vector.load %arg6[%c0_10, %c0_11] : memref<8x128xf32, #tpu.memory_space<vmem>>, vector<8x128xf32>
      %c0_12 = arith.constant 0 : index
      %c0_13 = arith.constant 0 : index
      %16 = vector.load %arg4[%c0_12, %c0_13] : memref<1x128xf32, #tpu.memory_space<vmem>>, vector<1x128xf32>
      %17 = vector.broadcast %16 : vector<1x128xf32> to vector<8x128xf32>
      %18 = arith.addf %15, %17 : vector<8x128xf32>
      %cst_14 = arith.constant 2.000000e-01 : f32
      %19 = vector.broadcast %cst_14 : f32 to vector<8x128xf32>
      %20 = arith.mulf %19, %18 : vector<8x128xf32>
      %21 = arith.maximumf %18, %20 : vector<8x128xf32>
      %22 = arith.truncf %21 : vector<8x128xf32> to vector<8x128xbf16>
      %c0_15 = arith.constant 0 : index
      %c0_16 = arith.constant 0 : index
      %23 = vector.load %arg5[%c0_15, %c0_16] : memref<8x128xbf16, #tpu.memory_space<vmem>>, vector<8x128xbf16>
      tpu.vector_store %arg5[%c0_15, %c0_16], %22 {strides = array<i32>} : memref<8x128xbf16, #tpu.memory_space<vmem>>, vector<8x128xbf16>,
    } else {
    }
    return
  }
  func.func @transform_0(%arg0: i32, %arg1: i32) -> (i32, i32, i32) {
    %c0_i32 = arith.constant 0 : i32
    %c0_i32_0 = arith.constant 0 : i32
    %c0_i32_1 = arith.constant 0 : i32
    %c0_i32_2 = arith.constant 0 : i32
    return %c0_i32, %c0_i32_0, %c0_i32_1 : i32, i32, i32
  }
  func.func @transform_1(%arg0: i32, %arg1: i32) -> (i32, i32, i32) {
    %c0_i32 = arith.constant 0 : i32
    %c0_i32_0 = arith.constant 0 : i32
    return %arg1, %c0_i32, %arg0 : i32, i32, i32
  }
  func.func @transform_2(%arg0: i32, %arg1: i32) -> (i32, i32) {
    %c0_i32 = arith.constant 0 : i32
    %c0_i32_0 = arith.constant 0 : i32
    return %c0_i32, %arg0 : i32, i32
  }
  func.func @transform_3(%arg0: i32, %arg1: i32) -> (i32, i32) {
    %c0_i32 = arith.constant 0 : i32
    %c0_i32_0 = arith.constant 0 : i32
    return %c0_i32, %arg0 : i32, i32
  }
}

</mosaic_0001>

<bundles_post_ra>
// kernel: dispnet_costvolume_encoder.7
= control target key start
LH: loop header
LB: loop body
LE: loop exit
PB: predicated region body
PF: predicated region fallthrough
CT: control target
= control target key end

     0   :  { %s3967_s12 = smov 0   ;;  %s3969_s13 = smov 0   ;;  %s4791_s0 = inlined_call_operand.vmem [shape: bf16[9,512,288], index: 0, kind: input, shape index: {}]   ;;  %s4792_s1 = inlined_call_operand.vmem [shape: bf16[9,288,256], index: 1, kind: input, shape index: {}]   ;;  %s4793_s2 = inlined_call_operand.vmem [shape: f32[1,256], index: 2, kind: input, shape index: {}]   ;;  %s4794_s3 = inlined_call_operand.vmem [shape: bf16[512,256], index: 3, kind: output, shape index: {}]  }
   0x1   :  { %s3971_s14 = smov 0   ;;  %s3973_s15 = smov 0  }
   0x2   :  { %s3975_s16 = smov 0   ;;  %s3977_s17 = smov 0  }
   0x3   :  { %s3979_s18 = smov 0   ;;  %s3981_s19 = smov 0  }
   0x4   :  { %s3983_s20 = smov 0  }
   0x5 LB: > { %s22_s21 = sadd.s32 1, %s3935_s18  ;;  %s25_s22 = sadd.s32 1, %s3939_s19  ;;  %s3943_s20 = sphi %s3983_s20, %s13_s20   ;;  %s3939_s19 = sphi %s3981_s19, %s4804_s19   ;;  %s3935_s18 = sphi %s3979_s18, %s4803_s18   ;;  %s3931_s17 = sphi %s3977_s17, %s4802_s17   ;;  %s3927_s16 = sphi %s3975_s16, %s4801_s16   ;;  %s3923_s15 = sphi %s3973_s15, %s4800_s15   ;;  %s3919_s14 = sphi %s3971_s14, %s4799_s14   ;;  %s3915_s13 = sphi %s3969_s13, %s4798_s13   ;;  %s3911_s12 = sphi %s3967_s12, %s4797_s12  }
   0x6   : > { %p23_p0 = scmp.ge.s32.totalorder %s22_s21, 9  ;;  %p62_p1 = scmp.ne.s32.totalorder %s3923_s15, %s3919_s14 }
   0x7   : > { %s3035_s23 = sadd.s32 4294967295, %s3943_s20   ;;  %p63_p2 = scmp.eq.s32.totalorder %s3943_s20, 0 }
   0x8   : > { %s4806_s21 = smov (%p23_p0, %s22_s21), 0  ;;  %s4808_s22 = smov (!%p23_p0, %s25_s22), %s3939_s19 }
   0x9   : > { %p27_p3 = scmp.ge.s32.totalorder %s4808_s22, 2  ;;  %s50_s24 = ssub.s32 %s3935_s18, %s4806_s21 }
   0xa   : > { %p4023_p4 = por %p63_p2, %p62_p1  ;;  %p117_p5 = scmp.ne.s32.totalorder %s3915_s13, %s3911_s12 }
   0xb   : > { %s4810_s22 = smov (%p27_p3, %s4808_s22), 0  ;;  %s55_s26 = sadd.s32 1, %s3923_s15 }
   0xc   : > { %p118_p6 = scmp.eq.s32.totalorder %s3035_s23, 17  ;;  %s51_s27 = ssub.s32 %s3939_s19, %s4810_s22 }
   0xd   : > { %s107_s28 = sadd.s32 1, %s3915_s13  ;;  %s52_s29 = sor.u32 %s51_s27, %s50_s24 }
   0xe   : > { %p105_p7 = scmp.eq.s32.totalorder %s51_s27, 0  ;;  %p53_p8 = scmp.eq.s32.totalorder %s52_s29, 0 }
   0xf   : > { %p4035_p9 = por %p118_p6, %p117_p5  ;;  %p3038_p10 = scmp.ge.s32.totalorder %s3943_s20, 18 }
  0x10   : > { %s4040_s4 = scalar_select %p105_p7, %s3915_s13, %s107_s28  }
  0x11   : > { %s4043_s5 = scalar_select %p53_p8, %s3923_s15, %s55_s26  }
  0x12   : > { %143 = sbr.rel (%p3038_p10) target bundleno = 56 (0x38), region = 20 }
  0x19   : > { %146 = sbr.rel (!%p4023_p4) target bundleno = 56 (0x38), region = 24  ;;  %s148_s6 = sand.u32 (%p4023_p4), 1, %s3923_s15  }
  0x1a   : > { %s3651_s7 = smul.u32 (%p4023_p4), 72, %s3935_s18 }
  0x1b   : > { %s3650_s8 = smul.u32 (%p4023_p4), 144, %s148_s6 }
  0x1c   : > { %s152_s9 = sadd.s32 (%p4023_p4), %s3939_s19, %s3651_s7 }
  0x1d   : > { %s3039_s10 = sshll.u32 (%p4023_p4), %s152_s9, 2  ;;  %s4059_s25 = scalar_lea.vmem (%p4023_p4), [#allocation3], %s3650_s8 }
  0x1e   : > { %s4054_s24 = scalar_lea.vmem (%p4023_p4), %s4792_s1, %s3039_s10 }
  0x1f   : > { %v170_v0 = vld [vmem:[%s4054_s24] sm:$0xf] (%p4023_p4)  ;;  %v172_v1 = vld [vmem:[%s4054_s24 + $0x8] sm:$0xf] (%p4023_p4)  ;;  %v174_v2 = vld [vmem:[%s4054_s24 + $0x10] sm:$0xf] (%p4023_p4) }
  0x20   : > { %171 = vst [vmem:[%s4059_s25] sm:$0xf] %v170_v0  ;;  %173 = vst [vmem:[%s4059_s25 + $0x4] sm:$0xf] %v172_v1  ;;  %v176_v3 = vld [vmem:[%s4054_s24 + $0x18] sm:$0xf] }
  0x21   : > { %175 = vst [vmem:[%s4059_s25 + $0x8] sm:$0xf] %v174_v2  ;;  %v178_v4 = vld [vmem:[%s4054_s24 + $0x20] sm:$0xf]  ;;  %v180_v5 = vld [vmem:[%s4054_s24 + $0x28] sm:$0xf] }
  0x22   : > { %177 = vst [vmem:[%s4059_s25 + $0xc] sm:$0xf] %v176_v3  ;;  %179 = vst [vmem:[%s4059_s25 + $0x10] sm:$0xf] %v178_v4  ;;  %v182_v6 = vld [vmem:[%s4054_s24 + $0x30] sm:$0xf] }
  0x23   : > { %181 = vst [vmem:[%s4059_s25 + $0x14] sm:$0xf] %v180_v5  ;;  %v184_v7 = vld [vmem:[%s4054_s24 + $0x38] sm:$0xf]  ;;  %v186_v8 = vld [vmem:[%s4054_s24 + $0x40] sm:$0xf] }
  0x24   : > { %183 = vst [vmem:[%s4059_s25 + $0x18] sm:$0xf] %v182_v6  ;;  %185 = vst [vmem:[%s4059_s25 + $0x1c] sm:$0xf] %v184_v7  ;;  %v188_v9 = vld [vmem:[%s4054_s24 + $0x48] sm:$0xf] }
  0x25   : > { %187 = vst [vmem:[%s4059_s25 + $0x20] sm:$0xf] %v186_v8  ;;  %v190_v10 = vld [vmem:[%s4054_s24 + $0x50] sm:$0xf]  ;;  %v192_v11 = vld [vmem:[%s4054_s24 + $0x58] sm:$0xf] }
  0x26   : > { %189 = vst [vmem:[%s4059_s25 + $0x24] sm:$0xf] %v188_v9  ;;  %191 = vst [vmem:[%s4059_s25 + $0x28] sm:$0xf] %v190_v10  ;;  %v194_v12 = vld [vmem:[%s4054_s24 + $0x60] sm:$0xf] }
  0x27   : > { %193 = vst [vmem:[%s4059_s25 + $0x2c] sm:$0xf] %v192_v11  ;;  %v196_v13 = vld [vmem:[%s4054_s24 + $0x68] sm:$0xf]  ;;  %v198_v14 = vld [vmem:[%s4054_s24 + $0x70] sm:$0xf] }
  0x28   : > { %195 = vst [vmem:[%s4059_s25 + $0x30] sm:$0xf] %v194_v12  ;;  %197 = vst [vmem:[%s4059_s25 + $0x34] sm:$0xf] %v196_v13  ;;  %v200_v15 = vld [vmem:[%s4054_s24 + $0x78] sm:$0xf] }
  0x29   : > { %199 = vst [vmem:[%s4059_s25 + $0x38] sm:$0xf] %v198_v14  ;;  %v202_v16 = vld [vmem:[%s4054_s24 + $0x80] sm:$0xf]  ;;  %v204_v17 = vld [vmem:[%s4054_s24 + $0x88] sm:$0xf] }
  0x2a   : > { %201 = vst [vmem:[%s4059_s25 + $0x3c] sm:$0xf] %v200_v15  ;;  %203 = vst [vmem:[%s4059_s25 + $0x40] sm:$0xf] %v202_v16  ;;  %v206_v18 = vld [vmem:[%s4054_s24 + $0x90] sm:$0xf] }
  0x2b   : > { %205 = vst [vmem:[%s4059_s25 + $0x44] sm:$0xf] %v204_v17  ;;  %v208_v19 = vld [vmem:[%s4054_s24 + $0x98] sm:$0xf]  ;;  %v210_v20 = vld [vmem:[%s4054_s24 + $0xa0] sm:$0xf] }
  0x2c   : > { %207 = vst [vmem:[%s4059_s25 + $0x48] sm:$0xf] %v206_v18  ;;  %209 = vst [vmem:[%s4059_s25 + $0x4c] sm:$0xf] %v208_v19  ;;  %v212_v21 = vld [vmem:[%s4054_s24 + $0xa8] sm:$0xf] }
  0x2d   : > { %211 = vst [vmem:[%s4059_s25 + $0x50] sm:$0xf] %v210_v20  ;;  %v214_v22 = vld [vmem:[%s4054_s24 + $0xb0] sm:$0xf]  ;;  %v216_v23 = vld [vmem:[%s4054_s24 + $0xb8] sm:$0xf] }
  0x2e   : > { %213 = vst [vmem:[%s4059_s25 + $0x54] sm:$0xf] %v212_v21  ;;  %215 = vst [vmem:[%s4059_s25 + $0x58] sm:$0xf] %v214_v22  ;;  %v218_v24 = vld [vmem:[%s4054_s24 + $0xc0] sm:$0xf] }
  0x2f   : > { %217 = vst [vmem:[%s4059_s25 + $0x5c] sm:$0xf] %v216_v23  ;;  %v220_v25 = vld [vmem:[%s4054_s24 + $0xc8] sm:$0xf]  ;;  %v222_v26 = vld [vmem:[%s4054_s24 + $0xd0] sm:$0xf] }
  0x30   : > { %219 = vst [vmem:[%s4059_s25 + $0x60] sm:$0xf] %v218_v24  ;;  %221 = vst [vmem:[%s4059_s25 + $0x64] sm:$0xf] %v220_v25  ;;  %v224_v27 = vld [vmem:[%s4054_s24 + $0xd8] sm:$0xf] }
  0x31   : > { %223 = vst [vmem:[%s4059_s25 + $0x68] sm:$0xf] %v222_v26  ;;  %v226_v28 = vld [vmem:[%s4054_s24 + $0xe0] sm:$0xf]  ;;  %v228_v29 = vld [vmem:[%s4054_s24 + $0xe8] sm:$0xf] }
  0x32   : > { %225 = vst [vmem:[%s4059_s25 + $0x6c] sm:$0xf] %v224_v27  ;;  %227 = vst [vmem:[%s4059_s25 + $0x70] sm:$0xf] %v226_v28  ;;  %v230_v30 = vld [vmem:[%s4054_s24 + $0xf0] sm:$0xf] }
  0x33   : > { %229 = vst [vmem:[%s4059_s25 + $0x74] sm:$0xf] %v228_v29  ;;  %v232_v31 = vld [vmem:[%s4054_s24 + $0xf8] sm:$0xf]  ;;  %v234_v32 = vld [vmem:[%s4054_s24 + $0x100] sm:$0xf] }
  0x34   : > { %231 = vst [vmem:[%s4059_s25 + $0x78] sm:$0xf] %v230_v30  ;;  %233 = vst [vmem:[%s4059_s25 + $0x7c] sm:$0xf] %v232_v31  ;;  %v236_v33 = vld [vmem:[%s4054_s24 + $0x108] sm:$0xf] }
  0x35   : > { %235 = vst [vmem:[%s4059_s25 + $0x80] sm:$0xf] %v234_v32  ;;  %v238_v34 = vld [vmem:[%s4054_s24 + $0x110] sm:$0xf]  ;;  %v240_v35 = vld [vmem:[%s4054_s24 + $0x118] sm:$0xf] }
  0x36   : > { %237 = vst [vmem:[%s4059_s25 + $0x84] sm:$0xf] %v236_v33  ;;  %239 = vst [vmem:[%s4059_s25 + $0x88] sm:$0xf] %v238_v34 }
  0x37   : > { %241 = vst [vmem:[%s4059_s25 + $0x8c] sm:$0xf] %v240_v35 }
  0x38 PF: > { %p3040_p11 = scmp.ge.s32.totalorder %s3943_s20, 1  ;;  %p341_p12 = scmp.lt.s32.totalorder %s3943_s20, 19 }
  0x3a   : > { %p342_p13 = pnand %p3040_p11, %p341_p12 }
  0x3b   : > { %s348_s26 = sand.u32 (!%p342_p13), 1, %s3919_s14   ;;  %s370_s27 = sand.u32 (!%p342_p13), 1, %s3911_s12  }
  0x3c   : > { %345 = sbr.rel (%p342_p13) target bundleno = 672 (0x2a0), region = 69  ;;  %s3041_s29 = sshll.u32 (!%p342_p13), %s370_s27, 8 }
  0x3d   : > { %s3652_s28 = smul.u32 (!%p342_p13), 144, %s348_s26  ;;  %p373_p0 = scmp.lt.s32.totalorder (!%p342_p13), %s3931_s17, 1 }
  0x3e   : > { %s4144_s11 = scalar_lea.vmem (!%p342_p13), [#allocation4], %s3041_s29  ;;  %p3042_p1 = scmp.ne.s32.totalorder (!%p342_p13), %s3927_s16, 0 }
  0x3f   : > { %s4142_s10 = scalar_lea.vmem (!%p342_p13), [#allocation3], %s3652_s28 }
  0x43   : > { %s4136_s6 = scalar_select %p373_p0, %s3931_s17, 1 }
  0x44   : > { %380 = sbr.rel (%p3042_p1) target bundleno = 101 (0x65), region = 77  ;;  %v3945_v36 = vmov (!%p3042_p1), 0.0  }
  0x45   : > { %s375_s9 = scalar_lea.vmem %s4793_s2, %s4136_s6  ;;  %381 = vst [vmem:[#allocation2] sm:$0xff] (!%p3042_p1), %v3945_v36  ;;  %382 = vst [vmem:[#allocation2 + $0x8] sm:$0xff] (!%p3042_p1), %v3945_v36 }
  0x46   : > { %383 = vst [vmem:[#allocation2 + $0x10] sm:$0xff] (!%p3042_p1), %v3945_v36  ;;  %384 = vst [vmem:[#allocation2 + $0x18] sm:$0xff] (!%p3042_p1), %v3945_v36 }
  0x47   : > { %385 = vst [vmem:[#allocation2 + $0x20] sm:$0xff] (!%p3042_p1), %v3945_v36  ;;  %386 = vst [vmem:[#allocation2 + $0x28] sm:$0xff] (!%p3042_p1), %v3945_v36 }
  0x48   : > { %387 = vst [vmem:[#allocation2 + $0x30] sm:$0xff] (!%p3042_p1), %v3945_v36  ;;  %388 = vst [vmem:[#allocation2 + $0x38] sm:$0xff] (!%p3042_p1), %v3945_v36 }
  0x49   : > { %389 = vst [vmem:[#allocation2 + $0x40] sm:$0xff] (!%p3042_p1), %v3945_v36  ;;  %390 = vst [vmem:[#allocation2 + $0x48] sm:$0xff] (!%p3042_p1), %v3945_v36 }
  0x4a   : > { %391 = vst [vmem:[#allocation2 + $0x50] sm:$0xff] (!%p3042_p1), %v3945_v36  ;;  %392 = vst [vmem:[#allocation2 + $0x58] sm:$0xff] (!%p3042_p1), %v3945_v36 }
  0x4b   : > { %393 = vst [vmem:[#allocation2 + $0x60] sm:$0xff] %v3945_v36  ;;  %394 = vst [vmem:[#allocation2 + $0x68] sm:$0xff] %v3945_v36 }
  0x4c   : > { %395 = vst [vmem:[#allocation2 + $0x70] sm:$0xff] %v3945_v36  ;;  %396 = vst [vmem:[#allocation2 + $0x78] sm:$0xff] %v3945_v36 }
  0x4d   : > { %397 = vst [vmem:[#allocation2 + $0x80] sm:$0xff] %v3945_v36  ;;  %398 = vst [vmem:[#allocation2 + $0x88] sm:$0xff] %v3945_v36 }
  0x4e   : > { %399 = vst [vmem:[#allocation2 + $0x90] sm:$0xff] %v3945_v36  ;;  %400 = vst [vmem:[#allocation2 + $0x98] sm:$0xff] %v3945_v36 }
  0x4f   : > { %401 = vst [vmem:[#allocation2 + $0xa0] sm:$0xff] %v3945_v36  ;;  %402 = vst [vmem:[#allocation2 + $0xa8] sm:$0xff] %v3945_v36 }
  0x50   : > { %403 = vst [vmem:[#allocation2 + $0xb0] sm:$0xff] %v3945_v36  ;;  %404 = vst [vmem:[#allocation2 + $0xb8] sm:$0xff] %v3945_v36 }
  0x51   : > { %405 = vst [vmem:[#allocation2 + $0xc0] sm:$0xff] %v3945_v36  ;;  %406 = vst [vmem:[#allocation2 + $0xc8] sm:$0xff] %v3945_v36 }
  0x52   : > { %407 = vst [vmem:[#allocation2 + $0xd0] sm:$0xff] %v3945_v36  ;;  %408 = vst [vmem:[#allocation2 + $0xd8] sm:$0xff] %v3945_v36 }
  0x53   : > { %409 = vst [vmem:[#allocation2 + $0xe0] sm:$0xff] %v3945_v36  ;;  %410 = vst [vmem:[#allocation2 + $0xe8] sm:$0xff] %v3945_v36 }
  0x54   : > { %411 = vst [vmem:[#allocation2 + $0xf0] sm:$0xff] %v3945_v36  ;;  %412 = vst [vmem:[#allocation2 + $0xf8] sm:$0xff] %v3945_v36 }
  0x55   : > { %413 = vst [vmem:[#allocation2 + $0x100] sm:$0xff] %v3945_v36  ;;  %414 = vst [vmem:[#allocation2 + $0x108] sm:$0xff] %v3945_v36 }
  0x56   : > { %415 = vst [vmem:[#allocation2 + $0x110] sm:$0xff] %v3945_v36  ;;  %416 = vst [vmem:[#allocation2 + $0x118] sm:$0xff] %v3945_v36 }
  0x57   : > { %417 = vst [vmem:[#allocation2 + $0x120] sm:$0xff] %v3945_v36  ;;  %418 = vst [vmem:[#allocation2 + $0x128] sm:$0xff] %v3945_v36 }
  0x58   : > { %419 = vst [vmem:[#allocation2 + $0x130] sm:$0xff] %v3945_v36  ;;  %420 = vst [vmem:[#allocation2 + $0x138] sm:$0xff] %v3945_v36 }
  0x59   : > { %421 = vst [vmem:[#allocation2 + $0x140] sm:$0xff] %v3945_v36  ;;  %422 = vst [vmem:[#allocation2 + $0x148] sm:$0xff] %v3945_v36 }
  0x5a   : > { %423 = vst [vmem:[#allocation2 + $0x150] sm:$0xff] %v3945_v36  ;;  %424 = vst [vmem:[#allocation2 + $0x158] sm:$0xff] %v3945_v36 }
  0x5b   : > { %425 = vst [vmem:[#allocation2 + $0x160] sm:$0xff] %v3945_v36  ;;  %426 = vst [vmem:[#allocation2 + $0x168] sm:$0xff] %v3945_v36 }
  0x5c   : > { %427 = vst [vmem:[#allocation2 + $0x170] sm:$0xff] %v3945_v36  ;;  %428 = vst [vmem:[#allocation2 + $0x178] sm:$0xff] %v3945_v36 }
  0x5d   : > { %429 = vst [vmem:[#allocation2 + $0x180] sm:$0xff] %v3945_v36  ;;  %430 = vst [vmem:[#allocation2 + $0x188] sm:$0xff] %v3945_v36 }
  0x5e   : > { %431 = vst [vmem:[#allocation2 + $0x190] sm:$0xff] %v3945_v36  ;;  %432 = vst [vmem:[#allocation2 + $0x198] sm:$0xff] %v3945_v36 }
  0x5f   : > { %433 = vst [vmem:[#allocation2 + $0x1a0] sm:$0xff] %v3945_v36  ;;  %434 = vst [vmem:[#allocation2 + $0x1a8] sm:$0xff] %v3945_v36 }
  0x60   : > { %435 = vst [vmem:[#allocation2 + $0x1b0] sm:$0xff] %v3945_v36  ;;  %436 = vst [vmem:[#allocation2 + $0x1b8] sm:$0xff] %v3945_v36 }
  0x61   : > { %437 = vst [vmem:[#allocation2 + $0x1c0] sm:$0xff] %v3945_v36  ;;  %438 = vst [vmem:[#allocation2 + $0x1c8] sm:$0xff] %v3945_v36 }
  0x62   : > { %439 = vst [vmem:[#allocation2 + $0x1d0] sm:$0xff] %v3945_v36  ;;  %440 = vst [vmem:[#allocation2 + $0x1d8] sm:$0xff] %v3945_v36 }
  0x63   : > { %441 = vst [vmem:[#allocation2 + $0x1e0] sm:$0xff] %v3945_v36  ;;  %442 = vst [vmem:[#allocation2 + $0x1e8] sm:$0xff] %v3945_v36 }
  0x64   : > { %443 = vst [vmem:[#allocation2 + $0x1f0] sm:$0xff] %v3945_v36  ;;  %444 = vst [vmem:[#allocation2 + $0x1f8] sm:$0xff] %v3945_v36 }
  0x65 PF: > { %v3727_v37 = vld [vmem:[%s4142_s10] sm:$0xff]   ;;  %v3946_v38 = vmov 0   ;;  %v3728_v39 = vld [vmem:[%s4142_s10 + $0x8] sm:$0xff]   ;;  %v3729_v40 = vld [vmem:[%s4142_s10 + $0x10] sm:$0xff]   ;;  %s3260_s12 = smul.u32 768, %s3927_s16  ;;  %vm1264_vm0 = vcmask 261120  }
  0x66   : > { %1361 = vmatprep.subr.bf16.mxu0 %v3946_v38  ;;  %3618 = vmatprep.subr.bf16.mxu1 %v3946_v38  ;;  %v3730_v41 = vld [vmem:[%s4142_s10 + $0x18] sm:$0xff]   ;;  %v3731_v42 = vld [vmem:[%s4142_s10 + $0x20] sm:$0xff]   ;;  %v3732_v44 = vld [vmem:[%s4142_s10 + $0x28] sm:$0xff]   ;;  %p3190_p2 = scmp.ne.s32.totalorder %s3927_s16, 8 }
  0x67   : > { %1362 = vmatpush1.bf16.msra.mxu0 %v3727_v37  ;;  %3634 = vmatpush1.bf16.msra.mxu1 %v3727_v37  ;;  %s4228_s24 = scalar_lea.vmem %s4791_s0, %s3260_s12  ;;  %v3733_v46 = vld [vmem:[%s4142_s10 + $0x30] sm:$0xff]   ;;  %v3734_v47 = vld [vmem:[%s4142_s10 + $0x38] sm:$0xff]   ;;  %v3735_v48 = vld [vmem:[%s4142_s10 + $0x40] sm:$0xff]  }
  0x68   : > { %1363 = vmatprep.subr.bf16.mxu0 %v3946_v38  ;;  %3619 = vmatprep.subr.bf16.mxu1 %v3946_v38  ;;  %v3745_v43 = vld [vmem:[%s4228_s24 + $0x4] ss:$12 sps:$4 sm:$0xff]   ;;  %v3736_v49 = vld [vmem:[%s4142_s10 + $0x48] sm:$0xff]   ;;  %v3738_v51 = vld [vmem:[%s4142_s10 + $0x58] sm:$0xff]  }
  0x69   : > { %v3748_v45 = vld [vmem:[%s4228_s24 + $0x244] ss:$12 sps:$4 sm:$0xff]   ;;  %1393 = vmatprep.mubr.bf16.mxu0 %v3745_v43  ;;  %v3740_v53 = vld [vmem:[%s4142_s10 + $0x68] sm:$0xff]   ;;  %v3742_v55 = vld [vmem:[%s4142_s10 + $0x78] sm:$0xff]  }
  0x6a   : > { %1585 = vmatprep.mubr.bf16.mxu1 %v3748_v45  ;;  %v3737_v50 = vld [vmem:[%s4142_s10 + $0x50] sm:$0xff]   ;;  %v3739_v52 = vld [vmem:[%s4142_s10 + $0x60] sm:$0xff]   ;;  %v3750_v59 = vld [vmem:[%s4228_s24 + $0x1c] ss:$12 sps:$4 sm:$0xff]  }
  0x6b   : > { %1364 = vmatpush1.bf16.msra.mxu0 %v3728_v39  ;;  %3635 = vmatpush1.bf16.msra.mxu1 %v3728_v39  ;;  %v3741_v54 = vld [vmem:[%s4142_s10 + $0x70] sm:$0xff]   ;;  %v3749_v56 = vld [vmem:[%s4142_s10 + $0x80] sm:$0xff]   ;;  %v3752_v60 = vld [vmem:[%s4228_s24 + $0x25c] ss:$12 sps:$4 sm:$0xff]  }
  0x6c   : > { %1365 = vmatprep.subr.bf16.mxu0 %v3946_v38  ;;  %3620 = vmatprep.subr.bf16.mxu1 %v3946_v38  ;;  %v3743_v57 = vld [vmem:[%s4228_s24] ss:$12 sps:$4 sm:$0xff]   ;;  %v3754_v62 = vld [vmem:[%s4228_s24 + $0x18] ss:$12 sps:$4 sm:$0xff]   ;;  %v3760_v2 = vld [vmem:[%s4228_s24 + $0x30] ss:$12 sps:$4 sm:$0xff]  }
  0x6d   : > { %v3746_v58 = vld [vmem:[%s4228_s24 + $0x240] ss:$12 sps:$4 sm:$0xff]   ;;  %v3755_v63 = vld [vmem:[%s4228_s24 + $0x258] ss:$12 sps:$4 sm:$0xff]   ;;  %v3761_v3 = vld [vmem:[%s4228_s24 + $0x270] ss:$12 sps:$4 sm:$0xff]  }
  0x6e   : > { %v3774_v61 = vld [vmem:[%s4142_s10 + $0x88] sm:$0xff]   ;;  %v3756_v0 = vld [vmem:[%s4228_s24 + $0x34] ss:$12 sps:$4 sm:$0xff]   ;;  %v3768_v8 = vld [vmem:[%s4228_s24 + $0x64] ss:$12 sps:$4 sm:$0xff]  }
  0x6f   : > { %1366 = vmatpush1.bf16.msra.mxu0 %v3729_v40  ;;  %3636 = vmatpush1.bf16.msra.mxu1 %v3729_v40  ;;  %v3758_v1 = vld [vmem:[%s4228_s24 + $0x274] ss:$12 sps:$4 sm:$0xff]   ;;  %v3762_v4 = vld [vmem:[%s4228_s24 + $0x4c] ss:$12 sps:$4 sm:$0xff]   ;;  %v3770_v9 = vld [vmem:[%s4228_s24 + $0x2a4] ss:$12 sps:$4 sm:$0xff]  }
  0x70   : > { %1367 = vmatprep.subr.bf16.mxu0 %v3946_v38  ;;  %3621 = vmatprep.subr.bf16.mxu1 %v3946_v38  ;;  %v3764_v5 = vld [vmem:[%s4228_s24 + $0x28c] ss:$12 sps:$4 sm:$0xff]   ;;  %v3766_v6 = vld [vmem:[%s4228_s24 + $0x48] ss:$12 sps:$4 sm:$0xff]   ;;  %v3785_v18 = vld [vmem:[%s4228_s24 + $0x90] ss:$12 sps:$4 sm:$0xff]  }
  0x71   : > { %v3767_v7 = vld [vmem:[%s4228_s24 + $0x288] ss:$12 sps:$4 sm:$0xff]   ;;  %v3772_v10 = vld [vmem:[%s4228_s24 + $0x60] ss:$12 sps:$4 sm:$0xff]   ;;  %v3779_v14 = vld [vmem:[%s4228_s24 + $0x78] ss:$12 sps:$4 sm:$0xff]  }
  0x72   : > { %v3773_v11 = vld [vmem:[%s4228_s24 + $0x2a0] ss:$12 sps:$4 sm:$0xff]   ;;  %v3775_v12 = vld [vmem:[%s4228_s24 + $0x7c] ss:$12 sps:$4 sm:$0xff]   ;;  %v3780_v15 = vld [vmem:[%s4228_s24 + $0x2b8] ss:$12 sps:$4 sm:$0xff]  }
  0x73   : > { %1368 = vmatpush1.bf16.msra.mxu0 %v3730_v41  ;;  %3637 = vmatpush1.bf16.msra.mxu1 %v3730_v41  ;;  %v3777_v13 = vld [vmem:[%s4228_s24 + $0x2bc] ss:$12 sps:$4 sm:$0xff]   ;;  %v3781_v16 = vld [vmem:[%s4228_s24 + $0x94] ss:$12 sps:$4 sm:$0xff]   ;;  %v3787_v20 = vld [vmem:[%s4228_s24 + $0xac] ss:$12 sps:$4 sm:$0xff]  }
  0x74   : > { %1369 = vmatprep.subr.bf16.mxu0 %v3946_v38  ;;  %3622 = vmatprep.subr.bf16.mxu1 %v3946_v38  ;;  %v3783_v17 = vld [vmem:[%s4228_s24 + $0x2d4] ss:$12 sps:$4 sm:$0xff]   ;;  %v3786_v19 = vld [vmem:[%s4228_s24 + $0x2d0] ss:$12 sps:$4 sm:$0xff]   ;;  %v3789_v21 = vld [vmem:[%s4228_s24 + $0x2ec] ss:$12 sps:$4 sm:$0xff]  }
  0x75   : > { %v3791_v22 = vld [vmem:[%s4228_s24 + $0xa8] ss:$12 sps:$4 sm:$0xff]   ;;  %v3793_v24 = vld [vmem:[%s4228_s24 + $0xc4] ss:$12 sps:$4 sm:$0xff]   ;;  %v3796_v26 = vld [vmem:[%s4228_s24 + $0xc0] ss:$12 sps:$4 sm:$0xff]  }
  0x76   : > { %v3792_v23 = vld [vmem:[%s4228_s24 + $0x2e8] ss:$12 sps:$4 sm:$0xff]   ;;  %v3797_v27 = vld [vmem:[%s4228_s24 + $0x20] ss:$12 sps:$4 sm:$0xff]   ;;  %v3800_v29 = vld [vmem:[%s4228_s24 + $0x38] ss:$12 sps:$4 sm:$0xff]  }
  0x77   : > { %1370 = vmatpush1.bf16.msra.mxu0 %v3731_v42  ;;  %3638 = vmatpush1.bf16.msra.mxu1 %v3731_v42  ;;  %v3795_v25 = vld [vmem:[%s4228_s24 + $0x8] ss:$12 sps:$4 sm:$0xff]   ;;  %v3801_v30 = vld [vmem:[%s4228_s24 + $0xd8] ss:$12 sps:$4 sm:$0xff]   ;;  %v3802_v31 = vld [vmem:[%s4228_s24 + $0x50] ss:$12 sps:$4 sm:$0xff]  }
  0x78   : > { %1371 = vmatprep.subr.bf16.mxu0 %v3946_v38  ;;  %3623 = vmatprep.subr.bf16.mxu1 %v3946_v38  ;;  %v3798_v28 = vld [vmem:[%s4228_s24 + $0xdc] ss:$12 sps:$4 sm:$0xff]   ;;  %v3803_v32 = vld [vmem:[%s4228_s24 + $0xf4] ss:$12 sps:$4 sm:$0xff]   ;;  %v3808_v36 = vld [vmem:[%s4228_s24 + $0x10c] ss:$12 sps:$4 sm:$0xff]  }
  0x79   : > { %v3805_v33 = vld [vmem:[%s4228_s24 + $0x68] ss:$12 sps:$4 sm:$0xff]   ;;  %v3806_v34 = vld [vmem:[%s4228_s24 + $0xf0] ss:$12 sps:$4 sm:$0xff]   ;;  %v3807_v35 = vld [vmem:[%s4228_s24 + $0x80] ss:$12 sps:$4 sm:$0xff]  }
  0x7a   : > { %v3810_v37 = vld [vmem:[%s4228_s24 + $0x98] ss:$12 sps:$4 sm:$0xff]   ;;  %v3812_v39 = vld [vmem:[%s4228_s24 + $0xb0] ss:$12 sps:$4 sm:$0xff]   ;;  %v3815_v41 = vld [vmem:[%s4228_s24 + $0xc8] ss:$12 sps:$4 sm:$0xff]  }
  0x7b   : > { %1372 = vmatpush1.bf16.msra.mxu0 %v3732_v44  ;;  %3639 = vmatpush1.bf16.msra.mxu1 %v3732_v44  ;;  %v3813_v40 = vld [vmem:[%s4228_s24 + $0x124] ss:$12 sps:$4 sm:$0xff]   ;;  %v3816_v42 = vld [vmem:[%s4228_s24 + $0x120] ss:$12 sps:$4 sm:$0xff]   ;;  %v3818_v44 = vld [vmem:[%s4228_s24 + $0x13c] ss:$12 sps:$4 sm:$0xff]  }
  0x7c   : > { %1373 = vmatprep.subr.bf16.mxu0 %v3946_v38  ;;  %3624 = vmatprep.subr.bf16.mxu1 %v3946_v38  ;;  %v3817_v43 = vld [vmem:[%s4228_s24 + $0xe0] ss:$12 sps:$4 sm:$0xff]   ;;  %v3820_v45 = vld [vmem:[%s4228_s24 + $0xf8] ss:$12 sps:$4 sm:$0xff]  }
  0x7f   : > { %1374 = vmatpush1.bf16.msra.mxu0 %v3733_v46  ;;  %3640 = vmatpush1.bf16.msra.mxu1 %v3733_v46  ;;  %v3821_v46 = vld [vmem:[%s4228_s24 + $0x138] ss:$12 sps:$4 sm:$0xff]  }
  0x80   : > { %1375 = vmatprep.subr.bf16.mxu0 %v3946_v38  ;;  %3625 = vmatprep.subr.bf16.mxu1 %v3946_v38 }
  0x83   : > { %1376 = vmatpush1.bf16.msra.mxu0 %v3734_v47  ;;  %3641 = vmatpush1.bf16.msra.mxu1 %v3734_v47  ;;  %v3822_v47 = vld [vmem:[%s4228_s24 + $0x110] ss:$12 sps:$4 sm:$0xff]  }
  0x84   : > { %1377 = vmatprep.subr.bf16.mxu0 %v3946_v38  ;;  %3626 = vmatprep.subr.bf16.mxu1 %v3946_v38 }
  0x87   : > { %1378 = vmatpush1.bf16.msra.mxu0 %v3735_v48  ;;  %3642 = vmatpush1.bf16.msra.mxu1 %v3735_v48  ;;  %v3823_v48 = vld [vmem:[%s4228_s24 + $0x154] ss:$12 sps:$4 sm:$0xff]  }
  0x88   : > { %1379 = vmatprep.subr.bf16.mxu0 %v3946_v38  ;;  %3627 = vmatprep.subr.bf16.mxu1 %v3946_v38 }
  0x8b   : > { %1380 = vmatpush1.bf16.msra.mxu0 %v3736_v49  ;;  %3643 = vmatpush1.bf16.msra.mxu1 %v3736_v49  ;;  %v3825_v49 = vld [vmem:[%s4228_s24 + $0x128] ss:$12 sps:$4 sm:$0xff]  }
  0x8c   : > { %1381 = vmatprep.subr.bf16.mxu0 %v3946_v38  ;;  %3628 = vmatprep.subr.bf16.mxu1 %v3946_v38 }
  0x8f   : > { %1382 = vmatpush1.bf16.msra.mxu0 %v3737_v50  ;;  %3644 = vmatpush1.bf16.msra.mxu1 %v3737_v50  ;;  %v3826_v50 = vld [vmem:[%s4228_s24 + $0x150] ss:$12 sps:$4 sm:$0xff]  }
  0x90   : > { %1383 = vmatprep.subr.bf16.mxu0 %v3946_v38  ;;  %3629 = vmatprep.subr.bf16.mxu1 %v3946_v38 }
  0x93   : > { %1384 = vmatpush1.bf16.msra.mxu0 %v3738_v51  ;;  %3645 = vmatpush1.bf16.msra.mxu1 %v3738_v51  ;;  %v3827_v51 = vld [vmem:[%s4228_s24 + $0x140] ss:$12 sps:$4 sm:$0xff]  }
  0x94   : > { %1385 = vmatprep.subr.bf16.mxu0 %v3946_v38  ;;  %3630 = vmatprep.subr.bf16.mxu1 %v3946_v38 }
  0x97   : > { %1386 = vmatpush1.bf16.msra.mxu0 %v3739_v52  ;;  %3646 = vmatpush1.bf16.msra.mxu1 %v3739_v52  ;;  %v3828_v52 = vld [vmem:[%s4228_s24 + $0x16c] ss:$12 sps:$4 sm:$0xff]  }
  0x98   : > { %1387 = vmatprep.subr.bf16.mxu0 %v3946_v38  ;;  %3631 = vmatprep.subr.bf16.mxu1 %v3946_v38 }
  0x9b   : > { %1388 = vmatpush1.bf16.msra.mxu0 %v3740_v53  ;;  %3647 = vmatpush1.bf16.msra.mxu1 %v3740_v53  ;;  %v3830_v53 = vld [vmem:[%s4228_s24 + $0x158] ss:$12 sps:$4 sm:$0xff]  }
  0x9c   : > { %1389 = vmatprep.subr.bf16.mxu0 %v3946_v38  ;;  %3632 = vmatprep.subr.bf16.mxu1 %v3946_v38 }
  0x9f   : > { %1390 = vmatpush1.bf16.msra.mxu0 %v3741_v54  ;;  %3648 = vmatpush1.bf16.msra.mxu1 %v3741_v54  ;;  %v3831_v54 = vld [vmem:[%s4228_s24 + $0x168] ss:$12 sps:$4 sm:$0xff]  }
  0xa0   : > { %1391 = vmatprep.subr.bf16.mxu0 %v3946_v38  ;;  %3633 = vmatprep.subr.bf16.mxu1 %v3946_v38  ;;  %v3811_v38 = vld [vmem:[%s4228_s24 + $0x108] ss:$12 sps:$4 sm:$0xff]  }
  0xa3   : > { %1392 = vmatpush1.bf16.msra.mxu0 %v3742_v55  ;;  %3649 = vmatpush1.bf16.msra.mxu1 %v3742_v55  ;;  %v3832_v55 = vld [vmem:[%s4228_s24 + $0x170] ss:$12 sps:$4 sm:$0xff]  }
  0xa4   : > { %3550 = vmatprep.subr.bf16.mxu1 %v3749_v56 }
  0xa6   : > { %1394 = vmatmul.mubr.bf16.vlgmr.msra.gmra.mrb[0].mxu0 %v3743_v57  ;;  %1586 = vmatmul.mubr.bf16.vlgmr.msra.gmra.mrb[0].mxu1 %v3746_v58  ;;  %v3835_v57 = vld [vmem:[%s4228_s24 + $0x188] ss:$12 sps:$4 sm:$0xff]   ;;  %v3836_v58 = vld [vmem:[%s4228_s24 + $0x180] ss:$12 sps:$4 sm:$0xff]  }
  0xa7   : > { %3551 = vmatpush3.bf16.msra.mxu1 %v3749_v56  ;;  %1401 = vmatprep.mubr.bf16.mxu0 %v3750_v59  ;;  %v3833_v56 = vld [vmem:[%s4228_s24 + $0x184] ss:$12 sps:$4 sm:$0xff]   ;;  %v3837_v59 = vld [vmem:[%s4228_s24 + $0x1a0] ss:$12 sps:$4 sm:$0xff]  }
  0xa8   : > { %1593 = vmatprep.mubr.bf16.mxu1 %v3752_v60  ;;  %3552 = vmatprep.subr.bf16.mxu1 %v3774_v61  ;;  %v3838_v60 = vld [vmem:[%s4228_s24 + $0x19c] ss:$12 sps:$4 sm:$0xff]  }
  0xab   : > { %3553 = vmatpush3.bf16.msra.mxu1 %v3774_v61  ;;  %v3840_v61 = vld [vmem:[%s4228_s24 + $0x1b8] ss:$12 sps:$4 sm:$0xff]  }
  0xae   : > { %1402 = vmatmul.mubr.bf16.gmra.mrb[4].mxu0 %v3754_v62  ;;  %1594 = vmatmul.mubr.bf16.gmra.mrb[4].mxu1 %v3755_v63  ;;  %v3841_v62 = vld [vmem:[%s4228_s24 + $0x198] ss:$12 sps:$4 sm:$0xff]   ;;  %v3842_v63 = vld [vmem:[%s4228_s24 + $0x1d0] ss:$12 sps:$4 sm:$0xff]  }
  0xaf   : > { %1409 = vmatprep.mubr.bf16.mxu0 %v3756_v0  ;;  %1601 = vmatprep.mubr.bf16.mxu1 %v3758_v1  ;;  %v3843_v0 = vld [vmem:[%s4228_s24 + $0x1b4] ss:$12 sps:$4 sm:$0xff]  }
  0xb0   : > { %v3845_v1 = vld [vmem:[%s4228_s24 + $0x1e8] ss:$12 sps:$4 sm:$0xff]  }
  0xb6   : > { %1410 = vmatmul.mubr.bf16.gmra.mrb[8].mxu0 %v3760_v2  ;;  %1602 = vmatmul.mubr.bf16.gmra.mrb[8].mxu1 %v3761_v3  ;;  %v3846_v2 = vld [vmem:[%s4228_s24 + $0x1b0] ss:$12 sps:$4 sm:$0xff]   ;;  %v3847_v3 = vld [vmem:[%s4228_s24 + $0x200] ss:$12 sps:$4 sm:$0xff]  }
  0xb7   : > { %1417 = vmatprep.mubr.bf16.mxu0 %v3762_v4  ;;  %1609 = vmatprep.mubr.bf16.mxu1 %v3764_v5  ;;  %v3848_v4 = vld [vmem:[%s4228_s24 + $0x1cc] ss:$12 sps:$4 sm:$0xff]  }
  0xb8   : > { %v3850_v5 = vld [vmem:[%s4228_s24 + $0x218] ss:$12 sps:$4 sm:$0xff]  }
  0xbe   : > { %1418 = vmatmul.mubr.bf16.gmra.mrb[12].mxu0 %v3766_v6  ;;  %1610 = vmatmul.mubr.bf16.gmra.mrb[12].mxu1 %v3767_v7  ;;  %v3851_v6 = vld [vmem:[%s4228_s24 + $0x1c8] ss:$12 sps:$4 sm:$0xff]   ;;  %v3852_v7 = vld [vmem:[%s4228_s24 + $0x230] ss:$12 sps:$4 sm:$0xff]  }
  0xbf   : > { %1425 = vmatprep.mubr.bf16.mxu0 %v3768_v8  ;;  %1617 = vmatprep.mubr.bf16.mxu1 %v3770_v9  ;;  %v3853_v8 = vld [vmem:[%s4228_s24 + $0x1e4] ss:$12 sps:$4 sm:$0xff]   ;;  %v3855_v9 = vld [vmem:[%s4228_s24 + $0x248] ss:$12 sps:$4 sm:$0xff]  }
  0xc6   : > { %1426 = vmatmul.mubr.bf16.gmra.mrb[16].mxu0 %v3772_v10  ;;  %1618 = vmatmul.mubr.bf16.gmra.mrb[16].mxu1 %v3773_v11  ;;  %v3856_v10 = vld [vmem:[%s4228_s24 + $0x1e0] ss:$12 sps:$4 sm:$0xff]  }
  0xc7   : > { %1433 = vmatprep.mubr.bf16.mxu0 %v3775_v12  ;;  %1625 = vmatprep.mubr.bf16.mxu1 %v3777_v13  ;;  %v3857_v11 = vld [vmem:[%s4228_s24 + $0x260] ss:$12 sps:$4 sm:$0xff]   ;;  %v3858_v12 = vld [vmem:[%s4228_s24 + $0x1fc] ss:$12 sps:$4 sm:$0xff]   ;;  %v3860_v13 = vld [vmem:[%s4228_s24 + $0x278] ss:$12 sps:$4 sm:$0xff]  }
  0xce   : > { %1434 = vmatmul.mubr.bf16.gmra.mrb[20].mxu0 %v3779_v14  ;;  %1626 = vmatmul.mubr.bf16.gmra.mrb[20].mxu1 %v3780_v15  ;;  %v3861_v14 = vld [vmem:[%s4228_s24 + $0x1f8] ss:$12 sps:$4 sm:$0xff]   ;;  %v3862_v15 = vld [vmem:[%s4228_s24 + $0x290] ss:$12 sps:$4 sm:$0xff]  }
  0xcf   : > { %1441 = vmatprep.mubr.bf16.mxu0 %v3781_v16  ;;  %1633 = vmatprep.mubr.bf16.mxu1 %v3783_v17  ;;  %v3863_v16 = vld [vmem:[%s4228_s24 + $0x214] ss:$12 sps:$4 sm:$0xff]  }
  0xd0   : > { %v3865_v17 = vld [vmem:[%s4228_s24 + $0x2a8] ss:$12 sps:$4 sm:$0xff]  }
  0xd6   : > { %1442 = vmatmul.mubr.bf16.gmra.mrb[24].mxu0 %v3785_v18  ;;  %1634 = vmatmul.mubr.bf16.gmra.mrb[24].mxu1 %v3786_v19  ;;  %v3866_v18 = vld [vmem:[%s4228_s24 + $0x210] ss:$12 sps:$4 sm:$0xff]   ;;  %v3867_v19 = vld [vmem:[%s4228_s24 + $0x2c0] ss:$12 sps:$4 sm:$0xff]  }
  0xd7   : > { %1449 = vmatprep.mubr.bf16.mxu0 %v3787_v20  ;;  %1641 = vmatprep.mubr.bf16.mxu1 %v3789_v21  ;;  %v3868_v20 = vld [vmem:[%s4228_s24 + $0x22c] ss:$12 sps:$4 sm:$0xff]  }
  0xd8   : > { %v3870_v21 = vld [vmem:[%s4228_s24 + $0x2d8] ss:$12 sps:$4 sm:$0xff]  }
  0xde   : > { %1450 = vmatmul.mubr.bf16.gmra.mrb[28].mxu0 %v3791_v22  ;;  %1642 = vmatmul.mubr.bf16.gmra.mrb[28].mxu1 %v3792_v23  ;;  %v3871_v22 = vld [vmem:[%s4228_s24 + $0x228] ss:$12 sps:$4 sm:$0xff]   ;;  %v3872_v23 = vld [vmem:[%s4228_s24 + $0x2f0] ss:$12 sps:$4 sm:$0xff]  }
  0xdf   : > { %1457 = vmatprep.mubr.bf16.mxu0 %v3793_v24  ;;  %3554 = vmatprep.mubr.msk.bf16.mxu1 %vm1264_vm0, %v3795_v25 }
  0xe6   : > { %1458 = vmatmul.mubr.bf16.gmra.mrb[32].mxu0 %v3796_v26  ;;  %3555 = vmatmul.mubr.msk.bf16.vlgmr.msra.gmra.mrb[32].mxu1 %vm1264_vm0, %v3797_v27 }
  0xe7   : > { %1465 = vmatprep.mubr.bf16.mxu0 %v3798_v28  ;;  %3558 = vmatprep.mubr.msk.bf16.mxu1 %vm1264_vm0, %v3800_v29 }
  0xee   : > { %1466 = vmatmul.mubr.bf16.gmra.mrb[36].mxu0 %v3801_v30  ;;  %3559 = vmatmul.mubr.msk.bf16.gmra.mrb[36].mxu1 %vm1264_vm0, %v3802_v31 }
  0xef   : > { %1473 = vmatprep.mubr.bf16.mxu0 %v3803_v32  ;;  %3562 = vmatprep.mubr.msk.bf16.mxu1 %vm1264_vm0, %v3805_v33 }
  0xf6   : > { %1474 = vmatmul.mubr.bf16.gmra.mrb[40].mxu0 %v3806_v34  ;;  %3563 = vmatmul.mubr.msk.bf16.gmra.mrb[40].mxu1 %vm1264_vm0, %v3807_v35 }
  0xf7   : > { %1481 = vmatprep.mubr.bf16.mxu0 %v3808_v36  ;;  %3566 = vmatprep.mubr.msk.bf16.mxu1 %vm1264_vm0, %v3810_v37 }
  0xfe   : > { %1482 = vmatmul.mubr.bf16.gmra.mrb[44].mxu0 %v3811_v38  ;;  %3567 = vmatmul.mubr.msk.bf16.gmra.mrb[44].mxu1 %vm1264_vm0, %v3812_v39 }
  0xff   : > { %1489 = vmatprep.mubr.bf16.mxu0 %v3813_v40  ;;  %3570 = vmatprep.mubr.msk.bf16.mxu1 %vm1264_vm0, %v3815_v41 }
 0x106   : > { %1490 = vmatmul.mubr.bf16.gmra.mrb[48].mxu0 %v3816_v42  ;;  %3571 = vmatmul.mubr.msk.bf16.gmra.mrb[48].mxu1 %vm1264_vm0, %v3817_v43 }
 0x107   : > { %1497 = vmatprep.mubr.bf16.mxu0 %v3818_v44  ;;  %3574 = vmatprep.mubr.msk.bf16.mxu1 %vm1264_vm0, %v3820_v45 }
 0x10e   : > { %1498 = vmatmul.mubr.bf16.gmra.mrb[52].mxu0 %v3821_v46  ;;  %3575 = vmatmul.mubr.msk.bf16.gmra.mrb[52].mxu1 %vm1264_vm0, %v3822_v47 }
 0x10f   : > { %1505 = vmatprep.mubr.bf16.mxu0 %v3823_v48  ;;  %3578 = vmatprep.mubr.msk.bf16.mxu1 %vm1264_vm0, %v3825_v49 }
 0x116   : > { %1506 = vmatmul.mubr.bf16.gmra.mrb[56].mxu0 %v3826_v50  ;;  %3579 = vmatmul.mubr.msk.bf16.gmra.mrb[56].mxu1 %vm1264_vm0, %v3827_v51 }
 0x117   : > { %1513 = vmatprep.mubr.bf16.mxu0 %v3828_v52  ;;  %3582 = vmatprep.mubr.msk.bf16.mxu1 %vm1264_vm0, %v3830_v53 }
 0x11e   : > { %1514 = vmatmul.mubr.bf16.gmra.mrb[60].mxu0 %v3831_v54  ;;  %3583 = vmatmul.mubr.msk.bf16.gmra.mrb[60].mxu1 %vm1264_vm0, %v3832_v55 }
 0x11f   : > { %1521 = vmatprep.mubr.bf16.mxu0 %v3833_v56  ;;  %3586 = vmatprep.mubr.msk.bf16.mxu1 %vm1264_vm0, %v3835_v57 }
 0x126   : > { %1522 = vmatmul.mubr.bf16.gmra.mrb[64].mxu0 %v3836_v58  ;;  %3587 = vmatmul.mubr.msk.bf16.gmra.mrb[64].mxu1 %vm1264_vm0, %v3837_v59 }
 0x127   : > { %1529 = vmatprep.mubr.bf16.mxu0 %v3838_v60  ;;  %3590 = vmatprep.mubr.msk.bf16.mxu1 %vm1264_vm0, %v3840_v61 }
 0x12e   : > { %1530 = vmatmul.mubr.bf16.gmra.mrb[68].mxu0 %v3841_v62  ;;  %3591 = vmatmul.mubr.msk.bf16.gmra.mrb[68].mxu1 %vm1264_vm0, %v3842_v63 }
 0x12f   : > { %1537 = vmatprep.mubr.bf16.mxu0 %v3843_v0  ;;  %3594 = vmatprep.mubr.msk.bf16.mxu1 %vm1264_vm0, %v3845_v1 }
 0x136   : > { %1538 = vmatmul.mubr.bf16.gmra.mrb[72].mxu0 %v3846_v2  ;;  %3595 = vmatmul.mubr.msk.bf16.gmra.mrb[72].mxu1 %vm1264_vm0, %v3847_v3 }
 0x137   : > { %1545 = vmatprep.mubr.bf16.mxu0 %v3848_v4  ;;  %3598 = vmatprep.mubr.msk.bf16.mxu1 %vm1264_vm0, %v3850_v5 }
 0x13e   : > { %1546 = vmatmul.mubr.bf16.gmra.mrb[76].mxu0 %v3851_v6  ;;  %3599 = vmatmul.mubr.msk.bf16.gmra.mrb[76].mxu1 %vm1264_vm0, %v3852_v7 }
 0x13f   : > { %1553 = vmatprep.mubr.bf16.mxu0 %v3853_v8  ;;  %3602 = vmatprep.mubr.msk.bf16.mxu1 %vm1264_vm0, %v3855_v9 }
 0x146   : > { %1554 = vmatmul.mubr.bf16.gmra.mrb[80].mxu0 %v3856_v10  ;;  %3603 = vmatmul.mubr.msk.bf16.gmra.mrb[80].mxu1 %vm1264_vm0, %v3857_v11 }
 0x147   : > { %1561 = vmatprep.mubr.bf16.mxu0 %v3858_v12  ;;  %3606 = vmatprep.mubr.msk.bf16.mxu1 %vm1264_vm0, %v3860_v13 }
 0x14e   : > { %1562 = vmatmul.mubr.bf16.gmra.mrb[84].mxu0 %v3861_v14  ;;  %3607 = vmatmul.mubr.msk.bf16.gmra.mrb[84].mxu1 %vm1264_vm0, %v3862_v15 }
 0x14f   : > { %1569 = vmatprep.mubr.bf16.mxu0 %v3863_v16  ;;  %3610 = vmatprep.mubr.msk.bf16.mxu1 %vm1264_vm0, %v3865_v17 }
 0x156   : > { %1570 = vmatmul.mubr.bf16.gmra.mrb[88].mxu0 %v3866_v18  ;;  %3611 = vmatmul.mubr.msk.bf16.gmra.mrb[88].mxu1 %vm1264_vm0, %v3867_v19 }
 0x157   : > { %1577 = vmatprep.mubr.bf16.mxu0 %v3868_v20  ;;  %3614 = vmatprep.mubr.msk.bf16.mxu1 %vm1264_vm0, %v3870_v21 }
 0x15e   : > { %1578 = vmatmul.mubr.bf16.gmra.mrb[92].mxu0 %v3871_v22  ;;  %3615 = vmatmul.mubr.msk.bf16.gmra.mrb[92].mxu1 %vm1264_vm0, %v3872_v23 }
 0x179   : > { %v4395_v24 = vpop.f32.mrb[0].mxu0  ;;  %v4397_v25 = vpop.f32.mrb[0].mxu1 }
 0x17a   : > { %v1397_v26 = vpop.f32.mrb[1].mxu0  ;;  %v1589_v27 = vpop.f32.mrb[1].mxu1 }
 0x17b   : > { %v4399_v28 = vpop.f32.mrb[2].mxu0  ;;  %v4401_v29 = vpop.f32.mrb[2].mxu1  ;;  %v447_v27 = vld [vmem:[#allocation2 + $0x10] sm:$0xff] }
 0x17c   : > { %v1400_v30 = vpop.f32.mrb[3].mxu0  ;;  %v1592_v31 = vpop.f32.mrb[3].mxu1 }
 0x181   : > { %v1403_v32 = vpop.f32.mrb[4].mxu0  ;;  %v4403_v33 = vpop.f32.mrb[4].mxu1 }
 0x182   : > { %v1405_v34 = vpop.f32.mrb[5].mxu0  ;;  %v1597_v35 = vpop.f32.mrb[5].mxu1 }
 0x183   : > { %v4405_v36 = vpop.f32.mrb[6].mxu0  ;;  %v4407_v37 = vpop.f32.mrb[6].mxu1  ;;  %v445_v35 = vld [vmem:[#allocation2] sm:$0xff] }
 0x184   : > { %v1408_v38 = vpop.f32.mrb[7].mxu0  ;;  %v1600_v39 = vpop.f32.mrb[7].mxu1 }
 0x189   : > { %v4409_v40 = vpop.f32.mrb[8].mxu0  ;;  %v4411_v41 = vpop.f32.mrb[8].mxu1 }
 0x18a   : > { %v1413_v42 = vpop.f32.mrb[9].mxu0  ;;  %v1605_v43 = vpop.f32.mrb[9].mxu1 }
 0x18b   : > { %v4413_v44 = vpop.f32.mrb[10].mxu0  ;;  %v4415_v45 = vpop.f32.mrb[10].mxu1  ;;  %v448_v43 = vld [vmem:[#allocation2 + $0x18] sm:$0xff] }
 0x18c   : > { %v1416_v46 = vpop.f32.mrb[11].mxu0  ;;  %v1608_v47 = vpop.f32.mrb[11].mxu1 }
 0x191   : > { %v4417_v48 = vpop.f32.mrb[12].mxu0  ;;  %v4419_v49 = vpop.f32.mrb[12].mxu1 }
 0x192   : > { %v1421_v50 = vpop.f32.mrb[13].mxu0  ;;  %v1613_v51 = vpop.f32.mrb[13].mxu1 }
 0x193   : > { %v4421_v52 = vpop.f32.mrb[14].mxu0  ;;  %v4423_v53 = vpop.f32.mrb[14].mxu1 }
 0x194   : > { %v1424_v54 = vpop.f32.mrb[15].mxu0  ;;  %v1616_v55 = vpop.f32.mrb[15].mxu1 }
 0x195   : > { %v446_v54 = vld [vmem:[#allocation2 + $0x8] sm:$0xff] }
 0x199   : > { %v4425_v56 = vpop.f32.mrb[16].mxu0  ;;  %v4427_v57 = vpop.f32.mrb[16].mxu1 }
 0x19a   : > { %v1429_v58 = vpop.f32.mrb[17].mxu0  ;;  %v1621_v59 = vpop.f32.mrb[17].mxu1 }
 0x19b   : > { %v4429_v60 = vpop.f32.mrb[18].mxu0  ;;  %v4431_v61 = vpop.f32.mrb[18].mxu1 }
 0x19c   : > { %v1432_v62 = vpop.f32.mrb[19].mxu0  ;;  %v1624_v63 = vpop.f32.mrb[19].mxu1 }
 0x19d   : > { %v451_v63 = vld [vmem:[#allocation2 + $0x30] sm:$0xff] }
 0x1a1   : > { %v4433_v0 = vpop.f32.mrb[20].mxu0  ;;  %v4435_v1 = vpop.f32.mrb[20].mxu1 }
 0x1a2   : > { %v1437_v2 = vpop.f32.mrb[21].mxu0  ;;  %v1629_v3 = vpop.f32.mrb[21].mxu1 }
 0x1a3   : > { %v4437_v4 = vpop.f32.mrb[22].mxu0  ;;  %v4439_v5 = vpop.f32.mrb[22].mxu1 }
 0x1a4   : > { %v1440_v6 = vpop.f32.mrb[23].mxu0  ;;  %v1632_v7 = vpop.f32.mrb[23].mxu1 }
 0x1a9   : > { %v4441_v8 = vpop.f32.mrb[24].mxu0  ;;  %v4443_v9 = vpop.f32.mrb[24].mxu1 }
 0x1aa   : > { %v1445_v10 = vpop.f32.mrb[25].mxu0  ;;  %v1637_v11 = vpop.f32.mrb[25].mxu1 }
 0x1ab   : > { %v4445_v12 = vpop.f32.mrb[26].mxu0  ;;  %v4447_v13 = vpop.f32.mrb[26].mxu1 }
 0x1ac   : > { %v1448_v14 = vpop.f32.mrb[27].mxu0  ;;  %v1640_v15 = vpop.f32.mrb[27].mxu1 }
 0x1b1   : > { %v4449_v16 = vpop.f32.mrb[28].mxu0  ;;  %v4451_v17 = vpop.f32.mrb[28].mxu1 }
 0x1b2   : > { %v1453_v18 = vpop.f32.mrb[29].mxu0  ;;  %v1645_v19 = vpop.f32.mrb[29].mxu1 }
 0x1b3   : > { %v4453_v20 = vpop.f32.mrb[30].mxu0  ;;  %v4455_v21 = vpop.f32.mrb[30].mxu1 }
 0x1b4   : > { %v1456_v22 = vpop.f32.mrb[31].mxu0  ;;  %v1648_v23 = vpop.f32.mrb[31].mxu1 }
 0x1b5   : > { %v450_v22 = vld [vmem:[#allocation2 + $0x28] sm:$0xff] }
 0x1b9   : > { %v4457_v26 = vpop.f32.mrb[32].mxu0  ;;  %v3556_v30 = vpop.f32.mrb[32].mxu1 }
 0x1ba   : > { %v1693_v31 = vadd.f32 %v3556_v30, %v1403_v32  ;;  %v1461_v34 = vpop.f32.mrb[33].mxu0  ;;  %v1684_v38 = vpop.f32.mrb[33].mxu1 }
 0x1bb   : > { %v1685_v39 = vadd.f32 %v1684_v38, %v4395_v24  ;;  %v4460_v42 = vpop.f32.mrb[34].mxu0  ;;  %v3557_v46 = vpop.f32.mrb[34].mxu1  ;;  %v455_v34 = vld [vmem:[#allocation2 + $0x50] sm:$0xff] }
 0x1bc   : > { %v1941_v47 = vadd.f32 %v1693_v31, %v447_v27  ;;  %v1696_v50 = vadd.f32 %v3557_v46, %v4405_v36  ;;  %v1464_v51 = vpop.f32.mrb[35].mxu0  ;;  %v1687_v55 = vpop.f32.mrb[35].mxu1  ;;  %v449_v36 = vld [vmem:[#allocation2 + $0x20] sm:$0xff] }
 0x1bd   : > { %v1939_v58 = vadd.f32 %v1685_v39, %v445_v35  ;;  %v1688_v59 = vadd.f32 %v1687_v55, %v4399_v28  ;;  %v452_v28 = vld [vmem:[#allocation2 + $0x38] sm:$0xff] }
 0x1be   : > { %2005 = vst [vmem:[#allocation2 + $0x10] sm:$0xff] %v1941_v47  ;;  %v1942_v32 = vadd.f32 %v1696_v50, %v448_v43 }
 0x1bf   : > { %2003 = vst [vmem:[#allocation2] sm:$0xff] %v1939_v58  ;;  %v1940_v62 = vadd.f32 %v1688_v59, %v446_v54  ;;  %v454_v58 = vld [vmem:[#allocation2 + $0x48] sm:$0xff] }
 0x1c0   : > { %2006 = vst [vmem:[#allocation2 + $0x18] sm:$0xff] %v1942_v32 }
 0x1c1   : > { %2004 = vst [vmem:[#allocation2 + $0x8] sm:$0xff] %v1940_v62  ;;  %v4464_v24 = vpop.f32.mrb[36].mxu0  ;;  %v3560_v2 = vpop.f32.mrb[36].mxu1 }
 0x1c2   : > { %v1709_v3 = vadd.f32 %v3560_v2, %v4417_v48  ;;  %v1469_v6 = vpop.f32.mrb[37].mxu0  ;;  %v1700_v7 = vpop.f32.mrb[37].mxu1  ;;  %v459_v2 = vld [vmem:[#allocation2 + $0x70] sm:$0xff] }
 0x1c3   : > { %v1701_v10 = vadd.f32 %v1700_v7, %v4409_v40  ;;  %v4468_v11 = vpop.f32.mrb[38].mxu0  ;;  %v3561_v14 = vpop.f32.mrb[38].mxu1  ;;  %v457_v7 = vld [vmem:[#allocation2 + $0x60] sm:$0xff] }
 0x1c4   : > { %v1945_v15 = vadd.f32 %v1709_v3, %v451_v63  ;;  %v1712_v18 = vadd.f32 %v3561_v14, %v4421_v52  ;;  %v1472_v19 = vpop.f32.mrb[39].mxu0  ;;  %v1703_v23 = vpop.f32.mrb[39].mxu1  ;;  %v453_v52 = vld [vmem:[#allocation2 + $0x40] sm:$0xff]  ;;  %v460_v14 = vld [vmem:[#allocation2 + $0x78] sm:$0xff] }
 0x1c5   : > { %v1943_v27 = vadd.f32 %v1701_v10, %v449_v36  ;;  %v1704_v30 = vadd.f32 %v1703_v23, %v4413_v44  ;;  %v456_v44 = vld [vmem:[#allocation2 + $0x58] sm:$0xff] }
 0x1c6   : > { %2009 = vst [vmem:[#allocation2 + $0x30] sm:$0xff] %v1945_v15  ;;  %v1946_v48 = vadd.f32 %v1712_v18, %v452_v28 }
 0x1c7   : > { %2007 = vst [vmem:[#allocation2 + $0x20] sm:$0xff] %v1943_v27  ;;  %v1944_v31 = vadd.f32 %v1704_v30, %v450_v22  ;;  %v458_v22 = vld [vmem:[#allocation2 + $0x68] sm:$0xff] }
 0x1c8   : > { %2010 = vst [vmem:[#allocation2 + $0x38] sm:$0xff] %v1946_v48 }
 0x1c9   : > { %2008 = vst [vmem:[#allocation2 + $0x28] sm:$0xff] %v1944_v31  ;;  %v4472_v40 = vpop.f32.mrb[40].mxu0  ;;  %v3564_v35 = vpop.f32.mrb[40].mxu1 }
 0x1ca   : > { %v1725_v38 = vadd.f32 %v3564_v35, %v4433_v0  ;;  %v1477_v39 = vpop.f32.mrb[41].mxu0  ;;  %v1716_v43 = vpop.f32.mrb[41].mxu1 }
 0x1cb   : > { %v1717_v46 = vadd.f32 %v1716_v43, %v4425_v56  ;;  %v4476_v47 = vpop.f32.mrb[42].mxu0  ;;  %v3565_v50 = vpop.f32.mrb[42].mxu1  ;;  %v461_v39 = vld [vmem:[#allocation2 + $0x80] sm:$0xff] }
 0x1cc   : > { %v1949_v51 = vadd.f32 %v1725_v38, %v455_v34  ;;  %v1728_v54 = vadd.f32 %v3565_v50, %v4437_v4  ;;  %v1480_v55 = vpop.f32.mrb[43].mxu0  ;;  %v1719_v59 = vpop.f32.mrb[43].mxu1 }
 0x1cd   : > { %v1947_v32 = vadd.f32 %v1717_v46, %v453_v52  ;;  %v1720_v62 = vadd.f32 %v1719_v59, %v4429_v60  ;;  %v464_v46 = vld [vmem:[#allocation2 + $0x98] sm:$0xff] }
 0x1ce   : > { %2013 = vst [vmem:[#allocation2 + $0x50] sm:$0xff] %v1949_v51  ;;  %v1950_v0 = vadd.f32 %v1728_v54, %v456_v44  ;;  %v462_v54 = vld [vmem:[#allocation2 + $0x88] sm:$0xff] }
 0x1cf   : > { %2011 = vst [vmem:[#allocation2 + $0x40] sm:$0xff] %v1947_v32  ;;  %v1948_v63 = vadd.f32 %v1720_v62, %v454_v58 }
 0x1d0   : > { %2014 = vst [vmem:[#allocation2 + $0x58] sm:$0xff] %v1950_v0 }
 0x1d1   : > { %2012 = vst [vmem:[#allocation2 + $0x48] sm:$0xff] %v1948_v63  ;;  %v1483_v56 = vpop.f32.mrb[44].mxu0  ;;  %v3568_v3 = vpop.f32.mrb[44].mxu1 }
 0x1d2   : > { %v1741_v6 = vadd.f32 %v3568_v3, %v4449_v16  ;;  %v1485_v36 = vpop.f32.mrb[45].mxu0  ;;  %v1732_v4 = vpop.f32.mrb[45].mxu1  ;;  %v465_v3 = vld [vmem:[#allocation2 + $0xa0] sm:$0xff] }
 0x1d3   : > { %v1733_v10 = vadd.f32 %v1732_v4, %v4441_v8  ;;  %v1486_v28 = vpop.f32.mrb[46].mxu0  ;;  %v3569_v15 = vpop.f32.mrb[46].mxu1  ;;  %v463_v8 = vld [vmem:[#allocation2 + $0x90] sm:$0xff] }
 0x1d4   : > { %v1953_v60 = vadd.f32 %v1741_v6, %v459_v2  ;;  %v1744_v18 = vadd.f32 %v3569_v15, %v4453_v20  ;;  %v1488_v19 = vpop.f32.mrb[47].mxu0  ;;  %v1735_v23 = vpop.f32.mrb[47].mxu1  ;;  %v466_v15 = vld [vmem:[#allocation2 + $0xa8] sm:$0xff] }
 0x1d5   : > { %v1951_v27 = vadd.f32 %v1733_v10, %v457_v7  ;;  %v1736_v30 = vadd.f32 %v1735_v23, %v4445_v12  ;;  %v468_v7 = vld [vmem:[#allocation2 + $0xb8] sm:$0xff] }
 0x1d6   : > { %2017 = vst [vmem:[#allocation2 + $0x70] sm:$0xff] %v1953_v60  ;;  %v1954_v48 = vadd.f32 %v1744_v18, %v460_v14 }
 0x1d7   : > { %2015 = vst [vmem:[#allocation2 + $0x60] sm:$0xff] %v1951_v27  ;;  %v1952_v16 = vadd.f32 %v1736_v30, %v458_v22  ;;  %v471_v27 = vld [vmem:[#allocation2 + $0xd0] sm:$0xff] }
 0x1d8   : > { %2018 = vst [vmem:[#allocation2 + $0x78] sm:$0xff] %v1954_v48 }
 0x1d9   : > { %2016 = vst [vmem:[#allocation2 + $0x68] sm:$0xff] %v1952_v16  ;;  %v1491_v31 = vpop.f32.mrb[48].mxu0  ;;  %v3572_v34 = vpop.f32.mrb[48].mxu1  ;;  %v469_v16 = vld [vmem:[#allocation2 + $0xc0] sm:$0xff] }
 0x1da   : > { %v1757_v35 = vadd.f32 %v3572_v34, %v4464_v24  ;;  %v1493_v38 = vpop.f32.mrb[49].mxu0  ;;  %v1748_v20 = vpop.f32.mrb[49].mxu1 }
 0x1db   : > { %v1749_v52 = vadd.f32 %v1748_v20, %v4457_v26  ;;  %v1494_v43 = vpop.f32.mrb[50].mxu0  ;;  %v3573_v44 = vpop.f32.mrb[50].mxu1  ;;  %v467_v26 = vld [vmem:[#allocation2 + $0xb0] sm:$0xff] }
 0x1dc   : > { %v1957_v12 = vadd.f32 %v1757_v35, %v463_v8  ;;  %v1760_v50 = vadd.f32 %v3573_v44, %v4468_v11  ;;  %v1496_v51 = vpop.f32.mrb[51].mxu0  ;;  %v1751_v55 = vpop.f32.mrb[51].mxu1  ;;  %v472_v35 = vld [vmem:[#allocation2 + $0xd8] sm:$0xff] }
 0x1dd   : > { %v1955_v58 = vadd.f32 %v1749_v52, %v461_v39  ;;  %v1752_v59 = vadd.f32 %v1751_v55, %v4460_v42  ;;  %v470_v52 = vld [vmem:[#allocation2 + $0xc8] sm:$0xff]  ;;  %v475_v55 = vld [vmem:[#allocation2 + $0xf0] sm:$0xff] }
 0x1de   : > { %2021 = vst [vmem:[#allocation2 + $0x90] sm:$0xff] %v1957_v12  ;;  %v1958_v32 = vadd.f32 %v1760_v50, %v464_v46 }
 0x1df   : > { %2019 = vst [vmem:[#allocation2 + $0x80] sm:$0xff] %v1955_v58  ;;  %v1956_v24 = vadd.f32 %v1752_v59, %v462_v54 }
 0x1e0   : > { %2022 = vst [vmem:[#allocation2 + $0x98] sm:$0xff] %v1958_v32  ;;  %v473_v32 = vld [vmem:[#allocation2 + $0xe0] sm:$0xff] }
 0x1e1   : > { %2020 = vst [vmem:[#allocation2 + $0x88] sm:$0xff] %v1956_v24  ;;  %v1499_v62 = vpop.f32.mrb[52].mxu0  ;;  %v3576_v0 = vpop.f32.mrb[52].mxu1 }
 0x1e2   : > { %v1773_v63 = vadd.f32 %v3576_v0, %v1483_v56  ;;  %v1501_v2 = vpop.f32.mrb[53].mxu0  ;;  %v1764_v6 = vpop.f32.mrb[53].mxu1  ;;  %v476_v0 = vld [vmem:[#allocation2 + $0xf8] sm:$0xff] }
 0x1e3   : > { %v1765_v11 = vadd.f32 %v1764_v6, %v4472_v40  ;;  %v1502_v36 = vpop.f32.mrb[54].mxu0  ;;  %v3577_v4 = vpop.f32.mrb[54].mxu1  ;;  %v474_v6 = vld [vmem:[#allocation2 + $0xe8] sm:$0xff] }
 0x1e4   : > { %v1961_v10 = vadd.f32 %v1773_v63, %v467_v26  ;;  %v1776_v42 = vadd.f32 %v3577_v4, %v1486_v28  ;;  %v1504_v14 = vpop.f32.mrb[55].mxu0  ;;  %v1767_v60 = vpop.f32.mrb[55].mxu1 }
 0x1e5   : > { %v1959_v18 = vadd.f32 %v1765_v11, %v465_v3  ;;  %v1768_v19 = vadd.f32 %v1767_v60, %v4476_v47  ;;  %v477_v60 = vld [vmem:[#allocation2 + $0x100] sm:$0xff] }
 0x1e6   : > { %2025 = vst [vmem:[#allocation2 + $0xb0] sm:$0xff] %v1961_v10  ;;  %v1962_v22 = vadd.f32 %v1776_v42, %v468_v7 }
 0x1e7   : > { %2023 = vst [vmem:[#allocation2 + $0xa0] sm:$0xff] %v1959_v18  ;;  %v1960_v56 = vadd.f32 %v1768_v19, %v466_v15 }
 0x1e8   : > { %2026 = vst [vmem:[#allocation2 + $0xb8] sm:$0xff] %v1962_v22 }
 0x1e9   : > { %2024 = vst [vmem:[#allocation2 + $0xa8] sm:$0xff] %v1960_v56  ;;  %v1507_v23 = vpop.f32.mrb[56].mxu0  ;;  %v3580_v40 = vpop.f32.mrb[56].mxu1 }
 0x1ea   : > { %v1789_v30 = vadd.f32 %v3580_v40, %v1499_v62  ;;  %v1509_v48 = vpop.f32.mrb[57].mxu0  ;;  %v1780_v8 = vpop.f32.mrb[57].mxu1 }
 0x1eb   : > { %v1781_v28 = vadd.f32 %v1780_v8, %v1491_v31  ;;  %v1510_v34 = vpop.f32.mrb[58].mxu0  ;;  %v3581_v38 = vpop.f32.mrb[58].mxu1  ;;  %v479_v8 = vld [vmem:[#allocation2 + $0x110] sm:$0xff] }
 0x1ec   : > { %v1965_v39 = vadd.f32 %v1789_v30, %v471_v27  ;;  %v1792_v20 = vadd.f32 %v3581_v38, %v1502_v36  ;;  %v1512_v47 = vpop.f32.mrb[59].mxu0  ;;  %v1783_v46 = vpop.f32.mrb[59].mxu1  ;;  %v478_v27 = vld [vmem:[#allocation2 + $0x108] sm:$0xff] }
 0x1ed   : > { %v1963_v44 = vadd.f32 %v1781_v28, %v469_v16  ;;  %v1784_v12 = vadd.f32 %v1783_v46, %v1494_v43 }
 0x1ee   : > { %2029 = vst [vmem:[#allocation2 + $0xd0] sm:$0xff] %v1965_v39  ;;  %v1966_v50 = vadd.f32 %v1792_v20, %v472_v35  ;;  %v480_v20 = vld [vmem:[#allocation2 + $0x118] sm:$0xff] }
 0x1ef   : > { %2027 = vst [vmem:[#allocation2 + $0xc0] sm:$0xff] %v1963_v44  ;;  %v1964_v51 = vadd.f32 %v1784_v12, %v470_v52 }
 0x1f0   : > { %2030 = vst [vmem:[#allocation2 + $0xd8] sm:$0xff] %v1966_v50 }
 0x1f1   : > { %2028 = vst [vmem:[#allocation2 + $0xc8] sm:$0xff] %v1964_v51  ;;  %v1515_v54 = vpop.f32.mrb[60].mxu0  ;;  %v3584_v58 = vpop.f32.mrb[60].mxu1 }
 0x1f2   : > { %v1805_v31 = vadd.f32 %v3584_v58, %v1515_v54  ;;  %v1517_v59 = vpop.f32.mrb[61].mxu0  ;;  %v1796_v24 = vpop.f32.mrb[61].mxu1  ;;  %v481_v54 = vld [vmem:[#allocation2 + $0x120] sm:$0xff] }
 0x1f3   : > { %v1797_v62 = vadd.f32 %v1796_v24, %v1507_v23  ;;  %v1518_v26 = vpop.f32.mrb[62].mxu0  ;;  %v3585_v63 = vpop.f32.mrb[62].mxu1  ;;  %v482_v24 = vld [vmem:[#allocation2 + $0x128] sm:$0xff] }
 0x1f4   : > { %v1969_v2 = vadd.f32 %v1805_v31, %v475_v55  ;;  %v1808_v3 = vadd.f32 %v3585_v63, %v1518_v26  ;;  %v1520_v43 = vpop.f32.mrb[63].mxu0  ;;  %v1799_v11 = vpop.f32.mrb[63].mxu1 }
 0x1f5   : > { %v1967_v36 = vadd.f32 %v1797_v62, %v473_v32  ;;  %v1800_v7 = vadd.f32 %v1799_v11, %v1510_v34 }
 0x1f6   : > { %2033 = vst [vmem:[#allocation2 + $0xf0] sm:$0xff] %v1969_v2  ;;  %v1970_v4 = vadd.f32 %v1808_v3, %v476_v0 }
 0x1f7   : > { %2031 = vst [vmem:[#allocation2 + $0xe0] sm:$0xff] %v1967_v36  ;;  %v1968_v10 = vadd.f32 %v1800_v7, %v474_v6  ;;  %v483_v6 = vld [vmem:[#allocation2 + $0x130] sm:$0xff] }
 0x1f8   : > { %2034 = vst [vmem:[#allocation2 + $0xf8] sm:$0xff] %v1970_v4 }
 0x1f9   : > { %2032 = vst [vmem:[#allocation2 + $0xe8] sm:$0xff] %v1968_v10  ;;  %v1523_v42 = vpop.f32.mrb[64].mxu0  ;;  %v3588_v14 = vpop.f32.mrb[64].mxu1 }
 0x1fa   : > { %v1525_v15 = vpop.f32.mrb[65].mxu0  ;;  %v1812_v18 = vpop.f32.mrb[65].mxu1 }
 0x1fb   : > { %v1813_v19 = vadd.f32 %v1812_v18, %v1523_v42  ;;  %v1526_v22 = vpop.f32.mrb[66].mxu0  ;;  %v3589_v56 = vpop.f32.mrb[66].mxu1  ;;  %v484_v42 = vld [vmem:[#allocation2 + $0x138] sm:$0xff] }
 0x1fc   : > { %v1528_v23 = vpop.f32.mrb[67].mxu0  ;;  %v1815_v40 = vpop.f32.mrb[67].mxu1 }
 0x1fd   : > { %v1971_v30 = vadd.f32 %v1813_v19, %v477_v60  ;;  %v1816_v48 = vadd.f32 %v1815_v40, %v1526_v22  ;;  %v485_v23 = vld [vmem:[#allocation2 + $0x140] sm:$0xff]  ;;  %v495_v40 = vld [vmem:[#allocation2 + $0x190] sm:$0xff] }
 0x1ff   : > { %2035 = vst [vmem:[#allocation2 + $0x100] sm:$0xff] %v1971_v30  ;;  %v1972_v16 = vadd.f32 %v1816_v48, %v478_v27 }
 0x201   : > { %2036 = vst [vmem:[#allocation2 + $0x108] sm:$0xff] %v1972_v16  ;;  %v1531_v28 = vpop.f32.mrb[68].mxu0  ;;  %v3592_v34 = vpop.f32.mrb[68].mxu1 }
 0x202   : > { %v1821_v35 = vadd.f32 %v3588_v14, %v1531_v28  ;;  %v1533_v38 = vpop.f32.mrb[69].mxu0  ;;  %v1828_v39 = vpop.f32.mrb[69].mxu1  ;;  %v493_v28 = vld [vmem:[#allocation2 + $0x180] sm:$0xff] }
 0x203   : > { %v1534_v47 = vpop.f32.mrb[70].mxu0  ;;  %v3593_v52 = vpop.f32.mrb[70].mxu1  ;;  %v486_v38 = vld [vmem:[#allocation2 + $0x148] sm:$0xff] }
 0x204   : > { %v1973_v46 = vadd.f32 %v1821_v35, %v479_v8  ;;  %v1824_v44 = vadd.f32 %v3589_v56, %v1534_v47  ;;  %v1536_v12 = vpop.f32.mrb[71].mxu0  ;;  %v1831_v50 = vpop.f32.mrb[71].mxu1 }
 0x206   : > { %2037 = vst [vmem:[#allocation2 + $0x110] sm:$0xff] %v1973_v46  ;;  %v1974_v51 = vadd.f32 %v1824_v44, %v480_v20  ;;  %v496_v20 = vld [vmem:[#allocation2 + $0x198] sm:$0xff] }
 0x208   : > { %2038 = vst [vmem:[#allocation2 + $0x118] sm:$0xff] %v1974_v51  ;;  %v494_v51 = vld [vmem:[#allocation2 + $0x188] sm:$0xff] }
 0x209   : > { %v1539_v55 = vpop.f32.mrb[72].mxu0  ;;  %v4490_v58 = vpop.f32.mrb[72].mxu1 }
 0x20a   : > { %v1829_v31 = vadd.f32 %v1828_v39, %v1539_v55  ;;  %v1541_v59 = vpop.f32.mrb[73].mxu0  ;;  %v1844_v32 = vpop.f32.mrb[73].mxu1 }
 0x20b   : > { %v1542_v62 = vpop.f32.mrb[74].mxu0  ;;  %v4492_v26 = vpop.f32.mrb[74].mxu1 }
 0x20c   : > { %v1975_v0 = vadd.f32 %v1829_v31, %v481_v54  ;;  %v1832_v63 = vadd.f32 %v1831_v50, %v1542_v62  ;;  %v1544_v2 = vpop.f32.mrb[75].mxu0  ;;  %v1847_v3 = vpop.f32.mrb[75].mxu1  ;;  %v499_v62 = vld [vmem:[#allocation2 + $0x1b0] sm:$0xff] }
 0x20e   : > { %2039 = vst [vmem:[#allocation2 + $0x120] sm:$0xff] %v1975_v0  ;;  %v1976_v43 = vadd.f32 %v1832_v63, %v482_v24 }
 0x210   : > { %2040 = vst [vmem:[#allocation2 + $0x128] sm:$0xff] %v1976_v43 }
 0x211   : > { %v1547_v11 = vpop.f32.mrb[76].mxu0  ;;  %v4494_v36 = vpop.f32.mrb[76].mxu1 }
 0x212   : > { %v1837_v7 = vadd.f32 %v3592_v34, %v1547_v11  ;;  %v1549_v4 = vpop.f32.mrb[77].mxu0  ;;  %v4496_v10 = vpop.f32.mrb[77].mxu1 }
 0x213   : > { %v1550_v14 = vpop.f32.mrb[78].mxu0  ;;  %v4498_v15 = vpop.f32.mrb[78].mxu1 }
 0x214   : > { %v1977_v60 = vadd.f32 %v1837_v7, %v483_v6  ;;  %v1840_v18 = vadd.f32 %v3593_v52, %v1550_v14  ;;  %v1552_v19 = vpop.f32.mrb[79].mxu0  ;;  %v4500_v22 = vpop.f32.mrb[79].mxu1  ;;  %v488_v6 = vld [vmem:[#allocation2 + $0x158] sm:$0xff] }
 0x215   : > { %v500_v7 = vld [vmem:[#allocation2 + $0x1b8] sm:$0xff] }
 0x216   : > { %2041 = vst [vmem:[#allocation2 + $0x130] sm:$0xff] %v1977_v60  ;;  %v1978_v56 = vadd.f32 %v1840_v18, %v484_v42 }
 0x218   : > { %2042 = vst [vmem:[#allocation2 + $0x138] sm:$0xff] %v1978_v56  ;;  %v498_v56 = vld [vmem:[#allocation2 + $0x1a8] sm:$0xff] }
 0x219   : > { %v1555_v27 = vpop.f32.mrb[80].mxu0  ;;  %v3604_v30 = vpop.f32.mrb[80].mxu1 }
 0x21a   : > { %v1845_v48 = vadd.f32 %v1844_v32, %v1555_v27  ;;  %v1885_v16 = vadd.f32 %v3604_v30, %v4403_v33  ;;  %v1557_v8 = vpop.f32.mrb[81].mxu0  ;;  %v1876_v34 = vpop.f32.mrb[81].mxu1  ;;  %v487_v32 = vld [vmem:[#allocation2 + $0x150] sm:$0xff]  ;;  %v489_v30 = vld [vmem:[#allocation2 + $0x160] sm:$0xff] }
 0x21b   : > { %v1877_v35 = vadd.f32 %v1876_v34, %v4397_v25  ;;  %v1558_v39 = vpop.f32.mrb[82].mxu0  ;;  %v3605_v47 = vpop.f32.mrb[82].mxu1  ;;  %v501_v34 = vld [vmem:[#allocation2 + $0x1c0] sm:$0xff] }
 0x21c   : > { %v1979_v52 = vadd.f32 %v1845_v48, %v485_v23  ;;  %v1989_v46 = vadd.f32 %v1885_v16, %v495_v40  ;;  %v1848_v44 = vadd.f32 %v1847_v3, %v1558_v39  ;;  %v1888_v12 = vadd.f32 %v3605_v47, %v4407_v37  ;;  %v1560_v50 = vpop.f32.mrb[83].mxu0  ;;  %v1879_v54 = vpop.f32.mrb[83].mxu1  ;;  %v497_v3 = vld [vmem:[#allocation2 + $0x1a0] sm:$0xff] }
 0x21d   : > { %v1987_v55 = vadd.f32 %v1877_v35, %v493_v28  ;;  %v1880_v33 = vadd.f32 %v1879_v54, %v4401_v29 }
 0x21e   : > { %2043 = vst [vmem:[#allocation2 + $0x140] sm:$0xff] %v1979_v52  ;;  %2053 = vst [vmem:[#allocation2 + $0x190] sm:$0xff] %v1989_v46  ;;  %v1980_v31 = vadd.f32 %v1848_v44, %v486_v38  ;;  %v1990_v59 = vadd.f32 %v1888_v12, %v496_v20  ;;  %v490_v38 = vld [vmem:[#allocation2 + $0x168] sm:$0xff]  ;;  %v504_v20 = vld [vmem:[#allocation2 + $0x1d8] sm:$0xff] }
 0x21f   : > { %2051 = vst [vmem:[#allocation2 + $0x180] sm:$0xff] %v1987_v55  ;;  %v1988_v25 = vadd.f32 %v1880_v33, %v494_v51  ;;  %v502_v51 = vld [vmem:[#allocation2 + $0x1c8] sm:$0xff] }
 0x220   : > { %2044 = vst [vmem:[#allocation2 + $0x148] sm:$0xff] %v1980_v31  ;;  %2054 = vst [vmem:[#allocation2 + $0x198] sm:$0xff] %v1990_v59  ;;  %v491_v31 = vld [vmem:[#allocation2 + $0x170] sm:$0xff] }
 0x221   : > { %2052 = vst [vmem:[#allocation2 + $0x188] sm:$0xff] %v1988_v25  ;;  %v1563_v24 = vpop.f32.mrb[84].mxu0  ;;  %v3608_v0 = vpop.f32.mrb[84].mxu1 }
 0x222   : > { %v1853_v37 = vadd.f32 %v4490_v58, %v1563_v24  ;;  %v1901_v63 = vadd.f32 %v3608_v0, %v4419_v49  ;;  %v1565_v2 = vpop.f32.mrb[85].mxu0  ;;  %v1892_v29 = vpop.f32.mrb[85].mxu1 }
 0x223   : > { %v1893_v43 = vadd.f32 %v1892_v29, %v4411_v41  ;;  %v1566_v11 = vpop.f32.mrb[86].mxu0  ;;  %v3609_v4 = vpop.f32.mrb[86].mxu1  ;;  %v508_v2 = vld [vmem:[#allocation2 + $0x1f8] sm:$0xff] }
 0x224   : > { %v1981_v42 = vadd.f32 %v1853_v37, %v487_v32  ;;  %v1993_v14 = vadd.f32 %v1901_v63, %v499_v62  ;;  %v1856_v60 = vadd.f32 %v4492_v26, %v1566_v11  ;;  %v1904_v18 = vadd.f32 %v3609_v4, %v4423_v53  ;;  %v1568_v19 = vpop.f32.mrb[87].mxu0  ;;  %v1895_v58 = vpop.f32.mrb[87].mxu1  ;;  %v503_v26 = vld [vmem:[#allocation2 + $0x1d0] sm:$0xff]  ;;  %v505_v62 = vld [vmem:[#allocation2 + $0x1e0] sm:$0xff]  ;;  %v492_v37 = vld [vmem:[#allocation2 + $0x178] sm:$0xff] }
 0x225   : > { %v1991_v23 = vadd.f32 %v1893_v43, %v497_v3  ;;  %v1896_v49 = vadd.f32 %v1895_v58, %v4415_v45  ;;  %v506_v4 = vld [vmem:[#allocation2 + $0x1e8] sm:$0xff]  ;;  %v2074_v58 = vld [vmem:[#allocation2 + $0x18] sm:$0xff] (!%p3190_p2) }
 0x226   : > { %2045 = vst [vmem:[#allocation2 + $0x150] sm:$0xff] %v1981_v42  ;;  %2057 = vst [vmem:[#allocation2 + $0x1b0] sm:$0xff] %v1993_v14  ;;  %v1982_v27 = vadd.f32 %v1856_v60, %v488_v6  ;;  %v1994_v41 = vadd.f32 %v1904_v18, %v500_v7 }
 0x227   : > { %2055 = vst [vmem:[#allocation2 + $0x1a0] sm:$0xff] %v1991_v23  ;;  %v1992_v40 = vadd.f32 %v1896_v49, %v498_v56  ;;  %v2073_v56 = vld [vmem:[#allocation2 + $0x10] sm:$0xff] (!%p3190_p2)  ;;  %v2075_v23 = vld [vmem:[#allocation2 + $0x20] sm:$0xff] (!%p3190_p2) }
 0x228   : > { %2046 = vst [vmem:[#allocation2 + $0x158] sm:$0xff] %v1982_v27  ;;  %2058 = vst [vmem:[#allocation2 + $0x1b8] sm:$0xff] %v1994_v41  ;;  %v2076_v41 = vld [vmem:[#allocation2 + $0x28] sm:$0xff] (!%p3190_p2) }
 0x229   : > { %2056 = vst [vmem:[#allocation2 + $0x1a8] sm:$0xff] %v1992_v40  ;;  %v1571_v48 = vpop.f32.mrb[88].mxu0  ;;  %v3612_v16 = vpop.f32.mrb[88].mxu1 }
 0x22a   : > { %v1861_v53 = vadd.f32 %v4496_v10, %v1571_v48  ;;  %v1917_v8 = vadd.f32 %v3612_v16, %v4435_v1  ;;  %v1573_v28 = vpop.f32.mrb[89].mxu0  ;;  %v1908_v45 = vpop.f32.mrb[89].mxu1  ;;  %v2078_v48 = vld [vmem:[#allocation2 + $0x38] sm:$0xff] (!%p3190_p2) }
 0x22b   : > { %v1909_v35 = vadd.f32 %v1908_v45, %v4427_v57  ;;  %v1574_v39 = vpop.f32.mrb[90].mxu0  ;;  %v3613_v47 = vpop.f32.mrb[90].mxu1  ;;  %v2079_v28 = vld [vmem:[#allocation2 + $0x40] sm:$0xff] (!%p3190_p2) }
 0x22c   : > { %v1983_v52 = vadd.f32 %v1861_v53, %v489_v30  ;;  %v1997_v46 = vadd.f32 %v1917_v8, %v503_v26  ;;  %v1864_v44 = vadd.f32 %v4500_v22, %v1574_v39  ;;  %v1920_v12 = vadd.f32 %v3613_v47, %v4439_v5  ;;  %v1576_v50 = vpop.f32.mrb[91].mxu0  ;;  %v1911_v10 = vpop.f32.mrb[91].mxu1  ;;  %v507_v22 = vld [vmem:[#allocation2 + $0x1f0] sm:$0xff] }
 0x22d   : > { %v1995_v54 = vadd.f32 %v1909_v35, %v501_v34  ;;  %v1912_v1 = vadd.f32 %v1911_v10, %v4431_v61  ;;  %v2077_v30 = vld [vmem:[#allocation2 + $0x30] sm:$0xff] (!%p3190_p2) }
 0x22e   : > { %2047 = vst [vmem:[#allocation2 + $0x160] sm:$0xff] %v1983_v52  ;;  %2061 = vst [vmem:[#allocation2 + $0x1d0] sm:$0xff] %v1997_v46  ;;  %v1984_v55 = vadd.f32 %v1864_v44, %v490_v38  ;;  %v1998_v57 = vadd.f32 %v1920_v12, %v504_v20  ;;  %v2080_v46 = vld [vmem:[#allocation2 + $0x48] sm:$0xff] (!%p3190_p2)  ;;  %v2081_v44 = vld [vmem:[#allocation2 + $0x50] sm:$0xff] (!%p3190_p2) }
 0x22f   : > { %2059 = vst [vmem:[#allocation2 + $0x1c0] sm:$0xff] %v1995_v54  ;;  %v1996_v33 = vadd.f32 %v1912_v1, %v502_v51  ;;  %v2082_v54 = vld [vmem:[#allocation2 + $0x58] sm:$0xff] (!%p3190_p2)  ;;  %v2083_v1 = vld [vmem:[#allocation2 + $0x60] sm:$0xff] (!%p3190_p2) }
 0x230   : > { %2048 = vst [vmem:[#allocation2 + $0x168] sm:$0xff] %v1984_v55  ;;  %2062 = vst [vmem:[#allocation2 + $0x1d8] sm:$0xff] %v1998_v57 }
 0x231   : > { %2060 = vst [vmem:[#allocation2 + $0x1c8] sm:$0xff] %v1996_v33  ;;  %v1579_v59 = vpop.f32.mrb[92].mxu0  ;;  %v3616_v25 = vpop.f32.mrb[92].mxu1 }
 0x232   : > { %v1869_v5 = vadd.f32 %v4494_v36, %v1579_v59  ;;  %v1933_v32 = vadd.f32 %v3616_v25, %v4451_v17  ;;  %v1581_v24 = vpop.f32.mrb[93].mxu0  ;;  %v1924_v61 = vpop.f32.mrb[93].mxu1  ;;  %v2084_v59 = vld [vmem:[#allocation2 + $0x68] sm:$0xff] (!%p3190_p2) }
 0x233   : > { %v1925_v0 = vadd.f32 %v1924_v61, %v4443_v9  ;;  %v1582_v63 = vpop.f32.mrb[94].mxu0  ;;  %v3617_v3 = vpop.f32.mrb[94].mxu1  ;;  %2070 = sbr.rel (%p3190_p2) target bundleno = 628 (0x274), region = 81  ;;  %v2085_v24 = vld [vmem:[#allocation2 + $0x70] sm:$0xff] (!%p3190_p2) }
 0x234   : > { %v1985_v29 = vadd.f32 %v1869_v5, %v491_v31  ;;  %v2001_v43 = vadd.f32 %v1933_v32, %v507_v22  ;;  %v1872_v6 = vadd.f32 %v4498_v15, %v1582_v63  ;;  %v1936_v11 = vadd.f32 %v3617_v3, %v4455_v21  ;;  %v1584_v7 = vpop.f32.mrb[95].mxu0  ;;  %v1927_v36 = vpop.f32.mrb[95].mxu1  ;;  %v2071_v15 = vld [vmem:[#allocation2] sm:$0xff] (!%p3190_p2)  ;;  %v2072_v21 = vld [vmem:[#allocation2 + $0x8] sm:$0xff] (!%p3190_p2)  ;;  %v2086_v63 = vld [vmem:[#allocation2 + $0x78] sm:$0xff] (!%p3190_p2) }
 0x235   : > { %v1999_v42 = vadd.f32 %v1925_v0, %v505_v62  ;;  %v1928_v17 = vadd.f32 %v1927_v36, %v4447_v13  ;;  %v4530_v13 = vld [vmem:[%s375_s9] ss:$0 sm:$0xff] (!%p3190_p2) }
 0x236   : > { %2049 = vst [vmem:[#allocation2 + $0x170] sm:$0xff] %v1985_v29  ;;  %2065 = vst [vmem:[#allocation2 + $0x1f0] sm:$0xff] %v2001_v43  ;;  %v1986_v14 = vadd.f32 %v1872_v6, %v492_v37  ;;  %v2002_v9 = vadd.f32 %v1936_v11, %v508_v2  ;;  %v2142_v18 = vadd.f32 (!%p3190_p2), %v4530_v13, %v2071_v15  ;;  %v2087_v6 = vld [vmem:[#allocation2 + $0x80] sm:$0xff] (!%p3190_p2)  ;;  %v2089_v15 = vld [vmem:[#allocation2 + $0x90] sm:$0xff] (!%p3190_p2) }
 0x237   : > { %2063 = vst [vmem:[#allocation2 + $0x1e0] sm:$0xff] %v1999_v42  ;;  %v2000_v60 = vadd.f32 %v1928_v17, %v506_v4  ;;  %v2143_v19 = vadd.f32 (!%p3190_p2), %v4530_v13, %v2072_v21  ;;  %v2144_v49 = vadd.f32 (!%p3190_p2), %v4530_v13, %v2073_v56  ;;  %v2145_v27 = vadd.f32 (!%p3190_p2), %v4530_v13, %v2074_v58  ;;  %v2088_v42 = vld [vmem:[#allocation2 + $0x88] sm:$0xff] (!%p3190_p2)  ;;  %v2090_v58 = vld [vmem:[#allocation2 + $0x98] sm:$0xff] (!%p3190_p2) }
 0x238   : > { %2050 = vst [vmem:[#allocation2 + $0x178] sm:$0xff] %v1986_v14  ;;  %2066 = vst [vmem:[#allocation2 + $0x1f8] sm:$0xff] %v2002_v9  ;;  %v2146_v40 = vadd.f32 (!%p3190_p2), %v4530_v13, %v2075_v23  ;;  %v2206_v26 = vmul.f32 (!%p3190_p2), 0.2, %v2142_v18  ;;  %v2147_v53 = vadd.f32 (!%p3190_p2), %v4530_v13, %v2076_v41  ;;  %v2148_v8 = vadd.f32 (!%p3190_p2), %v4530_v13, %v2077_v30  ;;  %v2092_v30 = vld [vmem:[#allocation2 + $0xa8] sm:$0xff] (!%p3190_p2) }
 0x239   : > { %2064 = vst [vmem:[#allocation2 + $0x1e8] sm:$0xff] %v2000_v60  ;;  %v2207_v16 = vmul.f32 (!%p3190_p2), 0.2, %v2143_v19  ;;  %v2208_v34 = vmul.f32 (!%p3190_p2), 0.2, %v2144_v49  ;;  %v2149_v38 = vadd.f32 (!%p3190_p2), %v4530_v13, %v2078_v48  ;;  %v2150_v31 = vadd.f32 (!%p3190_p2), %v4530_v13, %v2079_v28 }
 0x23a   : > { %v2209_v45 = vmul.f32 0.2, %v2145_v27  ;;  %v2210_v35 = vmul.f32 0.2, %v2146_v40  ;;  %v2270_v39 = vmax.f32 %v2142_v18, %v2206_v26  ;;  %v2211_v47 = vmul.f32 0.2, %v2147_v53 }
 0x23b   : > { %v2271_v20 = vmax.f32 %v2143_v19, %v2207_v16  ;;  %v2212_v52 = vmul.f32 0.2, %v2148_v8  ;;  %v2272_v12 = vmax.f32 %v2144_v49, %v2208_v34  ;;  %v2213_v10 = vmul.f32 0.2, %v2149_v38 }
 0x23c   : > { %v2273_v50 = vmax.f32 %v2145_v27, %v2209_v45  ;;  %v2274_v51 = vmax.f32 %v2146_v40, %v2210_v35  ;;  %v2275_v57 = vmax.f32 %v2147_v53, %v2211_v47  ;;  %v2151_v5 = vadd.f32 %v4530_v13, %v2080_v46  ;;  %v2091_v40 = vld [vmem:[#allocation2 + $0xa0] sm:$0xff] }
 0x23d   : > { %v3328_v55 = vpack.c.bf16 %v2271_v20, %v2270_v39  ;;  %v2276_v33 = vmax.f32 %v2148_v8, %v2212_v52  ;;  %v2277_v25 = vmax.f32 %v2149_v38, %v2213_v10  ;;  %v2152_v32 = vadd.f32 %v4530_v13, %v2081_v44  ;;  %v2093_v8 = vld [vmem:[#allocation2 + $0xb0] sm:$0xff]  ;;  %v2094_v38 = vld [vmem:[#allocation2 + $0xb8] sm:$0xff]  ;;  %v2095_v46 = vld [vmem:[#allocation2 + $0xc0] sm:$0xff] }
 0x23e   : > { %v3333_v22 = vpack.c.bf16 %v2273_v50, %v2272_v12  ;;  %v3338_v62 = vpack.c.bf16 %v2275_v57, %v2274_v51  ;;  %v2214_v61 = vmul.f32 0.2, %v2150_v31  ;;  %v2153_v0 = vadd.f32 %v4530_v13, %v2082_v54  ;;  %v2096_v10 = vld [vmem:[#allocation2 + $0xc8] sm:$0xff] }
 0x23f   : > { %3329 = vst [vmem:[%s4144_s11] sm:$0xff] %v3328_v55   ;;  %v2154_v37 = vadd.f32 %v4530_v13, %v2083_v1  ;;  %v3343_v2 = vpack.c.bf16 %v2277_v25, %v2276_v33  ;;  %v2215_v3 = vmul.f32 0.2, %v2151_v5  ;;  %v2216_v29 = vmul.f32 0.2, %v2152_v32  ;;  %v2097_v33 = vld [vmem:[#allocation2 + $0xd0] sm:$0xff] }
 0x240   : > { %3485 = vst [vmem:[%s4144_s11 + $0x8] sm:$0xff] %v3333_v22   ;;  %v2155_v43 = vadd.f32 %v4530_v13, %v2084_v59  ;;  %3486 = vst [vmem:[%s4144_s11 + $0x10] sm:$0xff] %v3338_v62   ;;  %v2278_v11 = vmax.f32 %v2150_v31, %v2214_v61  ;;  %v2217_v7 = vmul.f32 0.2, %v2153_v0  ;;  %v2156_v36 = vadd.f32 %v4530_v13, %v2085_v24 }
 0x241   : > { %v2218_v4 = vmul.f32 0.2, %v2154_v37  ;;  %3487 = vst [vmem:[%s4144_s11 + $0x18] sm:$0xff] %v3343_v2   ;;  %v2279_v17 = vmax.f32 %v2151_v5, %v2215_v3  ;;  %v2280_v14 = vmax.f32 %v2152_v32, %v2216_v29  ;;  %v2157_v60 = vadd.f32 %v4530_v13, %v2086_v63  ;;  %v2098_v5 = vld [vmem:[#allocation2 + $0xd8] sm:$0xff] }
 0x242   : > { %v2219_v9 = vmul.f32 0.2, %v2155_v43  ;;  %v2281_v21 = vmax.f32 %v2153_v0, %v2217_v7  ;;  %v2220_v19 = vmul.f32 0.2, %v2156_v36  ;;  %v2158_v56 = vadd.f32 %v4530_v13, %v2087_v6  ;;  %v2099_v0 = vld [vmem:[#allocation2 + $0xe0] sm:$0xff] }
 0x243   : > { %v2282_v18 = vmax.f32 %v2154_v37, %v2218_v4  ;;  %v3348_v23 = vpack.c.bf16 %v2279_v17, %v2278_v11  ;;  %v2221_v27 = vmul.f32 0.2, %v2157_v60  ;;  %v2159_v41 = vadd.f32 %v4530_v13, %v2088_v42  ;;  %v2100_v37 = vld [vmem:[#allocation2 + $0xe8] sm:$0xff] }
 0x244   : > { %v2283_v49 = vmax.f32 %v2155_v43, %v2219_v9  ;;  %v3353_v48 = vpack.c.bf16 %v2281_v21, %v2280_v14  ;;  %v2284_v26 = vmax.f32 %v2156_v36, %v2220_v19  ;;  %v2222_v16 = vmul.f32 0.2, %v2158_v56  ;;  %v2101_v43 = vld [vmem:[#allocation2 + $0xf0] sm:$0xff]  ;;  %v2102_v36 = vld [vmem:[#allocation2 + $0xf8] sm:$0xff] }
 0x245   : > { %v2160_v53 = vadd.f32 %v4530_v13, %v2089_v15  ;;  %3488 = vst [vmem:[%s4144_s11 + $0x20] sm:$0xff] %v3348_v23   ;;  %v2285_v34 = vmax.f32 %v2157_v60, %v2221_v27  ;;  %v2223_v45 = vmul.f32 0.2, %v2159_v41  ;;  %v2161_v35 = vadd.f32 %v4530_v13, %v2090_v58  ;;  %v2103_v60 = vld [vmem:[#allocation2 + $0x100] sm:$0xff] }
 0x246   : > { %v3358_v28 = vpack.c.bf16 %v2283_v49, %v2282_v18  ;;  %3489 = vst [vmem:[%s4144_s11 + $0x28] sm:$0xff] %v3353_v48   ;;  %v2286_v39 = vmax.f32 %v2158_v56, %v2222_v16  ;;  %v2162_v47 = vadd.f32 %v4530_v13, %v2091_v40  ;;  %v2163_v52 = vadd.f32 %v4530_v13, %v2092_v30  ;;  %v2104_v56 = vld [vmem:[#allocation2 + $0x108] sm:$0xff]  ;;  %v2106_v16 = vld [vmem:[#allocation2 + $0x118] sm:$0xff] }
 0x247   : > { %v2224_v20 = vmul.f32 0.2, %v2160_v53  ;;  %v3363_v44 = vpack.c.bf16 %v2285_v34, %v2284_v26  ;;  %v2287_v12 = vmax.f32 %v2159_v41, %v2223_v45  ;;  %v2225_v50 = vmul.f32 0.2, %v2161_v35  ;;  %v2105_v41 = vld [vmem:[#allocation2 + $0x110] sm:$0xff]  ;;  %v2107_v45 = vld [vmem:[#allocation2 + $0x120] sm:$0xff] }
 0x248   : > { %3490 = vst [vmem:[%s4144_s11 + $0x30] sm:$0xff] %v3358_v28   ;;  %v2164_v51 = vadd.f32 %v4530_v13, %v2093_v8  ;;  %v2226_v1 = vmul.f32 0.2, %v2162_v47  ;;  %v2227_v55 = vmul.f32 0.2, %v2163_v52  ;;  %v2165_v57 = vadd.f32 %v4530_v13, %v2094_v38 }
 0x249   : > { %v2288_v54 = vmax.f32 %v2160_v53, %v2224_v20  ;;  %3491 = vst [vmem:[%s4144_s11 + $0x38] sm:$0xff] %v3363_v44   ;;  %v3368_v31 = vpack.c.bf16 %v2287_v12, %v2286_v39  ;;  %v2289_v59 = vmax.f32 %v2161_v35, %v2225_v50  ;;  %v2166_v25 = vadd.f32 %v4530_v13, %v2095_v46  ;;  %v2108_v35 = vld [vmem:[#allocation2 + $0x128] sm:$0xff] }
 0x24a   : > { %v2228_v22 = vmul.f32 0.2, %v2164_v51  ;;  %v2290_v32 = vmax.f32 %v2162_v47, %v2226_v1  ;;  %v2291_v24 = vmax.f32 %v2163_v52, %v2227_v55  ;;  %v2229_v62 = vmul.f32 0.2, %v2165_v57  ;;  %v2109_v52 = vld [vmem:[#allocation2 + $0x130] sm:$0xff] }
 0x24b   : > { %v2167_v61 = vadd.f32 %v4530_v13, %v2096_v10  ;;  %3492 = vst [vmem:[%s4144_s11 + $0x40] sm:$0xff] %v3368_v31   ;;  %v3373_v63 = vpack.c.bf16 %v2289_v59, %v2288_v54  ;;  %v2230_v3 = vmul.f32 0.2, %v2166_v25  ;;  %v2168_v29 = vadd.f32 %v4530_v13, %v2097_v33 }
 0x24c   : > { %v2292_v2 = vmax.f32 %v2164_v51, %v2228_v22  ;;  %v3378_v6 = vpack.c.bf16 %v2291_v24, %v2290_v32  ;;  %v2293_v11 = vmax.f32 %v2165_v57, %v2229_v62  ;;  %v2169_v4 = vadd.f32 %v4530_v13, %v2098_v5  ;;  %v2110_v51 = vld [vmem:[#allocation2 + $0x138] sm:$0xff]  ;;  %v2111_v57 = vld [vmem:[#allocation2 + $0x140] sm:$0xff] }
 0x24d   : > { %v2231_v7 = vmul.f32 0.2, %v2167_v61  ;;  %3493 = vst [vmem:[%s4144_s11 + $0x48] sm:$0xff] %v3373_v63   ;;  %v2294_v42 = vmax.f32 %v2166_v25, %v2230_v3  ;;  %v2232_v17 = vmul.f32 0.2, %v2168_v29  ;;  %v2170_v14 = vadd.f32 %v4530_v13, %v2099_v0  ;;  %v2112_v25 = vld [vmem:[#allocation2 + $0x148] sm:$0xff] }
 0x24e   : > { %v2171_v9 = vadd.f32 %v4530_v13, %v2100_v37  ;;  %3494 = vst [vmem:[%s4144_s11 + $0x50] sm:$0xff] %v3378_v6   ;;  %v3383_v15 = vpack.c.bf16 %v2293_v11, %v2292_v2  ;;  %v2233_v18 = vmul.f32 0.2, %v2169_v4  ;;  %v2172_v19 = vadd.f32 %v4530_v13, %v2101_v43  ;;  %v2114_v3 = vld [vmem:[#allocation2 + $0x158] sm:$0xff] }
 0x24f   : > { %v2295_v21 = vmax.f32 %v2167_v61, %v2231_v7  ;;  %v2296_v58 = vmax.f32 %v2168_v29, %v2232_v17  ;;  %v2234_v23 = vmul.f32 0.2, %v2170_v14  ;;  %v2173_v27 = vadd.f32 %v4530_v13, %v2102_v36  ;;  %v2113_v61 = vld [vmem:[#allocation2 + $0x150] sm:$0xff]  ;;  %v2115_v7 = vld [vmem:[#allocation2 + $0x160] sm:$0xff] }
 0x250   : > { %v2235_v49 = vmul.f32 0.2, %v2171_v9  ;;  %3495 = vst [vmem:[%s4144_s11 + $0x58] sm:$0xff] %v3383_v15   ;;  %v2297_v30 = vmax.f32 %v2169_v4, %v2233_v18  ;;  %v2236_v48 = vmul.f32 0.2, %v2172_v19  ;;  %v2174_v26 = vadd.f32 %v4530_v13, %v2103_v60  ;;  %v2116_v4 = vld [vmem:[#allocation2 + $0x168] sm:$0xff] }
 0x251   : > { %v3388_v40 = vpack.c.bf16 %v2295_v21, %v2294_v42  ;;  %v2298_v53 = vmax.f32 %v2170_v14, %v2234_v23  ;;  %v2237_v28 = vmul.f32 0.2, %v2173_v27  ;;  %v2175_v34 = vadd.f32 %v4530_v13, %v2104_v56 }
 0x252   : > { %v2299_v8 = vmax.f32 %v2171_v9, %v2235_v49  ;;  %v3393_v38 = vpack.c.bf16 %v2297_v30, %v2296_v58  ;;  %v2300_v39 = vmax.f32 %v2172_v19, %v2236_v48  ;;  %v2238_v20 = vmul.f32 0.2, %v2174_v26  ;;  %v2117_v9 = vld [vmem:[#allocation2 + $0x170] sm:$0xff]  ;;  %v2118_v19 = vld [vmem:[#allocation2 + $0x178] sm:$0xff] }
 0x253   : > { %3496 = vst [vmem:[%s4144_s11 + $0x60] sm:$0xff] %v3388_v40   ;;  %v2176_v47 = vadd.f32 %v4530_v13, %v2105_v41  ;;  %v2301_v44 = vmax.f32 %v2173_v27, %v2237_v28  ;;  %v2239_v12 = vmul.f32 0.2, %v2175_v34  ;;  %v2177_v50 = vadd.f32 %v4530_v13, %v2106_v16  ;;  %v2119_v27 = vld [vmem:[#allocation2 + $0x180] sm:$0xff] }
 0x254   : > { %v3398_v46 = vpack.c.bf16 %v2299_v8, %v2298_v53  ;;  %3497 = vst [vmem:[%s4144_s11 + $0x68] sm:$0xff] %v3393_v38   ;;  %v2302_v10 = vmax.f32 %v2174_v26, %v2238_v20  ;;  %v2178_v1 = vadd.f32 %v4530_v13, %v2107_v45  ;;  %v2179_v55 = vadd.f32 %v4530_v13, %v2108_v35  ;;  %v2120_v26 = vld [vmem:[#allocation2 + $0x188] sm:$0xff]  ;;  %v2122_v20 = vld [vmem:[#allocation2 + $0x198] sm:$0xff] }
 0x255   : > { %v2240_v54 = vmul.f32 0.2, %v2176_v47  ;;  %v3403_v33 = vpack.c.bf16 %v2301_v44, %v2300_v39  ;;  %v2303_v31 = vmax.f32 %v2175_v34, %v2239_v12  ;;  %v2241_v59 = vmul.f32 0.2, %v2177_v50  ;;  %v2121_v34 = vld [vmem:[#allocation2 + $0x190] sm:$0xff]  ;;  %v2123_v12 = vld [vmem:[#allocation2 + $0x1a0] sm:$0xff] }
 0x256   : > { %3498 = vst [vmem:[%s4144_s11 + $0x70] sm:$0xff] %v3398_v46   ;;  %v2180_v22 = vadd.f32 %v4530_v13, %v2109_v52  ;;  %v2242_v32 = vmul.f32 0.2, %v2178_v1  ;;  %v2243_v24 = vmul.f32 0.2, %v2179_v55  ;;  %v2181_v62 = vadd.f32 %v4530_v13, %v2110_v51 }
 0x257   : > { %v2304_v5 = vmax.f32 %v2176_v47, %v2240_v54  ;;  %3499 = vst [vmem:[%s4144_s11 + $0x78] sm:$0xff] %v3403_v33   ;;  %v3408_v0 = vpack.c.bf16 %v2303_v31, %v2302_v10  ;;  %v2305_v37 = vmax.f32 %v2177_v50, %v2241_v59  ;;  %v2182_v2 = vadd.f32 %v4530_v13, %v2111_v57  ;;  %v2124_v50 = vld [vmem:[#allocation2 + $0x1a8] sm:$0xff] }
 0x258   : > { %v2244_v63 = vmul.f32 0.2, %v2180_v22  ;;  %v2306_v29 = vmax.f32 %v2178_v1, %v2242_v32  ;;  %v2307_v43 = vmax.f32 %v2179_v55, %v2243_v24  ;;  %v2245_v6 = vmul.f32 0.2, %v2181_v62  ;;  %v2125_v55 = vld [vmem:[#allocation2 + $0x1b0] sm:$0xff] }
 0x259   : > { %v2183_v11 = vadd.f32 %v4530_v13, %v2112_v25  ;;  %3500 = vst [vmem:[%s4144_s11 + $0x80] sm:$0xff] %v3408_v0   ;;  %v3413_v36 = vpack.c.bf16 %v2305_v37, %v2304_v5  ;;  %v2246_v17 = vmul.f32 0.2, %v2182_v2  ;;  %v2184_v14 = vadd.f32 %v4530_v13, %v2113_v61 }
 0x25a   : > { %v2308_v42 = vmax.f32 %v2180_v22, %v2244_v63  ;;  %v3418_v60 = vpack.c.bf16 %v2307_v43, %v2306_v29  ;;  %v2309_v15 = vmax.f32 %v2181_v62, %v2245_v6  ;;  %v2185_v18 = vadd.f32 %v4530_v13, %v2114_v3  ;;  %v2126_v22 = vld [vmem:[#allocation2 + $0x1b8] sm:$0xff]  ;;  %v2127_v62 = vld [vmem:[#allocation2 + $0x1c0] sm:$0xff] }
 0x25b   : > { %v2247_v21 = vmul.f32 0.2, %v2183_v11  ;;  %3501 = vst [vmem:[%s4144_s11 + $0x88] sm:$0xff] %v3413_v36   ;;  %v2310_v56 = vmax.f32 %v2182_v2, %v2246_v17  ;;  %v2248_v58 = vmul.f32 0.2, %v2184_v14  ;;  %v2186_v23 = vadd.f32 %v4530_v13, %v2115_v7  ;;  %v2128_v2 = vld [vmem:[#allocation2 + $0x1c8] sm:$0xff] }
 0x25c   : > { %v2187_v49 = vadd.f32 %v4530_v13, %v2116_v4  ;;  %3502 = vst [vmem:[%s4144_s11 + $0x90] sm:$0xff] %v3418_v60   ;;  %v3423_v41 = vpack.c.bf16 %v2309_v15, %v2308_v42  ;;  %v2249_v30 = vmul.f32 0.2, %v2185_v18  ;;  %v2188_v48 = vadd.f32 %v4530_v13, %v2117_v9  ;;  %v2130_v17 = vld [vmem:[#allocation2 + $0x1d8] sm:$0xff] }
 0x25d   : > { %v2311_v40 = vmax.f32 %v2183_v11, %v2247_v21  ;;  %v2312_v16 = vmax.f32 %v2184_v14, %v2248_v58  ;;  %v2250_v53 = vmul.f32 0.2, %v2186_v23  ;;  %v2189_v28 = vadd.f32 %v4530_v13, %v2118_v19  ;;  %v2129_v11 = vld [vmem:[#allocation2 + $0x1d0] sm:$0xff]  ;;  %v2131_v21 = vld [vmem:[#allocation2 + $0x1e0] sm:$0xff] }
 0x25e   : > { %v2251_v8 = vmul.f32 0.2, %v2187_v49  ;;  %3503 = vst [vmem:[%s4144_s11 + $0x98] sm:$0xff] %v3423_v41   ;;  %v2313_v35 = vmax.f32 %v2185_v18, %v2249_v30  ;;  %v2252_v38 = vmul.f32 0.2, %v2188_v48  ;;  %v2190_v39 = vadd.f32 %v4530_v13, %v2119_v27  ;;  %v2132_v18 = vld [vmem:[#allocation2 + $0x1e8] sm:$0xff] }
 0x25f   : > { %v3428_v45 = vpack.c.bf16 %v2311_v40, %v2310_v56  ;;  %v2314_v47 = vmax.f32 %v2186_v23, %v2250_v53  ;;  %v2253_v46 = vmul.f32 0.2, %v2189_v28  ;;  %v2191_v44 = vadd.f32 %v4530_v13, %v2120_v26 }
 0x260   : > { %v2315_v52 = vmax.f32 %v2187_v49, %v2251_v8  ;;  %v3433_v51 = vpack.c.bf16 %v2313_v35, %v2312_v16  ;;  %v2316_v10 = vmax.f32 %v2188_v48, %v2252_v38  ;;  %v2254_v54 = vmul.f32 0.2, %v2190_v39  ;;  %v2133_v49 = vld [vmem:[#allocation2 + $0x1f0] sm:$0xff]  ;;  %v2134_v48 = vld [vmem:[#allocation2 + $0x1f8] sm:$0xff] }
 0x261   : > { %3504 = vst [vmem:[%s4144_s11 + $0xa0] sm:$0xff] %v3428_v45   ;;  %v2192_v1 = vadd.f32 %v4530_v13, %v2121_v34  ;;  %v2317_v33 = vmax.f32 %v2189_v28, %v2253_v46  ;;  %v2255_v31 = vmul.f32 0.2, %v2191_v44  ;;  %v2193_v59 = vadd.f32 %v4530_v13, %v2122_v20 }
 0x262   : > { %v3438_v57 = vpack.c.bf16 %v2315_v52, %v2314_v47  ;;  %3505 = vst [vmem:[%s4144_s11 + $0xa8] sm:$0xff] %v3433_v51   ;;  %v2318_v25 = vmax.f32 %v2190_v39, %v2254_v54  ;;  %v2194_v32 = vadd.f32 %v4530_v13, %v2123_v12  ;;  %v2195_v24 = vadd.f32 %v4530_v13, %v2124_v50 }
 0x263   : > { %v2256_v5 = vmul.f32 0.2, %v2192_v1  ;;  %v3443_v61 = vpack.c.bf16 %v2317_v33, %v2316_v10  ;;  %v2319_v0 = vmax.f32 %v2191_v44, %v2255_v31  ;;  %v2257_v37 = vmul.f32 0.2, %v2193_v59 }
 0x264   : > { %3506 = vst [vmem:[%s4144_s11 + $0xb0] sm:$0xff] %v3438_v57   ;;  %v2196_v63 = vadd.f32 %v4530_v13, %v2125_v55  ;;  %v2258_v29 = vmul.f32 0.2, %v2194_v32  ;;  %v2259_v43 = vmul.f32 0.2, %v2195_v24  ;;  %v2197_v6 = vadd.f32 %v4530_v13, %v2126_v22 }
 0x265   : > { %v2320_v3 = vmax.f32 %v2192_v1, %v2256_v5  ;;  %3507 = vst [vmem:[%s4144_s11 + $0xb8] sm:$0xff] %v3443_v61   ;;  %v3448_v7 = vpack.c.bf16 %v2319_v0, %v2318_v25  ;;  %v2321_v4 = vmax.f32 %v2193_v59, %v2257_v37  ;;  %v2198_v42 = vadd.f32 %v4530_v13, %v2127_v62 }
 0x266   : > { %v2260_v36 = vmul.f32 0.2, %v2196_v63  ;;  %v2322_v14 = vmax.f32 %v2194_v32, %v2258_v29  ;;  %v2323_v9 = vmax.f32 %v2195_v24, %v2259_v43  ;;  %v2261_v60 = vmul.f32 0.2, %v2197_v6 }
 0x267   : > { %v2199_v15 = vadd.f32 %v4530_v13, %v2128_v2  ;;  %3508 = vst [vmem:[%s4144_s11 + $0xc0] sm:$0xff] %v3448_v7   ;;  %v3453_v19 = vpack.c.bf16 %v2321_v4, %v2320_v3  ;;  %v2262_v58 = vmul.f32 0.2, %v2198_v42  ;;  %v2200_v23 = vadd.f32 %v4530_v13, %v2129_v11 }
 0x268   : > { %v2324_v56 = vmax.f32 %v2196_v63, %v2260_v36  ;;  %v3458_v27 = vpack.c.bf16 %v2323_v9, %v2322_v14  ;;  %v2325_v41 = vmax.f32 %v2197_v6, %v2261_v60  ;;  %v2201_v30 = vadd.f32 %v4530_v13, %v2130_v17 }
 0x269   : > { %v2263_v40 = vmul.f32 0.2, %v2199_v15  ;;  %3509 = vst [vmem:[%s4144_s11 + $0xc8] sm:$0xff] %v3453_v19   ;;  %v2326_v26 = vmax.f32 %v2198_v42, %v2262_v58  ;;  %v2264_v16 = vmul.f32 0.2, %v2200_v23  ;;  %v2202_v53 = vadd.f32 %v4530_v13, %v2131_v21 }
 0x26a   : > { %v2203_v8 = vadd.f32 %v4530_v13, %v2132_v18  ;;  %3510 = vst [vmem:[%s4144_s11 + $0xd0] sm:$0xff] %v3458_v27   ;;  %v3463_v28 = vpack.c.bf16 %v2325_v41, %v2324_v56  ;;  %v2265_v45 = vmul.f32 0.2, %v2201_v30  ;;  %v2204_v35 = vadd.f32 %v4530_v13, %v2133_v49 }
 0x26b   : > { %v2327_v34 = vmax.f32 %v2199_v15, %v2263_v40  ;;  %v2328_v38 = vmax.f32 %v2200_v23, %v2264_v16  ;;  %v2266_v39 = vmul.f32 0.2, %v2202_v53  ;;  %v2205_v47 = vadd.f32 %v4530_v13, %v2134_v48 }
 0x26c   : > { %v2267_v20 = vmul.f32 0.2, %v2203_v8  ;;  %3511 = vst [vmem:[%s4144_s11 + $0xd8] sm:$0xff] %v3463_v28   ;;  %v2329_v46 = vmax.f32 %v2201_v30, %v2265_v45  ;;  %v2268_v44 = vmul.f32 0.2, %v2204_v35 }
 0x26d   : > { %v3468_v52 = vpack.c.bf16 %v2327_v34, %v2326_v26  ;;  %v2330_v12 = vmax.f32 %v2202_v53, %v2266_v39  ;;  %v2269_v51 = vmul.f32 0.2, %v2205_v47 }
 0x26e   : > { %v2331_v50 = vmax.f32 %v2203_v8, %v2267_v20  ;;  %v3473_v10 = vpack.c.bf16 %v2329_v46, %v2328_v38  ;;  %v2332_v54 = vmax.f32 %v2204_v35, %v2268_v44 }
 0x26f   : > { %3512 = vst [vmem:[%s4144_s11 + $0xe0] sm:$0xff] %v3468_v52   ;;  %v2333_v55 = vmax.f32 %v2205_v47, %v2269_v51 }
 0x270   : > { %v3478_v1 = vpack.c.bf16 %v2331_v50, %v2330_v12  ;;  %3513 = vst [vmem:[%s4144_s11 + $0xe8] sm:$0xff] %v3473_v10  }
 0x271   : > { %v3483_v57 = vpack.c.bf16 %v2333_v55, %v2332_v54 }
 0x272   : > { %3514 = vst [vmem:[%s4144_s11 + $0xf0] sm:$0xff] %v3478_v1  }
 0x273   : > { %3515 = vst [vmem:[%s4144_s11 + $0xf8] sm:$0xff] %v3483_v57  }
 0x274 PF: > { %2660 = sbr.rel (!%p4035_p9) target bundleno = 672 (0x2a0), region = 85  ;;  %s3257_s16 = sshll.u32 (%p4035_p9), %s3931_s17, 2  ;;  %v2678_v13 = vld [vmem:[%s4144_s11] sm:$0xf] (%p4035_p9)  ;;  %v2680_v33 = vld [vmem:[%s4144_s11 + $0x4] sm:$0xf] (%p4035_p9) }
 0x275   : > { %s4636_s29 = scalar_lea.vmem (%p4035_p9), %s4794_s3, %s3257_s16  ;;  %v2682_v31 = vld [vmem:[%s4144_s11 + $0x8] sm:$0xf] (%p4035_p9)  ;;  %v2684_v59 = vld [vmem:[%s4144_s11 + $0xc] sm:$0xf] (%p4035_p9)  ;;  %v2686_v22 = vld [vmem:[%s4144_s11 + $0x10] sm:$0xf] (%p4035_p9) }
 0x276   : > { %2679 = vst [vmem:[%s4636_s29] sm:$0xf] (%p4035_p9), %v2678_v13  ;;  %2681 = vst [vmem:[%s4636_s29 + $0x8] sm:$0xf] (%p4035_p9), %v2680_v33  ;;  %v2688_v25 = vld [vmem:[%s4144_s11 + $0x14] sm:$0xf] (%p4035_p9) }
 0x277   : > { %2683 = vst [vmem:[%s4636_s29 + $0x10] sm:$0xf] (%p4035_p9), %v2682_v31  ;;  %2685 = vst [vmem:[%s4636_s29 + $0x18] sm:$0xf] (%p4035_p9), %v2684_v59  ;;  %v2690_v5 = vld [vmem:[%s4144_s11 + $0x18] sm:$0xf] (%p4035_p9) }
 0x278   : > { %2687 = vst [vmem:[%s4636_s29 + $0x20] sm:$0xf] (%p4035_p9), %v2686_v22  ;;  %v2692_v32 = vld [vmem:[%s4144_s11 + $0x1c] sm:$0xf] (%p4035_p9)  ;;  %2689 = vst [vmem:[%s4636_s29 + $0x28] sm:$0xf] (%p4035_p9), %v2688_v25 }
 0x279   : > { %2691 = vst [vmem:[%s4636_s29 + $0x30] sm:$0xf] (%p4035_p9), %v2690_v5  ;;  %2693 = vst [vmem:[%s4636_s29 + $0x38] sm:$0xf] (%p4035_p9), %v2692_v32  ;;  %v2694_v24 = vld [vmem:[%s4144_s11 + $0x20] sm:$0xf] (%p4035_p9) }
 0x27a   : > { %v2696_v62 = vld [vmem:[%s4144_s11 + $0x24] sm:$0xf] (%p4035_p9)  ;;  %v2698_v61 = vld [vmem:[%s4144_s11 + $0x28] sm:$0xf] (%p4035_p9)  ;;  %2695 = vst [vmem:[%s4636_s29 + $0x40] sm:$0xf] (%p4035_p9), %v2694_v24 }
 0x27b   : > { %2697 = vst [vmem:[%s4636_s29 + $0x48] sm:$0xf] %v2696_v62  ;;  %2699 = vst [vmem:[%s4636_s29 + $0x50] sm:$0xf] %v2698_v61  ;;  %v2700_v0 = vld [vmem:[%s4144_s11 + $0x2c] sm:$0xf] }
 0x27c   : > { %v2702_v37 = vld [vmem:[%s4144_s11 + $0x30] sm:$0xf]  ;;  %v2704_v63 = vld [vmem:[%s4144_s11 + $0x34] sm:$0xf]  ;;  %2701 = vst [vmem:[%s4636_s29 + $0x58] sm:$0xf] %v2700_v0 }
 0x27d   : > { %2703 = vst [vmem:[%s4636_s29 + $0x60] sm:$0xf] %v2702_v37  ;;  %2705 = vst [vmem:[%s4636_s29 + $0x68] sm:$0xf] %v2704_v63  ;;  %v2706_v2 = vld [vmem:[%s4144_s11 + $0x38] sm:$0xf] }
 0x27e   : > { %v2708_v3 = vld [vmem:[%s4144_s11 + $0x3c] sm:$0xf]  ;;  %v2710_v29 = vld [vmem:[%s4144_s11 + $0x40] sm:$0xf]  ;;  %2707 = vst [vmem:[%s4636_s29 + $0x70] sm:$0xf] %v2706_v2 }
 0x27f   : > { %2709 = vst [vmem:[%s4636_s29 + $0x78] sm:$0xf] %v2708_v3  ;;  %2711 = vst [vmem:[%s4636_s29 + $0x80] sm:$0xf] %v2710_v29  ;;  %v2712_v43 = vld [vmem:[%s4144_s11 + $0x44] sm:$0xf] }
 0x280   : > { %v2714_v6 = vld [vmem:[%s4144_s11 + $0x48] sm:$0xf]  ;;  %v2716_v11 = vld [vmem:[%s4144_s11 + $0x4c] sm:$0xf]  ;;  %2713 = vst [vmem:[%s4636_s29 + $0x88] sm:$0xf] %v2712_v43 }
 0x281   : > { %2715 = vst [vmem:[%s4636_s29 + $0x90] sm:$0xf] %v2714_v6  ;;  %2717 = vst [vmem:[%s4636_s29 + $0x98] sm:$0xf] %v2716_v11  ;;  %v2718_v7 = vld [vmem:[%s4144_s11 + $0x50] sm:$0xf] }
 0x282   : > { %v2720_v4 = vld [vmem:[%s4144_s11 + $0x54] sm:$0xf]  ;;  %v2722_v36 = vld [vmem:[%s4144_s11 + $0x58] sm:$0xf]  ;;  %2719 = vst [vmem:[%s4636_s29 + $0xa0] sm:$0xf] %v2718_v7 }
 0x283   : > { %2721 = vst [vmem:[%s4636_s29 + $0xa8] sm:$0xf] %v2720_v4  ;;  %2723 = vst [vmem:[%s4636_s29 + $0xb0] sm:$0xf] %v2722_v36  ;;  %v2724_v42 = vld [vmem:[%s4144_s11 + $0x5c] sm:$0xf] }
 0x284   : > { %v2726_v17 = vld [vmem:[%s4144_s11 + $0x60] sm:$0xf]  ;;  %v2728_v14 = vld [vmem:[%s4144_s11 + $0x64] sm:$0xf]  ;;  %2725 = vst [vmem:[%s4636_s29 + $0xb8] sm:$0xf] %v2724_v42 }
 0x285   : > { %2727 = vst [vmem:[%s4636_s29 + $0xc0] sm:$0xf] %v2726_v17  ;;  %2729 = vst [vmem:[%s4636_s29 + $0xc8] sm:$0xf] %v2728_v14  ;;  %v2730_v9 = vld [vmem:[%s4144_s11 + $0x68] sm:$0xf] }
 0x286   : > { %v2732_v60 = vld [vmem:[%s4144_s11 + $0x6c] sm:$0xf]  ;;  %v2734_v15 = vld [vmem:[%s4144_s11 + $0x70] sm:$0xf]  ;;  %2731 = vst [vmem:[%s4636_s29 + $0xd0] sm:$0xf] %v2730_v9 }
 0x287   : > { %2733 = vst [vmem:[%s4636_s29 + $0xd8] sm:$0xf] %v2732_v60  ;;  %2735 = vst [vmem:[%s4636_s29 + $0xe0] sm:$0xf] %v2734_v15  ;;  %v2736_v21 = vld [vmem:[%s4144_s11 + $0x74] sm:$0xf] }
 0x288   : > { %v2738_v18 = vld [vmem:[%s4144_s11 + $0x78] sm:$0xf]  ;;  %v2740_v19 = vld [vmem:[%s4144_s11 + $0x7c] sm:$0xf]  ;;  %2737 = vst [vmem:[%s4636_s29 + $0xe8] sm:$0xf] %v2736_v21 }
 0x289   : > { %2739 = vst [vmem:[%s4636_s29 + $0xf0] sm:$0xf] %v2738_v18  ;;  %2741 = vst [vmem:[%s4636_s29 + $0xf8] sm:$0xf] %v2740_v19  ;;  %v2742_v56 = vld [vmem:[%s4144_s11 + $0x80] sm:$0xf] }
 0x28a   : > { %v2744_v58 = vld [vmem:[%s4144_s11 + $0x84] sm:$0xf]  ;;  %v2746_v23 = vld [vmem:[%s4144_s11 + $0x88] sm:$0xf]  ;;  %2743 = vst [vmem:[%s4636_s29 + $0x100] sm:$0xf] %v2742_v56 }
 0x28b   : > { %2745 = vst [vmem:[%s4636_s29 + $0x108] sm:$0xf] %v2744_v58  ;;  %2747 = vst [vmem:[%s4636_s29 + $0x110] sm:$0xf] %v2746_v23  ;;  %v2748_v49 = vld [vmem:[%s4144_s11 + $0x8c] sm:$0xf] }
 0x28c   : > { %v2750_v27 = vld [vmem:[%s4144_s11 + $0x90] sm:$0xf]  ;;  %v2752_v41 = vld [vmem:[%s4144_s11 + $0x94] sm:$0xf]  ;;  %2749 = vst [vmem:[%s4636_s29 + $0x118] sm:$0xf] %v2748_v49 }
 0x28d   : > { %2751 = vst [vmem:[%s4636_s29 + $0x120] sm:$0xf] %v2750_v27  ;;  %2753 = vst [vmem:[%s4636_s29 + $0x128] sm:$0xf] %v2752_v41  ;;  %v2754_v40 = vld [vmem:[%s4144_s11 + $0x98] sm:$0xf] }
 0x28e   : > { %v2756_v30 = vld [vmem:[%s4144_s11 + $0x9c] sm:$0xf]  ;;  %v2758_v48 = vld [vmem:[%s4144_s11 + $0xa0] sm:$0xf]  ;;  %2755 = vst [vmem:[%s4636_s29 + $0x130] sm:$0xf] %v2754_v40 }
 0x28f   : > { %2757 = vst [vmem:[%s4636_s29 + $0x138] sm:$0xf] %v2756_v30  ;;  %2759 = vst [vmem:[%s4636_s29 + $0x140] sm:$0xf] %v2758_v48  ;;  %v2760_v26 = vld [vmem:[%s4144_s11 + $0xa4] sm:$0xf] }
 0x290   : > { %v2762_v16 = vld [vmem:[%s4144_s11 + $0xa8] sm:$0xf]  ;;  %v2764_v53 = vld [vmem:[%s4144_s11 + $0xac] sm:$0xf]  ;;  %2761 = vst [vmem:[%s4636_s29 + $0x148] sm:$0xf] %v2760_v26 }
 0x291   : > { %2763 = vst [vmem:[%s4636_s29 + $0x150] sm:$0xf] %v2762_v16  ;;  %2765 = vst [vmem:[%s4636_s29 + $0x158] sm:$0xf] %v2764_v53  ;;  %v2766_v8 = vld [vmem:[%s4144_s11 + $0xb0] sm:$0xf] }
 0x292   : > { %v2768_v28 = vld [vmem:[%s4144_s11 + $0xb4] sm:$0xf]  ;;  %v2770_v34 = vld [vmem:[%s4144_s11 + $0xb8] sm:$0xf]  ;;  %2767 = vst [vmem:[%s4636_s29 + $0x160] sm:$0xf] %v2766_v8 }
 0x293   : > { %2769 = vst [vmem:[%s4636_s29 + $0x168] sm:$0xf] %v2768_v28  ;;  %2771 = vst [vmem:[%s4636_s29 + $0x170] sm:$0xf] %v2770_v34  ;;  %v2772_v45 = vld [vmem:[%s4144_s11 + $0xbc] sm:$0xf] }
 0x294   : > { %v2774_v35 = vld [vmem:[%s4144_s11 + $0xc0] sm:$0xf]  ;;  %v2776_v38 = vld [vmem:[%s4144_s11 + $0xc4] sm:$0xf]  ;;  %2773 = vst [vmem:[%s4636_s29 + $0x178] sm:$0xf] %v2772_v45 }
 0x295   : > { %2775 = vst [vmem:[%s4636_s29 + $0x180] sm:$0xf] %v2774_v35  ;;  %2777 = vst [vmem:[%s4636_s29 + $0x188] sm:$0xf] %v2776_v38  ;;  %v2778_v39 = vld [vmem:[%s4144_s11 + $0xc8] sm:$0xf] }
 0x296   : > { %v2780_v20 = vld [vmem:[%s4144_s11 + $0xcc] sm:$0xf]  ;;  %v2782_v47 = vld [vmem:[%s4144_s11 + $0xd0] sm:$0xf]  ;;  %2779 = vst [vmem:[%s4636_s29 + $0x190] sm:$0xf] %v2778_v39 }
 0x297   : > { %2781 = vst [vmem:[%s4636_s29 + $0x198] sm:$0xf] %v2780_v20  ;;  %2783 = vst [vmem:[%s4636_s29 + $0x1a0] sm:$0xf] %v2782_v47  ;;  %v2784_v52 = vld [vmem:[%s4144_s11 + $0xd4] sm:$0xf] }
 0x298   : > { %v2786_v46 = vld [vmem:[%s4144_s11 + $0xd8] sm:$0xf]  ;;  %v2788_v44 = vld [vmem:[%s4144_s11 + $0xdc] sm:$0xf]  ;;  %2785 = vst [vmem:[%s4636_s29 + $0x1a8] sm:$0xf] %v2784_v52 }
 0x299   : > { %2787 = vst [vmem:[%s4636_s29 + $0x1b0] sm:$0xf] %v2786_v46  ;;  %2789 = vst [vmem:[%s4636_s29 + $0x1b8] sm:$0xf] %v2788_v44  ;;  %v2790_v12 = vld [vmem:[%s4144_s11 + $0xe0] sm:$0xf] }
 0x29a   : > { %v2792_v50 = vld [vmem:[%s4144_s11 + $0xe4] sm:$0xf]  ;;  %v2794_v51 = vld [vmem:[%s4144_s11 + $0xe8] sm:$0xf]  ;;  %2791 = vst [vmem:[%s4636_s29 + $0x1c0] sm:$0xf] %v2790_v12 }
 0x29b   : > { %2793 = vst [vmem:[%s4636_s29 + $0x1c8] sm:$0xf] %v2792_v50  ;;  %2795 = vst [vmem:[%s4636_s29 + $0x1d0] sm:$0xf] %v2794_v51  ;;  %v2796_v10 = vld [vmem:[%s4144_s11 + $0xec] sm:$0xf] }
 0x29c   : > { %v2798_v54 = vld [vmem:[%s4144_s11 + $0xf0] sm:$0xf]  ;;  %v2800_v1 = vld [vmem:[%s4144_s11 + $0xf4] sm:$0xf]  ;;  %2797 = vst [vmem:[%s4636_s29 + $0x1d8] sm:$0xf] %v2796_v10 }
 0x29d   : > { %2799 = vst [vmem:[%s4636_s29 + $0x1e0] sm:$0xf] %v2798_v54  ;;  %2801 = vst [vmem:[%s4636_s29 + $0x1e8] sm:$0xf] %v2800_v1  ;;  %v2802_v55 = vld [vmem:[%s4144_s11 + $0xf8] sm:$0xf] }
 0x29e   : > { %v2804_v57 = vld [vmem:[%s4144_s11 + $0xfc] sm:$0xf]  ;;  %2803 = vst [vmem:[%s4636_s29 + $0x1f0] sm:$0xf] %v2802_v55 }
 0x29f   : > { %2805 = vst [vmem:[%s4636_s29 + $0x1f8] sm:$0xf] %v2804_v57 }
 0x2a0 PF: > { %s13_s20 = sadd.s32 1, %s3943_s20   ;;  %s4797_s12 = smov %s3915_s13 }
 0x2a1   : > { %p10_p3 = scmp.ge.s32.totalorder %s13_s20, 20   ;;  %s4798_s13 = smov %s4040_s4 }
 0x2a2   : > { %s4799_s14 = smov %s3923_s15  ;;  %s4800_s15 = smov %s4043_s5 }
 0x2a3   : > { %s4801_s16 = smov %s3935_s18  ;;  %s4802_s17 = smov %s3939_s19 }
 0x2a4   : > { %s4803_s18 = smov %s4806_s21  ;;  %s4804_s19 = smov %s4810_s22 }
 0x2a5   :  { %12 = sbr.rel (!%p10_p3) target bundleno = 5 (0x5), region = 161 }

// kernel: dispnet_costvolume_encoder.8
= control target key start
LH: loop header
LB: loop body
LE: loop exit
PB: predicated region body
PF: predicated region fallthrough
CT: control target
= control target key end

     0   :  { %s1514_s12 = smov 0   ;;  %s1516_s13 = smov 0   ;;  %s1805_s0 = inlined_call_operand.vmem [shape: bf16[9,128,256], index: 0, kind: input, shape index: {}]   ;;  %s1806_s1 = inlined_call_operand.vmem [shape: bf16[9,256,512], index: 1, kind: input, shape index: {}]   ;;  %s1807_s2 = inlined_call_operand.vmem [shape: f32[1,512], index: 2, kind: input, shape index: {}]   ;;  %s1808_s3 = inlined_call_operand.vmem [shape: bf16[128,512], index: 3, kind: output, shape index: {}]  }
   0x1   :  { %s1518_s14 = smov 0   ;;  %s1520_s15 = smov 0  }
   0x2   :  { %s1522_s16 = smov 0   ;;  %s1524_s17 = smov 0  }
   0x3   :  { %s1526_s18 = smov 0   ;;  %s1528_s19 = smov 0  }
   0x4   :  { %s1530_s20 = smov 0  }
   0x5 LB: > { %s22_s21 = sadd.s32 1, %s1483_s18  ;;  %s25_s22 = sadd.s32 1, %s1487_s19  ;;  %s1491_s20 = sphi %s1530_s20, %s13_s20   ;;  %s1487_s19 = sphi %s1528_s19, %s1818_s19   ;;  %s1483_s18 = sphi %s1526_s18, %s1817_s18   ;;  %s1479_s17 = sphi %s1524_s17, %s1816_s17   ;;  %s1475_s16 = sphi %s1522_s16, %s1815_s16   ;;  %s1471_s15 = sphi %s1520_s15, %s1814_s15   ;;  %s1467_s14 = sphi %s1518_s14, %s1813_s14   ;;  %s1463_s13 = sphi %s1516_s13, %s1812_s13   ;;  %s1459_s12 = sphi %s1514_s12, %s1811_s12  }
   0x6   : > { %p23_p0 = scmp.ge.s32.totalorder %s22_s21, 9  ;;  %p62_p1 = scmp.ne.s32.totalorder %s1471_s15, %s1467_s14 }
   0x7   : > { %s1097_s23 = sadd.s32 4294967295, %s1491_s20   ;;  %p63_p2 = scmp.eq.s32.totalorder %s1491_s20, 0 }
   0x8   : > { %s1820_s21 = smov (%p23_p0, %s22_s21), 0  ;;  %s1822_s22 = smov (!%p23_p0, %s25_s22), %s1487_s19 }
   0x9   : > { %p27_p3 = scmp.ge.s32.totalorder %s1822_s22, 4  ;;  %s50_s24 = ssub.s32 %s1483_s18, %s1820_s21 }
   0xa   : > { %p1570_p4 = por %p63_p2, %p62_p1  ;;  %p117_p5 = scmp.ne.s32.totalorder %s1463_s13, %s1459_s12 }
   0xb   : > { %s1824_s22 = smov (%p27_p3, %s1822_s22), 0  ;;  %s55_s26 = sadd.s32 1, %s1471_s15 }
   0xc   : > { %p118_p6 = scmp.eq.s32.totalorder %s1097_s23, 35  ;;  %s51_s27 = ssub.s32 %s1487_s19, %s1824_s22 }
   0xd   : > { %s107_s28 = sadd.s32 1, %s1463_s13  ;;  %s52_s29 = sor.u32 %s51_s27, %s50_s24 }
   0xe   : > { %p105_p7 = scmp.eq.s32.totalorder %s51_s27, 0  ;;  %p53_p8 = scmp.eq.s32.totalorder %s52_s29, 0 }
   0xf   : > { %p1582_p9 = por %p118_p6, %p117_p5  ;;  %p1100_p10 = scmp.ge.s32.totalorder %s1491_s20, 36 }
  0x10   : > { %s1587_s4 = scalar_select %p105_p7, %s1463_s13, %s107_s28  }
  0x11   : > { %s1590_s5 = scalar_select %p53_p8, %s1471_s15, %s55_s26  }
  0x12   : > { %143 = sbr.rel (%p1100_p10) target bundleno = 52 (0x34), region = 20 }
  0x19   : > { %146 = sbr.rel (!%p1570_p4) target bundleno = 52 (0x34), region = 24  ;;  %s148_s6 = sand.u32 (%p1570_p4), 1, %s1471_s15  }
  0x1a   : > { %s1102_s7 = sshll.u32 (%p1570_p4), %s1483_s18, 7  ;;  %s1101_s8 = sshll.u32 (%p1570_p4), %s148_s6, 7 }
  0x1b   : > { %s152_s9 = sadd.s32 (%p1570_p4), %s1487_s19, %s1102_s7  ;;  %s1606_s25 = scalar_lea.vmem (%p1570_p4), [#allocation3], %s1101_s8 }
  0x1c   : > { %s1103_s10 = sshll.u32 (%p1570_p4), %s152_s9, 2 }
  0x1d   : > { %s1601_s24 = scalar_lea.vmem (%p1570_p4), %s1806_s1, %s1103_s10 }
  0x1e   : > { %v170_v0 = vld [vmem:[%s1601_s24] sm:$0xf] (%p1570_p4)  ;;  %v172_v1 = vld [vmem:[%s1601_s24 + $0x10] sm:$0xf] (%p1570_p4) }
  0x1f   : > { %v174_v2 = vld [vmem:[%s1601_s24 + $0x20] sm:$0xf] (%p1570_p4)  ;;  %171 = vst [vmem:[%s1606_s25] sm:$0xf] (%p1570_p4), %v170_v0  ;;  %173 = vst [vmem:[%s1606_s25 + $0x4] sm:$0xf] (%p1570_p4), %v172_v1 }
  0x20   : > { %175 = vst [vmem:[%s1606_s25 + $0x8] sm:$0xf] %v174_v2  ;;  %v176_v3 = vld [vmem:[%s1601_s24 + $0x30] sm:$0xf]  ;;  %v178_v4 = vld [vmem:[%s1601_s24 + $0x40] sm:$0xf] }
  0x21   : > { %v180_v5 = vld [vmem:[%s1601_s24 + $0x50] sm:$0xf]  ;;  %177 = vst [vmem:[%s1606_s25 + $0xc] sm:$0xf] %v176_v3  ;;  %179 = vst [vmem:[%s1606_s25 + $0x10] sm:$0xf] %v178_v4 }
  0x22   : > { %181 = vst [vmem:[%s1606_s25 + $0x14] sm:$0xf] %v180_v5  ;;  %v182_v6 = vld [vmem:[%s1601_s24 + $0x60] sm:$0xf]  ;;  %v184_v7 = vld [vmem:[%s1601_s24 + $0x70] sm:$0xf] }
  0x23   : > { %v186_v8 = vld [vmem:[%s1601_s24 + $0x80] sm:$0xf]  ;;  %183 = vst [vmem:[%s1606_s25 + $0x18] sm:$0xf] %v182_v6  ;;  %185 = vst [vmem:[%s1606_s25 + $0x1c] sm:$0xf] %v184_v7 }
  0x24   : > { %187 = vst [vmem:[%s1606_s25 + $0x20] sm:$0xf] %v186_v8  ;;  %v188_v9 = vld [vmem:[%s1601_s24 + $0x90] sm:$0xf]  ;;  %v190_v10 = vld [vmem:[%s1601_s24 + $0xa0] sm:$0xf] }
  0x25   : > { %v192_v11 = vld [vmem:[%s1601_s24 + $0xb0] sm:$0xf]  ;;  %189 = vst [vmem:[%s1606_s25 + $0x24] sm:$0xf] %v188_v9  ;;  %191 = vst [vmem:[%s1606_s25 + $0x28] sm:$0xf] %v190_v10 }
  0x26   : > { %193 = vst [vmem:[%s1606_s25 + $0x2c] sm:$0xf] %v192_v11  ;;  %v194_v12 = vld [vmem:[%s1601_s24 + $0xc0] sm:$0xf]  ;;  %v196_v13 = vld [vmem:[%s1601_s24 + $0xd0] sm:$0xf] }
  0x27   : > { %v198_v14 = vld [vmem:[%s1601_s24 + $0xe0] sm:$0xf]  ;;  %195 = vst [vmem:[%s1606_s25 + $0x30] sm:$0xf] %v194_v12  ;;  %197 = vst [vmem:[%s1606_s25 + $0x34] sm:$0xf] %v196_v13 }
  0x28   : > { %199 = vst [vmem:[%s1606_s25 + $0x38] sm:$0xf] %v198_v14  ;;  %v200_v15 = vld [vmem:[%s1601_s24 + $0xf0] sm:$0xf]  ;;  %v202_v16 = vld [vmem:[%s1601_s24 + $0x100] sm:$0xf] }
  0x29   : > { %v204_v17 = vld [vmem:[%s1601_s24 + $0x110] sm:$0xf]  ;;  %201 = vst [vmem:[%s1606_s25 + $0x3c] sm:$0xf] %v200_v15  ;;  %203 = vst [vmem:[%s1606_s25 + $0x40] sm:$0xf] %v202_v16 }
  0x2a   : > { %205 = vst [vmem:[%s1606_s25 + $0x44] sm:$0xf] %v204_v17  ;;  %v206_v18 = vld [vmem:[%s1601_s24 + $0x120] sm:$0xf]  ;;  %v208_v19 = vld [vmem:[%s1601_s24 + $0x130] sm:$0xf] }
  0x2b   : > { %v210_v20 = vld [vmem:[%s1601_s24 + $0x140] sm:$0xf]  ;;  %207 = vst [vmem:[%s1606_s25 + $0x48] sm:$0xf] %v206_v18  ;;  %209 = vst [vmem:[%s1606_s25 + $0x4c] sm:$0xf] %v208_v19 }
  0x2c   : > { %211 = vst [vmem:[%s1606_s25 + $0x50] sm:$0xf] %v210_v20  ;;  %v212_v21 = vld [vmem:[%s1601_s24 + $0x150] sm:$0xf]  ;;  %v214_v22 = vld [vmem:[%s1601_s24 + $0x160] sm:$0xf] }
  0x2d   : > { %v216_v23 = vld [vmem:[%s1601_s24 + $0x170] sm:$0xf]  ;;  %213 = vst [vmem:[%s1606_s25 + $0x54] sm:$0xf] %v212_v21  ;;  %215 = vst [vmem:[%s1606_s25 + $0x58] sm:$0xf] %v214_v22 }
  0x2e   : > { %217 = vst [vmem:[%s1606_s25 + $0x5c] sm:$0xf] %v216_v23  ;;  %v218_v24 = vld [vmem:[%s1601_s24 + $0x180] sm:$0xf]  ;;  %v220_v25 = vld [vmem:[%s1601_s24 + $0x190] sm:$0xf] }
  0x2f   : > { %v222_v26 = vld [vmem:[%s1601_s24 + $0x1a0] sm:$0xf]  ;;  %219 = vst [vmem:[%s1606_s25 + $0x60] sm:$0xf] %v218_v24  ;;  %221 = vst [vmem:[%s1606_s25 + $0x64] sm:$0xf] %v220_v25 }
  0x30   : > { %223 = vst [vmem:[%s1606_s25 + $0x68] sm:$0xf] %v222_v26  ;;  %v224_v27 = vld [vmem:[%s1601_s24 + $0x1b0] sm:$0xf]  ;;  %v226_v28 = vld [vmem:[%s1601_s24 + $0x1c0] sm:$0xf] }
  0x31   : > { %v228_v29 = vld [vmem:[%s1601_s24 + $0x1d0] sm:$0xf]  ;;  %225 = vst [vmem:[%s1606_s25 + $0x6c] sm:$0xf] %v224_v27  ;;  %227 = vst [vmem:[%s1606_s25 + $0x70] sm:$0xf] %v226_v28 }
  0x32   : > { %229 = vst [vmem:[%s1606_s25 + $0x74] sm:$0xf] %v228_v29  ;;  %v230_v30 = vld [vmem:[%s1601_s24 + $0x1e0] sm:$0xf]  ;;  %v232_v31 = vld [vmem:[%s1601_s24 + $0x1f0] sm:$0xf] }
  0x33   : > { %231 = vst [vmem:[%s1606_s25 + $0x78] sm:$0xf] %v230_v30  ;;  %233 = vst [vmem:[%s1606_s25 + $0x7c] sm:$0xf] %v232_v31 }
  0x34 PF: > { %p1104_p11 = scmp.ge.s32.totalorder %s1491_s20, 1  ;;  %p325_p12 = scmp.lt.s32.totalorder %s1491_s20, 37 }
  0x36   : > { %p326_p13 = pnand %p1104_p11, %p325_p12 }
  0x37   : > { %s332_s26 = sand.u32 (!%p326_p13), 1, %s1467_s14   ;;  %s354_s27 = sand.u32 (!%p326_p13), 1, %s1459_s12  }
  0x38   : > { %329 = sbr.rel (%p326_p13) target bundleno = 379 (0x17b), region = 69  ;;  %s1105_s28 = sshll.u32 (!%p326_p13), %s332_s26, 7 }
  0x39   : > { %s1106_s29 = sshll.u32 (!%p326_p13), %s354_s27, 6  ;;  %p357_p0 = scmp.lt.s32.totalorder (!%p326_p13), %s1479_s17, 3 }
  0x3a   : > { %s1681_s10 = scalar_lea.vmem (!%p326_p13), [#allocation3], %s1105_s28  ;;  %s1683_s11 = scalar_lea.vmem (!%p326_p13), [#allocation4], %s1106_s29 }
  0x3b   : > { %p1107_p1 = scmp.ne.s32.totalorder (!%p326_p13), %s1475_s16, 0 }
  0x3f   : > { %s1675_s6 = scalar_select %p357_p0, %s1479_s17, 3 }
  0x40   : > { %364 = sbr.rel (%p1107_p1) target bundleno = 73 (0x49), region = 77  ;;  %v1493_v32 = vmov (!%p1107_p1), 0.0  }
  0x41   : > { %s359_s9 = scalar_lea.vmem %s1807_s2, %s1675_s6  ;;  %365 = vst [vmem:[#allocation2] sm:$0xff] (!%p1107_p1), %v1493_v32  ;;  %366 = vst [vmem:[#allocation2 + $0x8] sm:$0xff] (!%p1107_p1), %v1493_v32 }
  0x42   : > { %367 = vst [vmem:[#allocation2 + $0x10] sm:$0xff] (!%p1107_p1), %v1493_v32  ;;  %368 = vst [vmem:[#allocation2 + $0x18] sm:$0xff] (!%p1107_p1), %v1493_v32 }
  0x43   : > { %369 = vst [vmem:[#allocation2 + $0x20] sm:$0xff] (!%p1107_p1), %v1493_v32  ;;  %370 = vst [vmem:[#allocation2 + $0x28] sm:$0xff] (!%p1107_p1), %v1493_v32 }
  0x44   : > { %371 = vst [vmem:[#allocation2 + $0x30] sm:$0xff] (!%p1107_p1), %v1493_v32  ;;  %372 = vst [vmem:[#allocation2 + $0x38] sm:$0xff] (!%p1107_p1), %v1493_v32 }
  0x45   : > { %373 = vst [vmem:[#allocation2 + $0x40] sm:$0xff] (!%p1107_p1), %v1493_v32  ;;  %374 = vst [vmem:[#allocation2 + $0x48] sm:$0xff] (!%p1107_p1), %v1493_v32 }
  0x46   : > { %375 = vst [vmem:[#allocation2 + $0x50] sm:$0xff] (!%p1107_p1), %v1493_v32  ;;  %376 = vst [vmem:[#allocation2 + $0x58] sm:$0xff] (!%p1107_p1), %v1493_v32 }
  0x47   : > { %377 = vst [vmem:[#allocation2 + $0x60] sm:$0xff] %v1493_v32  ;;  %378 = vst [vmem:[#allocation2 + $0x68] sm:$0xff] %v1493_v32 }
  0x48   : > { %379 = vst [vmem:[#allocation2 + $0x70] sm:$0xff] %v1493_v32  ;;  %380 = vst [vmem:[#allocation2 + $0x78] sm:$0xff] %v1493_v32 }
  0x49 PF: > { %v1381_v33 = vld [vmem:[%s1681_s10 + $0x40] sm:$0xff]   ;;  %v1383_v35 = vld [vmem:[%s1681_s10 + $0x48] sm:$0xff]   ;;  %v1385_v37 = vld [vmem:[%s1681_s10 + $0x50] sm:$0xff]   ;;  %s1164_s12 = sshll.u32 %s1475_s16, 7  ;;  %p1142_p2 = scmp.ne.s32.totalorder %s1475_s16, 8 }
  0x4a   : > { %v1382_v34 = vld [vmem:[%s1681_s10] sm:$0xff]   ;;  %1228 = vmatprep.subr.bf16.mxu0 %v1381_v33  ;;  %1292 = vmatprep.subr.bf16.mxu1 %v1381_v33  ;;  %v1384_v36 = vld [vmem:[%s1681_s10 + $0x8] sm:$0xff]   ;;  %v1386_v38 = vld [vmem:[%s1681_s10 + $0x10] sm:$0xff]   ;;  %s1699_s24 = scalar_lea.vmem %s1805_s0, %s1164_s12 }
  0x4b   : > { %1229 = vmatpush3.bf16.msra.mxu0 %v1382_v34  ;;  %1300 = vmatpush3.bf16.msra.mxu1 %v1382_v34  ;;  %v1387_v39 = vld [vmem:[%s1681_s10 + $0x58] sm:$0xff]   ;;  %v1389_v41 = vld [vmem:[%s1681_s10 + $0x60] sm:$0xff]   ;;  %v1391_v43 = vld [vmem:[%s1681_s10 + $0x68] sm:$0xff]  }
  0x4c   : > { %1230 = vmatprep.subr.bf16.mxu0 %v1383_v35  ;;  %1293 = vmatprep.subr.bf16.mxu1 %v1383_v35  ;;  %v1388_v40 = vld [vmem:[%s1681_s10 + $0x18] sm:$0xff]   ;;  %v1390_v42 = vld [vmem:[%s1681_s10 + $0x20] sm:$0xff]   ;;  %v1392_v46 = vld [vmem:[%s1681_s10 + $0x28] sm:$0xff]  }
  0x4d   : > { %v1399_v44 = vld [vmem:[%s1699_s24 + $0x4] ss:$8 sps:$4 sm:$0xff]   ;;  %v1393_v47 = vld [vmem:[%s1681_s10 + $0x70] sm:$0xff]   ;;  %v1395_v49 = vld [vmem:[%s1681_s10 + $0x78] sm:$0xff]  }
  0x4e   : > { %v1402_v45 = vld [vmem:[%s1699_s24 + $0x44] ss:$8 sps:$4 sm:$0xff]   ;;  %656 = vmatprep.mubr.bf16.mxu0 %v1399_v44  ;;  %v1394_v48 = vld [vmem:[%s1681_s10 + $0x30] sm:$0xff]   ;;  %v1396_v50 = vld [vmem:[%s1681_s10 + $0x38] sm:$0xff]  }
  0x4f   : > { %1231 = vmatpush3.bf16.msra.mxu0 %v1384_v36  ;;  %1301 = vmatpush3.bf16.msra.mxu1 %v1384_v36  ;;  %v1397_v51 = vld [vmem:[%s1699_s24] ss:$8 sps:$4 sm:$0xff]   ;;  %v1403_v53 = vld [vmem:[%s1699_s24 + $0x14] ss:$8 sps:$4 sm:$0xff]   ;;  %v1407_v55 = vld [vmem:[%s1699_s24 + $0x10] ss:$8 sps:$4 sm:$0xff]  }
  0x50   : > { %1232 = vmatprep.subr.bf16.mxu0 %v1385_v37  ;;  %1294 = vmatprep.subr.bf16.mxu1 %v1385_v37  ;;  %v1400_v52 = vld [vmem:[%s1699_s24 + $0x40] ss:$8 sps:$4 sm:$0xff]   ;;  %v1405_v54 = vld [vmem:[%s1699_s24 + $0x54] ss:$8 sps:$4 sm:$0xff]   ;;  %v1408_v56 = vld [vmem:[%s1699_s24 + $0x50] ss:$8 sps:$4 sm:$0xff]  }
  0x51   : > { %688 = vmatprep.mubr.bf16.mxu1 %v1402_v45  ;;  %v1409_v57 = vld [vmem:[%s1699_s24 + $0x24] ss:$8 sps:$4 sm:$0xff]   ;;  %v1413_v59 = vld [vmem:[%s1699_s24 + $0x20] ss:$8 sps:$4 sm:$0xff]   ;;  %v1415_v61 = vld [vmem:[%s1699_s24 + $0x34] ss:$8 sps:$4 sm:$0xff]  }
  0x52   : > { %v1411_v58 = vld [vmem:[%s1699_s24 + $0x64] ss:$8 sps:$4 sm:$0xff]   ;;  %v1414_v60 = vld [vmem:[%s1699_s24 + $0x60] ss:$8 sps:$4 sm:$0xff]   ;;  %v1417_v62 = vld [vmem:[%s1699_s24 + $0x74] ss:$8 sps:$4 sm:$0xff]  }
  0x53   : > { %1233 = vmatpush3.bf16.msra.mxu0 %v1386_v38  ;;  %1302 = vmatpush3.bf16.msra.mxu1 %v1386_v38  ;;  %v1419_v63 = vld [vmem:[%s1699_s24 + $0x30] ss:$8 sps:$4 sm:$0xff]   ;;  %v381_v3 = vld [vmem:[#allocation2] sm:$0xff]  ;;  %v382_v11 = vld [vmem:[#allocation2 + $0x8] sm:$0xff] }
  0x54   : > { %1234 = vmatprep.subr.bf16.mxu0 %v1387_v39  ;;  %1295 = vmatprep.subr.bf16.mxu1 %v1387_v39  ;;  %v1420_v0 = vld [vmem:[%s1699_s24 + $0x70] ss:$8 sps:$4 sm:$0xff]   ;;  %v389_v5 = vld [vmem:[#allocation2 + $0x40] sm:$0xff]  ;;  %v390_v13 = vld [vmem:[#allocation2 + $0x48] sm:$0xff] }
  0x55   : > { %v383_v23 = vld [vmem:[#allocation2 + $0x10] sm:$0xff]  ;;  %v384_v31 = vld [vmem:[#allocation2 + $0x18] sm:$0xff]  ;;  %v393_v45 = vld [vmem:[#allocation2 + $0x60] sm:$0xff] }
  0x56   : > { %v391_v25 = vld [vmem:[#allocation2 + $0x50] sm:$0xff]  ;;  %v392_v33 = vld [vmem:[#allocation2 + $0x58] sm:$0xff] }
  0x57   : > { %1235 = vmatpush3.bf16.msra.mxu0 %v1388_v40  ;;  %1303 = vmatpush3.bf16.msra.mxu1 %v1388_v40 }
  0x58   : > { %1236 = vmatprep.subr.bf16.mxu0 %v1389_v41  ;;  %1296 = vmatprep.subr.bf16.mxu1 %v1389_v41 }
  0x5b   : > { %1237 = vmatpush3.bf16.msra.mxu0 %v1390_v42  ;;  %1304 = vmatpush3.bf16.msra.mxu1 %v1390_v42 }
  0x5c   : > { %1238 = vmatprep.subr.bf16.mxu0 %v1391_v43  ;;  %1297 = vmatprep.subr.bf16.mxu1 %v1391_v43  ;;  %v385_v43 = vld [vmem:[#allocation2 + $0x20] sm:$0xff] }
  0x5f   : > { %1239 = vmatpush3.bf16.msra.mxu0 %v1392_v46  ;;  %1305 = vmatpush3.bf16.msra.mxu1 %v1392_v46 }
  0x60   : > { %1240 = vmatprep.subr.bf16.mxu0 %v1393_v47  ;;  %1298 = vmatprep.subr.bf16.mxu1 %v1393_v47 }
  0x63   : > { %1241 = vmatpush3.bf16.msra.mxu0 %v1394_v48  ;;  %1306 = vmatpush3.bf16.msra.mxu1 %v1394_v48 }
  0x64   : > { %1242 = vmatprep.subr.bf16.mxu0 %v1395_v49  ;;  %1299 = vmatprep.subr.bf16.mxu1 %v1395_v49 }
  0x67   : > { %1243 = vmatpush3.bf16.msra.mxu0 %v1396_v50  ;;  %1307 = vmatpush3.bf16.msra.mxu1 %v1396_v50 }
  0x6a   : > { %657 = vmatmul.mubr.bf16.vlgmr.msra.gmra.mrb[0].mxu0 %v1397_v51  ;;  %689 = vmatmul.mubr.bf16.vlgmr.msra.gmra.mrb[0].mxu1 %v1400_v52  ;;  %v386_v51 = vld [vmem:[#allocation2 + $0x28] sm:$0xff] }
  0x6b   : > { %664 = vmatprep.mubr.bf16.mxu0 %v1403_v53  ;;  %696 = vmatprep.mubr.bf16.mxu1 %v1405_v54  ;;  %v394_v53 = vld [vmem:[#allocation2 + $0x68] sm:$0xff] }
  0x72   : > { %665 = vmatmul.mubr.bf16.gmra.mrb[4].mxu0 %v1407_v55  ;;  %697 = vmatmul.mubr.bf16.gmra.mrb[4].mxu1 %v1408_v56 }
  0x73   : > { %672 = vmatprep.mubr.bf16.mxu0 %v1409_v57  ;;  %704 = vmatprep.mubr.bf16.mxu1 %v1411_v58 }
  0x7a   : > { %673 = vmatmul.mubr.bf16.gmra.mrb[8].mxu0 %v1413_v59  ;;  %705 = vmatmul.mubr.bf16.gmra.mrb[8].mxu1 %v1414_v60 }
  0x7b   : > { %680 = vmatprep.mubr.bf16.mxu0 %v1415_v61  ;;  %712 = vmatprep.mubr.bf16.mxu1 %v1417_v62 }
  0x82   : > { %681 = vmatmul.mubr.bf16.gmra.mrb[12].mxu0 %v1419_v63  ;;  %713 = vmatmul.mubr.bf16.gmra.mrb[12].mxu1 %v1420_v0  ;;  %v387_v63 = vld [vmem:[#allocation2 + $0x30] sm:$0xff] }
 0x13d   : > { %v1244_v1 = vpop.f32.mrb[0].mxu0  ;;  %v1268_v2 = vpop.f32.mrb[0].mxu1 }
 0x13e   : > { %v1245_v4 = vpop.f32.mrb[1].mxu0  ;;  %v1269_v6 = vpop.f32.mrb[1].mxu1 }
 0x13f   : > { %v1246_v7 = vadd.f32 %v1245_v4, %v1244_v1  ;;  %v1270_v8 = vadd.f32 %v1269_v6, %v1268_v2  ;;  %v1247_v9 = vpop.f32.mrb[2].mxu0  ;;  %v1271_v10 = vpop.f32.mrb[2].mxu1  ;;  %v395_v1 = vld [vmem:[#allocation2 + $0x70] sm:$0xff] }
 0x140   : > { %v1248_v12 = vpop.f32.mrb[3].mxu0  ;;  %v1272_v14 = vpop.f32.mrb[3].mxu1 }
 0x141   : > { %v721_v15 = vadd.f32 %v1246_v7, %v381_v3  ;;  %v729_v16 = vadd.f32 %v1270_v8, %v389_v5  ;;  %v1249_v17 = vadd.f32 %v1248_v12, %v1247_v9  ;;  %v1273_v18 = vadd.f32 %v1272_v14, %v1271_v10  ;;  %v388_v7 = vld [vmem:[#allocation2 + $0x38] sm:$0xff] }
 0x142   : > { %v396_v9 = vld [vmem:[#allocation2 + $0x78] sm:$0xff] }
 0x143   : > { %737 = vst [vmem:[#allocation2] sm:$0xff] %v721_v15  ;;  %745 = vst [vmem:[#allocation2 + $0x40] sm:$0xff] %v729_v16  ;;  %v722_v19 = vadd.f32 %v1249_v17, %v382_v11  ;;  %v730_v20 = vadd.f32 %v1273_v18, %v390_v13 }
 0x145   : > { %738 = vst [vmem:[#allocation2 + $0x8] sm:$0xff] %v722_v19  ;;  %746 = vst [vmem:[#allocation2 + $0x48] sm:$0xff] %v730_v20  ;;  %v1250_v21 = vpop.f32.mrb[4].mxu0  ;;  %v1274_v22 = vpop.f32.mrb[4].mxu1  ;;  %v1730_v19 = vld [vmem:[%s359_s9] ss:$0 sm:$0xff] (!%p1142_p2) }
 0x146   : > { %v1251_v24 = vpop.f32.mrb[5].mxu0  ;;  %v1275_v26 = vpop.f32.mrb[5].mxu1 }
 0x147   : > { %v1252_v27 = vadd.f32 %v1251_v24, %v1250_v21  ;;  %v1276_v28 = vadd.f32 %v1275_v26, %v1274_v22  ;;  %v1253_v29 = vpop.f32.mrb[6].mxu0  ;;  %v1277_v30 = vpop.f32.mrb[6].mxu1 }
 0x148   : > { %v1254_v32 = vpop.f32.mrb[7].mxu0  ;;  %v1278_v34 = vpop.f32.mrb[7].mxu1 }
 0x149   : > { %v723_v35 = vadd.f32 %v1252_v27, %v383_v23  ;;  %v731_v36 = vadd.f32 %v1276_v28, %v391_v25  ;;  %v1255_v37 = vadd.f32 %v1254_v32, %v1253_v29  ;;  %v1279_v38 = vadd.f32 %v1278_v34, %v1277_v30 }
 0x14a   : > { %v757_v17 = vld [vmem:[#allocation2] sm:$0xff] (!%p1142_p2) }
 0x14b   : > { %739 = vst [vmem:[#allocation2 + $0x10] sm:$0xff] %v723_v35  ;;  %747 = vst [vmem:[#allocation2 + $0x50] sm:$0xff] %v731_v36  ;;  %v724_v39 = vadd.f32 %v1255_v37, %v384_v31  ;;  %v732_v40 = vadd.f32 %v1279_v38, %v392_v33  ;;  %v780_v20 = vadd.f32 (!%p1142_p2), %v1730_v19, %v757_v17  ;;  %v765_v35 = vld [vmem:[#allocation2 + $0x40] sm:$0xff] (!%p1142_p2) }
 0x14c   : > { %v758_v18 = vld [vmem:[#allocation2 + $0x8] sm:$0xff] (!%p1142_p2) }
 0x14d   : > { %740 = vst [vmem:[#allocation2 + $0x18] sm:$0xff] %v724_v39  ;;  %748 = vst [vmem:[#allocation2 + $0x58] sm:$0xff] %v732_v40  ;;  %v1256_v41 = vpop.f32.mrb[8].mxu0  ;;  %v1280_v42 = vpop.f32.mrb[8].mxu1  ;;  %v781_v21 = vadd.f32 (!%p1142_p2), %v1730_v19, %v758_v18  ;;  %v796_v31 = vmul.f32 (!%p1142_p2), 0.2, %v780_v20 }
 0x14e   : > { %v1257_v44 = vpop.f32.mrb[9].mxu0  ;;  %v1281_v46 = vpop.f32.mrb[9].mxu1 }
 0x14f   : > { %v1258_v47 = vadd.f32 %v1257_v44, %v1256_v41  ;;  %v1282_v48 = vadd.f32 %v1281_v46, %v1280_v42  ;;  %v1259_v49 = vpop.f32.mrb[10].mxu0  ;;  %v1283_v50 = vpop.f32.mrb[10].mxu1  ;;  %v797_v32 = vmul.f32 (!%p1142_p2), 0.2, %v781_v21  ;;  %v812_v40 = vmax.f32 (!%p1142_p2), %v780_v20, %v796_v31  ;;  %v766_v44 = vld [vmem:[#allocation2 + $0x48] sm:$0xff] (!%p1142_p2) }
 0x150   : > { %v1260_v52 = vpop.f32.mrb[11].mxu0  ;;  %v1284_v54 = vpop.f32.mrb[11].mxu1 }
 0x151   : > { %v725_v55 = vadd.f32 %v1258_v47, %v385_v43  ;;  %v733_v56 = vadd.f32 %v1282_v48, %v393_v45  ;;  %v1261_v57 = vadd.f32 %v1260_v52, %v1259_v49  ;;  %v1285_v58 = vadd.f32 %v1284_v54, %v1283_v50 }
 0x152   : > { %v759_v22 = vld [vmem:[#allocation2 + $0x10] sm:$0xff] (!%p1142_p2)  ;;  %v813_v41 = vmax.f32 (!%p1142_p2), %v781_v21, %v797_v32 }
 0x153   : > { %741 = vst [vmem:[#allocation2 + $0x20] sm:$0xff] %v725_v55  ;;  %749 = vst [vmem:[#allocation2 + $0x60] sm:$0xff] %v733_v56  ;;  %v726_v59 = vadd.f32 %v1261_v57, %v386_v51  ;;  %v734_v60 = vadd.f32 %v1285_v58, %v394_v53  ;;  %v782_v25 = vadd.f32 (!%p1142_p2), %v1730_v19, %v759_v22  ;;  %v767_v45 = vld [vmem:[#allocation2 + $0x50] sm:$0xff] (!%p1142_p2) }
 0x154   : > { %v760_v23 = vld [vmem:[#allocation2 + $0x18] sm:$0xff] (!%p1142_p2)  ;;  %v1184_v52 = vpack.c.bf16 (!%p1142_p2), %v813_v41, %v812_v40  ;;  %v788_v55 = vadd.f32 (!%p1142_p2), %v1730_v19, %v765_v35 }
 0x155   : > { %742 = vst [vmem:[#allocation2 + $0x28] sm:$0xff] %v726_v59  ;;  %750 = vst [vmem:[#allocation2 + $0x68] sm:$0xff] %v734_v60  ;;  %v1262_v61 = vpop.f32.mrb[12].mxu0  ;;  %v1286_v62 = vpop.f32.mrb[12].mxu1  ;;  %v783_v26 = vadd.f32 (!%p1142_p2), %v1730_v19, %v760_v23  ;;  %v798_v36 = vmul.f32 (!%p1142_p2), 0.2, %v782_v25  ;;  %v789_v59 = vadd.f32 (!%p1142_p2), %v1730_v19, %v766_v44  ;;  %v790_v60 = vadd.f32 (!%p1142_p2), %v1730_v19, %v767_v45 }
 0x156   : > { %v1263_v0 = vpop.f32.mrb[13].mxu0  ;;  %v1287_v2 = vpop.f32.mrb[13].mxu1  ;;  %v768_v50 = vld [vmem:[#allocation2 + $0x58] sm:$0xff] (!%p1142_p2)  ;;  %1185 = vst [vmem:[%s1683_s11] sm:$0xff] (!%p1142_p2), %v1184_v52  }
 0x157   : > { %v1264_v3 = vadd.f32 %v1263_v0, %v1262_v61  ;;  %v1288_v4 = vadd.f32 %v1287_v2, %v1286_v62  ;;  %v1265_v5 = vpop.f32.mrb[14].mxu0  ;;  %v1289_v6 = vpop.f32.mrb[14].mxu1  ;;  %756 = sbr.rel (%p1142_p2) target bundleno = 367 (0x16f), region = 81  ;;  %v799_v37 = vmul.f32 (!%p1142_p2), 0.2, %v783_v26  ;;  %v814_v46 = vmax.f32 (!%p1142_p2), %v782_v25, %v798_v36 }
 0x158   : > { %v1266_v8 = vpop.f32.mrb[15].mxu0  ;;  %v1290_v10 = vpop.f32.mrb[15].mxu1  ;;  %v791_v0 = vadd.f32 (!%p1142_p2), %v1730_v19, %v768_v50 }
 0x159   : > { %v727_v11 = vadd.f32 %v1264_v3, %v387_v63  ;;  %v735_v12 = vadd.f32 %v1288_v4, %v395_v1  ;;  %v1267_v13 = vadd.f32 %v1266_v8, %v1265_v5  ;;  %v1291_v14 = vadd.f32 %v1290_v10, %v1289_v6 }
 0x15a   : > { %v761_v24 = vld [vmem:[#allocation2 + $0x20] sm:$0xff] (!%p1142_p2)  ;;  %v815_v47 = vmax.f32 (!%p1142_p2), %v783_v26, %v799_v37  ;;  %v804_v63 = vmul.f32 (!%p1142_p2), 0.2, %v788_v55  ;;  %v805_v4 = vmul.f32 (!%p1142_p2), 0.2, %v789_v59 }
 0x15b   : > { %743 = vst [vmem:[#allocation2 + $0x30] sm:$0xff] %v727_v11  ;;  %751 = vst [vmem:[#allocation2 + $0x70] sm:$0xff] %v735_v12  ;;  %v728_v15 = vadd.f32 %v1267_v13, %v388_v7  ;;  %v736_v16 = vadd.f32 %v1291_v14, %v396_v9  ;;  %v784_v28 = vadd.f32 (!%p1142_p2), %v1730_v19, %v761_v24  ;;  %v769_v51 = vld [vmem:[#allocation2 + $0x60] sm:$0xff] (!%p1142_p2)  ;;  %v806_v5 = vmul.f32 (!%p1142_p2), 0.2, %v790_v60 }
 0x15c   : > { %v762_v27 = vld [vmem:[#allocation2 + $0x28] sm:$0xff] (!%p1142_p2)  ;;  %v1189_v57 = vpack.c.bf16 (!%p1142_p2), %v815_v47, %v814_v46  ;;  %v792_v1 = vadd.f32 (!%p1142_p2), %v1730_v19, %v769_v51  ;;  %v820_v7 = vmax.f32 (!%p1142_p2), %v788_v55, %v804_v63  ;;  %v807_v8 = vmul.f32 (!%p1142_p2), 0.2, %v791_v0 }
 0x15d   : > { %744 = vst [vmem:[#allocation2 + $0x38] sm:$0xff] %v728_v15  ;;  %752 = vst [vmem:[#allocation2 + $0x78] sm:$0xff] %v736_v16  ;;  %v785_v33 = vadd.f32 (!%p1142_p2), %v1730_v19, %v762_v27  ;;  %v800_v38 = vmul.f32 (!%p1142_p2), 0.2, %v784_v28  ;;  %v770_v56 = vld [vmem:[#allocation2 + $0x68] sm:$0xff] (!%p1142_p2)  ;;  %v821_v11 = vmax.f32 (!%p1142_p2), %v789_v59, %v805_v4  ;;  %v822_v12 = vmax.f32 (!%p1142_p2), %v790_v60, %v806_v5 }
 0x15e   : > { %1221 = vst [vmem:[%s1683_s11 + $0x8] sm:$0xff] %v1189_v57   ;;  %v793_v6 = vadd.f32 %v1730_v19, %v770_v56  ;;  %v808_v9 = vmul.f32 0.2, %v792_v1  ;;  %v823_v15 = vmax.f32 %v791_v0, %v807_v8 }
 0x15f   : > { %v801_v42 = vmul.f32 0.2, %v785_v33  ;;  %v816_v48 = vmax.f32 %v784_v28, %v800_v38  ;;  %v1204_v18 = vpack.c.bf16 %v821_v11, %v820_v7 }
 0x160   : > { %v809_v13 = vmul.f32 0.2, %v793_v6  ;;  %v824_v16 = vmax.f32 %v792_v1, %v808_v9  ;;  %v1209_v22 = vpack.c.bf16 %v823_v15, %v822_v12 }
 0x161   : > { %v817_v53 = vmax.f32 %v785_v33, %v801_v42  ;;  %1224 = vst [vmem:[%s1683_s11 + $0x20] sm:$0xff] %v1204_v18  }
 0x162   : > { %v763_v29 = vld [vmem:[#allocation2 + $0x30] sm:$0xff]  ;;  %v825_v20 = vmax.f32 %v793_v6, %v809_v13  ;;  %1225 = vst [vmem:[%s1683_s11 + $0x28] sm:$0xff] %v1209_v22  }
 0x163   : > { %v786_v34 = vadd.f32 %v1730_v19, %v763_v29  ;;  %v771_v61 = vld [vmem:[#allocation2 + $0x70] sm:$0xff]  ;;  %v1194_v62 = vpack.c.bf16 %v817_v53, %v816_v48 }
 0x164   : > { %v764_v30 = vld [vmem:[#allocation2 + $0x38] sm:$0xff]  ;;  %v794_v10 = vadd.f32 %v1730_v19, %v771_v61  ;;  %v1214_v24 = vpack.c.bf16 %v825_v20, %v824_v16 }
 0x165   : > { %v787_v39 = vadd.f32 %v1730_v19, %v764_v30  ;;  %v802_v43 = vmul.f32 0.2, %v786_v34  ;;  %v772_v2 = vld [vmem:[#allocation2 + $0x78] sm:$0xff]  ;;  %1222 = vst [vmem:[%s1683_s11 + $0x10] sm:$0xff] %v1194_v62  }
 0x166   : > { %v795_v14 = vadd.f32 %v1730_v19, %v772_v2  ;;  %v810_v17 = vmul.f32 0.2, %v794_v10  ;;  %1226 = vst [vmem:[%s1683_s11 + $0x30] sm:$0xff] %v1214_v24  }
 0x167   : > { %v803_v49 = vmul.f32 0.2, %v787_v39  ;;  %v818_v54 = vmax.f32 %v786_v34, %v802_v43 }
 0x168   : > { %v811_v21 = vmul.f32 0.2, %v795_v14  ;;  %v826_v23 = vmax.f32 %v794_v10, %v810_v17 }
 0x169   : > { %v819_v58 = vmax.f32 %v787_v39, %v803_v49 }
 0x16a   : > { %v827_v25 = vmax.f32 %v795_v14, %v811_v21 }
 0x16b   : > { %v1199_v3 = vpack.c.bf16 %v819_v58, %v818_v54 }
 0x16c   : > { %v1219_v26 = vpack.c.bf16 %v827_v25, %v826_v23 }
 0x16d   : > { %1223 = vst [vmem:[%s1683_s11 + $0x18] sm:$0xff] %v1199_v3  }
 0x16e   : > { %1227 = vst [vmem:[%s1683_s11 + $0x38] sm:$0xff] %v1219_v26  }
 0x16f PF: > { %914 = sbr.rel (!%p1582_p9) target bundleno = 379 (0x17b), region = 85  ;;  %s1161_s16 = sshll.u32 (%p1582_p9), %s1479_s17, 2  ;;  %v932_v19 = vld [vmem:[%s1683_s11] sm:$0xf] (%p1582_p9)  ;;  %v934_v27 = vld [vmem:[%s1683_s11 + $0x4] sm:$0xf] (%p1582_p9) }
 0x170   : > { %s916_s29 = scalar_lea.vmem (%p1582_p9), %s1808_s3, %s1161_s16  ;;  %v940_v30 = vld [vmem:[%s1683_s11 + $0x10] sm:$0xf] (%p1582_p9)  ;;  %v942_v31 = vld [vmem:[%s1683_s11 + $0x14] sm:$0xf] (%p1582_p9)  ;;  %v948_v34 = vld [vmem:[%s1683_s11 + $0x20] sm:$0xf] (%p1582_p9) }
 0x171   : > { %933 = vst [vmem:[%s916_s29] sm:$0xf] (%p1582_p9), %v932_v19  ;;  %935 = vst [vmem:[%s916_s29 + $0x10] sm:$0xf] (%p1582_p9), %v934_v27  ;;  %v950_v35 = vld [vmem:[%s1683_s11 + $0x24] sm:$0xf] (%p1582_p9) }
 0x172   : > { %941 = vst [vmem:[%s916_s29 + $0x40] sm:$0xf] (%p1582_p9), %v940_v30  ;;  %943 = vst [vmem:[%s916_s29 + $0x50] sm:$0xf] (%p1582_p9), %v942_v31  ;;  %v952_v36 = vld [vmem:[%s1683_s11 + $0x28] sm:$0xf] (%p1582_p9) }
 0x173   : > { %949 = vst [vmem:[%s916_s29 + $0x80] sm:$0xf] (%p1582_p9), %v948_v34  ;;  %951 = vst [vmem:[%s916_s29 + $0x90] sm:$0xf] (%p1582_p9), %v950_v35  ;;  %v954_v37 = vld [vmem:[%s1683_s11 + $0x2c] sm:$0xf] (%p1582_p9) }
 0x174   : > { %v944_v32 = vld [vmem:[%s1683_s11 + $0x18] sm:$0xf] (%p1582_p9)  ;;  %v946_v33 = vld [vmem:[%s1683_s11 + $0x1c] sm:$0xf] (%p1582_p9)  ;;  %953 = vst [vmem:[%s916_s29 + $0xa0] sm:$0xf] (%p1582_p9), %v952_v36 }
 0x175   : > { %945 = vst [vmem:[%s916_s29 + $0x60] sm:$0xf] (%p1582_p9), %v944_v32  ;;  %947 = vst [vmem:[%s916_s29 + $0x70] sm:$0xf] (%p1582_p9), %v946_v33  ;;  %v956_v38 = vld [vmem:[%s1683_s11 + $0x30] sm:$0xf] (%p1582_p9) }
 0x176   : > { %v936_v28 = vld [vmem:[%s1683_s11 + $0x8] sm:$0xf]  ;;  %v938_v29 = vld [vmem:[%s1683_s11 + $0xc] sm:$0xf]  ;;  %v958_v39 = vld [vmem:[%s1683_s11 + $0x34] sm:$0xf] }
 0x177   : > { %937 = vst [vmem:[%s916_s29 + $0x20] sm:$0xf] %v936_v28  ;;  %939 = vst [vmem:[%s916_s29 + $0x30] sm:$0xf] %v938_v29  ;;  %v960_v40 = vld [vmem:[%s1683_s11 + $0x38] sm:$0xf] }
 0x178   : > { %955 = vst [vmem:[%s916_s29 + $0xb0] sm:$0xf] %v954_v37  ;;  %957 = vst [vmem:[%s916_s29 + $0xc0] sm:$0xf] %v956_v38  ;;  %v962_v41 = vld [vmem:[%s1683_s11 + $0x3c] sm:$0xf] }
 0x179   : > { %959 = vst [vmem:[%s916_s29 + $0xd0] sm:$0xf] %v958_v39  ;;  %961 = vst [vmem:[%s916_s29 + $0xe0] sm:$0xf] %v960_v40 }
 0x17a   : > { %963 = vst [vmem:[%s916_s29 + $0xf0] sm:$0xf] %v962_v41 }
 0x17b PF: > { %s13_s20 = sadd.s32 1, %s1491_s20   ;;  %s1811_s12 = smov %s1463_s13 }
 0x17c   : > { %p10_p3 = scmp.ge.s32.totalorder %s13_s20, 38   ;;  %s1812_s13 = smov %s1587_s4 }
 0x17d   : > { %s1813_s14 = smov %s1471_s15  ;;  %s1814_s15 = smov %s1590_s5 }
 0x17e   : > { %s1815_s16 = smov %s1483_s18  ;;  %s1816_s17 = smov %s1487_s19 }
 0x17f   : > { %s1817_s18 = smov %s1820_s21  ;;  %s1818_s19 = smov %s1824_s22 }
 0x180   :  { %12 = sbr.rel (!%p10_p3) target bundleno = 5 (0x5), region = 161 }

// kernel: dispnet_costvolume_encoder.9
= control target key start
LH: loop header
LB: loop body
LE: loop exit
PB: predicated region body
PF: predicated region fallthrough
CT: control target
= control target key end

     0   :  { %s2083_s12 = smov 0   ;;  %s2085_s13 = smov 0   ;;  %s2470_s0 = inlined_call_operand.vmem [shape: bf16[9,128,512], index: 0, kind: input, shape index: {}]   ;;  %s2471_s1 = inlined_call_operand.vmem [shape: bf16[9,512,512], index: 1, kind: input, shape index: {}]   ;;  %s2472_s2 = inlined_call_operand.vmem [shape: f32[1,512], index: 2, kind: input, shape index: {}]   ;;  %s2473_s3 = inlined_call_operand.vmem [shape: bf16[128,512], index: 3, kind: output, shape index: {}]  }
   0x1   :  { %s2087_s14 = smov 0   ;;  %s2089_s15 = smov 0  }
   0x2   :  { %s2091_s16 = smov 0   ;;  %s2093_s17 = smov 0  }
   0x3   :  { %s2095_s18 = smov 0   ;;  %s2097_s19 = smov 0  }
   0x4   :  { %s2099_s20 = smov 0  }
   0x5 LB: > { %s22_s21 = sadd.s32 1, %s2052_s18  ;;  %s25_s22 = sadd.s32 1, %s2056_s19  ;;  %s2060_s20 = sphi %s2099_s20, %s13_s20   ;;  %s2056_s19 = sphi %s2097_s19, %s2483_s19   ;;  %s2052_s18 = sphi %s2095_s18, %s2482_s18   ;;  %s2048_s17 = sphi %s2093_s17, %s2481_s17   ;;  %s2044_s16 = sphi %s2091_s16, %s2480_s16   ;;  %s2040_s15 = sphi %s2089_s15, %s2479_s15   ;;  %s2036_s14 = sphi %s2087_s14, %s2478_s14   ;;  %s2032_s13 = sphi %s2085_s13, %s2477_s13   ;;  %s2028_s12 = sphi %s2083_s12, %s2476_s12  }
   0x6   : > { %p23_p0 = scmp.ge.s32.totalorder %s22_s21, 9  ;;  %p62_p1 = scmp.ne.s32.totalorder %s2040_s15, %s2036_s14 }
   0x7   : > { %s1546_s23 = sadd.s32 4294967295, %s2060_s20   ;;  %p63_p2 = scmp.eq.s32.totalorder %s2060_s20, 0 }
   0x8   : > { %s2485_s21 = smov (%p23_p0, %s22_s21), 0  ;;  %s2487_s22 = smov (!%p23_p0, %s25_s22), %s2056_s19 }
   0x9   : > { %p27_p3 = scmp.ge.s32.totalorder %s2487_s22, 4  ;;  %s50_s24 = ssub.s32 %s2052_s18, %s2485_s21 }
   0xa   : > { %p2139_p4 = por %p63_p2, %p62_p1  ;;  %p117_p5 = scmp.ne.s32.totalorder %s2032_s13, %s2028_s12 }
   0xb   : > { %s2489_s22 = smov (%p27_p3, %s2487_s22), 0  ;;  %s55_s26 = sadd.s32 1, %s2040_s15 }
   0xc   : > { %p118_p6 = scmp.eq.s32.totalorder %s1546_s23, 35  ;;  %s51_s27 = ssub.s32 %s2056_s19, %s2489_s22 }
   0xd   : > { %s107_s28 = sadd.s32 1, %s2032_s13  ;;  %s52_s29 = sor.u32 %s51_s27, %s50_s24 }
   0xe   : > { %p105_p7 = scmp.eq.s32.totalorder %s51_s27, 0  ;;  %p53_p8 = scmp.eq.s32.totalorder %s52_s29, 0 }
   0xf   : > { %p2151_p9 = por %p118_p6, %p117_p5  ;;  %p1549_p10 = scmp.ge.s32.totalorder %s2060_s20, 36 }
  0x10   : > { %s2156_s4 = scalar_select %p105_p7, %s2032_s13, %s107_s28  }
  0x11   : > { %s2159_s5 = scalar_select %p53_p8, %s2040_s15, %s55_s26  }
  0x12   : > { %143 = sbr.rel (%p1549_p10) target bundleno = 74 (0x4a), region = 20 }
  0x19   : > { %146 = sbr.rel (!%p2139_p4) target bundleno = 74 (0x4a), region = 24  ;;  %s148_s6 = sand.u32 (%p2139_p4), 1, %s2040_s15  }
  0x1a   : > { %s1551_s7 = sshll.u32 (%p2139_p4), %s2052_s18, 8  ;;  %s1550_s8 = sshll.u32 (%p2139_p4), %s148_s6, 8 }
  0x1b   : > { %s152_s9 = sadd.s32 (%p2139_p4), %s2056_s19, %s1551_s7  ;;  %s2175_s25 = scalar_lea.vmem (%p2139_p4), [#allocation3], %s1550_s8 }
  0x1c   : > { %s1552_s10 = sshll.u32 (%p2139_p4), %s152_s9, 2 }
  0x1d   : > { %s2170_s24 = scalar_lea.vmem (%p2139_p4), %s2471_s1, %s1552_s10 }
  0x1e   : > { %v170_v0 = vld [vmem:[%s2170_s24] sm:$0xf] (%p2139_p4)  ;;  %v172_v1 = vld [vmem:[%s2170_s24 + $0x10] sm:$0xf] (%p2139_p4) }
  0x1f   : > { %v174_v2 = vld [vmem:[%s2170_s24 + $0x20] sm:$0xf] (%p2139_p4)  ;;  %171 = vst [vmem:[%s2175_s25] sm:$0xf] (%p2139_p4), %v170_v0  ;;  %173 = vst [vmem:[%s2175_s25 + $0x4] sm:$0xf] (%p2139_p4), %v172_v1 }
  0x20   : > { %175 = vst [vmem:[%s2175_s25 + $0x8] sm:$0xf] %v174_v2  ;;  %v176_v3 = vld [vmem:[%s2170_s24 + $0x30] sm:$0xf]  ;;  %v178_v4 = vld [vmem:[%s2170_s24 + $0x40] sm:$0xf] }
  0x21   : > { %v180_v5 = vld [vmem:[%s2170_s24 + $0x50] sm:$0xf]  ;;  %177 = vst [vmem:[%s2175_s25 + $0xc] sm:$0xf] %v176_v3  ;;  %179 = vst [vmem:[%s2175_s25 + $0x10] sm:$0xf] %v178_v4 }
  0x22   : > { %181 = vst [vmem:[%s2175_s25 + $0x14] sm:$0xf] %v180_v5  ;;  %v182_v6 = vld [vmem:[%s2170_s24 + $0x60] sm:$0xf]  ;;  %v184_v7 = vld [vmem:[%s2170_s24 + $0x70] sm:$0xf] }
  0x23   : > { %v186_v8 = vld [vmem:[%s2170_s24 + $0x80] sm:$0xf]  ;;  %183 = vst [vmem:[%s2175_s25 + $0x18] sm:$0xf] %v182_v6  ;;  %185 = vst [vmem:[%s2175_s25 + $0x1c] sm:$0xf] %v184_v7 }
  0x24   : > { %187 = vst [vmem:[%s2175_s25 + $0x20] sm:$0xf] %v186_v8  ;;  %v188_v9 = vld [vmem:[%s2170_s24 + $0x90] sm:$0xf]  ;;  %v190_v10 = vld [vmem:[%s2170_s24 + $0xa0] sm:$0xf] }
  0x25   : > { %v192_v11 = vld [vmem:[%s2170_s24 + $0xb0] sm:$0xf]  ;;  %189 = vst [vmem:[%s2175_s25 + $0x24] sm:$0xf] %v188_v9  ;;  %191 = vst [vmem:[%s2175_s25 + $0x28] sm:$0xf] %v190_v10 }
  0x26   : > { %193 = vst [vmem:[%s2175_s25 + $0x2c] sm:$0xf] %v192_v11  ;;  %v194_v12 = vld [vmem:[%s2170_s24 + $0xc0] sm:$0xf]  ;;  %v196_v13 = vld [vmem:[%s2170_s24 + $0xd0] sm:$0xf] }
  0x27   : > { %v198_v14 = vld [vmem:[%s2170_s24 + $0xe0] sm:$0xf]  ;;  %195 = vst [vmem:[%s2175_s25 + $0x30] sm:$0xf] %v194_v12  ;;  %197 = vst [vmem:[%s2175_s25 + $0x34] sm:$0xf] %v196_v13 }
  0x28   : > { %199 = vst [vmem:[%s2175_s25 + $0x38] sm:$0xf] %v198_v14  ;;  %v200_v15 = vld [vmem:[%s2170_s24 + $0xf0] sm:$0xf]  ;;  %v202_v16 = vld [vmem:[%s2170_s24 + $0x100] sm:$0xf] }
  0x29   : > { %v204_v17 = vld [vmem:[%s2170_s24 + $0x110] sm:$0xf]  ;;  %201 = vst [vmem:[%s2175_s25 + $0x3c] sm:$0xf] %v200_v15  ;;  %203 = vst [vmem:[%s2175_s25 + $0x40] sm:$0xf] %v202_v16 }
  0x2a   : > { %205 = vst [vmem:[%s2175_s25 + $0x44] sm:$0xf] %v204_v17  ;;  %v206_v18 = vld [vmem:[%s2170_s24 + $0x120] sm:$0xf]  ;;  %v208_v19 = vld [vmem:[%s2170_s24 + $0x130] sm:$0xf] }
  0x2b   : > { %v210_v20 = vld [vmem:[%s2170_s24 + $0x140] sm:$0xf]  ;;  %207 = vst [vmem:[%s2175_s25 + $0x48] sm:$0xf] %v206_v18  ;;  %209 = vst [vmem:[%s2175_s25 + $0x4c] sm:$0xf] %v208_v19 }
  0x2c   : > { %211 = vst [vmem:[%s2175_s25 + $0x50] sm:$0xf] %v210_v20  ;;  %v212_v21 = vld [vmem:[%s2170_s24 + $0x150] sm:$0xf]  ;;  %v214_v22 = vld [vmem:[%s2170_s24 + $0x160] sm:$0xf] }
  0x2d   : > { %v216_v23 = vld [vmem:[%s2170_s24 + $0x170] sm:$0xf]  ;;  %213 = vst [vmem:[%s2175_s25 + $0x54] sm:$0xf] %v212_v21  ;;  %215 = vst [vmem:[%s2175_s25 + $0x58] sm:$0xf] %v214_v22 }
  0x2e   : > { %217 = vst [vmem:[%s2175_s25 + $0x5c] sm:$0xf] %v216_v23  ;;  %v218_v24 = vld [vmem:[%s2170_s24 + $0x180] sm:$0xf]  ;;  %v220_v25 = vld [vmem:[%s2170_s24 + $0x190] sm:$0xf] }
  0x2f   : > { %v222_v26 = vld [vmem:[%s2170_s24 + $0x1a0] sm:$0xf]  ;;  %219 = vst [vmem:[%s2175_s25 + $0x60] sm:$0xf] %v218_v24  ;;  %221 = vst [vmem:[%s2175_s25 + $0x64] sm:$0xf] %v220_v25 }
  0x30   : > { %223 = vst [vmem:[%s2175_s25 + $0x68] sm:$0xf] %v222_v26  ;;  %v224_v27 = vld [vmem:[%s2170_s24 + $0x1b0] sm:$0xf]  ;;  %v226_v28 = vld [vmem:[%s2170_s24 + $0x1c0] sm:$0xf] }
  0x31   : > { %v228_v29 = vld [vmem:[%s2170_s24 + $0x1d0] sm:$0xf]  ;;  %225 = vst [vmem:[%s2175_s25 + $0x6c] sm:$0xf] %v224_v27  ;;  %227 = vst [vmem:[%s2175_s25 + $0x70] sm:$0xf] %v226_v28 }
  0x32   : > { %229 = vst [vmem:[%s2175_s25 + $0x74] sm:$0xf] %v228_v29  ;;  %v230_v30 = vld [vmem:[%s2170_s24 + $0x1e0] sm:$0xf]  ;;  %v232_v31 = vld [vmem:[%s2170_s24 + $0x1f0] sm:$0xf] }
  0x33   : > { %v234_v32 = vld [vmem:[%s2170_s24 + $0x200] sm:$0xf]  ;;  %231 = vst [vmem:[%s2175_s25 + $0x78] sm:$0xf] %v230_v30  ;;  %233 = vst [vmem:[%s2175_s25 + $0x7c] sm:$0xf] %v232_v31 }
  0x34   : > { %235 = vst [vmem:[%s2175_s25 + $0x80] sm:$0xf] %v234_v32  ;;  %v236_v33 = vld [vmem:[%s2170_s24 + $0x210] sm:$0xf]  ;;  %v238_v34 = vld [vmem:[%s2170_s24 + $0x220] sm:$0xf] }
  0x35   : > { %v240_v35 = vld [vmem:[%s2170_s24 + $0x230] sm:$0xf]  ;;  %237 = vst [vmem:[%s2175_s25 + $0x84] sm:$0xf] %v236_v33  ;;  %239 = vst [vmem:[%s2175_s25 + $0x88] sm:$0xf] %v238_v34 }
  0x36   : > { %241 = vst [vmem:[%s2175_s25 + $0x8c] sm:$0xf] %v240_v35  ;;  %v242_v36 = vld [vmem:[%s2170_s24 + $0x240] sm:$0xf]  ;;  %v244_v37 = vld [vmem:[%s2170_s24 + $0x250] sm:$0xf] }
  0x37   : > { %v246_v38 = vld [vmem:[%s2170_s24 + $0x260] sm:$0xf]  ;;  %243 = vst [vmem:[%s2175_s25 + $0x90] sm:$0xf] %v242_v36  ;;  %245 = vst [vmem:[%s2175_s25 + $0x94] sm:$0xf] %v244_v37 }
  0x38   : > { %247 = vst [vmem:[%s2175_s25 + $0x98] sm:$0xf] %v246_v38  ;;  %v248_v39 = vld [vmem:[%s2170_s24 + $0x270] sm:$0xf]  ;;  %v250_v40 = vld [vmem:[%s2170_s24 + $0x280] sm:$0xf] }
  0x39   : > { %v252_v41 = vld [vmem:[%s2170_s24 + $0x290] sm:$0xf]  ;;  %249 = vst [vmem:[%s2175_s25 + $0x9c] sm:$0xf] %v248_v39  ;;  %251 = vst [vmem:[%s2175_s25 + $0xa0] sm:$0xf] %v250_v40 }
  0x3a   : > { %253 = vst [vmem:[%s2175_s25 + $0xa4] sm:$0xf] %v252_v41  ;;  %v254_v42 = vld [vmem:[%s2170_s24 + $0x2a0] sm:$0xf]  ;;  %v256_v43 = vld [vmem:[%s2170_s24 + $0x2b0] sm:$0xf] }
  0x3b   : > { %v258_v44 = vld [vmem:[%s2170_s24 + $0x2c0] sm:$0xf]  ;;  %255 = vst [vmem:[%s2175_s25 + $0xa8] sm:$0xf] %v254_v42  ;;  %257 = vst [vmem:[%s2175_s25 + $0xac] sm:$0xf] %v256_v43 }
  0x3c   : > { %259 = vst [vmem:[%s2175_s25 + $0xb0] sm:$0xf] %v258_v44  ;;  %v260_v45 = vld [vmem:[%s2170_s24 + $0x2d0] sm:$0xf]  ;;  %v262_v46 = vld [vmem:[%s2170_s24 + $0x2e0] sm:$0xf] }
  0x3d   : > { %v264_v47 = vld [vmem:[%s2170_s24 + $0x2f0] sm:$0xf]  ;;  %261 = vst [vmem:[%s2175_s25 + $0xb4] sm:$0xf] %v260_v45  ;;  %263 = vst [vmem:[%s2175_s25 + $0xb8] sm:$0xf] %v262_v46 }
  0x3e   : > { %265 = vst [vmem:[%s2175_s25 + $0xbc] sm:$0xf] %v264_v47  ;;  %v266_v48 = vld [vmem:[%s2170_s24 + $0x300] sm:$0xf]  ;;  %v268_v49 = vld [vmem:[%s2170_s24 + $0x310] sm:$0xf] }
  0x3f   : > { %v270_v50 = vld [vmem:[%s2170_s24 + $0x320] sm:$0xf]  ;;  %267 = vst [vmem:[%s2175_s25 + $0xc0] sm:$0xf] %v266_v48  ;;  %269 = vst [vmem:[%s2175_s25 + $0xc4] sm:$0xf] %v268_v49 }
  0x40   : > { %271 = vst [vmem:[%s2175_s25 + $0xc8] sm:$0xf] %v270_v50  ;;  %v272_v51 = vld [vmem:[%s2170_s24 + $0x330] sm:$0xf]  ;;  %v274_v52 = vld [vmem:[%s2170_s24 + $0x340] sm:$0xf] }
  0x41   : > { %v276_v53 = vld [vmem:[%s2170_s24 + $0x350] sm:$0xf]  ;;  %273 = vst [vmem:[%s2175_s25 + $0xcc] sm:$0xf] %v272_v51  ;;  %275 = vst [vmem:[%s2175_s25 + $0xd0] sm:$0xf] %v274_v52 }
  0x42   : > { %277 = vst [vmem:[%s2175_s25 + $0xd4] sm:$0xf] %v276_v53  ;;  %v278_v54 = vld [vmem:[%s2170_s24 + $0x360] sm:$0xf]  ;;  %v280_v55 = vld [vmem:[%s2170_s24 + $0x370] sm:$0xf] }
  0x43   : > { %v282_v56 = vld [vmem:[%s2170_s24 + $0x380] sm:$0xf]  ;;  %279 = vst [vmem:[%s2175_s25 + $0xd8] sm:$0xf] %v278_v54  ;;  %281 = vst [vmem:[%s2175_s25 + $0xdc] sm:$0xf] %v280_v55 }
  0x44   : > { %283 = vst [vmem:[%s2175_s25 + $0xe0] sm:$0xf] %v282_v56  ;;  %v284_v57 = vld [vmem:[%s2170_s24 + $0x390] sm:$0xf]  ;;  %v286_v58 = vld [vmem:[%s2170_s24 + $0x3a0] sm:$0xf] }
  0x45   : > { %v288_v59 = vld [vmem:[%s2170_s24 + $0x3b0] sm:$0xf]  ;;  %285 = vst [vmem:[%s2175_s25 + $0xe4] sm:$0xf] %v284_v57  ;;  %287 = vst [vmem:[%s2175_s25 + $0xe8] sm:$0xf] %v286_v58 }
  0x46   : > { %289 = vst [vmem:[%s2175_s25 + $0xec] sm:$0xf] %v288_v59  ;;  %v290_v60 = vld [vmem:[%s2170_s24 + $0x3c0] sm:$0xf]  ;;  %v292_v61 = vld [vmem:[%s2170_s24 + $0x3d0] sm:$0xf] }
  0x47   : > { %v294_v62 = vld [vmem:[%s2170_s24 + $0x3e0] sm:$0xf]  ;;  %291 = vst [vmem:[%s2175_s25 + $0xf0] sm:$0xf] %v290_v60  ;;  %293 = vst [vmem:[%s2175_s25 + $0xf4] sm:$0xf] %v292_v61 }
  0x48   : > { %295 = vst [vmem:[%s2175_s25 + $0xf8] sm:$0xf] %v294_v62  ;;  %v296_v63 = vld [vmem:[%s2170_s24 + $0x3f0] sm:$0xf] }
  0x49   : > { %297 = vst [vmem:[%s2175_s25 + $0xfc] sm:$0xf] %v296_v63 }
  0x4a PF: > { %p1553_p11 = scmp.ge.s32.totalorder %s2060_s20, 1  ;;  %p453_p12 = scmp.lt.s32.totalorder %s2060_s20, 37 }
  0x4c   : > { %p454_p13 = pnand %p1553_p11, %p453_p12 }
  0x4d   : > { %s460_s26 = sand.u32 (!%p454_p13), 1, %s2036_s14   ;;  %s482_s27 = sand.u32 (!%p454_p13), 1, %s2028_s12  }
  0x4e   : > { %457 = sbr.rel (%p454_p13) target bundleno = 436 (0x1b4), region = 69  ;;  %s1554_s28 = sshll.u32 (!%p454_p13), %s460_s26, 8 }
  0x4f   : > { %s1555_s29 = sshll.u32 (!%p454_p13), %s482_s27, 6  ;;  %p485_p0 = scmp.lt.s32.totalorder (!%p454_p13), %s2048_s17, 3 }
  0x50   : > { %s2314_s10 = scalar_lea.vmem (!%p454_p13), [#allocation3], %s1554_s28  ;;  %s2316_s11 = scalar_lea.vmem (!%p454_p13), [#allocation4], %s1555_s29 }
  0x51   : > { %p1556_p1 = scmp.ne.s32.totalorder (!%p454_p13), %s2044_s16, 0 }
  0x55   : > { %s2308_s6 = scalar_select %p485_p0, %s2048_s17, 3 }
  0x56   : > { %492 = sbr.rel (%p1556_p1) target bundleno = 95 (0x5f), region = 77  ;;  %v2062_v0 = vmov (!%p1556_p1), 0.0  }
  0x57   : > { %s487_s9 = scalar_lea.vmem %s2472_s2, %s2308_s6  ;;  %493 = vst [vmem:[#allocation2] sm:$0xff] (!%p1556_p1), %v2062_v0  ;;  %494 = vst [vmem:[#allocation2 + $0x8] sm:$0xff] (!%p1556_p1), %v2062_v0 }
  0x58   : > { %495 = vst [vmem:[#allocation2 + $0x10] sm:$0xff] (!%p1556_p1), %v2062_v0  ;;  %496 = vst [vmem:[#allocation2 + $0x18] sm:$0xff] (!%p1556_p1), %v2062_v0 }
  0x59   : > { %497 = vst [vmem:[#allocation2 + $0x20] sm:$0xff] (!%p1556_p1), %v2062_v0  ;;  %498 = vst [vmem:[#allocation2 + $0x28] sm:$0xff] (!%p1556_p1), %v2062_v0 }
  0x5a   : > { %499 = vst [vmem:[#allocation2 + $0x30] sm:$0xff] (!%p1556_p1), %v2062_v0  ;;  %500 = vst [vmem:[#allocation2 + $0x38] sm:$0xff] (!%p1556_p1), %v2062_v0 }
  0x5b   : > { %501 = vst [vmem:[#allocation2 + $0x40] sm:$0xff] (!%p1556_p1), %v2062_v0  ;;  %502 = vst [vmem:[#allocation2 + $0x48] sm:$0xff] (!%p1556_p1), %v2062_v0 }
  0x5c   : > { %503 = vst [vmem:[#allocation2 + $0x50] sm:$0xff] (!%p1556_p1), %v2062_v0  ;;  %504 = vst [vmem:[#allocation2 + $0x58] sm:$0xff] (!%p1556_p1), %v2062_v0 }
  0x5d   : > { %505 = vst [vmem:[#allocation2 + $0x60] sm:$0xff] %v2062_v0  ;;  %506 = vst [vmem:[#allocation2 + $0x68] sm:$0xff] %v2062_v0 }
  0x5e   : > { %507 = vst [vmem:[#allocation2 + $0x70] sm:$0xff] %v2062_v0  ;;  %508 = vst [vmem:[#allocation2 + $0x78] sm:$0xff] %v2062_v0 }
  0x5f PF: > { %v1910_v1 = vld [vmem:[%s2314_s10 + $0x40] sm:$0xff]   ;;  %v1914_v5 = vld [vmem:[%s2314_s10 + $0x48] sm:$0xff]   ;;  %v1918_v9 = vld [vmem:[%s2314_s10 + $0x50] sm:$0xff]   ;;  %s1645_s12 = sshll.u32 %s2044_s16, 8  ;;  %p1623_p2 = scmp.ne.s32.totalorder %s2044_s16, 8 }
  0x60   : > { %v1911_v2 = vld [vmem:[%s2314_s10 + $0xc0] sm:$0xff]   ;;  %1709 = vmatprep.subr.bf16.mxu0 %v1910_v1  ;;  %v1915_v6 = vld [vmem:[%s2314_s10 + $0xc8] sm:$0xff]   ;;  %v1919_v10 = vld [vmem:[%s2314_s10 + $0xd0] sm:$0xff]   ;;  %s2353_s24 = scalar_lea.vmem %s2470_s0, %s1645_s12 }
  0x61   : > { %v1912_v3 = vld [vmem:[%s2314_s10] sm:$0xff]   ;;  %1773 = vmatprep.subr.bf16.mxu1 %v1911_v2  ;;  %v1916_v7 = vld [vmem:[%s2314_s10 + $0x8] sm:$0xff]   ;;  %v1920_v11 = vld [vmem:[%s2314_s10 + $0x10] sm:$0xff]  }
  0x62   : > { %v1913_v4 = vld [vmem:[%s2314_s10 + $0x80] sm:$0xff]   ;;  %1710 = vmatpush3.bf16.msra.mxu0 %v1912_v3  ;;  %v1917_v8 = vld [vmem:[%s2314_s10 + $0x88] sm:$0xff]   ;;  %v1921_v12 = vld [vmem:[%s2314_s10 + $0x90] sm:$0xff]  }
  0x63   : > { %1774 = vmatpush3.bf16.msra.mxu1 %v1913_v4  ;;  %1711 = vmatprep.subr.bf16.mxu0 %v1914_v5  ;;  %v1922_v13 = vld [vmem:[%s2314_s10 + $0x58] sm:$0xff]   ;;  %v1926_v17 = vld [vmem:[%s2314_s10 + $0x60] sm:$0xff]   ;;  %v1930_v21 = vld [vmem:[%s2314_s10 + $0x68] sm:$0xff]  }
  0x64   : > { %1775 = vmatprep.subr.bf16.mxu1 %v1915_v6  ;;  %v1923_v14 = vld [vmem:[%s2314_s10 + $0xd8] sm:$0xff]   ;;  %v1927_v18 = vld [vmem:[%s2314_s10 + $0xe0] sm:$0xff]   ;;  %v1931_v22 = vld [vmem:[%s2314_s10 + $0xe8] sm:$0xff]  }
  0x65   : > { %v1924_v15 = vld [vmem:[%s2314_s10 + $0x18] sm:$0xff]   ;;  %v1928_v19 = vld [vmem:[%s2314_s10 + $0x20] sm:$0xff]   ;;  %v1932_v23 = vld [vmem:[%s2314_s10 + $0x28] sm:$0xff]  }
  0x66   : > { %1712 = vmatpush3.bf16.msra.mxu0 %v1916_v7  ;;  %v1925_v16 = vld [vmem:[%s2314_s10 + $0x98] sm:$0xff]   ;;  %v1929_v20 = vld [vmem:[%s2314_s10 + $0xa0] sm:$0xff]   ;;  %v1933_v24 = vld [vmem:[%s2314_s10 + $0xa8] sm:$0xff]  }
  0x67   : > { %1776 = vmatpush3.bf16.msra.mxu1 %v1917_v8  ;;  %1713 = vmatprep.subr.bf16.mxu0 %v1918_v9  ;;  %v1934_v25 = vld [vmem:[%s2314_s10 + $0x70] sm:$0xff]   ;;  %v1938_v29 = vld [vmem:[%s2314_s10 + $0x78] sm:$0xff]  }
  0x68   : > { %1777 = vmatprep.subr.bf16.mxu1 %v1919_v10  ;;  %v1935_v26 = vld [vmem:[%s2314_s10 + $0xf0] sm:$0xff]   ;;  %v1939_v30 = vld [vmem:[%s2314_s10 + $0xf8] sm:$0xff]   ;;  %v509_v10 = vld [vmem:[#allocation2] sm:$0xff] }
  0x69   : > { %v1936_v27 = vld [vmem:[%s2314_s10 + $0x30] sm:$0xff]   ;;  %v1940_v31 = vld [vmem:[%s2314_s10 + $0x38] sm:$0xff]  }
  0x6a   : > { %1714 = vmatpush3.bf16.msra.mxu0 %v1920_v11  ;;  %v1937_v28 = vld [vmem:[%s2314_s10 + $0xb0] sm:$0xff]   ;;  %v1941_v32 = vld [vmem:[%s2314_s10 + $0xb8] sm:$0xff]  }
  0x6b   : > { %1778 = vmatpush3.bf16.msra.mxu1 %v1921_v12  ;;  %1715 = vmatprep.subr.bf16.mxu0 %v1922_v13  ;;  %v1942_v33 = vld [vmem:[%s2353_s24] ss:$16 sps:$4 sm:$0xff]   ;;  %v1944_v34 = vld [vmem:[%s2353_s24 + $0x4] ss:$16 sps:$4 sm:$0xff]   ;;  %v1945_v35 = vld [vmem:[%s2353_s24 + $0x8] ss:$16 sps:$4 sm:$0xff]  }
  0x6c   : > { %1779 = vmatprep.subr.bf16.mxu1 %v1923_v14  ;;  %v1947_v36 = vld [vmem:[%s2353_s24 + $0xc] ss:$16 sps:$4 sm:$0xff]   ;;  %1008 = vmatprep.mubr.bf16.mxu0 %v1944_v34  ;;  %v1948_v37 = vld [vmem:[%s2353_s24 + $0x24] ss:$16 sps:$4 sm:$0xff]   ;;  %v1952_v39 = vld [vmem:[%s2353_s24 + $0x20] ss:$16 sps:$4 sm:$0xff]  }
  0x6d   : > { %1105 = vmatprep.mubr.bf16.mxu1 %v1947_v36  ;;  %v1950_v38 = vld [vmem:[%s2353_s24 + $0x2c] ss:$16 sps:$4 sm:$0xff]   ;;  %v1953_v40 = vld [vmem:[%s2353_s24 + $0x28] ss:$16 sps:$4 sm:$0xff]   ;;  %v1954_v41 = vld [vmem:[%s2353_s24 + $0x44] ss:$16 sps:$4 sm:$0xff]  }
  0x6e   : > { %1716 = vmatpush3.bf16.msra.mxu0 %v1924_v15  ;;  %v1956_v42 = vld [vmem:[%s2353_s24 + $0x4c] ss:$16 sps:$4 sm:$0xff]   ;;  %v1958_v43 = vld [vmem:[%s2353_s24 + $0x40] ss:$16 sps:$4 sm:$0xff]   ;;  %v1959_v44 = vld [vmem:[%s2353_s24 + $0x48] ss:$16 sps:$4 sm:$0xff]  }
  0x6f   : > { %1780 = vmatpush3.bf16.msra.mxu1 %v1925_v16  ;;  %1717 = vmatprep.subr.bf16.mxu0 %v1926_v17  ;;  %v1960_v45 = vld [vmem:[%s2353_s24 + $0x64] ss:$16 sps:$4 sm:$0xff]   ;;  %v1962_v46 = vld [vmem:[%s2353_s24 + $0x6c] ss:$16 sps:$4 sm:$0xff]   ;;  %v1964_v47 = vld [vmem:[%s2353_s24 + $0x60] ss:$16 sps:$4 sm:$0xff]  }
  0x70   : > { %1781 = vmatprep.subr.bf16.mxu1 %v1927_v18  ;;  %v1965_v48 = vld [vmem:[%s2353_s24 + $0x68] ss:$16 sps:$4 sm:$0xff]   ;;  %v1966_v49 = vld [vmem:[%s2353_s24 + $0x84] ss:$16 sps:$4 sm:$0xff]   ;;  %v1968_v50 = vld [vmem:[%s2353_s24 + $0x8c] ss:$16 sps:$4 sm:$0xff]  }
  0x71   : > { %v1970_v51 = vld [vmem:[%s2353_s24 + $0x80] ss:$16 sps:$4 sm:$0xff]   ;;  %v1971_v52 = vld [vmem:[%s2353_s24 + $0x88] ss:$16 sps:$4 sm:$0xff]   ;;  %v1972_v53 = vld [vmem:[%s2353_s24 + $0xa4] ss:$16 sps:$4 sm:$0xff]  }
  0x72   : > { %1718 = vmatpush3.bf16.msra.mxu0 %v1928_v19  ;;  %v1974_v54 = vld [vmem:[%s2353_s24 + $0xac] ss:$16 sps:$4 sm:$0xff]   ;;  %v1976_v55 = vld [vmem:[%s2353_s24 + $0xa0] ss:$16 sps:$4 sm:$0xff]   ;;  %v1977_v56 = vld [vmem:[%s2353_s24 + $0xa8] ss:$16 sps:$4 sm:$0xff]  }
  0x73   : > { %1782 = vmatpush3.bf16.msra.mxu1 %v1929_v20  ;;  %1719 = vmatprep.subr.bf16.mxu0 %v1930_v21  ;;  %v1978_v57 = vld [vmem:[%s2353_s24 + $0xc4] ss:$16 sps:$4 sm:$0xff]   ;;  %v1980_v58 = vld [vmem:[%s2353_s24 + $0xcc] ss:$16 sps:$4 sm:$0xff]   ;;  %v1982_v59 = vld [vmem:[%s2353_s24 + $0xc0] ss:$16 sps:$4 sm:$0xff]  }
  0x74   : > { %1783 = vmatprep.subr.bf16.mxu1 %v1931_v22  ;;  %v1983_v60 = vld [vmem:[%s2353_s24 + $0xc8] ss:$16 sps:$4 sm:$0xff]   ;;  %v1984_v61 = vld [vmem:[%s2353_s24 + $0xe4] ss:$16 sps:$4 sm:$0xff]   ;;  %v1986_v62 = vld [vmem:[%s2353_s24 + $0xec] ss:$16 sps:$4 sm:$0xff]  }
  0x75   : > { %v1988_v63 = vld [vmem:[%s2353_s24 + $0xe0] ss:$16 sps:$4 sm:$0xff]   ;;  %v1989_v0 = vld [vmem:[%s2353_s24 + $0xe8] ss:$16 sps:$4 sm:$0xff]  }
  0x76   : > { %1720 = vmatpush3.bf16.msra.mxu0 %v1932_v23  ;;  %v510_v15 = vld [vmem:[#allocation2 + $0x8] sm:$0xff] }
  0x77   : > { %1784 = vmatpush3.bf16.msra.mxu1 %v1933_v24  ;;  %1721 = vmatprep.subr.bf16.mxu0 %v1934_v25 }
  0x78   : > { %1785 = vmatprep.subr.bf16.mxu1 %v1935_v26 }
  0x7a   : > { %1722 = vmatpush3.bf16.msra.mxu0 %v1936_v27 }
  0x7b   : > { %1786 = vmatpush3.bf16.msra.mxu1 %v1937_v28  ;;  %1723 = vmatprep.subr.bf16.mxu0 %v1938_v29  ;;  %v511_v28 = vld [vmem:[#allocation2 + $0x10] sm:$0xff] }
  0x7c   : > { %1787 = vmatprep.subr.bf16.mxu1 %v1939_v30 }
  0x7e   : > { %1724 = vmatpush3.bf16.msra.mxu0 %v1940_v31 }
  0x7f   : > { %1788 = vmatpush3.bf16.msra.mxu1 %v1941_v32 }
  0x81   : > { %1009 = vmatmul.mubr.bf16.vlgmr.msra.gmra.mrb[0].mxu0 %v1942_v33  ;;  %v512_v33 = vld [vmem:[#allocation2 + $0x18] sm:$0xff] }
  0x82   : > { %1106 = vmatmul.mubr.bf16.vlgmr.msra.gmra.mrb[0].mxu1 %v1945_v35  ;;  %1016 = vmatprep.mubr.bf16.mxu0 %v1948_v37 }
  0x83   : > { %1113 = vmatprep.mubr.bf16.mxu1 %v1950_v38 }
  0x89   : > { %1017 = vmatmul.mubr.bf16.gmra.mrb[4].mxu0 %v1952_v39 }
  0x8a   : > { %1114 = vmatmul.mubr.bf16.gmra.mrb[4].mxu1 %v1953_v40  ;;  %1024 = vmatprep.mubr.bf16.mxu0 %v1954_v41 }
  0x8b   : > { %1121 = vmatprep.mubr.bf16.mxu1 %v1956_v42 }
  0x91   : > { %1025 = vmatmul.mubr.bf16.gmra.mrb[8].mxu0 %v1958_v43 }
  0x92   : > { %1122 = vmatmul.mubr.bf16.gmra.mrb[8].mxu1 %v1959_v44  ;;  %1032 = vmatprep.mubr.bf16.mxu0 %v1960_v45 }
  0x93   : > { %1129 = vmatprep.mubr.bf16.mxu1 %v1962_v46  ;;  %v513_v46 = vld [vmem:[#allocation2 + $0x20] sm:$0xff] }
  0x99   : > { %1033 = vmatmul.mubr.bf16.gmra.mrb[12].mxu0 %v1964_v47 }
  0x9a   : > { %1130 = vmatmul.mubr.bf16.gmra.mrb[12].mxu1 %v1965_v48  ;;  %1040 = vmatprep.mubr.bf16.mxu0 %v1966_v49 }
  0x9b   : > { %1137 = vmatprep.mubr.bf16.mxu1 %v1968_v50 }
  0xa1   : > { %1041 = vmatmul.mubr.bf16.gmra.mrb[16].mxu0 %v1970_v51  ;;  %v514_v51 = vld [vmem:[#allocation2 + $0x28] sm:$0xff] }
  0xa2   : > { %1138 = vmatmul.mubr.bf16.gmra.mrb[16].mxu1 %v1971_v52  ;;  %1048 = vmatprep.mubr.bf16.mxu0 %v1972_v53 }
  0xa3   : > { %1145 = vmatprep.mubr.bf16.mxu1 %v1974_v54 }
  0xa9   : > { %1049 = vmatmul.mubr.bf16.gmra.mrb[20].mxu0 %v1976_v55 }
  0xaa   : > { %1146 = vmatmul.mubr.bf16.gmra.mrb[20].mxu1 %v1977_v56  ;;  %1056 = vmatprep.mubr.bf16.mxu0 %v1978_v57 }
  0xab   : > { %1153 = vmatprep.mubr.bf16.mxu1 %v1980_v58 }
  0xb1   : > { %1057 = vmatmul.mubr.bf16.gmra.mrb[24].mxu0 %v1982_v59 }
  0xb2   : > { %1154 = vmatmul.mubr.bf16.gmra.mrb[24].mxu1 %v1983_v60  ;;  %1064 = vmatprep.mubr.bf16.mxu0 %v1984_v61 }
  0xb3   : > { %1161 = vmatprep.mubr.bf16.mxu1 %v1986_v62 }
  0xb9   : > { %1065 = vmatmul.mubr.bf16.gmra.mrb[28].mxu0 %v1988_v63 }
  0xba   : > { %1162 = vmatmul.mubr.bf16.gmra.mrb[28].mxu1 %v1989_v0  ;;  %v515_v0 = vld [vmem:[#allocation2 + $0x30] sm:$0xff] }
 0x154   : > { %v1725_v1 = vpop.f32.mrb[0].mxu0 }
 0x155   : > { %v1789_v2 = vpop.f32.mrb[0].mxu1  ;;  %v1726_v3 = vpop.f32.mrb[1].mxu0 }
 0x156   : > { %v1727_v4 = vadd.f32 %v1726_v3, %v1725_v1  ;;  %v1790_v5 = vpop.f32.mrb[1].mxu1  ;;  %v1728_v6 = vpop.f32.mrb[2].mxu0 }
 0x157   : > { %v1791_v7 = vadd.f32 %v1790_v5, %v1789_v2  ;;  %v1792_v8 = vpop.f32.mrb[2].mxu1  ;;  %v1729_v9 = vpop.f32.mrb[3].mxu0  ;;  %v516_v5 = vld [vmem:[#allocation2 + $0x38] sm:$0xff] }
 0x158   : > { %v1730_v11 = vadd.f32 %v1729_v9, %v1728_v6  ;;  %v1793_v12 = vpop.f32.mrb[3].mxu1 }
 0x159   : > { %v1108_v13 = vadd.f32 %v1791_v7, %v1727_v4  ;;  %v1794_v14 = vadd.f32 %v1793_v12, %v1792_v8 }
 0x15b   : > { %v1170_v16 = vadd.f32 %v1108_v13, %v509_v10  ;;  %v1111_v17 = vadd.f32 %v1794_v14, %v1730_v11 }
 0x15c   : > { %v1731_v18 = vpop.f32.mrb[4].mxu0 }
 0x15d   : > { %1186 = vst [vmem:[#allocation2] sm:$0xff] %v1170_v16  ;;  %v1171_v19 = vadd.f32 %v1111_v17, %v510_v15  ;;  %v1795_v20 = vpop.f32.mrb[4].mxu1  ;;  %v1732_v21 = vpop.f32.mrb[5].mxu0 }
 0x15e   : > { %v1733_v22 = vadd.f32 %v1732_v21, %v1731_v18  ;;  %v1796_v23 = vpop.f32.mrb[5].mxu1  ;;  %v1734_v24 = vpop.f32.mrb[6].mxu0  ;;  %v517_v18 = vld [vmem:[#allocation2 + $0x40] sm:$0xff] }
 0x15f   : > { %1187 = vst [vmem:[#allocation2 + $0x8] sm:$0xff] %v1171_v19  ;;  %v1797_v25 = vadd.f32 %v1796_v23, %v1795_v20  ;;  %v1798_v26 = vpop.f32.mrb[6].mxu1  ;;  %v1735_v27 = vpop.f32.mrb[7].mxu0  ;;  %v518_v23 = vld [vmem:[#allocation2 + $0x48] sm:$0xff] }
 0x160   : > { %v1736_v29 = vadd.f32 %v1735_v27, %v1734_v24  ;;  %v1799_v30 = vpop.f32.mrb[7].mxu1 }
 0x161   : > { %v1116_v31 = vadd.f32 %v1797_v25, %v1733_v22  ;;  %v1800_v32 = vadd.f32 %v1799_v30, %v1798_v26 }
 0x163   : > { %v1172_v34 = vadd.f32 %v1116_v31, %v511_v28  ;;  %v1119_v35 = vadd.f32 %v1800_v32, %v1736_v29 }
 0x164   : > { %v1737_v36 = vpop.f32.mrb[8].mxu0 }
 0x165   : > { %1188 = vst [vmem:[#allocation2 + $0x10] sm:$0xff] %v1172_v34  ;;  %v1173_v37 = vadd.f32 %v1119_v35, %v512_v33  ;;  %v1801_v38 = vpop.f32.mrb[8].mxu1  ;;  %v1738_v39 = vpop.f32.mrb[9].mxu0 }
 0x166   : > { %v1739_v40 = vadd.f32 %v1738_v39, %v1737_v36  ;;  %v1802_v41 = vpop.f32.mrb[9].mxu1  ;;  %v1740_v42 = vpop.f32.mrb[10].mxu0  ;;  %v519_v36 = vld [vmem:[#allocation2 + $0x50] sm:$0xff] }
 0x167   : > { %1189 = vst [vmem:[#allocation2 + $0x18] sm:$0xff] %v1173_v37  ;;  %v1803_v43 = vadd.f32 %v1802_v41, %v1801_v38  ;;  %v1804_v44 = vpop.f32.mrb[10].mxu1  ;;  %v1741_v45 = vpop.f32.mrb[11].mxu0  ;;  %v520_v41 = vld [vmem:[#allocation2 + $0x58] sm:$0xff] }
 0x168   : > { %v1742_v47 = vadd.f32 %v1741_v45, %v1740_v42  ;;  %v1805_v48 = vpop.f32.mrb[11].mxu1 }
 0x169   : > { %v1124_v49 = vadd.f32 %v1803_v43, %v1739_v40  ;;  %v1806_v50 = vadd.f32 %v1805_v48, %v1804_v44 }
 0x16b   : > { %v1174_v52 = vadd.f32 %v1124_v49, %v513_v46  ;;  %v1127_v53 = vadd.f32 %v1806_v50, %v1742_v47 }
 0x16c   : > { %v1743_v54 = vpop.f32.mrb[12].mxu0 }
 0x16d   : > { %1190 = vst [vmem:[#allocation2 + $0x20] sm:$0xff] %v1174_v52  ;;  %v1175_v55 = vadd.f32 %v1127_v53, %v514_v51  ;;  %v1807_v56 = vpop.f32.mrb[12].mxu1  ;;  %v1744_v57 = vpop.f32.mrb[13].mxu0 }
 0x16e   : > { %v1745_v58 = vadd.f32 %v1744_v57, %v1743_v54  ;;  %v1808_v59 = vpop.f32.mrb[13].mxu1  ;;  %v1746_v60 = vpop.f32.mrb[14].mxu0  ;;  %v521_v54 = vld [vmem:[#allocation2 + $0x60] sm:$0xff] }
 0x16f   : > { %1191 = vst [vmem:[#allocation2 + $0x28] sm:$0xff] %v1175_v55  ;;  %v1809_v61 = vadd.f32 %v1808_v59, %v1807_v56  ;;  %v1810_v62 = vpop.f32.mrb[14].mxu1  ;;  %v1747_v63 = vpop.f32.mrb[15].mxu0  ;;  %v522_v59 = vld [vmem:[#allocation2 + $0x68] sm:$0xff] }
 0x170   : > { %v1748_v1 = vadd.f32 %v1747_v63, %v1746_v60  ;;  %v1811_v2 = vpop.f32.mrb[15].mxu1 }
 0x171   : > { %v1132_v3 = vadd.f32 %v1809_v61, %v1745_v58  ;;  %v1812_v4 = vadd.f32 %v1811_v2, %v1810_v62 }
 0x173   : > { %v1176_v6 = vadd.f32 %v1132_v3, %v515_v0  ;;  %v1135_v7 = vadd.f32 %v1812_v4, %v1748_v1 }
 0x174   : > { %v1749_v8 = vpop.f32.mrb[16].mxu0 }
 0x175   : > { %1192 = vst [vmem:[#allocation2 + $0x30] sm:$0xff] %v1176_v6  ;;  %v1177_v9 = vadd.f32 %v1135_v7, %v516_v5  ;;  %v1813_v10 = vpop.f32.mrb[16].mxu1  ;;  %v1750_v11 = vpop.f32.mrb[17].mxu0 }
 0x176   : > { %v1751_v12 = vadd.f32 %v1750_v11, %v1749_v8  ;;  %v1814_v13 = vpop.f32.mrb[17].mxu1  ;;  %v1752_v14 = vpop.f32.mrb[18].mxu0  ;;  %v523_v8 = vld [vmem:[#allocation2 + $0x70] sm:$0xff] }
 0x177   : > { %1193 = vst [vmem:[#allocation2 + $0x38] sm:$0xff] %v1177_v9  ;;  %v1815_v15 = vadd.f32 %v1814_v13, %v1813_v10  ;;  %v1816_v16 = vpop.f32.mrb[18].mxu1  ;;  %v1753_v17 = vpop.f32.mrb[19].mxu0  ;;  %v524_v13 = vld [vmem:[#allocation2 + $0x78] sm:$0xff] }
 0x178   : > { %v1754_v19 = vadd.f32 %v1753_v17, %v1752_v14  ;;  %v1817_v20 = vpop.f32.mrb[19].mxu1  ;;  %v1206_v17 = vld [vmem:[#allocation2] sm:$0xff] (!%p1623_p2) }
 0x179   : > { %v1140_v21 = vadd.f32 %v1815_v15, %v1751_v12  ;;  %v1818_v22 = vadd.f32 %v1817_v20, %v1816_v16 }
 0x17b   : > { %v1178_v24 = vadd.f32 %v1140_v21, %v517_v18  ;;  %v1143_v25 = vadd.f32 %v1818_v22, %v1754_v19  ;;  %v1207_v18 = vld [vmem:[#allocation2 + $0x8] sm:$0xff] (!%p1623_p2)  ;;  %v2395_v19 = vld [vmem:[%s487_s9] ss:$0 sm:$0xff] (!%p1623_p2)  ;;  %v1208_v22 = vld [vmem:[#allocation2 + $0x10] sm:$0xff] (!%p1623_p2) }
 0x17c   : > { %v1755_v26 = vpop.f32.mrb[20].mxu0  ;;  %v1229_v20 = vadd.f32 (!%p1623_p2), %v2395_v19, %v1206_v17  ;;  %v1230_v21 = vadd.f32 (!%p1623_p2), %v2395_v19, %v1207_v18 }
 0x17d   : > { %1194 = vst [vmem:[#allocation2 + $0x40] sm:$0xff] %v1178_v24  ;;  %v1179_v27 = vadd.f32 %v1143_v25, %v518_v23  ;;  %v1819_v28 = vpop.f32.mrb[20].mxu1  ;;  %v1756_v29 = vpop.f32.mrb[21].mxu0  ;;  %v1209_v23 = vld [vmem:[#allocation2 + $0x18] sm:$0xff] (!%p1623_p2)  ;;  %v1210_v24 = vld [vmem:[#allocation2 + $0x20] sm:$0xff] (!%p1623_p2)  ;;  %v1231_v25 = vadd.f32 (!%p1623_p2), %v2395_v19, %v1208_v22 }
 0x17e   : > { %v1757_v30 = vadd.f32 %v1756_v29, %v1755_v26  ;;  %v1820_v31 = vpop.f32.mrb[21].mxu1  ;;  %v1758_v32 = vpop.f32.mrb[22].mxu0  ;;  %v1232_v26 = vadd.f32 (!%p1623_p2), %v2395_v19, %v1209_v23  ;;  %v1212_v29 = vld [vmem:[#allocation2 + $0x30] sm:$0xff] (!%p1623_p2) }
 0x17f   : > { %1195 = vst [vmem:[#allocation2 + $0x48] sm:$0xff] %v1179_v27  ;;  %v1821_v33 = vadd.f32 %v1820_v31, %v1819_v28  ;;  %v1822_v34 = vpop.f32.mrb[22].mxu1  ;;  %v1759_v35 = vpop.f32.mrb[23].mxu0  ;;  %v1211_v27 = vld [vmem:[#allocation2 + $0x28] sm:$0xff] (!%p1623_p2)  ;;  %v1233_v28 = vadd.f32 (!%p1623_p2), %v2395_v19, %v1210_v24  ;;  %v1245_v31 = vmul.f32 (!%p1623_p2), 0.2, %v1229_v20 }
 0x180   : > { %v1760_v37 = vadd.f32 %v1759_v35, %v1758_v32  ;;  %v1823_v38 = vpop.f32.mrb[23].mxu1  ;;  %v1246_v32 = vmul.f32 (!%p1623_p2), 0.2, %v1230_v21 }
 0x181   : > { %v1148_v39 = vadd.f32 %v1821_v33, %v1757_v30  ;;  %v1824_v40 = vadd.f32 %v1823_v38, %v1822_v34  ;;  %v1213_v30 = vld [vmem:[#allocation2 + $0x38] sm:$0xff] (!%p1623_p2)  ;;  %v1234_v33 = vadd.f32 (!%p1623_p2), %v2395_v19, %v1211_v27  ;;  %v1235_v34 = vadd.f32 (!%p1623_p2), %v2395_v19, %v1212_v29 }
 0x182   : > { %v1249_v38 = vmul.f32 (!%p1623_p2), 0.2, %v1233_v28 }
 0x183   : > { %v1180_v42 = vadd.f32 %v1148_v39, %v519_v36  ;;  %v1151_v43 = vadd.f32 %v1824_v40, %v1760_v37  ;;  %v1247_v36 = vmul.f32 (!%p1623_p2), 0.2, %v1231_v25  ;;  %v1248_v37 = vmul.f32 (!%p1623_p2), 0.2, %v1232_v26 }
 0x184   : > { %v1761_v44 = vpop.f32.mrb[24].mxu0  ;;  %v1214_v35 = vld [vmem:[#allocation2 + $0x40] sm:$0xff] (!%p1623_p2)  ;;  %v1236_v39 = vadd.f32 (!%p1623_p2), %v2395_v19, %v1213_v30  ;;  %v1261_v40 = vmax.f32 (!%p1623_p2), %v1229_v20, %v1245_v31 }
 0x185   : > { %1196 = vst [vmem:[#allocation2 + $0x50] sm:$0xff] %v1180_v42  ;;  %v1181_v45 = vadd.f32 %v1151_v43, %v520_v41  ;;  %v1825_v46 = vpop.f32.mrb[24].mxu1  ;;  %v1762_v47 = vpop.f32.mrb[25].mxu0  ;;  %v1262_v41 = vmax.f32 (!%p1623_p2), %v1230_v21, %v1246_v32  ;;  %v1250_v42 = vmul.f32 (!%p1623_p2), 0.2, %v1234_v33 }
 0x186   : > { %v1763_v48 = vadd.f32 %v1762_v47, %v1761_v44  ;;  %v1826_v49 = vpop.f32.mrb[25].mxu1  ;;  %v1764_v50 = vpop.f32.mrb[26].mxu0  ;;  %v1251_v43 = vmul.f32 (!%p1623_p2), 0.2, %v1235_v34  ;;  %v1215_v44 = vld [vmem:[#allocation2 + $0x48] sm:$0xff] (!%p1623_p2)  ;;  %v1264_v47 = vmax.f32 (!%p1623_p2), %v1232_v26, %v1248_v37 }
 0x187   : > { %1197 = vst [vmem:[#allocation2 + $0x58] sm:$0xff] %v1181_v45  ;;  %v1827_v51 = vadd.f32 %v1826_v49, %v1825_v46  ;;  %v1828_v52 = vpop.f32.mrb[26].mxu1  ;;  %v1765_v53 = vpop.f32.mrb[27].mxu0  ;;  %v1263_v46 = vmax.f32 (!%p1623_p2), %v1231_v25, %v1247_v36  ;;  %v1252_v49 = vmul.f32 (!%p1623_p2), 0.2, %v1236_v39 }
 0x188   : > { %v1766_v55 = vadd.f32 %v1765_v53, %v1764_v50  ;;  %v1829_v56 = vpop.f32.mrb[27].mxu1  ;;  %v1266_v53 = vmax.f32 (!%p1623_p2), %v1234_v33, %v1250_v42 }
 0x189   : > { %v1156_v57 = vadd.f32 %v1827_v51, %v1763_v48  ;;  %v1830_v58 = vadd.f32 %v1829_v56, %v1828_v52  ;;  %v1265_v48 = vmax.f32 (!%p1623_p2), %v1233_v28, %v1249_v38  ;;  %v1665_v52 = vpack.c.bf16 (!%p1623_p2), %v1262_v41, %v1261_v40 }
 0x18b   : > { %v1182_v60 = vadd.f32 %v1156_v57, %v521_v54  ;;  %v1159_v61 = vadd.f32 %v1830_v58, %v1766_v55  ;;  %v1267_v54 = vmax.f32 (!%p1623_p2), %v1235_v34, %v1251_v43  ;;  %v1237_v55 = vadd.f32 (!%p1623_p2), %v2395_v19, %v1214_v35  ;;  %1666 = vst [vmem:[%s2316_s11] sm:$0xff] (!%p1623_p2), %v1665_v52  }
 0x18c   : > { %v1767_v62 = vpop.f32.mrb[28].mxu0  ;;  %v1216_v45 = vld [vmem:[#allocation2 + $0x50] sm:$0xff] (!%p1623_p2)  ;;  %v1670_v57 = vpack.c.bf16 (!%p1623_p2), %v1264_v47, %v1263_v46  ;;  %v1268_v58 = vmax.f32 (!%p1623_p2), %v1236_v39, %v1252_v49 }
 0x18d   : > { %1198 = vst [vmem:[#allocation2 + $0x60] sm:$0xff] %v1182_v60  ;;  %v1183_v63 = vadd.f32 %v1159_v61, %v522_v59  ;;  %v1831_v0 = vpop.f32.mrb[28].mxu1  ;;  %v1768_v1 = vpop.f32.mrb[29].mxu0  ;;  %v1238_v59 = vadd.f32 (!%p1623_p2), %v2395_v19, %v1215_v44  ;;  %v1239_v60 = vadd.f32 (!%p1623_p2), %v2395_v19, %v1216_v45 }
 0x18e   : > { %v1769_v2 = vadd.f32 %v1768_v1, %v1767_v62  ;;  %v1832_v3 = vpop.f32.mrb[29].mxu1  ;;  %v1770_v4 = vpop.f32.mrb[30].mxu0  ;;  %v1217_v50 = vld [vmem:[#allocation2 + $0x58] sm:$0xff] (!%p1623_p2)  ;;  %v1675_v62 = vpack.c.bf16 (!%p1623_p2), %v1266_v53, %v1265_v48  ;;  %1702 = vst [vmem:[%s2316_s11 + $0x8] sm:$0xff] (!%p1623_p2), %v1670_v57  }
 0x18f   : > { %1199 = vst [vmem:[#allocation2 + $0x68] sm:$0xff] %v1183_v63  ;;  %v1833_v5 = vadd.f32 %v1832_v3, %v1831_v0  ;;  %v1834_v6 = vpop.f32.mrb[30].mxu1  ;;  %v1771_v7 = vpop.f32.mrb[31].mxu0  ;;  %v1253_v63 = vmul.f32 (!%p1623_p2), 0.2, %v1237_v55  ;;  %v1240_v0 = vadd.f32 (!%p1623_p2), %v2395_v19, %v1217_v50  ;;  %v1680_v3 = vpack.c.bf16 (!%p1623_p2), %v1268_v58, %v1267_v54 }
 0x190   : > { %v1772_v9 = vadd.f32 %v1771_v7, %v1770_v4  ;;  %v1835_v10 = vpop.f32.mrb[31].mxu1  ;;  %v1254_v4 = vmul.f32 (!%p1623_p2), 0.2, %v1238_v59  ;;  %1703 = vst [vmem:[%s2316_s11 + $0x10] sm:$0xff] (!%p1623_p2), %v1675_v62  }
 0x191   : > { %v1164_v11 = vadd.f32 %v1833_v5, %v1769_v2  ;;  %v1836_v12 = vadd.f32 %v1835_v10, %v1834_v6  ;;  %1205 = sbr.rel (%p1623_p2) target bundleno = 424 (0x1a8), region = 81  ;;  %v1255_v5 = vmul.f32 (!%p1623_p2), 0.2, %v1239_v60  ;;  %v1269_v7 = vmax.f32 (!%p1623_p2), %v1237_v55, %v1253_v63  ;;  %1704 = vst [vmem:[%s2316_s11 + $0x18] sm:$0xff] (!%p1623_p2), %v1680_v3  }
 0x193   : > { %v1184_v14 = vadd.f32 %v1164_v11, %v523_v8  ;;  %v1167_v15 = vadd.f32 %v1836_v12, %v1772_v9  ;;  %v1256_v8 = vmul.f32 (!%p1623_p2), 0.2, %v1240_v0  ;;  %v1270_v11 = vmax.f32 (!%p1623_p2), %v1238_v59, %v1254_v4 }
 0x194   : > { %v1218_v51 = vld [vmem:[#allocation2 + $0x60] sm:$0xff] (!%p1623_p2)  ;;  %v1271_v12 = vmax.f32 (!%p1623_p2), %v1239_v60, %v1255_v5 }
 0x195   : > { %1200 = vst [vmem:[#allocation2 + $0x70] sm:$0xff] %v1184_v14  ;;  %v1185_v16 = vadd.f32 %v1167_v15, %v524_v13  ;;  %v1241_v1 = vadd.f32 (!%p1623_p2), %v2395_v19, %v1218_v51  ;;  %v1272_v15 = vmax.f32 (!%p1623_p2), %v1240_v0, %v1256_v8  ;;  %v1685_v18 = vpack.c.bf16 (!%p1623_p2), %v1270_v11, %v1269_v7 }
 0x196   : > { %v1219_v56 = vld [vmem:[#allocation2 + $0x68] sm:$0xff] (!%p1623_p2) }
 0x197   : > { %1201 = vst [vmem:[#allocation2 + $0x78] sm:$0xff] %v1185_v16  ;;  %v1242_v6 = vadd.f32 (!%p1623_p2), %v2395_v19, %v1219_v56  ;;  %v1257_v9 = vmul.f32 (!%p1623_p2), 0.2, %v1241_v1  ;;  %v1690_v22 = vpack.c.bf16 (!%p1623_p2), %v1272_v15, %v1271_v12  ;;  %1705 = vst [vmem:[%s2316_s11 + $0x20] sm:$0xff] (!%p1623_p2), %v1685_v18  }
 0x199   : > { %v1258_v13 = vmul.f32 0.2, %v1242_v6  ;;  %v1273_v16 = vmax.f32 %v1241_v1, %v1257_v9  ;;  %1706 = vst [vmem:[%s2316_s11 + $0x28] sm:$0xff] %v1690_v22  }
 0x19b   : > { %v1274_v20 = vmax.f32 %v1242_v6, %v1258_v13 }
 0x19c   : > { %v1220_v61 = vld [vmem:[#allocation2 + $0x70] sm:$0xff] }
 0x19d   : > { %v1243_v10 = vadd.f32 %v2395_v19, %v1220_v61  ;;  %v1695_v24 = vpack.c.bf16 %v1274_v20, %v1273_v16 }
 0x19e   : > { %v1221_v2 = vld [vmem:[#allocation2 + $0x78] sm:$0xff] }
 0x19f   : > { %v1244_v14 = vadd.f32 %v2395_v19, %v1221_v2  ;;  %v1259_v17 = vmul.f32 0.2, %v1243_v10  ;;  %1707 = vst [vmem:[%s2316_s11 + $0x30] sm:$0xff] %v1695_v24  }
 0x1a1   : > { %v1260_v21 = vmul.f32 0.2, %v1244_v14  ;;  %v1275_v23 = vmax.f32 %v1243_v10, %v1259_v17 }
 0x1a3   : > { %v1276_v25 = vmax.f32 %v1244_v14, %v1260_v21 }
 0x1a5   : > { %v1700_v26 = vpack.c.bf16 %v1276_v25, %v1275_v23 }
 0x1a7   : > { %1708 = vst [vmem:[%s2316_s11 + $0x38] sm:$0xff] %v1700_v26  }
 0x1a8 PF: > { %1363 = sbr.rel (!%p2151_p9) target bundleno = 436 (0x1b4), region = 85  ;;  %s1642_s16 = sshll.u32 (%p2151_p9), %s2048_s17, 2  ;;  %v1381_v19 = vld [vmem:[%s2316_s11] sm:$0xf] (%p2151_p9)  ;;  %v1383_v27 = vld [vmem:[%s2316_s11 + $0x4] sm:$0xf] (%p2151_p9) }
 0x1a9   : > { %s1365_s29 = scalar_lea.vmem (%p2151_p9), %s2473_s3, %s1642_s16  ;;  %v1385_v28 = vld [vmem:[%s2316_s11 + $0x8] sm:$0xf] (%p2151_p9)  ;;  %v1387_v29 = vld [vmem:[%s2316_s11 + $0xc] sm:$0xf] (%p2151_p9)  ;;  %v1389_v30 = vld [vmem:[%s2316_s11 + $0x10] sm:$0xf] (%p2151_p9) }
 0x1aa   : > { %1382 = vst [vmem:[%s1365_s29] sm:$0xf] (%p2151_p9), %v1381_v19  ;;  %1384 = vst [vmem:[%s1365_s29 + $0x10] sm:$0xf] (%p2151_p9), %v1383_v27  ;;  %v1391_v31 = vld [vmem:[%s2316_s11 + $0x14] sm:$0xf] (%p2151_p9) }
 0x1ab   : > { %1386 = vst [vmem:[%s1365_s29 + $0x20] sm:$0xf] (%p2151_p9), %v1385_v28  ;;  %1388 = vst [vmem:[%s1365_s29 + $0x30] sm:$0xf] (%p2151_p9), %v1387_v29  ;;  %v1393_v32 = vld [vmem:[%s2316_s11 + $0x18] sm:$0xf] (%p2151_p9) }
 0x1ac   : > { %1390 = vst [vmem:[%s1365_s29 + $0x40] sm:$0xf] (%p2151_p9), %v1389_v30  ;;  %v1395_v33 = vld [vmem:[%s2316_s11 + $0x1c] sm:$0xf] (%p2151_p9)  ;;  %1392 = vst [vmem:[%s1365_s29 + $0x50] sm:$0xf] (%p2151_p9), %v1391_v31 }
 0x1ad   : > { %1394 = vst [vmem:[%s1365_s29 + $0x60] sm:$0xf] (%p2151_p9), %v1393_v32  ;;  %1396 = vst [vmem:[%s1365_s29 + $0x70] sm:$0xf] (%p2151_p9), %v1395_v33  ;;  %v1401_v36 = vld [vmem:[%s2316_s11 + $0x28] sm:$0xf] (%p2151_p9) }
 0x1ae   : > { %v1397_v34 = vld [vmem:[%s2316_s11 + $0x20] sm:$0xf] (%p2151_p9)  ;;  %v1399_v35 = vld [vmem:[%s2316_s11 + $0x24] sm:$0xf] (%p2151_p9)  ;;  %1402 = vst [vmem:[%s1365_s29 + $0xa0] sm:$0xf] (%p2151_p9), %v1401_v36 }
 0x1af   : > { %1398 = vst [vmem:[%s1365_s29 + $0x80] sm:$0xf] %v1397_v34  ;;  %1400 = vst [vmem:[%s1365_s29 + $0x90] sm:$0xf] %v1399_v35  ;;  %v1403_v37 = vld [vmem:[%s2316_s11 + $0x2c] sm:$0xf] }
 0x1b0   : > { %v1405_v38 = vld [vmem:[%s2316_s11 + $0x30] sm:$0xf]  ;;  %v1407_v39 = vld [vmem:[%s2316_s11 + $0x34] sm:$0xf]  ;;  %1404 = vst [vmem:[%s1365_s29 + $0xb0] sm:$0xf] %v1403_v37 }
 0x1b1   : > { %1406 = vst [vmem:[%s1365_s29 + $0xc0] sm:$0xf] %v1405_v38  ;;  %1408 = vst [vmem:[%s1365_s29 + $0xd0] sm:$0xf] %v1407_v39  ;;  %v1409_v40 = vld [vmem:[%s2316_s11 + $0x38] sm:$0xf] }
 0x1b2   : > { %v1411_v41 = vld [vmem:[%s2316_s11 + $0x3c] sm:$0xf]  ;;  %1410 = vst [vmem:[%s1365_s29 + $0xe0] sm:$0xf] %v1409_v40 }
 0x1b3   : > { %1412 = vst [vmem:[%s1365_s29 + $0xf0] sm:$0xf] %v1411_v41 }
 0x1b4 PF: > { %s13_s20 = sadd.s32 1, %s2060_s20   ;;  %s2476_s12 = smov %s2032_s13 }
 0x1b5   : > { %p10_p3 = scmp.ge.s32.totalorder %s13_s20, 38   ;;  %s2477_s13 = smov %s2156_s4 }
 0x1b6   : > { %s2478_s14 = smov %s2040_s15  ;;  %s2479_s15 = smov %s2159_s5 }
 0x1b7   : > { %s2480_s16 = smov %s2052_s18  ;;  %s2481_s17 = smov %s2056_s19 }
 0x1b8   : > { %s2482_s18 = smov %s2485_s21  ;;  %s2483_s19 = smov %s2489_s22 }
 0x1b9   :  { %12 = sbr.rel (!%p10_p3) target bundleno = 5 (0x5), region = 161 }

// kernel: dispnet_costvolume_encoder.10
= control target key start
LH: loop header
LB: loop body
LE: loop exit
PB: predicated region body
PF: predicated region fallthrough
CT: control target
= control target key end

     0   :  { %s1447_s12 = smov 0   ;;  %s1449_s13 = smov 0   ;;  %s1764_s0 = inlined_call_operand.vmem [shape: bf16[9,32,512], index: 0, kind: input, shape index: {}]   ;;  %s1765_s1 = inlined_call_operand.vmem [shape: bf16[9,512,512], index: 1, kind: input, shape index: {}]   ;;  %s1766_s2 = inlined_call_operand.vmem [shape: f32[1,512], index: 2, kind: input, shape index: {}]   ;;  %s1767_s3 = inlined_call_operand.vmem [shape: bf16[32,512], index: 3, kind: output, shape index: {}]  }
   0x1   :  { %s1451_s14 = smov 0   ;;  %s1453_s15 = smov 0  }
   0x2   :  { %s1455_s16 = smov 0   ;;  %s1457_s17 = smov 0  }
   0x3   :  { %s1459_s18 = smov 0   ;;  %s1461_s19 = smov 0  }
   0x4   :  { %s1463_s20 = smov 0  }
   0x5 LB: > { %s22_s21 = sadd.s32 1, %s1416_s18  ;;  %s25_s22 = sadd.s32 1, %s1420_s19  ;;  %s1424_s20 = sphi %s1463_s20, %s13_s20   ;;  %s1420_s19 = sphi %s1461_s19, %s1777_s19   ;;  %s1416_s18 = sphi %s1459_s18, %s1776_s18   ;;  %s1412_s17 = sphi %s1457_s17, %s1775_s17   ;;  %s1408_s16 = sphi %s1455_s16, %s1774_s16   ;;  %s1404_s15 = sphi %s1453_s15, %s1773_s15   ;;  %s1400_s14 = sphi %s1451_s14, %s1772_s14   ;;  %s1396_s13 = sphi %s1449_s13, %s1771_s13   ;;  %s1392_s12 = sphi %s1447_s12, %s1770_s12  }
   0x6   : > { %p23_p0 = scmp.ge.s32.totalorder %s22_s21, 9  ;;  %p62_p1 = scmp.ne.s32.totalorder %s1404_s15, %s1400_s14 }
   0x7   : > { %s1102_s23 = sadd.s32 4294967295, %s1424_s20   ;;  %p63_p2 = scmp.eq.s32.totalorder %s1424_s20, 0 }
   0x8   : > { %s1779_s21 = smov (%p23_p0, %s22_s21), 0  ;;  %s1781_s22 = smov (!%p23_p0, %s25_s22), %s1420_s19 }
   0x9   : > { %p27_p3 = scmp.ge.s32.totalorder %s1781_s22, 4  ;;  %s50_s24 = ssub.s32 %s1416_s18, %s1779_s21 }
   0xa   : > { %p1503_p4 = por %p63_p2, %p62_p1  ;;  %p117_p5 = scmp.ne.s32.totalorder %s1396_s13, %s1392_s12 }
   0xb   : > { %s1783_s22 = smov (%p27_p3, %s1781_s22), 0  ;;  %s55_s26 = sadd.s32 1, %s1404_s15 }
   0xc   : > { %p118_p6 = scmp.eq.s32.totalorder %s1102_s23, 35  ;;  %s51_s27 = ssub.s32 %s1420_s19, %s1783_s22 }
   0xd   : > { %s107_s28 = sadd.s32 1, %s1396_s13  ;;  %s52_s29 = sor.u32 %s51_s27, %s50_s24 }
   0xe   : > { %p105_p7 = scmp.eq.s32.totalorder %s51_s27, 0  ;;  %p53_p8 = scmp.eq.s32.totalorder %s52_s29, 0 }
   0xf   : > { %p1515_p9 = por %p118_p6, %p117_p5  ;;  %p1105_p10 = scmp.ge.s32.totalorder %s1424_s20, 36 }
  0x10   : > { %s1520_s4 = scalar_select %p105_p7, %s1396_s13, %s107_s28  }
  0x11   : > { %s1523_s5 = scalar_select %p53_p8, %s1404_s15, %s55_s26  }
  0x12   : > { %143 = sbr.rel (%p1105_p10) target bundleno = 74 (0x4a), region = 20 }
  0x19   : > { %146 = sbr.rel (!%p1503_p4) target bundleno = 74 (0x4a), region = 24  ;;  %s148_s6 = sand.u32 (%p1503_p4), 1, %s1404_s15  }
  0x1a   : > { %s1107_s7 = sshll.u32 (%p1503_p4), %s1416_s18, 8  ;;  %s1106_s8 = sshll.u32 (%p1503_p4), %s148_s6, 8 }
  0x1b   : > { %s152_s9 = sadd.s32 (%p1503_p4), %s1420_s19, %s1107_s7  ;;  %s1539_s25 = scalar_lea.vmem (%p1503_p4), [#allocation3], %s1106_s8 }
  0x1c   : > { %s1108_s10 = sshll.u32 (%p1503_p4), %s152_s9, 2 }
  0x1d   : > { %s1534_s24 = scalar_lea.vmem (%p1503_p4), %s1765_s1, %s1108_s10 }
  0x1e   : > { %v170_v0 = vld [vmem:[%s1534_s24] sm:$0xf] (%p1503_p4)  ;;  %v172_v1 = vld [vmem:[%s1534_s24 + $0x10] sm:$0xf] (%p1503_p4) }
  0x1f   : > { %v174_v2 = vld [vmem:[%s1534_s24 + $0x20] sm:$0xf] (%p1503_p4)  ;;  %171 = vst [vmem:[%s1539_s25] sm:$0xf] (%p1503_p4), %v170_v0  ;;  %173 = vst [vmem:[%s1539_s25 + $0x4] sm:$0xf] (%p1503_p4), %v172_v1 }
  0x20   : > { %175 = vst [vmem:[%s1539_s25 + $0x8] sm:$0xf] %v174_v2  ;;  %v176_v3 = vld [vmem:[%s1534_s24 + $0x30] sm:$0xf]  ;;  %v178_v4 = vld [vmem:[%s1534_s24 + $0x40] sm:$0xf] }
  0x21   : > { %v180_v5 = vld [vmem:[%s1534_s24 + $0x50] sm:$0xf]  ;;  %177 = vst [vmem:[%s1539_s25 + $0xc] sm:$0xf] %v176_v3  ;;  %179 = vst [vmem:[%s1539_s25 + $0x10] sm:$0xf] %v178_v4 }
  0x22   : > { %181 = vst [vmem:[%s1539_s25 + $0x14] sm:$0xf] %v180_v5  ;;  %v182_v6 = vld [vmem:[%s1534_s24 + $0x60] sm:$0xf]  ;;  %v184_v7 = vld [vmem:[%s1534_s24 + $0x70] sm:$0xf] }
  0x23   : > { %v186_v8 = vld [vmem:[%s1534_s24 + $0x80] sm:$0xf]  ;;  %183 = vst [vmem:[%s1539_s25 + $0x18] sm:$0xf] %v182_v6  ;;  %185 = vst [vmem:[%s1539_s25 + $0x1c] sm:$0xf] %v184_v7 }
  0x24   : > { %187 = vst [vmem:[%s1539_s25 + $0x20] sm:$0xf] %v186_v8  ;;  %v188_v9 = vld [vmem:[%s1534_s24 + $0x90] sm:$0xf]  ;;  %v190_v10 = vld [vmem:[%s1534_s24 + $0xa0] sm:$0xf] }
  0x25   : > { %v192_v11 = vld [vmem:[%s1534_s24 + $0xb0] sm:$0xf]  ;;  %189 = vst [vmem:[%s1539_s25 + $0x24] sm:$0xf] %v188_v9  ;;  %191 = vst [vmem:[%s1539_s25 + $0x28] sm:$0xf] %v190_v10 }
  0x26   : > { %193 = vst [vmem:[%s1539_s25 + $0x2c] sm:$0xf] %v192_v11  ;;  %v194_v12 = vld [vmem:[%s1534_s24 + $0xc0] sm:$0xf]  ;;  %v196_v13 = vld [vmem:[%s1534_s24 + $0xd0] sm:$0xf] }
  0x27   : > { %v198_v14 = vld [vmem:[%s1534_s24 + $0xe0] sm:$0xf]  ;;  %195 = vst [vmem:[%s1539_s25 + $0x30] sm:$0xf] %v194_v12  ;;  %197 = vst [vmem:[%s1539_s25 + $0x34] sm:$0xf] %v196_v13 }
  0x28   : > { %199 = vst [vmem:[%s1539_s25 + $0x38] sm:$0xf] %v198_v14  ;;  %v200_v15 = vld [vmem:[%s1534_s24 + $0xf0] sm:$0xf]  ;;  %v202_v16 = vld [vmem:[%s1534_s24 + $0x100] sm:$0xf] }
  0x29   : > { %v204_v17 = vld [vmem:[%s1534_s24 + $0x110] sm:$0xf]  ;;  %201 = vst [vmem:[%s1539_s25 + $0x3c] sm:$0xf] %v200_v15  ;;  %203 = vst [vmem:[%s1539_s25 + $0x40] sm:$0xf] %v202_v16 }
  0x2a   : > { %205 = vst [vmem:[%s1539_s25 + $0x44] sm:$0xf] %v204_v17  ;;  %v206_v18 = vld [vmem:[%s1534_s24 + $0x120] sm:$0xf]  ;;  %v208_v19 = vld [vmem:[%s1534_s24 + $0x130] sm:$0xf] }
  0x2b   : > { %v210_v20 = vld [vmem:[%s1534_s24 + $0x140] sm:$0xf]  ;;  %207 = vst [vmem:[%s1539_s25 + $0x48] sm:$0xf] %v206_v18  ;;  %209 = vst [vmem:[%s1539_s25 + $0x4c] sm:$0xf] %v208_v19 }
  0x2c   : > { %211 = vst [vmem:[%s1539_s25 + $0x50] sm:$0xf] %v210_v20  ;;  %v212_v21 = vld [vmem:[%s1534_s24 + $0x150] sm:$0xf]  ;;  %v214_v22 = vld [vmem:[%s1534_s24 + $0x160] sm:$0xf] }
  0x2d   : > { %v216_v23 = vld [vmem:[%s1534_s24 + $0x170] sm:$0xf]  ;;  %213 = vst [vmem:[%s1539_s25 + $0x54] sm:$0xf] %v212_v21  ;;  %215 = vst [vmem:[%s1539_s25 + $0x58] sm:$0xf] %v214_v22 }
  0x2e   : > { %217 = vst [vmem:[%s1539_s25 + $0x5c] sm:$0xf] %v216_v23  ;;  %v218_v24 = vld [vmem:[%s1534_s24 + $0x180] sm:$0xf]  ;;  %v220_v25 = vld [vmem:[%s1534_s24 + $0x190] sm:$0xf] }
  0x2f   : > { %v222_v26 = vld [vmem:[%s1534_s24 + $0x1a0] sm:$0xf]  ;;  %219 = vst [vmem:[%s1539_s25 + $0x60] sm:$0xf] %v218_v24  ;;  %221 = vst [vmem:[%s1539_s25 + $0x64] sm:$0xf] %v220_v25 }
  0x30   : > { %223 = vst [vmem:[%s1539_s25 + $0x68] sm:$0xf] %v222_v26  ;;  %v224_v27 = vld [vmem:[%s1534_s24 + $0x1b0] sm:$0xf]  ;;  %v226_v28 = vld [vmem:[%s1534_s24 + $0x1c0] sm:$0xf] }
  0x31   : > { %v228_v29 = vld [vmem:[%s1534_s24 + $0x1d0] sm:$0xf]  ;;  %225 = vst [vmem:[%s1539_s25 + $0x6c] sm:$0xf] %v224_v27  ;;  %227 = vst [vmem:[%s1539_s25 + $0x70] sm:$0xf] %v226_v28 }
  0x32   : > { %229 = vst [vmem:[%s1539_s25 + $0x74] sm:$0xf] %v228_v29  ;;  %v230_v30 = vld [vmem:[%s1534_s24 + $0x1e0] sm:$0xf]  ;;  %v232_v31 = vld [vmem:[%s1534_s24 + $0x1f0] sm:$0xf] }
  0x33   : > { %v234_v32 = vld [vmem:[%s1534_s24 + $0x200] sm:$0xf]  ;;  %231 = vst [vmem:[%s1539_s25 + $0x78] sm:$0xf] %v230_v30  ;;  %233 = vst [vmem:[%s1539_s25 + $0x7c] sm:$0xf] %v232_v31 }
  0x34   : > { %235 = vst [vmem:[%s1539_s25 + $0x80] sm:$0xf] %v234_v32  ;;  %v236_v33 = vld [vmem:[%s1534_s24 + $0x210] sm:$0xf]  ;;  %v238_v34 = vld [vmem:[%s1534_s24 + $0x220] sm:$0xf] }
  0x35   : > { %v240_v35 = vld [vmem:[%s1534_s24 + $0x230] sm:$0xf]  ;;  %237 = vst [vmem:[%s1539_s25 + $0x84] sm:$0xf] %v236_v33  ;;  %239 = vst [vmem:[%s1539_s25 + $0x88] sm:$0xf] %v238_v34 }
  0x36   : > { %241 = vst [vmem:[%s1539_s25 + $0x8c] sm:$0xf] %v240_v35  ;;  %v242_v36 = vld [vmem:[%s1534_s24 + $0x240] sm:$0xf]  ;;  %v244_v37 = vld [vmem:[%s1534_s24 + $0x250] sm:$0xf] }
  0x37   : > { %v246_v38 = vld [vmem:[%s1534_s24 + $0x260] sm:$0xf]  ;;  %243 = vst [vmem:[%s1539_s25 + $0x90] sm:$0xf] %v242_v36  ;;  %245 = vst [vmem:[%s1539_s25 + $0x94] sm:$0xf] %v244_v37 }
  0x38   : > { %247 = vst [vmem:[%s1539_s25 + $0x98] sm:$0xf] %v246_v38  ;;  %v248_v39 = vld [vmem:[%s1534_s24 + $0x270] sm:$0xf]  ;;  %v250_v40 = vld [vmem:[%s1534_s24 + $0x280] sm:$0xf] }
  0x39   : > { %v252_v41 = vld [vmem:[%s1534_s24 + $0x290] sm:$0xf]  ;;  %249 = vst [vmem:[%s1539_s25 + $0x9c] sm:$0xf] %v248_v39  ;;  %251 = vst [vmem:[%s1539_s25 + $0xa0] sm:$0xf] %v250_v40 }
  0x3a   : > { %253 = vst [vmem:[%s1539_s25 + $0xa4] sm:$0xf] %v252_v41  ;;  %v254_v42 = vld [vmem:[%s1534_s24 + $0x2a0] sm:$0xf]  ;;  %v256_v43 = vld [vmem:[%s1534_s24 + $0x2b0] sm:$0xf] }
  0x3b   : > { %v258_v44 = vld [vmem:[%s1534_s24 + $0x2c0] sm:$0xf]  ;;  %255 = vst [vmem:[%s1539_s25 + $0xa8] sm:$0xf] %v254_v42  ;;  %257 = vst [vmem:[%s1539_s25 + $0xac] sm:$0xf] %v256_v43 }
  0x3c   : > { %259 = vst [vmem:[%s1539_s25 + $0xb0] sm:$0xf] %v258_v44  ;;  %v260_v45 = vld [vmem:[%s1534_s24 + $0x2d0] sm:$0xf]  ;;  %v262_v46 = vld [vmem:[%s1534_s24 + $0x2e0] sm:$0xf] }
  0x3d   : > { %v264_v47 = vld [vmem:[%s1534_s24 + $0x2f0] sm:$0xf]  ;;  %261 = vst [vmem:[%s1539_s25 + $0xb4] sm:$0xf] %v260_v45  ;;  %263 = vst [vmem:[%s1539_s25 + $0xb8] sm:$0xf] %v262_v46 }
  0x3e   : > { %265 = vst [vmem:[%s1539_s25 + $0xbc] sm:$0xf] %v264_v47  ;;  %v266_v48 = vld [vmem:[%s1534_s24 + $0x300] sm:$0xf]  ;;  %v268_v49 = vld [vmem:[%s1534_s24 + $0x310] sm:$0xf] }
  0x3f   : > { %v270_v50 = vld [vmem:[%s1534_s24 + $0x320] sm:$0xf]  ;;  %267 = vst [vmem:[%s1539_s25 + $0xc0] sm:$0xf] %v266_v48  ;;  %269 = vst [vmem:[%s1539_s25 + $0xc4] sm:$0xf] %v268_v49 }
  0x40   : > { %271 = vst [vmem:[%s1539_s25 + $0xc8] sm:$0xf] %v270_v50  ;;  %v272_v51 = vld [vmem:[%s1534_s24 + $0x330] sm:$0xf]  ;;  %v274_v52 = vld [vmem:[%s1534_s24 + $0x340] sm:$0xf] }
  0x41   : > { %v276_v53 = vld [vmem:[%s1534_s24 + $0x350] sm:$0xf]  ;;  %273 = vst [vmem:[%s1539_s25 + $0xcc] sm:$0xf] %v272_v51  ;;  %275 = vst [vmem:[%s1539_s25 + $0xd0] sm:$0xf] %v274_v52 }
  0x42   : > { %277 = vst [vmem:[%s1539_s25 + $0xd4] sm:$0xf] %v276_v53  ;;  %v278_v54 = vld [vmem:[%s1534_s24 + $0x360] sm:$0xf]  ;;  %v280_v55 = vld [vmem:[%s1534_s24 + $0x370] sm:$0xf] }
  0x43   : > { %v282_v56 = vld [vmem:[%s1534_s24 + $0x380] sm:$0xf]  ;;  %279 = vst [vmem:[%s1539_s25 + $0xd8] sm:$0xf] %v278_v54  ;;  %281 = vst [vmem:[%s1539_s25 + $0xdc] sm:$0xf] %v280_v55 }
  0x44   : > { %283 = vst [vmem:[%s1539_s25 + $0xe0] sm:$0xf] %v282_v56  ;;  %v284_v57 = vld [vmem:[%s1534_s24 + $0x390] sm:$0xf]  ;;  %v286_v58 = vld [vmem:[%s1534_s24 + $0x3a0] sm:$0xf] }
  0x45   : > { %v288_v59 = vld [vmem:[%s1534_s24 + $0x3b0] sm:$0xf]  ;;  %285 = vst [vmem:[%s1539_s25 + $0xe4] sm:$0xf] %v284_v57  ;;  %287 = vst [vmem:[%s1539_s25 + $0xe8] sm:$0xf] %v286_v58 }
  0x46   : > { %289 = vst [vmem:[%s1539_s25 + $0xec] sm:$0xf] %v288_v59  ;;  %v290_v60 = vld [vmem:[%s1534_s24 + $0x3c0] sm:$0xf]  ;;  %v292_v61 = vld [vmem:[%s1534_s24 + $0x3d0] sm:$0xf] }
  0x47   : > { %v294_v62 = vld [vmem:[%s1534_s24 + $0x3e0] sm:$0xf]  ;;  %291 = vst [vmem:[%s1539_s25 + $0xf0] sm:$0xf] %v290_v60  ;;  %293 = vst [vmem:[%s1539_s25 + $0xf4] sm:$0xf] %v292_v61 }
  0x48   : > { %295 = vst [vmem:[%s1539_s25 + $0xf8] sm:$0xf] %v294_v62  ;;  %v296_v63 = vld [vmem:[%s1534_s24 + $0x3f0] sm:$0xf] }
  0x49   : > { %297 = vst [vmem:[%s1539_s25 + $0xfc] sm:$0xf] %v296_v63 }
  0x4a PF: > { %p1109_p11 = scmp.ge.s32.totalorder %s1424_s20, 1  ;;  %p453_p12 = scmp.lt.s32.totalorder %s1424_s20, 37 }
  0x4c   : > { %p454_p13 = pnand %p1109_p11, %p453_p12 }
  0x4d   : > { %s460_s26 = sand.u32 (!%p454_p13), 1, %s1400_s14   ;;  %s482_s27 = sand.u32 (!%p454_p13), 1, %s1392_s12  }
  0x4e   : > { %457 = sbr.rel (%p454_p13) target bundleno = 382 (0x17e), region = 69  ;;  %s1110_s28 = sshll.u32 (!%p454_p13), %s460_s26, 8 }
  0x4f   : > { %s1111_s29 = sshll.u32 (!%p454_p13), %s482_s27, 4  ;;  %p485_p0 = scmp.lt.s32.totalorder (!%p454_p13), %s1412_s17, 3 }
  0x50   : > { %s1678_s10 = scalar_lea.vmem (!%p454_p13), [#allocation3], %s1110_s28  ;;  %s1680_s11 = scalar_lea.vmem (!%p454_p13), [#allocation4], %s1111_s29 }
  0x51   : > { %p1112_p1 = scmp.ne.s32.totalorder (!%p454_p13), %s1408_s16, 0 }
  0x55   : > { %s1672_s6 = scalar_select %p485_p0, %s1412_s17, 3 }
  0x56   : > { %492 = sbr.rel (%p1112_p1) target bundleno = 93 (0x5d), region = 77  ;;  %v1426_v0 = vmov (!%p1112_p1), 0.0  }
  0x57   : > { %s487_s9 = scalar_lea.vmem %s1766_s2, %s1672_s6  ;;  %493 = vst [vmem:[#allocation2] sm:$0xff] (!%p1112_p1), %v1426_v0  ;;  %494 = vst [vmem:[#allocation2 + $0x8] sm:$0xff] (!%p1112_p1), %v1426_v0 }
  0x58   : > { %495 = vst [vmem:[#allocation2 + $0x10] sm:$0xff] (!%p1112_p1), %v1426_v0  ;;  %496 = vst [vmem:[#allocation2 + $0x18] sm:$0xff] (!%p1112_p1), %v1426_v0 }
  0x5d PF: > { %v1310_v1 = vld [vmem:[%s1678_s10 + $0x40] sm:$0xff]   ;;  %v1314_v5 = vld [vmem:[%s1678_s10 + $0x48] sm:$0xff]   ;;  %v1318_v9 = vld [vmem:[%s1678_s10 + $0x50] sm:$0xff]   ;;  %s1165_s12 = sshll.u32 %s1408_s16, 6  ;;  %p1155_p2 = scmp.ne.s32.totalorder %s1408_s16, 8 }
  0x5e   : > { %v1311_v2 = vld [vmem:[%s1678_s10 + $0xc0] sm:$0xff]   ;;  %1181 = vmatprep.subr.bf16.mxu0 %v1310_v1  ;;  %v1315_v6 = vld [vmem:[%s1678_s10 + $0xc8] sm:$0xff]   ;;  %v1319_v10 = vld [vmem:[%s1678_s10 + $0xd0] sm:$0xff]   ;;  %s503_s24 = scalar_lea.vmem %s1764_s0, %s1165_s12 }
  0x5f   : > { %v1312_v3 = vld [vmem:[%s1678_s10] sm:$0xff]   ;;  %1209 = vmatprep.subr.bf16.mxu1 %v1311_v2  ;;  %v1316_v7 = vld [vmem:[%s1678_s10 + $0x8] sm:$0xff]   ;;  %v1320_v11 = vld [vmem:[%s1678_s10 + $0x10] sm:$0xff]  }
  0x60   : > { %v1313_v4 = vld [vmem:[%s1678_s10 + $0x80] sm:$0xff]   ;;  %1182 = vmatpush3.bf16.msra.mxu0 %v1312_v3  ;;  %v1317_v8 = vld [vmem:[%s1678_s10 + $0x88] sm:$0xff]   ;;  %v1321_v12 = vld [vmem:[%s1678_s10 + $0x90] sm:$0xff]  }
  0x61   : > { %1210 = vmatpush3.bf16.msra.mxu1 %v1313_v4  ;;  %1183 = vmatprep.subr.bf16.mxu0 %v1314_v5  ;;  %v1322_v13 = vld [vmem:[%s1678_s10 + $0x58] sm:$0xff]   ;;  %v1326_v17 = vld [vmem:[%s1678_s10 + $0x60] sm:$0xff]   ;;  %v1330_v21 = vld [vmem:[%s1678_s10 + $0x68] sm:$0xff]  }
  0x62   : > { %1211 = vmatprep.subr.bf16.mxu1 %v1315_v6  ;;  %v1323_v14 = vld [vmem:[%s1678_s10 + $0xd8] sm:$0xff]   ;;  %v1327_v18 = vld [vmem:[%s1678_s10 + $0xe0] sm:$0xff]   ;;  %v1331_v22 = vld [vmem:[%s1678_s10 + $0xe8] sm:$0xff]  }
  0x63   : > { %v1324_v15 = vld [vmem:[%s1678_s10 + $0x18] sm:$0xff]   ;;  %v1328_v19 = vld [vmem:[%s1678_s10 + $0x20] sm:$0xff]   ;;  %v1332_v23 = vld [vmem:[%s1678_s10 + $0x28] sm:$0xff]  }
  0x64   : > { %1184 = vmatpush3.bf16.msra.mxu0 %v1316_v7  ;;  %v1325_v16 = vld [vmem:[%s1678_s10 + $0x98] sm:$0xff]   ;;  %v1329_v20 = vld [vmem:[%s1678_s10 + $0xa0] sm:$0xff]   ;;  %v1333_v24 = vld [vmem:[%s1678_s10 + $0xa8] sm:$0xff]  }
  0x65   : > { %1212 = vmatpush3.bf16.msra.mxu1 %v1317_v8  ;;  %1185 = vmatprep.subr.bf16.mxu0 %v1318_v9  ;;  %v1334_v25 = vld [vmem:[%s1678_s10 + $0x70] sm:$0xff]   ;;  %v1338_v29 = vld [vmem:[%s1678_s10 + $0x78] sm:$0xff]   ;;  %v497_v50 = vld [vmem:[#allocation2] sm:$0xff] }
  0x66   : > { %1213 = vmatprep.subr.bf16.mxu1 %v1319_v10  ;;  %v1335_v26 = vld [vmem:[%s1678_s10 + $0xf0] sm:$0xff]   ;;  %v1339_v30 = vld [vmem:[%s1678_s10 + $0xf8] sm:$0xff]   ;;  %v498_v55 = vld [vmem:[#allocation2 + $0x8] sm:$0xff] }
  0x67   : > { %v1336_v27 = vld [vmem:[%s1678_s10 + $0x30] sm:$0xff]   ;;  %v1340_v31 = vld [vmem:[%s1678_s10 + $0x38] sm:$0xff]  }
  0x68   : > { %1186 = vmatpush3.bf16.msra.mxu0 %v1320_v11  ;;  %v1337_v28 = vld [vmem:[%s1678_s10 + $0xb0] sm:$0xff]   ;;  %v1341_v32 = vld [vmem:[%s1678_s10 + $0xb8] sm:$0xff]  }
  0x69   : > { %1214 = vmatpush3.bf16.msra.mxu1 %v1321_v12  ;;  %1187 = vmatprep.subr.bf16.mxu0 %v1322_v13  ;;  %v1342_v33 = vld [vmem:[%s503_s24] ss:$16 sps:$4 sm:$0xff]   ;;  %v1344_v34 = vld [vmem:[%s503_s24 + $0x4] ss:$16 sps:$4 sm:$0xff]   ;;  %v1345_v35 = vld [vmem:[%s503_s24 + $0x8] ss:$16 sps:$4 sm:$0xff]  }
  0x6a   : > { %1215 = vmatprep.subr.bf16.mxu1 %v1323_v14  ;;  %v1347_v36 = vld [vmem:[%s503_s24 + $0xc] ss:$16 sps:$4 sm:$0xff]   ;;  %840 = vmatprep.mubr.bf16.mxu0 %v1344_v34  ;;  %v1348_v37 = vld [vmem:[%s503_s24 + $0x24] ss:$16 sps:$4 sm:$0xff]   ;;  %v1352_v39 = vld [vmem:[%s503_s24 + $0x20] ss:$16 sps:$4 sm:$0xff]  }
  0x6b   : > { %889 = vmatprep.mubr.bf16.mxu1 %v1347_v36  ;;  %v1350_v38 = vld [vmem:[%s503_s24 + $0x2c] ss:$16 sps:$4 sm:$0xff]   ;;  %v1353_v40 = vld [vmem:[%s503_s24 + $0x28] ss:$16 sps:$4 sm:$0xff]   ;;  %v499_v4 = vld [vmem:[#allocation2 + $0x10] sm:$0xff] }
  0x6c   : > { %1188 = vmatpush3.bf16.msra.mxu0 %v1324_v15  ;;  %v500_v9 = vld [vmem:[#allocation2 + $0x18] sm:$0xff]  ;;  %v1156_v15 = vld [vmem:[%s487_s9] ss:$0 sm:$0xff] (!%p1155_p2) }
  0x6d   : > { %1216 = vmatpush3.bf16.msra.mxu1 %v1325_v16  ;;  %1189 = vmatprep.subr.bf16.mxu0 %v1326_v17 }
  0x6e   : > { %1217 = vmatprep.subr.bf16.mxu1 %v1327_v18 }
  0x70   : > { %1190 = vmatpush3.bf16.msra.mxu0 %v1328_v19 }
  0x71   : > { %1218 = vmatpush3.bf16.msra.mxu1 %v1329_v20  ;;  %1191 = vmatprep.subr.bf16.mxu0 %v1330_v21 }
  0x72   : > { %1219 = vmatprep.subr.bf16.mxu1 %v1331_v22 }
  0x74   : > { %1192 = vmatpush3.bf16.msra.mxu0 %v1332_v23 }
  0x75   : > { %1220 = vmatpush3.bf16.msra.mxu1 %v1333_v24  ;;  %1193 = vmatprep.subr.bf16.mxu0 %v1334_v25 }
  0x76   : > { %1221 = vmatprep.subr.bf16.mxu1 %v1335_v26 }
  0x78   : > { %1194 = vmatpush3.bf16.msra.mxu0 %v1336_v27 }
  0x79   : > { %1222 = vmatpush3.bf16.msra.mxu1 %v1337_v28  ;;  %1195 = vmatprep.subr.bf16.mxu0 %v1338_v29 }
  0x7a   : > { %1223 = vmatprep.subr.bf16.mxu1 %v1339_v30 }
  0x7c   : > { %1196 = vmatpush3.bf16.msra.mxu0 %v1340_v31 }
  0x7d   : > { %1224 = vmatpush3.bf16.msra.mxu1 %v1341_v32 }
  0x7f   : > { %841 = vmatmul.mubr.bf16.vlgmr.msra.gmra.mrb[0].mxu0 %v1342_v33 }
  0x80   : > { %890 = vmatmul.mubr.bf16.vlgmr.msra.gmra.mrb[0].mxu1 %v1345_v35  ;;  %848 = vmatprep.mubr.bf16.mxu0 %v1348_v37 }
  0x81   : > { %897 = vmatprep.mubr.bf16.mxu1 %v1350_v38 }
  0x87   : > { %849 = vmatmul.mubr.bf16.gmra.mrb[4].mxu0 %v1352_v39 }
  0x88   : > { %898 = vmatmul.mubr.bf16.gmra.mrb[4].mxu1 %v1353_v40 }
 0x152   : > { %v1197_v41 = vpop.f32.mrb[0].mxu0 }
 0x153   : > { %v1225_v42 = vpop.f32.mrb[0].mxu1  ;;  %v1198_v43 = vpop.f32.mrb[1].mxu0 }
 0x154   : > { %v1199_v44 = vadd.f32 %v1198_v43, %v1197_v41  ;;  %v1226_v45 = vpop.f32.mrb[1].mxu1  ;;  %v1200_v46 = vpop.f32.mrb[2].mxu0 }
 0x155   : > { %v1227_v47 = vadd.f32 %v1226_v45, %v1225_v42  ;;  %v1228_v48 = vpop.f32.mrb[2].mxu1  ;;  %v1201_v49 = vpop.f32.mrb[3].mxu0 }
 0x156   : > { %v1202_v51 = vadd.f32 %v1201_v49, %v1200_v46  ;;  %v1229_v52 = vpop.f32.mrb[3].mxu1 }
 0x157   : > { %v892_v53 = vadd.f32 %v1227_v47, %v1199_v44  ;;  %v1230_v54 = vadd.f32 %v1229_v52, %v1228_v48 }
 0x159   : > { %v906_v56 = vadd.f32 %v892_v53, %v497_v50  ;;  %v895_v57 = vadd.f32 %v1230_v54, %v1202_v51 }
 0x15a   : > { %v1203_v58 = vpop.f32.mrb[4].mxu0 }
 0x15b   : > { %910 = vst [vmem:[#allocation2] sm:$0xff] %v906_v56  ;;  %v907_v59 = vadd.f32 %v895_v57, %v498_v55  ;;  %v1231_v60 = vpop.f32.mrb[4].mxu1  ;;  %v1204_v61 = vpop.f32.mrb[5].mxu0 }
 0x15c   : > { %v1205_v62 = vadd.f32 %v1204_v61, %v1203_v58  ;;  %v1232_v63 = vpop.f32.mrb[5].mxu1  ;;  %v1206_v0 = vpop.f32.mrb[6].mxu0 }
 0x15d   : > { %911 = vst [vmem:[#allocation2 + $0x8] sm:$0xff] %v907_v59  ;;  %v1233_v1 = vadd.f32 %v1232_v63, %v1231_v60  ;;  %v1234_v2 = vpop.f32.mrb[6].mxu1  ;;  %v1207_v3 = vpop.f32.mrb[7].mxu0 }
 0x15e   : > { %v1208_v5 = vadd.f32 %v1207_v3, %v1206_v0  ;;  %v1235_v6 = vpop.f32.mrb[7].mxu1 }
 0x15f   : > { %v900_v7 = vadd.f32 %v1233_v1, %v1205_v62  ;;  %v1236_v8 = vadd.f32 %v1235_v6, %v1234_v2  ;;  %917 = sbr.rel (%p1155_p2) target bundleno = 374 (0x176), region = 81 }
 0x161   : > { %v908_v10 = vadd.f32 %v900_v7, %v499_v4  ;;  %v903_v11 = vadd.f32 %v1236_v8, %v1208_v5 }
 0x162   : > { %v918_v13 = vld [vmem:[#allocation2] sm:$0xff] (!%p1155_p2) }
 0x163   : > { %912 = vst [vmem:[#allocation2 + $0x10] sm:$0xff] %v908_v10  ;;  %v909_v12 = vadd.f32 %v903_v11, %v500_v9  ;;  %v929_v16 = vadd.f32 (!%p1155_p2), %v1156_v15, %v918_v13 }
 0x164   : > { %v919_v14 = vld [vmem:[#allocation2 + $0x8] sm:$0xff] (!%p1155_p2) }
 0x165   : > { %913 = vst [vmem:[#allocation2 + $0x18] sm:$0xff] %v909_v12  ;;  %v930_v17 = vadd.f32 (!%p1155_p2), %v1156_v15, %v919_v14  ;;  %v933_v22 = vmul.f32 (!%p1155_p2), 0.2, %v929_v16 }
 0x167   : > { %v934_v23 = vmul.f32 0.2, %v930_v17  ;;  %v937_v26 = vmax.f32 %v929_v16, %v933_v22 }
 0x169   : > { %v938_v27 = vmax.f32 %v930_v17, %v934_v23 }
 0x16a   : > { %v920_v18 = vld [vmem:[#allocation2 + $0x10] sm:$0xff] }
 0x16b   : > { %v931_v20 = vadd.f32 %v1156_v15, %v920_v18  ;;  %v1173_v30 = vpack.c.bf16 %v938_v27, %v937_v26 }
 0x16c   : > { %v921_v19 = vld [vmem:[#allocation2 + $0x18] sm:$0xff] }
 0x16d   : > { %v932_v21 = vadd.f32 %v1156_v15, %v921_v19  ;;  %v935_v24 = vmul.f32 0.2, %v931_v20  ;;  %1174 = vst [vmem:[%s1680_s11] sm:$0xff] %v1173_v30  }
 0x16f   : > { %v936_v25 = vmul.f32 0.2, %v932_v21  ;;  %v939_v28 = vmax.f32 %v931_v20, %v935_v24 }
 0x171   : > { %v940_v29 = vmax.f32 %v932_v21, %v936_v25 }
 0x173   : > { %v1178_v31 = vpack.c.bf16 %v940_v29, %v939_v28 }
 0x175   : > { %1180 = vst [vmem:[%s1680_s11 + $0x8] sm:$0xff] %v1178_v31  }
 0x176 PF: > { %967 = sbr.rel (!%p1515_p9) target bundleno = 382 (0x17e), region = 85  ;;  %s1162_s16 = sshll.u32 (%p1515_p9), %s1412_s17, 2  ;;  %v985_v32 = vld [vmem:[%s1680_s11] sm:$0xf] (%p1515_p9)  ;;  %v987_v33 = vld [vmem:[%s1680_s11 + $0x4] sm:$0xf] (%p1515_p9) }
 0x177   : > { %s969_s29 = scalar_lea.vmem (%p1515_p9), %s1767_s3, %s1162_s16 }
 0x178   : > { %986 = vst [vmem:[%s969_s29] sm:$0xf] (%p1515_p9), %v985_v32  ;;  %988 = vst [vmem:[%s969_s29 + $0x10] sm:$0xf] (%p1515_p9), %v987_v33 }
 0x17c   : > { %v989_v34 = vld [vmem:[%s1680_s11 + $0x8] sm:$0xf] (%p1515_p9)  ;;  %v991_v35 = vld [vmem:[%s1680_s11 + $0xc] sm:$0xf] (%p1515_p9) }
 0x17d   : > { %990 = vst [vmem:[%s969_s29 + $0x20] sm:$0xf] %v989_v34  ;;  %992 = vst [vmem:[%s969_s29 + $0x30] sm:$0xf] %v991_v35 }
 0x17e PF: > { %s13_s20 = sadd.s32 1, %s1424_s20   ;;  %s1770_s12 = smov %s1396_s13 }
 0x17f   : > { %p10_p3 = scmp.ge.s32.totalorder %s13_s20, 38   ;;  %s1771_s13 = smov %s1520_s4 }
 0x180   : > { %s1772_s14 = smov %s1404_s15  ;;  %s1773_s15 = smov %s1523_s5 }
 0x181   : > { %s1774_s16 = smov %s1416_s18  ;;  %s1775_s17 = smov %s1420_s19 }
 0x182   : > { %s1776_s18 = smov %s1779_s21  ;;  %s1777_s19 = smov %s1783_s22 }
 0x183   :  { %12 = sbr.rel (!%p10_p3) target bundleno = 5 (0x5), region = 161 }

// kernel: dispnet_costvolume_encoder.12
= control target key start
LH: loop header
LB: loop body
LE: loop exit
PB: predicated region body
PF: predicated region fallthrough
CT: control target
= control target key end

     0   :  { %s1224_s12 = smov 0   ;;  %s1226_s13 = smov 0   ;;  %s1500_s0 = inlined_call_operand.vmem [shape: bf16[9,8,512], index: 0, kind: input, shape index: {}]   ;;  %s1501_s1 = inlined_call_operand.vmem [shape: bf16[9,512,1024], index: 1, kind: input, shape index: {}]   ;;  %s1502_s2 = inlined_call_operand.vmem [shape: f32[1,1024], index: 2, kind: input, shape index: {}]   ;;  %s1503_s3 = inlined_call_operand.vmem [shape: bf16[8,1024], index: 3, kind: output, shape index: {}]  }
   0x1   :  { %s1228_s14 = smov 0   ;;  %s1230_s15 = smov 0  }
   0x2   :  { %s1232_s16 = smov 0   ;;  %s1234_s17 = smov 0  }
   0x3   :  { %s1236_s18 = smov 0  }
   0x4 LB: > { %s22_s19 = sadd.s32 1, %s1193_s16  ;;  %s25_s20 = sadd.s32 1, %s1197_s17  ;;  %s1201_s18 = sphi %s1236_s18, %s13_s18   ;;  %s1197_s17 = sphi %s1234_s17, %s1509_s17   ;;  %s1193_s16 = sphi %s1232_s16, %s1508_s16   ;;  %s1189_s15 = sphi %s1230_s15, %s1507_s15   ;;  %s1185_s14 = sphi %s1228_s14, %s1506_s14   ;;  %s1181_s13 = sphi %s1226_s13, %s1505_s13   ;;  %s1177_s12 = sphi %s1224_s12, %s1504_s12  }
   0x5   : > { %p23_p0 = scmp.ge.s32.totalorder %s22_s19, 9  ;;  %p62_p1 = scmp.ne.s32.totalorder %s1181_s13, %s1177_s12 }
   0x6   : > { %p63_p2 = scmp.eq.s32.totalorder %s1201_s18, 0  ;;  %s55_s24 = sadd.s32 1, %s1181_s13 }
   0x7   : > { %s1511_s19 = smov (%p23_p0, %s22_s19), 0  ;;  %s1513_s20 = smov (!%p23_p0, %s25_s20), %s1197_s17 }
   0x8   : > { %p64_p3 = por %p63_p2, %p62_p1  ;;  %p27_p4 = scmp.ge.s32.totalorder %s1513_s20, 8 }
   0x9   : > { %s50_s21 = ssub.s32 %s1193_s16, %s1511_s19  ;;  %p959_p6 = scmp.ge.s32.totalorder %s1201_s18, 72 }
   0xa   : > { %s1515_s20 = smov (%p27_p4, %s1513_s20), 0 }
   0xb   : > { %s51_s22 = ssub.s32 %s1197_s17, %s1515_s20  ;;  %143 = sbr.rel (%p959_p6) target bundleno = 88 (0x58), region = 20 }
   0xc   : > { %s52_s23 = sor.u32 %s51_s22, %s50_s21 }
   0xd   : > { %p53_p5 = scmp.eq.s32.totalorder %s52_s23, 0 }
   0xf   : > { %s1275_s25 = scalar_select %p53_p5, %s1181_s13, %s55_s24  }
  0x12   : > { %146 = sbr.rel (!%p64_p3) target bundleno = 88 (0x58), region = 24  ;;  %s148_s26 = sand.u32 (%p64_p3), 1, %s1181_s13  }
  0x13   : > { %s961_s27 = sshll.u32 (%p64_p3), %s1193_s16, 9  ;;  %s960_s28 = sshll.u32 (%p64_p3), %s148_s26, 8 }
  0x14   : > { %s152_s29 = sadd.s32 (%p64_p3), %s1197_s17, %s961_s27  ;;  %s1289_s7 = scalar_lea.vmem (%p64_p3), [#allocation3], %s960_s28 }
  0x15   : > { %s962_s30 = sshll.u32 (%p64_p3), %s152_s29, 2 }
  0x16   : > { %s1284_s6 = scalar_lea.vmem (%p64_p3), %s1501_s1, %s962_s30 }
  0x17   : > { %v170_v0 = vld [vmem:[%s1284_s6] sm:$0xf] (%p64_p3) }
  0x18   : > { %v172_v1 = vld [vmem:[%s1284_s6 + $0x20] sm:$0xf] (%p64_p3)  ;;  %171 = vst [vmem:[%s1289_s7] sm:$0xf] (%p64_p3), %v170_v0 }
  0x19   : > { %v174_v2 = vld [vmem:[%s1284_s6 + $0x40] sm:$0xf]  ;;  %173 = vst [vmem:[%s1289_s7 + $0x4] sm:$0xf] %v172_v1 }
  0x1a   : > { %175 = vst [vmem:[%s1289_s7 + $0x8] sm:$0xf] %v174_v2  ;;  %v176_v3 = vld [vmem:[%s1284_s6 + $0x60] sm:$0xf] }
  0x1b   : > { %v178_v4 = vld [vmem:[%s1284_s6 + $0x80] sm:$0xf]  ;;  %177 = vst [vmem:[%s1289_s7 + $0xc] sm:$0xf] %v176_v3 }
  0x1c   : > { %v180_v5 = vld [vmem:[%s1284_s6 + $0xa0] sm:$0xf]  ;;  %179 = vst [vmem:[%s1289_s7 + $0x10] sm:$0xf] %v178_v4 }
  0x1d   : > { %181 = vst [vmem:[%s1289_s7 + $0x14] sm:$0xf] %v180_v5  ;;  %v182_v6 = vld [vmem:[%s1284_s6 + $0xc0] sm:$0xf] }
  0x1e   : > { %v184_v7 = vld [vmem:[%s1284_s6 + $0xe0] sm:$0xf]  ;;  %183 = vst [vmem:[%s1289_s7 + $0x18] sm:$0xf] %v182_v6 }
  0x1f   : > { %v186_v8 = vld [vmem:[%s1284_s6 + $0x100] sm:$0xf]  ;;  %185 = vst [vmem:[%s1289_s7 + $0x1c] sm:$0xf] %v184_v7 }
  0x20   : > { %187 = vst [vmem:[%s1289_s7 + $0x20] sm:$0xf] %v186_v8  ;;  %v188_v9 = vld [vmem:[%s1284_s6 + $0x120] sm:$0xf] }
  0x21   : > { %v190_v10 = vld [vmem:[%s1284_s6 + $0x140] sm:$0xf]  ;;  %189 = vst [vmem:[%s1289_s7 + $0x24] sm:$0xf] %v188_v9 }
  0x22   : > { %v192_v11 = vld [vmem:[%s1284_s6 + $0x160] sm:$0xf]  ;;  %191 = vst [vmem:[%s1289_s7 + $0x28] sm:$0xf] %v190_v10 }
  0x23   : > { %193 = vst [vmem:[%s1289_s7 + $0x2c] sm:$0xf] %v192_v11  ;;  %v194_v12 = vld [vmem:[%s1284_s6 + $0x180] sm:$0xf] }
  0x24   : > { %v196_v13 = vld [vmem:[%s1284_s6 + $0x1a0] sm:$0xf]  ;;  %195 = vst [vmem:[%s1289_s7 + $0x30] sm:$0xf] %v194_v12 }
  0x25   : > { %v198_v14 = vld [vmem:[%s1284_s6 + $0x1c0] sm:$0xf]  ;;  %197 = vst [vmem:[%s1289_s7 + $0x34] sm:$0xf] %v196_v13 }
  0x26   : > { %199 = vst [vmem:[%s1289_s7 + $0x38] sm:$0xf] %v198_v14  ;;  %v200_v15 = vld [vmem:[%s1284_s6 + $0x1e0] sm:$0xf] }
  0x27   : > { %v202_v16 = vld [vmem:[%s1284_s6 + $0x200] sm:$0xf]  ;;  %201 = vst [vmem:[%s1289_s7 + $0x3c] sm:$0xf] %v200_v15 }
  0x28   : > { %v204_v17 = vld [vmem:[%s1284_s6 + $0x220] sm:$0xf]  ;;  %203 = vst [vmem:[%s1289_s7 + $0x40] sm:$0xf] %v202_v16 }
  0x29   : > { %205 = vst [vmem:[%s1289_s7 + $0x44] sm:$0xf] %v204_v17  ;;  %v206_v18 = vld [vmem:[%s1284_s6 + $0x240] sm:$0xf] }
  0x2a   : > { %v208_v19 = vld [vmem:[%s1284_s6 + $0x260] sm:$0xf]  ;;  %207 = vst [vmem:[%s1289_s7 + $0x48] sm:$0xf] %v206_v18 }
  0x2b   : > { %v210_v20 = vld [vmem:[%s1284_s6 + $0x280] sm:$0xf]  ;;  %209 = vst [vmem:[%s1289_s7 + $0x4c] sm:$0xf] %v208_v19 }
  0x2c   : > { %211 = vst [vmem:[%s1289_s7 + $0x50] sm:$0xf] %v210_v20  ;;  %v212_v21 = vld [vmem:[%s1284_s6 + $0x2a0] sm:$0xf] }
  0x2d   : > { %v214_v22 = vld [vmem:[%s1284_s6 + $0x2c0] sm:$0xf]  ;;  %213 = vst [vmem:[%s1289_s7 + $0x54] sm:$0xf] %v212_v21 }
  0x2e   : > { %v216_v23 = vld [vmem:[%s1284_s6 + $0x2e0] sm:$0xf]  ;;  %215 = vst [vmem:[%s1289_s7 + $0x58] sm:$0xf] %v214_v22 }
  0x2f   : > { %217 = vst [vmem:[%s1289_s7 + $0x5c] sm:$0xf] %v216_v23  ;;  %v218_v24 = vld [vmem:[%s1284_s6 + $0x300] sm:$0xf] }
  0x30   : > { %v220_v25 = vld [vmem:[%s1284_s6 + $0x320] sm:$0xf]  ;;  %219 = vst [vmem:[%s1289_s7 + $0x60] sm:$0xf] %v218_v24 }
  0x31   : > { %v222_v26 = vld [vmem:[%s1284_s6 + $0x340] sm:$0xf]  ;;  %221 = vst [vmem:[%s1289_s7 + $0x64] sm:$0xf] %v220_v25 }
  0x32   : > { %223 = vst [vmem:[%s1289_s7 + $0x68] sm:$0xf] %v222_v26  ;;  %v224_v27 = vld [vmem:[%s1284_s6 + $0x360] sm:$0xf] }
  0x33   : > { %v226_v28 = vld [vmem:[%s1284_s6 + $0x380] sm:$0xf]  ;;  %225 = vst [vmem:[%s1289_s7 + $0x6c] sm:$0xf] %v224_v27 }
  0x34   : > { %v228_v29 = vld [vmem:[%s1284_s6 + $0x3a0] sm:$0xf]  ;;  %227 = vst [vmem:[%s1289_s7 + $0x70] sm:$0xf] %v226_v28 }
  0x35   : > { %229 = vst [vmem:[%s1289_s7 + $0x74] sm:$0xf] %v228_v29  ;;  %v230_v30 = vld [vmem:[%s1284_s6 + $0x3c0] sm:$0xf] }
  0x36   : > { %v232_v31 = vld [vmem:[%s1284_s6 + $0x3e0] sm:$0xf]  ;;  %231 = vst [vmem:[%s1289_s7 + $0x78] sm:$0xf] %v230_v30 }
  0x37   : > { %v234_v32 = vld [vmem:[%s1284_s6 + $0x400] sm:$0xf]  ;;  %233 = vst [vmem:[%s1289_s7 + $0x7c] sm:$0xf] %v232_v31 }
  0x38   : > { %235 = vst [vmem:[%s1289_s7 + $0x80] sm:$0xf] %v234_v32  ;;  %v236_v33 = vld [vmem:[%s1284_s6 + $0x420] sm:$0xf] }
  0x39   : > { %v238_v34 = vld [vmem:[%s1284_s6 + $0x440] sm:$0xf]  ;;  %237 = vst [vmem:[%s1289_s7 + $0x84] sm:$0xf] %v236_v33 }
  0x3a   : > { %v240_v35 = vld [vmem:[%s1284_s6 + $0x460] sm:$0xf]  ;;  %239 = vst [vmem:[%s1289_s7 + $0x88] sm:$0xf] %v238_v34 }
  0x3b   : > { %241 = vst [vmem:[%s1289_s7 + $0x8c] sm:$0xf] %v240_v35  ;;  %v242_v36 = vld [vmem:[%s1284_s6 + $0x480] sm:$0xf] }
  0x3c   : > { %v244_v37 = vld [vmem:[%s1284_s6 + $0x4a0] sm:$0xf]  ;;  %243 = vst [vmem:[%s1289_s7 + $0x90] sm:$0xf] %v242_v36 }
  0x3d   : > { %v246_v38 = vld [vmem:[%s1284_s6 + $0x4c0] sm:$0xf]  ;;  %245 = vst [vmem:[%s1289_s7 + $0x94] sm:$0xf] %v244_v37 }
  0x3e   : > { %247 = vst [vmem:[%s1289_s7 + $0x98] sm:$0xf] %v246_v38  ;;  %v248_v39 = vld [vmem:[%s1284_s6 + $0x4e0] sm:$0xf] }
  0x3f   : > { %v250_v40 = vld [vmem:[%s1284_s6 + $0x500] sm:$0xf]  ;;  %249 = vst [vmem:[%s1289_s7 + $0x9c] sm:$0xf] %v248_v39 }
  0x40   : > { %v252_v41 = vld [vmem:[%s1284_s6 + $0x520] sm:$0xf]  ;;  %251 = vst [vmem:[%s1289_s7 + $0xa0] sm:$0xf] %v250_v40 }
  0x41   : > { %253 = vst [vmem:[%s1289_s7 + $0xa4] sm:$0xf] %v252_v41  ;;  %v254_v42 = vld [vmem:[%s1284_s6 + $0x540] sm:$0xf] }
  0x42   : > { %v256_v43 = vld [vmem:[%s1284_s6 + $0x560] sm:$0xf]  ;;  %255 = vst [vmem:[%s1289_s7 + $0xa8] sm:$0xf] %v254_v42 }
  0x43   : > { %v258_v44 = vld [vmem:[%s1284_s6 + $0x580] sm:$0xf]  ;;  %257 = vst [vmem:[%s1289_s7 + $0xac] sm:$0xf] %v256_v43 }
  0x44   : > { %259 = vst [vmem:[%s1289_s7 + $0xb0] sm:$0xf] %v258_v44  ;;  %v260_v45 = vld [vmem:[%s1284_s6 + $0x5a0] sm:$0xf] }
  0x45   : > { %v262_v46 = vld [vmem:[%s1284_s6 + $0x5c0] sm:$0xf]  ;;  %261 = vst [vmem:[%s1289_s7 + $0xb4] sm:$0xf] %v260_v45 }
  0x46   : > { %v264_v47 = vld [vmem:[%s1284_s6 + $0x5e0] sm:$0xf]  ;;  %263 = vst [vmem:[%s1289_s7 + $0xb8] sm:$0xf] %v262_v46 }
  0x47   : > { %265 = vst [vmem:[%s1289_s7 + $0xbc] sm:$0xf] %v264_v47  ;;  %v266_v48 = vld [vmem:[%s1284_s6 + $0x600] sm:$0xf] }
  0x48   : > { %v268_v49 = vld [vmem:[%s1284_s6 + $0x620] sm:$0xf]  ;;  %267 = vst [vmem:[%s1289_s7 + $0xc0] sm:$0xf] %v266_v48 }
  0x49   : > { %v270_v50 = vld [vmem:[%s1284_s6 + $0x640] sm:$0xf]  ;;  %269 = vst [vmem:[%s1289_s7 + $0xc4] sm:$0xf] %v268_v49 }
  0x4a   : > { %271 = vst [vmem:[%s1289_s7 + $0xc8] sm:$0xf] %v270_v50  ;;  %v272_v51 = vld [vmem:[%s1284_s6 + $0x660] sm:$0xf] }
  0x4b   : > { %v274_v52 = vld [vmem:[%s1284_s6 + $0x680] sm:$0xf]  ;;  %273 = vst [vmem:[%s1289_s7 + $0xcc] sm:$0xf] %v272_v51 }
  0x4c   : > { %v276_v53 = vld [vmem:[%s1284_s6 + $0x6a0] sm:$0xf]  ;;  %275 = vst [vmem:[%s1289_s7 + $0xd0] sm:$0xf] %v274_v52 }
  0x4d   : > { %277 = vst [vmem:[%s1289_s7 + $0xd4] sm:$0xf] %v276_v53  ;;  %v278_v54 = vld [vmem:[%s1284_s6 + $0x6c0] sm:$0xf] }
  0x4e   : > { %v280_v55 = vld [vmem:[%s1284_s6 + $0x6e0] sm:$0xf]  ;;  %279 = vst [vmem:[%s1289_s7 + $0xd8] sm:$0xf] %v278_v54 }
  0x4f   : > { %v282_v56 = vld [vmem:[%s1284_s6 + $0x700] sm:$0xf]  ;;  %281 = vst [vmem:[%s1289_s7 + $0xdc] sm:$0xf] %v280_v55 }
  0x50   : > { %283 = vst [vmem:[%s1289_s7 + $0xe0] sm:$0xf] %v282_v56  ;;  %v284_v57 = vld [vmem:[%s1284_s6 + $0x720] sm:$0xf] }
  0x51   : > { %v286_v58 = vld [vmem:[%s1284_s6 + $0x740] sm:$0xf]  ;;  %285 = vst [vmem:[%s1289_s7 + $0xe4] sm:$0xf] %v284_v57 }
  0x52   : > { %v288_v59 = vld [vmem:[%s1284_s6 + $0x760] sm:$0xf]  ;;  %287 = vst [vmem:[%s1289_s7 + $0xe8] sm:$0xf] %v286_v58 }
  0x53   : > { %289 = vst [vmem:[%s1289_s7 + $0xec] sm:$0xf] %v288_v59  ;;  %v290_v60 = vld [vmem:[%s1284_s6 + $0x780] sm:$0xf] }
  0x54   : > { %v292_v61 = vld [vmem:[%s1284_s6 + $0x7a0] sm:$0xf]  ;;  %291 = vst [vmem:[%s1289_s7 + $0xf0] sm:$0xf] %v290_v60 }
  0x55   : > { %v294_v62 = vld [vmem:[%s1284_s6 + $0x7c0] sm:$0xf]  ;;  %293 = vst [vmem:[%s1289_s7 + $0xf4] sm:$0xf] %v292_v61 }
  0x56   : > { %295 = vst [vmem:[%s1289_s7 + $0xf8] sm:$0xf] %v294_v62  ;;  %v296_v63 = vld [vmem:[%s1284_s6 + $0x7e0] sm:$0xf] }
  0x57   : > { %297 = vst [vmem:[%s1289_s7 + $0xfc] sm:$0xf] %v296_v63 }
  0x58 PF: > { %p963_p7 = scmp.ge.s32.totalorder %s1201_s18, 1  ;;  %p453_p8 = scmp.lt.s32.totalorder %s1201_s18, 73 }
  0x5a   : > { %p454_p9 = pnand %p963_p7, %p453_p8 }
  0x5b   : > { %s460_s8 = sand.u32 (!%p454_p9), 1, %s1177_s12   ;;  %p485_p10 = scmp.lt.s32.totalorder (!%p454_p9), %s1189_s15, 7 }
  0x5c   : > { %457 = sbr.rel (%p454_p9) target bundleno = 377 (0x179), region = 69  ;;  %s964_s9 = sshll.u32 (!%p454_p9), %s460_s8, 8 }
  0x5d   : > { %s1433_s27 = scalar_lea.vmem (!%p454_p9), [#allocation3], %s964_s9  ;;  %p966_p11 = scmp.ne.s32.totalorder (!%p454_p9), %s1185_s14, 0 }
  0x63   : > { %s1517_s15 = smov (!%p485_p10, %s1189_s15), 7  ;;  %496 = sbr.rel (%p966_p11) target bundleno = 106 (0x6a), region = 77 }
  0x64   : > { %s487_s21 = scalar_lea.vmem %s1502_s2, %s1517_s15  ;;  %s965_s22 = sshll.u32 %s1517_s15, 2  ;;  %v1203_v0 = vmov (!%p966_p11), 0.0  }
  0x65   : > { %s1431_s26 = scalar_lea.vmem %s1503_s3, %s965_s22  ;;  %497 = vst [vmem:[#allocation2] sm:$0xff] (!%p966_p11), %v1203_v0 }
  0x6a PF: > { %v1111_v1 = vld [vmem:[%s1433_s27 + $0x40] sm:$0xff]   ;;  %v1115_v5 = vld [vmem:[%s1433_s27 + $0x48] sm:$0xff]   ;;  %v1119_v9 = vld [vmem:[%s1433_s27 + $0x50] sm:$0xff]   ;;  %s1009_s12 = sshll.u32 %s1185_s14, 4  ;;  %p1005_p12 = scmp.ne.s32.totalorder %s1185_s14, 8 }
  0x6b   : > { %v1112_v2 = vld [vmem:[%s1433_s27 + $0xc0] sm:$0xff]   ;;  %1010 = vmatprep.subr.bf16.mxu0 %v1111_v1  ;;  %v1116_v6 = vld [vmem:[%s1433_s27 + $0xc8] sm:$0xff]   ;;  %v1120_v10 = vld [vmem:[%s1433_s27 + $0xd0] sm:$0xff]   ;;  %s501_s30 = scalar_lea.vmem %s1500_s0, %s1009_s12 }
  0x6c   : > { %v1113_v3 = vld [vmem:[%s1433_s27] sm:$0xff]   ;;  %1032 = vmatprep.subr.bf16.mxu1 %v1112_v2  ;;  %v1117_v7 = vld [vmem:[%s1433_s27 + $0x8] sm:$0xff]   ;;  %v1121_v11 = vld [vmem:[%s1433_s27 + $0x10] sm:$0xff]  }
  0x6d   : > { %v1114_v4 = vld [vmem:[%s1433_s27 + $0x80] sm:$0xff]   ;;  %1011 = vmatpush3.bf16.msra.mxu0 %v1113_v3  ;;  %v1118_v8 = vld [vmem:[%s1433_s27 + $0x88] sm:$0xff]   ;;  %v1122_v12 = vld [vmem:[%s1433_s27 + $0x90] sm:$0xff]  }
  0x6e   : > { %1033 = vmatpush3.bf16.msra.mxu1 %v1114_v4  ;;  %1012 = vmatprep.subr.bf16.mxu0 %v1115_v5  ;;  %v1123_v13 = vld [vmem:[%s1433_s27 + $0x58] sm:$0xff]   ;;  %v1127_v17 = vld [vmem:[%s1433_s27 + $0x60] sm:$0xff]   ;;  %v1131_v21 = vld [vmem:[%s1433_s27 + $0x68] sm:$0xff]  }
  0x6f   : > { %1034 = vmatprep.subr.bf16.mxu1 %v1116_v6  ;;  %v1124_v14 = vld [vmem:[%s1433_s27 + $0xd8] sm:$0xff]   ;;  %v1128_v18 = vld [vmem:[%s1433_s27 + $0xe0] sm:$0xff]   ;;  %v1132_v22 = vld [vmem:[%s1433_s27 + $0xe8] sm:$0xff]  }
  0x70   : > { %v1125_v15 = vld [vmem:[%s1433_s27 + $0x18] sm:$0xff]   ;;  %v1129_v19 = vld [vmem:[%s1433_s27 + $0x20] sm:$0xff]   ;;  %v1133_v23 = vld [vmem:[%s1433_s27 + $0x28] sm:$0xff]  }
  0x71   : > { %1013 = vmatpush3.bf16.msra.mxu0 %v1117_v7  ;;  %v1126_v16 = vld [vmem:[%s1433_s27 + $0x98] sm:$0xff]   ;;  %v1130_v20 = vld [vmem:[%s1433_s27 + $0xa0] sm:$0xff]   ;;  %v1134_v24 = vld [vmem:[%s1433_s27 + $0xa8] sm:$0xff]  }
  0x72   : > { %1035 = vmatpush3.bf16.msra.mxu1 %v1118_v8  ;;  %1014 = vmatprep.subr.bf16.mxu0 %v1119_v9  ;;  %v1135_v25 = vld [vmem:[%s1433_s27 + $0x70] sm:$0xff]   ;;  %v1139_v29 = vld [vmem:[%s1433_s27 + $0x78] sm:$0xff]   ;;  %v503_v34 = vld [vmem:[%s501_s30 + $0x8] sm:$0xff] }
  0x73   : > { %1036 = vmatprep.subr.bf16.mxu1 %v1120_v10  ;;  %v1136_v26 = vld [vmem:[%s1433_s27 + $0xf0] sm:$0xff]   ;;  %v1140_v30 = vld [vmem:[%s1433_s27 + $0xf8] sm:$0xff]   ;;  %v971_v37 = vcombine.low %v503_v34, %v503_v34  ;;  %v972_v38 = vcombine.high %v503_v34, %v503_v34 }
  0x74   : > { %v1137_v27 = vld [vmem:[%s1433_s27 + $0x30] sm:$0xff]   ;;  %v1141_v31 = vld [vmem:[%s1433_s27 + $0x38] sm:$0xff]  }
  0x75   : > { %1015 = vmatpush3.bf16.msra.mxu0 %v1121_v11  ;;  %v1138_v28 = vld [vmem:[%s1433_s27 + $0xb0] sm:$0xff]   ;;  %v1142_v32 = vld [vmem:[%s1433_s27 + $0xb8] sm:$0xff]   ;;  %846 = vmatprep.mubr.bf16.mxu1 %v972_v38 }
  0x76   : > { %1037 = vmatpush3.bf16.msra.mxu1 %v1122_v12  ;;  %1016 = vmatprep.subr.bf16.mxu0 %v1123_v13  ;;  %v502_v33 = vld [vmem:[%s501_s30] sm:$0xff] }
  0x77   : > { %1038 = vmatprep.subr.bf16.mxu1 %v1124_v14  ;;  %v969_v35 = vcombine.low %v502_v33, %v502_v33  ;;  %v970_v36 = vcombine.high %v502_v33, %v502_v33  ;;  %v498_v47 = vld [vmem:[#allocation2] sm:$0xff] }
  0x78   : > { %v1006_v53 = vld [vmem:[%s487_s21] ss:$0 sm:$0xff] (!%p1005_p12) }
  0x79   : > { %1017 = vmatpush3.bf16.msra.mxu0 %v1125_v15  ;;  %806 = vmatprep.mubr.bf16.mxu0 %v970_v36 }
  0x7a   : > { %1039 = vmatpush3.bf16.msra.mxu1 %v1126_v16  ;;  %1018 = vmatprep.subr.bf16.mxu0 %v1127_v17 }
  0x7b   : > { %1040 = vmatprep.subr.bf16.mxu1 %v1128_v18 }
  0x7d   : > { %1019 = vmatpush3.bf16.msra.mxu0 %v1129_v19 }
  0x7e   : > { %1041 = vmatpush3.bf16.msra.mxu1 %v1130_v20  ;;  %1020 = vmatprep.subr.bf16.mxu0 %v1131_v21 }
  0x7f   : > { %1042 = vmatprep.subr.bf16.mxu1 %v1132_v22 }
  0x81   : > { %1021 = vmatpush3.bf16.msra.mxu0 %v1133_v23 }
  0x82   : > { %1043 = vmatpush3.bf16.msra.mxu1 %v1134_v24  ;;  %1022 = vmatprep.subr.bf16.mxu0 %v1135_v25 }
  0x83   : > { %1044 = vmatprep.subr.bf16.mxu1 %v1136_v26 }
  0x85   : > { %1023 = vmatpush3.bf16.msra.mxu0 %v1137_v27 }
  0x86   : > { %1045 = vmatpush3.bf16.msra.mxu1 %v1138_v28  ;;  %1024 = vmatprep.subr.bf16.mxu0 %v1139_v29 }
  0x87   : > { %1046 = vmatprep.subr.bf16.mxu1 %v1140_v30 }
  0x89   : > { %1025 = vmatpush3.bf16.msra.mxu0 %v1141_v31 }
  0x8a   : > { %1047 = vmatpush3.bf16.msra.mxu1 %v1142_v32 }
  0x8c   : > { %807 = vmatmul.mubr.bf16.vlgmr.msra.gmra.mrb[0].mxu0 %v969_v35 }
  0x8d   : > { %847 = vmatmul.mubr.bf16.vlgmr.msra.gmra.mrb[0].mxu1 %v971_v37 }
 0x15f   : > { %v1026_v39 = vpop.f32.mrb[0].mxu0 }
 0x160   : > { %v1048_v40 = vpop.f32.mrb[0].mxu1  ;;  %v1027_v41 = vpop.f32.mrb[1].mxu0 }
 0x161   : > { %v1049_v42 = vpop.f32.mrb[1].mxu1  ;;  %v1028_v43 = vadd.f32 %v1027_v41, %v1026_v39  ;;  %v1029_v45 = vpop.f32.mrb[2].mxu0 }
 0x162   : > { %v1050_v44 = vadd.f32 %v1049_v42, %v1048_v40  ;;  %v1051_v46 = vpop.f32.mrb[2].mxu1  ;;  %v1030_v48 = vpop.f32.mrb[3].mxu0  ;;  %859 = sbr.rel (%p1005_p12) target bundleno = 377 (0x179), region = 81 }
 0x163   : > { %v1052_v49 = vpop.f32.mrb[3].mxu1 }
 0x164   : > { %v849_v50 = vadd.f32 %v1050_v44, %v1028_v43 }
 0x166   : > { %v854_v51 = vadd.f32 %v849_v50, %v498_v47 }
 0x168   : > { %855 = vst [vmem:[#allocation2] sm:$0xff] %v854_v51 }
 0x16f   : > { %v860_v52 = vld [vmem:[#allocation2] sm:$0xff] }
 0x170   : > { %v868_v54 = vadd.f32 %v1006_v53, %v860_v52 }
 0x172   : > { %v869_v55 = vmul.f32 0.2, %v868_v54 }
 0x174   : > { %v870_v56 = vmax.f32 %v868_v54, %v869_v55 }
 0x176   : > { %v871_v57 = vpack.c.bf16 %v870_v56, %v870_v56 }
 0x178   : > { %872 = vst [vmem:[%s1431_s26] sm:$0xf] %v871_v57 }
 0x179 PF: > { %s13_s18 = sadd.s32 1, %s1201_s18   ;;  %s1504_s12 = smov %s1181_s13 }
 0x17a   : > { %p10_p13 = scmp.ge.s32.totalorder %s13_s18, 74   ;;  %s1505_s13 = smov %s1275_s25 }
 0x17b   : > { %s1506_s14 = smov %s1193_s16  ;;  %s1507_s15 = smov %s1197_s17 }
 0x17c   : > { %s1508_s16 = smov %s1511_s19  ;;  %s1509_s17 = smov %s1515_s20 }
 0x17d   :  { %12 = sbr.rel (!%p10_p13) target bundleno = 4 (0x4), region = 120 }

// kernel: dispnet_costvolume_encoder.13
= control target key start
LH: loop header
LB: loop body
LE: loop exit
PB: predicated region body
PF: predicated region fallthrough
CT: control target
= control target key end

     0   :  { %s1948_s12 = smov 0   ;;  %s1950_s13 = smov 0   ;;  %s2390_s0 = inlined_call_operand.vmem [shape: bf16[9,8,1024], index: 0, kind: input, shape index: {}]   ;;  %s2391_s1 = inlined_call_operand.vmem [shape: bf16[9,1024,1024], index: 1, kind: input, shape index: {}]   ;;  %s2392_s2 = inlined_call_operand.vmem [shape: f32[1,1024], index: 2, kind: input, shape index: {}]   ;;  %s2393_s3 = inlined_call_operand.vmem [shape: bf16[8,1024], index: 3, kind: output, shape index: {}]  }
   0x1   :  { %s1952_s14 = smov 0   ;;  %s1954_s15 = smov 0  }
   0x2   :  { %s1956_s16 = smov 0   ;;  %s1958_s17 = smov 0  }
   0x3   :  { %s1960_s18 = smov 0  }
   0x4 LB: > { %s22_s19 = sadd.s32 1, %s1917_s16  ;;  %s25_s20 = sadd.s32 1, %s1921_s17  ;;  %s1925_s18 = sphi %s1960_s18, %s13_s18   ;;  %s1921_s17 = sphi %s1958_s17, %s2399_s17   ;;  %s1917_s16 = sphi %s1956_s16, %s2398_s16   ;;  %s1913_s15 = sphi %s1954_s15, %s2397_s15   ;;  %s1909_s14 = sphi %s1952_s14, %s2396_s14   ;;  %s1905_s13 = sphi %s1950_s13, %s2395_s13   ;;  %s1901_s12 = sphi %s1948_s12, %s2394_s12  }
   0x5   : > { %p23_p0 = scmp.ge.s32.totalorder %s22_s19, 9  ;;  %p62_p1 = scmp.ne.s32.totalorder %s1905_s13, %s1901_s12 }
   0x6   : > { %p63_p2 = scmp.eq.s32.totalorder %s1925_s18, 0  ;;  %s55_s24 = sadd.s32 1, %s1905_s13 }
   0x7   : > { %s2401_s19 = smov (%p23_p0, %s22_s19), 0  ;;  %s2403_s20 = smov (!%p23_p0, %s25_s20), %s1921_s17 }
   0x8   : > { %p64_p3 = por %p63_p2, %p62_p1  ;;  %p27_p4 = scmp.ge.s32.totalorder %s2403_s20, 8 }
   0x9   : > { %s50_s21 = ssub.s32 %s1917_s16, %s2401_s19  ;;  %p1567_p6 = scmp.ge.s32.totalorder %s1925_s18, 72 }
   0xa   : > { %s2405_s20 = smov (%p27_p4, %s2403_s20), 0 }
   0xb   : > { %s51_s22 = ssub.s32 %s1921_s17, %s2405_s20  ;;  %143 = sbr.rel (%p1567_p6) target bundleno = 152 (0x98), region = 20 }
   0xc   : > { %s52_s23 = sor.u32 %s51_s22, %s50_s21 }
   0xd   : > { %p53_p5 = scmp.eq.s32.totalorder %s52_s23, 0 }
   0xf   : > { %s1999_s25 = scalar_select %p53_p5, %s1905_s13, %s55_s24  }
  0x12   : > { %146 = sbr.rel (!%p64_p3) target bundleno = 152 (0x98), region = 24  ;;  %s148_s26 = sand.u32 (%p64_p3), 1, %s1905_s13  }
  0x13   : > { %s1569_s27 = sshll.u32 (%p64_p3), %s1917_s16, 10  ;;  %s1568_s28 = sshll.u32 (%p64_p3), %s148_s26, 9 }
  0x14   : > { %s152_s29 = sadd.s32 (%p64_p3), %s1921_s17, %s1569_s27  ;;  %s2013_s7 = scalar_lea.vmem (%p64_p3), [#allocation3], %s1568_s28 }
  0x15   : > { %s1570_s30 = sshll.u32 (%p64_p3), %s152_s29, 2 }
  0x16   : > { %s2008_s6 = scalar_lea.vmem (%p64_p3), %s2391_s1, %s1570_s30 }
  0x17   : > { %v170_v0 = vld [vmem:[%s2008_s6] sm:$0xf] (%p64_p3) }
  0x18   : > { %v172_v1 = vld [vmem:[%s2008_s6 + $0x20] sm:$0xf] (%p64_p3)  ;;  %171 = vst [vmem:[%s2013_s7] sm:$0xf] (%p64_p3), %v170_v0 }
  0x19   : > { %v174_v2 = vld [vmem:[%s2008_s6 + $0x40] sm:$0xf]  ;;  %173 = vst [vmem:[%s2013_s7 + $0x4] sm:$0xf] %v172_v1 }
  0x1a   : > { %175 = vst [vmem:[%s2013_s7 + $0x8] sm:$0xf] %v174_v2  ;;  %v176_v3 = vld [vmem:[%s2008_s6 + $0x60] sm:$0xf] }
  0x1b   : > { %v178_v4 = vld [vmem:[%s2008_s6 + $0x80] sm:$0xf]  ;;  %177 = vst [vmem:[%s2013_s7 + $0xc] sm:$0xf] %v176_v3 }
  0x1c   : > { %v180_v5 = vld [vmem:[%s2008_s6 + $0xa0] sm:$0xf]  ;;  %179 = vst [vmem:[%s2013_s7 + $0x10] sm:$0xf] %v178_v4 }
  0x1d   : > { %181 = vst [vmem:[%s2013_s7 + $0x14] sm:$0xf] %v180_v5  ;;  %v182_v6 = vld [vmem:[%s2008_s6 + $0xc0] sm:$0xf] }
  0x1e   : > { %v184_v7 = vld [vmem:[%s2008_s6 + $0xe0] sm:$0xf]  ;;  %183 = vst [vmem:[%s2013_s7 + $0x18] sm:$0xf] %v182_v6 }
  0x1f   : > { %v186_v8 = vld [vmem:[%s2008_s6 + $0x100] sm:$0xf]  ;;  %185 = vst [vmem:[%s2013_s7 + $0x1c] sm:$0xf] %v184_v7 }
  0x20   : > { %187 = vst [vmem:[%s2013_s7 + $0x20] sm:$0xf] %v186_v8  ;;  %v188_v9 = vld [vmem:[%s2008_s6 + $0x120] sm:$0xf] }
  0x21   : > { %v190_v10 = vld [vmem:[%s2008_s6 + $0x140] sm:$0xf]  ;;  %189 = vst [vmem:[%s2013_s7 + $0x24] sm:$0xf] %v188_v9 }
  0x22   : > { %v192_v11 = vld [vmem:[%s2008_s6 + $0x160] sm:$0xf]  ;;  %191 = vst [vmem:[%s2013_s7 + $0x28] sm:$0xf] %v190_v10 }
  0x23   : > { %193 = vst [vmem:[%s2013_s7 + $0x2c] sm:$0xf] %v192_v11  ;;  %v194_v12 = vld [vmem:[%s2008_s6 + $0x180] sm:$0xf] }
  0x24   : > { %v196_v13 = vld [vmem:[%s2008_s6 + $0x1a0] sm:$0xf]  ;;  %195 = vst [vmem:[%s2013_s7 + $0x30] sm:$0xf] %v194_v12 }
  0x25   : > { %v198_v14 = vld [vmem:[%s2008_s6 + $0x1c0] sm:$0xf]  ;;  %197 = vst [vmem:[%s2013_s7 + $0x34] sm:$0xf] %v196_v13 }
  0x26   : > { %199 = vst [vmem:[%s2013_s7 + $0x38] sm:$0xf] %v198_v14  ;;  %v200_v15 = vld [vmem:[%s2008_s6 + $0x1e0] sm:$0xf] }
  0x27   : > { %v202_v16 = vld [vmem:[%s2008_s6 + $0x200] sm:$0xf]  ;;  %201 = vst [vmem:[%s2013_s7 + $0x3c] sm:$0xf] %v200_v15 }
  0x28   : > { %v204_v17 = vld [vmem:[%s2008_s6 + $0x220] sm:$0xf]  ;;  %203 = vst [vmem:[%s2013_s7 + $0x40] sm:$0xf] %v202_v16 }
  0x29   : > { %205 = vst [vmem:[%s2013_s7 + $0x44] sm:$0xf] %v204_v17  ;;  %v206_v18 = vld [vmem:[%s2008_s6 + $0x240] sm:$0xf] }
  0x2a   : > { %v208_v19 = vld [vmem:[%s2008_s6 + $0x260] sm:$0xf]  ;;  %207 = vst [vmem:[%s2013_s7 + $0x48] sm:$0xf] %v206_v18 }
  0x2b   : > { %v210_v20 = vld [vmem:[%s2008_s6 + $0x280] sm:$0xf]  ;;  %209 = vst [vmem:[%s2013_s7 + $0x4c] sm:$0xf] %v208_v19 }
  0x2c   : > { %211 = vst [vmem:[%s2013_s7 + $0x50] sm:$0xf] %v210_v20  ;;  %v212_v21 = vld [vmem:[%s2008_s6 + $0x2a0] sm:$0xf] }
  0x2d   : > { %v214_v22 = vld [vmem:[%s2008_s6 + $0x2c0] sm:$0xf]  ;;  %213 = vst [vmem:[%s2013_s7 + $0x54] sm:$0xf] %v212_v21 }
  0x2e   : > { %v216_v23 = vld [vmem:[%s2008_s6 + $0x2e0] sm:$0xf]  ;;  %215 = vst [vmem:[%s2013_s7 + $0x58] sm:$0xf] %v214_v22 }
  0x2f   : > { %217 = vst [vmem:[%s2013_s7 + $0x5c] sm:$0xf] %v216_v23  ;;  %v218_v24 = vld [vmem:[%s2008_s6 + $0x300] sm:$0xf] }
  0x30   : > { %v220_v25 = vld [vmem:[%s2008_s6 + $0x320] sm:$0xf]  ;;  %219 = vst [vmem:[%s2013_s7 + $0x60] sm:$0xf] %v218_v24 }
  0x31   : > { %v222_v26 = vld [vmem:[%s2008_s6 + $0x340] sm:$0xf]  ;;  %221 = vst [vmem:[%s2013_s7 + $0x64] sm:$0xf] %v220_v25 }
  0x32   : > { %223 = vst [vmem:[%s2013_s7 + $0x68] sm:$0xf] %v222_v26  ;;  %v224_v27 = vld [vmem:[%s2008_s6 + $0x360] sm:$0xf] }
  0x33   : > { %v226_v28 = vld [vmem:[%s2008_s6 + $0x380] sm:$0xf]  ;;  %225 = vst [vmem:[%s2013_s7 + $0x6c] sm:$0xf] %v224_v27 }
  0x34   : > { %v228_v29 = vld [vmem:[%s2008_s6 + $0x3a0] sm:$0xf]  ;;  %227 = vst [vmem:[%s2013_s7 + $0x70] sm:$0xf] %v226_v28 }
  0x35   : > { %229 = vst [vmem:[%s2013_s7 + $0x74] sm:$0xf] %v228_v29  ;;  %v230_v30 = vld [vmem:[%s2008_s6 + $0x3c0] sm:$0xf] }
  0x36   : > { %v232_v31 = vld [vmem:[%s2008_s6 + $0x3e0] sm:$0xf]  ;;  %231 = vst [vmem:[%s2013_s7 + $0x78] sm:$0xf] %v230_v30 }
  0x37   : > { %v234_v32 = vld [vmem:[%s2008_s6 + $0x400] sm:$0xf]  ;;  %233 = vst [vmem:[%s2013_s7 + $0x7c] sm:$0xf] %v232_v31 }
  0x38   : > { %235 = vst [vmem:[%s2013_s7 + $0x80] sm:$0xf] %v234_v32  ;;  %v236_v33 = vld [vmem:[%s2008_s6 + $0x420] sm:$0xf] }
  0x39   : > { %v238_v34 = vld [vmem:[%s2008_s6 + $0x440] sm:$0xf]  ;;  %237 = vst [vmem:[%s2013_s7 + $0x84] sm:$0xf] %v236_v33 }
  0x3a   : > { %v240_v35 = vld [vmem:[%s2008_s6 + $0x460] sm:$0xf]  ;;  %239 = vst [vmem:[%s2013_s7 + $0x88] sm:$0xf] %v238_v34 }
  0x3b   : > { %241 = vst [vmem:[%s2013_s7 + $0x8c] sm:$0xf] %v240_v35  ;;  %v242_v36 = vld [vmem:[%s2008_s6 + $0x480] sm:$0xf] }
  0x3c   : > { %v244_v37 = vld [vmem:[%s2008_s6 + $0x4a0] sm:$0xf]  ;;  %243 = vst [vmem:[%s2013_s7 + $0x90] sm:$0xf] %v242_v36 }
  0x3d   : > { %v246_v38 = vld [vmem:[%s2008_s6 + $0x4c0] sm:$0xf]  ;;  %245 = vst [vmem:[%s2013_s7 + $0x94] sm:$0xf] %v244_v37 }
  0x3e   : > { %247 = vst [vmem:[%s2013_s7 + $0x98] sm:$0xf] %v246_v38  ;;  %v248_v39 = vld [vmem:[%s2008_s6 + $0x4e0] sm:$0xf] }
  0x3f   : > { %v250_v40 = vld [vmem:[%s2008_s6 + $0x500] sm:$0xf]  ;;  %249 = vst [vmem:[%s2013_s7 + $0x9c] sm:$0xf] %v248_v39 }
  0x40   : > { %v252_v41 = vld [vmem:[%s2008_s6 + $0x520] sm:$0xf]  ;;  %251 = vst [vmem:[%s2013_s7 + $0xa0] sm:$0xf] %v250_v40 }
  0x41   : > { %253 = vst [vmem:[%s2013_s7 + $0xa4] sm:$0xf] %v252_v41  ;;  %v254_v42 = vld [vmem:[%s2008_s6 + $0x540] sm:$0xf] }
  0x42   : > { %v256_v43 = vld [vmem:[%s2008_s6 + $0x560] sm:$0xf]  ;;  %255 = vst [vmem:[%s2013_s7 + $0xa8] sm:$0xf] %v254_v42 }
  0x43   : > { %v258_v44 = vld [vmem:[%s2008_s6 + $0x580] sm:$0xf]  ;;  %257 = vst [vmem:[%s2013_s7 + $0xac] sm:$0xf] %v256_v43 }
  0x44   : > { %259 = vst [vmem:[%s2013_s7 + $0xb0] sm:$0xf] %v258_v44  ;;  %v260_v45 = vld [vmem:[%s2008_s6 + $0x5a0] sm:$0xf] }
  0x45   : > { %v262_v46 = vld [vmem:[%s2008_s6 + $0x5c0] sm:$0xf]  ;;  %261 = vst [vmem:[%s2013_s7 + $0xb4] sm:$0xf] %v260_v45 }
  0x46   : > { %v264_v47 = vld [vmem:[%s2008_s6 + $0x5e0] sm:$0xf]  ;;  %263 = vst [vmem:[%s2013_s7 + $0xb8] sm:$0xf] %v262_v46 }
  0x47   : > { %265 = vst [vmem:[%s2013_s7 + $0xbc] sm:$0xf] %v264_v47  ;;  %v266_v48 = vld [vmem:[%s2008_s6 + $0x600] sm:$0xf] }
  0x48   : > { %v268_v49 = vld [vmem:[%s2008_s6 + $0x620] sm:$0xf]  ;;  %267 = vst [vmem:[%s2013_s7 + $0xc0] sm:$0xf] %v266_v48 }
  0x49   : > { %v270_v50 = vld [vmem:[%s2008_s6 + $0x640] sm:$0xf]  ;;  %269 = vst [vmem:[%s2013_s7 + $0xc4] sm:$0xf] %v268_v49 }
  0x4a   : > { %271 = vst [vmem:[%s2013_s7 + $0xc8] sm:$0xf] %v270_v50  ;;  %v272_v51 = vld [vmem:[%s2008_s6 + $0x660] sm:$0xf] }
  0x4b   : > { %v274_v52 = vld [vmem:[%s2008_s6 + $0x680] sm:$0xf]  ;;  %273 = vst [vmem:[%s2013_s7 + $0xcc] sm:$0xf] %v272_v51 }
  0x4c   : > { %v276_v53 = vld [vmem:[%s2008_s6 + $0x6a0] sm:$0xf]  ;;  %275 = vst [vmem:[%s2013_s7 + $0xd0] sm:$0xf] %v274_v52 }
  0x4d   : > { %277 = vst [vmem:[%s2013_s7 + $0xd4] sm:$0xf] %v276_v53  ;;  %v278_v54 = vld [vmem:[%s2008_s6 + $0x6c0] sm:$0xf] }
  0x4e   : > { %v280_v55 = vld [vmem:[%s2008_s6 + $0x6e0] sm:$0xf]  ;;  %279 = vst [vmem:[%s2013_s7 + $0xd8] sm:$0xf] %v278_v54 }
  0x4f   : > { %v282_v56 = vld [vmem:[%s2008_s6 + $0x700] sm:$0xf]  ;;  %281 = vst [vmem:[%s2013_s7 + $0xdc] sm:$0xf] %v280_v55 }
  0x50   : > { %283 = vst [vmem:[%s2013_s7 + $0xe0] sm:$0xf] %v282_v56  ;;  %v284_v57 = vld [vmem:[%s2008_s6 + $0x720] sm:$0xf] }
  0x51   : > { %v286_v58 = vld [vmem:[%s2008_s6 + $0x740] sm:$0xf]  ;;  %285 = vst [vmem:[%s2013_s7 + $0xe4] sm:$0xf] %v284_v57 }
  0x52   : > { %v288_v59 = vld [vmem:[%s2008_s6 + $0x760] sm:$0xf]  ;;  %287 = vst [vmem:[%s2013_s7 + $0xe8] sm:$0xf] %v286_v58 }
  0x53   : > { %289 = vst [vmem:[%s2013_s7 + $0xec] sm:$0xf] %v288_v59  ;;  %v290_v60 = vld [vmem:[%s2008_s6 + $0x780] sm:$0xf] }
  0x54   : > { %v292_v61 = vld [vmem:[%s2008_s6 + $0x7a0] sm:$0xf]  ;;  %291 = vst [vmem:[%s2013_s7 + $0xf0] sm:$0xf] %v290_v60 }
  0x55   : > { %v294_v62 = vld [vmem:[%s2008_s6 + $0x7c0] sm:$0xf]  ;;  %293 = vst [vmem:[%s2013_s7 + $0xf4] sm:$0xf] %v292_v61 }
  0x56   : > { %295 = vst [vmem:[%s2013_s7 + $0xf8] sm:$0xf] %v294_v62  ;;  %v296_v63 = vld [vmem:[%s2008_s6 + $0x7e0] sm:$0xf] }
  0x57   : > { %v298_v0 = vld [vmem:[%s2008_s6 + $0x800] sm:$0xf]  ;;  %297 = vst [vmem:[%s2013_s7 + $0xfc] sm:$0xf] %v296_v63 }
  0x58   : > { %v300_v1 = vld [vmem:[%s2008_s6 + $0x820] sm:$0xf]  ;;  %299 = vst [vmem:[%s2013_s7 + $0x100] sm:$0xf] %v298_v0 }
  0x59   : > { %301 = vst [vmem:[%s2013_s7 + $0x104] sm:$0xf] %v300_v1  ;;  %v302_v2 = vld [vmem:[%s2008_s6 + $0x840] sm:$0xf] }
  0x5a   : > { %v304_v3 = vld [vmem:[%s2008_s6 + $0x860] sm:$0xf]  ;;  %303 = vst [vmem:[%s2013_s7 + $0x108] sm:$0xf] %v302_v2 }
  0x5b   : > { %v306_v4 = vld [vmem:[%s2008_s6 + $0x880] sm:$0xf]  ;;  %305 = vst [vmem:[%s2013_s7 + $0x10c] sm:$0xf] %v304_v3 }
  0x5c   : > { %307 = vst [vmem:[%s2013_s7 + $0x110] sm:$0xf] %v306_v4  ;;  %v308_v5 = vld [vmem:[%s2008_s6 + $0x8a0] sm:$0xf] }
  0x5d   : > { %v310_v6 = vld [vmem:[%s2008_s6 + $0x8c0] sm:$0xf]  ;;  %309 = vst [vmem:[%s2013_s7 + $0x114] sm:$0xf] %v308_v5 }
  0x5e   : > { %v312_v7 = vld [vmem:[%s2008_s6 + $0x8e0] sm:$0xf]  ;;  %311 = vst [vmem:[%s2013_s7 + $0x118] sm:$0xf] %v310_v6 }
  0x5f   : > { %313 = vst [vmem:[%s2013_s7 + $0x11c] sm:$0xf] %v312_v7  ;;  %v314_v8 = vld [vmem:[%s2008_s6 + $0x900] sm:$0xf] }
  0x60   : > { %v316_v9 = vld [vmem:[%s2008_s6 + $0x920] sm:$0xf]  ;;  %315 = vst [vmem:[%s2013_s7 + $0x120] sm:$0xf] %v314_v8 }
  0x61   : > { %v318_v10 = vld [vmem:[%s2008_s6 + $0x940] sm:$0xf]  ;;  %317 = vst [vmem:[%s2013_s7 + $0x124] sm:$0xf] %v316_v9 }
  0x62   : > { %319 = vst [vmem:[%s2013_s7 + $0x128] sm:$0xf] %v318_v10  ;;  %v320_v11 = vld [vmem:[%s2008_s6 + $0x960] sm:$0xf] }
  0x63   : > { %v322_v12 = vld [vmem:[%s2008_s6 + $0x980] sm:$0xf]  ;;  %321 = vst [vmem:[%s2013_s7 + $0x12c] sm:$0xf] %v320_v11 }
  0x64   : > { %v324_v13 = vld [vmem:[%s2008_s6 + $0x9a0] sm:$0xf]  ;;  %323 = vst [vmem:[%s2013_s7 + $0x130] sm:$0xf] %v322_v12 }
  0x65   : > { %325 = vst [vmem:[%s2013_s7 + $0x134] sm:$0xf] %v324_v13  ;;  %v326_v14 = vld [vmem:[%s2008_s6 + $0x9c0] sm:$0xf] }
  0x66   : > { %v328_v15 = vld [vmem:[%s2008_s6 + $0x9e0] sm:$0xf]  ;;  %327 = vst [vmem:[%s2013_s7 + $0x138] sm:$0xf] %v326_v14 }
  0x67   : > { %v330_v16 = vld [vmem:[%s2008_s6 + $0xa00] sm:$0xf]  ;;  %329 = vst [vmem:[%s2013_s7 + $0x13c] sm:$0xf] %v328_v15 }
  0x68   : > { %331 = vst [vmem:[%s2013_s7 + $0x140] sm:$0xf] %v330_v16  ;;  %v332_v17 = vld [vmem:[%s2008_s6 + $0xa20] sm:$0xf] }
  0x69   : > { %v334_v18 = vld [vmem:[%s2008_s6 + $0xa40] sm:$0xf]  ;;  %333 = vst [vmem:[%s2013_s7 + $0x144] sm:$0xf] %v332_v17 }
  0x6a   : > { %v336_v19 = vld [vmem:[%s2008_s6 + $0xa60] sm:$0xf]  ;;  %335 = vst [vmem:[%s2013_s7 + $0x148] sm:$0xf] %v334_v18 }
  0x6b   : > { %337 = vst [vmem:[%s2013_s7 + $0x14c] sm:$0xf] %v336_v19  ;;  %v338_v20 = vld [vmem:[%s2008_s6 + $0xa80] sm:$0xf] }
  0x6c   : > { %v340_v21 = vld [vmem:[%s2008_s6 + $0xaa0] sm:$0xf]  ;;  %339 = vst [vmem:[%s2013_s7 + $0x150] sm:$0xf] %v338_v20 }
  0x6d   : > { %v342_v22 = vld [vmem:[%s2008_s6 + $0xac0] sm:$0xf]  ;;  %341 = vst [vmem:[%s2013_s7 + $0x154] sm:$0xf] %v340_v21 }
  0x6e   : > { %343 = vst [vmem:[%s2013_s7 + $0x158] sm:$0xf] %v342_v22  ;;  %v344_v23 = vld [vmem:[%s2008_s6 + $0xae0] sm:$0xf] }
  0x6f   : > { %v346_v24 = vld [vmem:[%s2008_s6 + $0xb00] sm:$0xf]  ;;  %345 = vst [vmem:[%s2013_s7 + $0x15c] sm:$0xf] %v344_v23 }
  0x70   : > { %v348_v25 = vld [vmem:[%s2008_s6 + $0xb20] sm:$0xf]  ;;  %347 = vst [vmem:[%s2013_s7 + $0x160] sm:$0xf] %v346_v24 }
  0x71   : > { %349 = vst [vmem:[%s2013_s7 + $0x164] sm:$0xf] %v348_v25  ;;  %v350_v26 = vld [vmem:[%s2008_s6 + $0xb40] sm:$0xf] }
  0x72   : > { %v352_v27 = vld [vmem:[%s2008_s6 + $0xb60] sm:$0xf]  ;;  %351 = vst [vmem:[%s2013_s7 + $0x168] sm:$0xf] %v350_v26 }
  0x73   : > { %v354_v28 = vld [vmem:[%s2008_s6 + $0xb80] sm:$0xf]  ;;  %353 = vst [vmem:[%s2013_s7 + $0x16c] sm:$0xf] %v352_v27 }
  0x74   : > { %355 = vst [vmem:[%s2013_s7 + $0x170] sm:$0xf] %v354_v28  ;;  %v356_v29 = vld [vmem:[%s2008_s6 + $0xba0] sm:$0xf] }
  0x75   : > { %v358_v30 = vld [vmem:[%s2008_s6 + $0xbc0] sm:$0xf]  ;;  %357 = vst [vmem:[%s2013_s7 + $0x174] sm:$0xf] %v356_v29 }
  0x76   : > { %v360_v31 = vld [vmem:[%s2008_s6 + $0xbe0] sm:$0xf]  ;;  %359 = vst [vmem:[%s2013_s7 + $0x178] sm:$0xf] %v358_v30 }
  0x77   : > { %361 = vst [vmem:[%s2013_s7 + $0x17c] sm:$0xf] %v360_v31  ;;  %v362_v32 = vld [vmem:[%s2008_s6 + $0xc00] sm:$0xf] }
  0x78   : > { %v364_v33 = vld [vmem:[%s2008_s6 + $0xc20] sm:$0xf]  ;;  %363 = vst [vmem:[%s2013_s7 + $0x180] sm:$0xf] %v362_v32 }
  0x79   : > { %v366_v34 = vld [vmem:[%s2008_s6 + $0xc40] sm:$0xf]  ;;  %365 = vst [vmem:[%s2013_s7 + $0x184] sm:$0xf] %v364_v33 }
  0x7a   : > { %367 = vst [vmem:[%s2013_s7 + $0x188] sm:$0xf] %v366_v34  ;;  %v368_v35 = vld [vmem:[%s2008_s6 + $0xc60] sm:$0xf] }
  0x7b   : > { %v370_v36 = vld [vmem:[%s2008_s6 + $0xc80] sm:$0xf]  ;;  %369 = vst [vmem:[%s2013_s7 + $0x18c] sm:$0xf] %v368_v35 }
  0x7c   : > { %v372_v37 = vld [vmem:[%s2008_s6 + $0xca0] sm:$0xf]  ;;  %371 = vst [vmem:[%s2013_s7 + $0x190] sm:$0xf] %v370_v36 }
  0x7d   : > { %373 = vst [vmem:[%s2013_s7 + $0x194] sm:$0xf] %v372_v37  ;;  %v374_v38 = vld [vmem:[%s2008_s6 + $0xcc0] sm:$0xf] }
  0x7e   : > { %v376_v39 = vld [vmem:[%s2008_s6 + $0xce0] sm:$0xf]  ;;  %375 = vst [vmem:[%s2013_s7 + $0x198] sm:$0xf] %v374_v38 }
  0x7f   : > { %v378_v40 = vld [vmem:[%s2008_s6 + $0xd00] sm:$0xf]  ;;  %377 = vst [vmem:[%s2013_s7 + $0x19c] sm:$0xf] %v376_v39 }
  0x80   : > { %379 = vst [vmem:[%s2013_s7 + $0x1a0] sm:$0xf] %v378_v40  ;;  %v380_v41 = vld [vmem:[%s2008_s6 + $0xd20] sm:$0xf] }
  0x81   : > { %v382_v42 = vld [vmem:[%s2008_s6 + $0xd40] sm:$0xf]  ;;  %381 = vst [vmem:[%s2013_s7 + $0x1a4] sm:$0xf] %v380_v41 }
  0x82   : > { %v384_v43 = vld [vmem:[%s2008_s6 + $0xd60] sm:$0xf]  ;;  %383 = vst [vmem:[%s2013_s7 + $0x1a8] sm:$0xf] %v382_v42 }
  0x83   : > { %385 = vst [vmem:[%s2013_s7 + $0x1ac] sm:$0xf] %v384_v43  ;;  %v386_v44 = vld [vmem:[%s2008_s6 + $0xd80] sm:$0xf] }
  0x84   : > { %v388_v45 = vld [vmem:[%s2008_s6 + $0xda0] sm:$0xf]  ;;  %387 = vst [vmem:[%s2013_s7 + $0x1b0] sm:$0xf] %v386_v44 }
  0x85   : > { %v390_v46 = vld [vmem:[%s2008_s6 + $0xdc0] sm:$0xf]  ;;  %389 = vst [vmem:[%s2013_s7 + $0x1b4] sm:$0xf] %v388_v45 }
  0x86   : > { %391 = vst [vmem:[%s2013_s7 + $0x1b8] sm:$0xf] %v390_v46  ;;  %v392_v47 = vld [vmem:[%s2008_s6 + $0xde0] sm:$0xf] }
  0x87   : > { %v394_v48 = vld [vmem:[%s2008_s6 + $0xe00] sm:$0xf]  ;;  %393 = vst [vmem:[%s2013_s7 + $0x1bc] sm:$0xf] %v392_v47 }
  0x88   : > { %v396_v49 = vld [vmem:[%s2008_s6 + $0xe20] sm:$0xf]  ;;  %395 = vst [vmem:[%s2013_s7 + $0x1c0] sm:$0xf] %v394_v48 }
  0x89   : > { %397 = vst [vmem:[%s2013_s7 + $0x1c4] sm:$0xf] %v396_v49  ;;  %v398_v50 = vld [vmem:[%s2008_s6 + $0xe40] sm:$0xf] }
  0x8a   : > { %v400_v51 = vld [vmem:[%s2008_s6 + $0xe60] sm:$0xf]  ;;  %399 = vst [vmem:[%s2013_s7 + $0x1c8] sm:$0xf] %v398_v50 }
  0x8b   : > { %v402_v52 = vld [vmem:[%s2008_s6 + $0xe80] sm:$0xf]  ;;  %401 = vst [vmem:[%s2013_s7 + $0x1cc] sm:$0xf] %v400_v51 }
  0x8c   : > { %403 = vst [vmem:[%s2013_s7 + $0x1d0] sm:$0xf] %v402_v52  ;;  %v404_v53 = vld [vmem:[%s2008_s6 + $0xea0] sm:$0xf] }
  0x8d   : > { %v406_v54 = vld [vmem:[%s2008_s6 + $0xec0] sm:$0xf]  ;;  %405 = vst [vmem:[%s2013_s7 + $0x1d4] sm:$0xf] %v404_v53 }
  0x8e   : > { %v408_v55 = vld [vmem:[%s2008_s6 + $0xee0] sm:$0xf]  ;;  %407 = vst [vmem:[%s2013_s7 + $0x1d8] sm:$0xf] %v406_v54 }
  0x8f   : > { %409 = vst [vmem:[%s2013_s7 + $0x1dc] sm:$0xf] %v408_v55  ;;  %v410_v56 = vld [vmem:[%s2008_s6 + $0xf00] sm:$0xf] }
  0x90   : > { %v412_v57 = vld [vmem:[%s2008_s6 + $0xf20] sm:$0xf]  ;;  %411 = vst [vmem:[%s2013_s7 + $0x1e0] sm:$0xf] %v410_v56 }
  0x91   : > { %v414_v58 = vld [vmem:[%s2008_s6 + $0xf40] sm:$0xf]  ;;  %413 = vst [vmem:[%s2013_s7 + $0x1e4] sm:$0xf] %v412_v57 }
  0x92   : > { %415 = vst [vmem:[%s2013_s7 + $0x1e8] sm:$0xf] %v414_v58  ;;  %v416_v59 = vld [vmem:[%s2008_s6 + $0xf60] sm:$0xf] }
  0x93   : > { %v418_v60 = vld [vmem:[%s2008_s6 + $0xf80] sm:$0xf]  ;;  %417 = vst [vmem:[%s2013_s7 + $0x1ec] sm:$0xf] %v416_v59 }
  0x94   : > { %v420_v61 = vld [vmem:[%s2008_s6 + $0xfa0] sm:$0xf]  ;;  %419 = vst [vmem:[%s2013_s7 + $0x1f0] sm:$0xf] %v418_v60 }
  0x95   : > { %421 = vst [vmem:[%s2013_s7 + $0x1f4] sm:$0xf] %v420_v61  ;;  %v422_v62 = vld [vmem:[%s2008_s6 + $0xfc0] sm:$0xf] }
  0x96   : > { %v424_v63 = vld [vmem:[%s2008_s6 + $0xfe0] sm:$0xf]  ;;  %423 = vst [vmem:[%s2013_s7 + $0x1f8] sm:$0xf] %v422_v62 }
  0x97   : > { %425 = vst [vmem:[%s2013_s7 + $0x1fc] sm:$0xf] %v424_v63 }
  0x98 PF: > { %p1571_p7 = scmp.ge.s32.totalorder %s1925_s18, 1  ;;  %p709_p8 = scmp.lt.s32.totalorder %s1925_s18, 73 }
  0x9a   : > { %p710_p9 = pnand %p1571_p7, %p709_p8 }
  0x9b   : > { %s716_s8 = sand.u32 (!%p710_p9), 1, %s1901_s12   ;;  %p741_p10 = scmp.lt.s32.totalorder (!%p710_p9), %s1913_s15, 7 }
  0x9c   : > { %713 = sbr.rel (%p710_p9) target bundleno = 474 (0x1da), region = 69  ;;  %s1572_s9 = sshll.u32 (!%p710_p9), %s716_s8, 9 }
  0x9d   : > { %s2285_s27 = scalar_lea.vmem (!%p710_p9), [#allocation3], %s1572_s9  ;;  %p1574_p11 = scmp.ne.s32.totalorder (!%p710_p9), %s1909_s14, 0 }
  0xa3   : > { %s2407_s15 = smov (!%p741_p10, %s1913_s15), 7  ;;  %752 = sbr.rel (%p1574_p11) target bundleno = 170 (0xaa), region = 77 }
  0xa4   : > { %s743_s21 = scalar_lea.vmem %s2392_s2, %s2407_s15  ;;  %s1573_s22 = sshll.u32 %s2407_s15, 2  ;;  %v1927_v0 = vmov (!%p1574_p11), 0.0  }
  0xa5   : > { %s2283_s26 = scalar_lea.vmem %s2393_s3, %s1573_s22  ;;  %753 = vst [vmem:[#allocation2] sm:$0xff] (!%p1574_p11), %v1927_v0 }
  0xaa PF: > { %v1799_v1 = vld [vmem:[%s2285_s27 + $0x40] sm:$0xff]   ;;  %v1803_v5 = vld [vmem:[%s2285_s27 + $0x48] sm:$0xff]   ;;  %v1807_v9 = vld [vmem:[%s2285_s27 + $0x50] sm:$0xff]   ;;  %s1653_s12 = sshll.u32 %s1909_s14, 5  ;;  %p1649_p12 = scmp.ne.s32.totalorder %s1909_s14, 8 }
  0xab   : > { %v1800_v2 = vld [vmem:[%s2285_s27 + $0xc0] sm:$0xff]   ;;  %1654 = vmatprep.subr.bf16.mxu0 %v1799_v1  ;;  %v1804_v6 = vld [vmem:[%s2285_s27 + $0xc8] sm:$0xff]   ;;  %v1808_v10 = vld [vmem:[%s2285_s27 + $0xd0] sm:$0xff]   ;;  %s2322_s30 = scalar_lea.vmem %s2390_s0, %s1653_s12 }
  0xac   : > { %v1801_v3 = vld [vmem:[%s2285_s27] sm:$0xff]   ;;  %1676 = vmatprep.subr.bf16.mxu1 %v1800_v2  ;;  %v1805_v7 = vld [vmem:[%s2285_s27 + $0x8] sm:$0xff]   ;;  %v1809_v11 = vld [vmem:[%s2285_s27 + $0x10] sm:$0xff]  }
  0xad   : > { %v1802_v4 = vld [vmem:[%s2285_s27 + $0x80] sm:$0xff]   ;;  %1655 = vmatpush3.bf16.msra.mxu0 %v1801_v3  ;;  %v1806_v8 = vld [vmem:[%s2285_s27 + $0x88] sm:$0xff]   ;;  %v1810_v12 = vld [vmem:[%s2285_s27 + $0x90] sm:$0xff]  }
  0xae   : > { %1677 = vmatpush3.bf16.msra.mxu1 %v1802_v4  ;;  %1656 = vmatprep.subr.bf16.mxu0 %v1803_v5  ;;  %v1811_v13 = vld [vmem:[%s2285_s27 + $0x58] sm:$0xff]   ;;  %v1815_v17 = vld [vmem:[%s2285_s27 + $0x60] sm:$0xff]   ;;  %v1819_v21 = vld [vmem:[%s2285_s27 + $0x68] sm:$0xff]  }
  0xaf   : > { %1678 = vmatprep.subr.bf16.mxu1 %v1804_v6  ;;  %v1812_v14 = vld [vmem:[%s2285_s27 + $0xd8] sm:$0xff]   ;;  %v1816_v18 = vld [vmem:[%s2285_s27 + $0xe0] sm:$0xff]   ;;  %v1820_v22 = vld [vmem:[%s2285_s27 + $0xe8] sm:$0xff]  }
  0xb0   : > { %v1813_v15 = vld [vmem:[%s2285_s27 + $0x18] sm:$0xff]   ;;  %v1817_v19 = vld [vmem:[%s2285_s27 + $0x20] sm:$0xff]   ;;  %v1821_v23 = vld [vmem:[%s2285_s27 + $0x28] sm:$0xff]  }
  0xb1   : > { %1657 = vmatpush3.bf16.msra.mxu0 %v1805_v7  ;;  %v1814_v16 = vld [vmem:[%s2285_s27 + $0x98] sm:$0xff]   ;;  %v1818_v20 = vld [vmem:[%s2285_s27 + $0xa0] sm:$0xff]   ;;  %v1822_v24 = vld [vmem:[%s2285_s27 + $0xa8] sm:$0xff]  }
  0xb2   : > { %1679 = vmatpush3.bf16.msra.mxu1 %v1806_v8  ;;  %1658 = vmatprep.subr.bf16.mxu0 %v1807_v9  ;;  %v1823_v25 = vld [vmem:[%s2285_s27 + $0x70] sm:$0xff]   ;;  %v1827_v29 = vld [vmem:[%s2285_s27 + $0x78] sm:$0xff]   ;;  %v759_v34 = vld [vmem:[%s2322_s30 + $0x8] sm:$0xff] }
  0xb3   : > { %1680 = vmatprep.subr.bf16.mxu1 %v1808_v10  ;;  %v1824_v26 = vld [vmem:[%s2285_s27 + $0xf0] sm:$0xff]   ;;  %v1828_v30 = vld [vmem:[%s2285_s27 + $0xf8] sm:$0xff]   ;;  %v1579_v37 = vcombine.low %v759_v34, %v759_v34  ;;  %v1580_v38 = vcombine.high %v759_v34, %v759_v34  ;;  %v1835_v39 = vld [vmem:[%s2285_s27 + $0x140] sm:$0xff]  }
  0xb4   : > { %v1825_v27 = vld [vmem:[%s2285_s27 + $0x30] sm:$0xff]   ;;  %v1829_v31 = vld [vmem:[%s2285_s27 + $0x38] sm:$0xff]   ;;  %v1836_v40 = vld [vmem:[%s2285_s27 + $0x1c0] sm:$0xff]  }
  0xb5   : > { %1659 = vmatpush3.bf16.msra.mxu0 %v1809_v11  ;;  %v1826_v28 = vld [vmem:[%s2285_s27 + $0xb0] sm:$0xff]   ;;  %v1830_v32 = vld [vmem:[%s2285_s27 + $0xb8] sm:$0xff]   ;;  %1374 = vmatprep.mubr.bf16.mxu1 %v1580_v38  ;;  %v1837_v41 = vld [vmem:[%s2285_s27 + $0x100] sm:$0xff]  }
  0xb6   : > { %1681 = vmatpush3.bf16.msra.mxu1 %v1810_v12  ;;  %1660 = vmatprep.subr.bf16.mxu0 %v1811_v13  ;;  %v758_v33 = vld [vmem:[%s2322_s30] sm:$0xff]  ;;  %v1838_v42 = vld [vmem:[%s2285_s27 + $0x180] sm:$0xff]   ;;  %v1839_v43 = vld [vmem:[%s2285_s27 + $0x148] sm:$0xff]  }
  0xb7   : > { %1682 = vmatprep.subr.bf16.mxu1 %v1812_v14  ;;  %v1577_v35 = vcombine.low %v758_v33, %v758_v33  ;;  %v1578_v36 = vcombine.high %v758_v33, %v758_v33  ;;  %v1840_v44 = vld [vmem:[%s2285_s27 + $0x1c8] sm:$0xff]   ;;  %v1843_v47 = vld [vmem:[%s2285_s27 + $0x150] sm:$0xff]   ;;  %v1847_v51 = vld [vmem:[%s2285_s27 + $0x158] sm:$0xff]  }
  0xb8   : > { %v1841_v45 = vld [vmem:[%s2285_s27 + $0x108] sm:$0xff]   ;;  %v1844_v48 = vld [vmem:[%s2285_s27 + $0x1d0] sm:$0xff]   ;;  %v1848_v52 = vld [vmem:[%s2285_s27 + $0x1d8] sm:$0xff]  }
  0xb9   : > { %1661 = vmatpush3.bf16.msra.mxu0 %v1813_v15  ;;  %1334 = vmatprep.mubr.bf16.mxu0 %v1578_v36  ;;  %v1842_v46 = vld [vmem:[%s2285_s27 + $0x188] sm:$0xff]   ;;  %v1845_v49 = vld [vmem:[%s2285_s27 + $0x110] sm:$0xff]   ;;  %v1849_v53 = vld [vmem:[%s2285_s27 + $0x118] sm:$0xff]  }
  0xba   : > { %1683 = vmatpush3.bf16.msra.mxu1 %v1814_v16  ;;  %1662 = vmatprep.subr.bf16.mxu0 %v1815_v17  ;;  %v1846_v50 = vld [vmem:[%s2285_s27 + $0x190] sm:$0xff]   ;;  %v1850_v54 = vld [vmem:[%s2285_s27 + $0x198] sm:$0xff]   ;;  %v1851_v55 = vld [vmem:[%s2285_s27 + $0x160] sm:$0xff]  }
  0xbb   : > { %1684 = vmatprep.subr.bf16.mxu1 %v1816_v18  ;;  %v1852_v56 = vld [vmem:[%s2285_s27 + $0x1e0] sm:$0xff]   ;;  %v1855_v59 = vld [vmem:[%s2285_s27 + $0x168] sm:$0xff]   ;;  %v1859_v63 = vld [vmem:[%s2285_s27 + $0x170] sm:$0xff]  }
  0xbc   : > { %v1853_v57 = vld [vmem:[%s2285_s27 + $0x120] sm:$0xff]   ;;  %v1856_v60 = vld [vmem:[%s2285_s27 + $0x1e8] sm:$0xff]   ;;  %v1860_v0 = vld [vmem:[%s2285_s27 + $0x1f0] sm:$0xff]  }
  0xbd   : > { %1663 = vmatpush3.bf16.msra.mxu0 %v1817_v19  ;;  %v1854_v58 = vld [vmem:[%s2285_s27 + $0x1a0] sm:$0xff]   ;;  %v1857_v61 = vld [vmem:[%s2285_s27 + $0x128] sm:$0xff]   ;;  %v1861_v1 = vld [vmem:[%s2285_s27 + $0x130] sm:$0xff]  }
  0xbe   : > { %1685 = vmatpush3.bf16.msra.mxu1 %v1818_v20  ;;  %1664 = vmatprep.subr.bf16.mxu0 %v1819_v21  ;;  %v1858_v62 = vld [vmem:[%s2285_s27 + $0x1a8] sm:$0xff]   ;;  %v1862_v2 = vld [vmem:[%s2285_s27 + $0x1b0] sm:$0xff]   ;;  %v1863_v3 = vld [vmem:[%s2285_s27 + $0x178] sm:$0xff]  }
  0xbf   : > { %1686 = vmatprep.subr.bf16.mxu1 %v1820_v22  ;;  %v1864_v4 = vld [vmem:[%s2285_s27 + $0x1f8] sm:$0xff]   ;;  %v760_v7 = vld [vmem:[%s2322_s30 + $0x10] sm:$0xff]  ;;  %v761_v10 = vld [vmem:[%s2322_s30 + $0x18] sm:$0xff] }
  0xc0   : > { %v1865_v5 = vld [vmem:[%s2285_s27 + $0x138] sm:$0xff]   ;;  %v1581_v8 = vcombine.low %v760_v7, %v760_v7  ;;  %v1582_v9 = vcombine.high %v760_v7, %v760_v7  ;;  %v1583_v11 = vcombine.low %v761_v10, %v761_v10  ;;  %v1584_v12 = vcombine.high %v761_v10, %v761_v10 }
  0xc1   : > { %1665 = vmatpush3.bf16.msra.mxu0 %v1821_v23  ;;  %v1866_v6 = vld [vmem:[%s2285_s27 + $0x1b8] sm:$0xff]  }
  0xc2   : > { %1687 = vmatpush3.bf16.msra.mxu1 %v1822_v24  ;;  %1666 = vmatprep.subr.bf16.mxu0 %v1823_v25 }
  0xc3   : > { %1688 = vmatprep.subr.bf16.mxu1 %v1824_v26 }
  0xc5   : > { %1667 = vmatpush3.bf16.msra.mxu0 %v1825_v27 }
  0xc6   : > { %1689 = vmatpush3.bf16.msra.mxu1 %v1826_v28  ;;  %1668 = vmatprep.subr.bf16.mxu0 %v1827_v29 }
  0xc7   : > { %1690 = vmatprep.subr.bf16.mxu1 %v1828_v30 }
  0xc9   : > { %1669 = vmatpush3.bf16.msra.mxu0 %v1829_v31 }
  0xca   : > { %1691 = vmatpush3.bf16.msra.mxu1 %v1830_v32  ;;  %1698 = vmatprep.subr.bf16.mxu0 %v1835_v39  ;;  %v1650_v39 = vld [vmem:[%s743_s21] ss:$0 sm:$0xff] (!%p1649_p12) }
  0xcb   : > { %1720 = vmatprep.subr.bf16.mxu1 %v1836_v40 }
  0xcc   : > { %1335 = vmatmul.mubr.bf16.vlgmr.msra.gmra.mrb[0].mxu0 %v1577_v35  ;;  %v754_v35 = vld [vmem:[#allocation2] sm:$0xff] }
  0xcd   : > { %1375 = vmatmul.mubr.bf16.vlgmr.msra.gmra.mrb[0].mxu1 %v1579_v37  ;;  %1699 = vmatpush3.bf16.msra.mxu0 %v1837_v41 }
  0xce   : > { %1721 = vmatpush3.bf16.msra.mxu1 %v1838_v42  ;;  %1700 = vmatprep.subr.bf16.mxu0 %v1839_v43 }
  0xcf   : > { %1722 = vmatprep.subr.bf16.mxu1 %v1840_v44  ;;  %1414 = vmatprep.mubr.bf16.mxu0 %v1582_v9 }
  0xd0   : > { %1454 = vmatprep.mubr.bf16.mxu1 %v1584_v12 }
  0xd1   : > { %1701 = vmatpush3.bf16.msra.mxu0 %v1841_v45 }
  0xd2   : > { %1723 = vmatpush3.bf16.msra.mxu1 %v1842_v46  ;;  %1702 = vmatprep.subr.bf16.mxu0 %v1843_v47 }
  0xd3   : > { %1724 = vmatprep.subr.bf16.mxu1 %v1844_v48 }
  0xd5   : > { %1703 = vmatpush3.bf16.msra.mxu0 %v1845_v49 }
  0xd6   : > { %1725 = vmatpush3.bf16.msra.mxu1 %v1846_v50  ;;  %1704 = vmatprep.subr.bf16.mxu0 %v1847_v51 }
  0xd7   : > { %1726 = vmatprep.subr.bf16.mxu1 %v1848_v52 }
  0xd9   : > { %1705 = vmatpush3.bf16.msra.mxu0 %v1849_v53 }
  0xda   : > { %1727 = vmatpush3.bf16.msra.mxu1 %v1850_v54  ;;  %1706 = vmatprep.subr.bf16.mxu0 %v1851_v55 }
  0xdb   : > { %1728 = vmatprep.subr.bf16.mxu1 %v1852_v56 }
  0xdd   : > { %1707 = vmatpush3.bf16.msra.mxu0 %v1853_v57 }
  0xde   : > { %1729 = vmatpush3.bf16.msra.mxu1 %v1854_v58  ;;  %1708 = vmatprep.subr.bf16.mxu0 %v1855_v59 }
  0xdf   : > { %1730 = vmatprep.subr.bf16.mxu1 %v1856_v60 }
  0xe1   : > { %1709 = vmatpush3.bf16.msra.mxu0 %v1857_v61 }
  0xe2   : > { %1731 = vmatpush3.bf16.msra.mxu1 %v1858_v62  ;;  %1710 = vmatprep.subr.bf16.mxu0 %v1859_v63 }
  0xe3   : > { %1732 = vmatprep.subr.bf16.mxu1 %v1860_v0 }
  0xe5   : > { %1711 = vmatpush3.bf16.msra.mxu0 %v1861_v1 }
  0xe6   : > { %1733 = vmatpush3.bf16.msra.mxu1 %v1862_v2  ;;  %1712 = vmatprep.subr.bf16.mxu0 %v1863_v3 }
  0xe7   : > { %1734 = vmatprep.subr.bf16.mxu1 %v1864_v4 }
  0xe9   : > { %1713 = vmatpush3.bf16.msra.mxu0 %v1865_v5 }
  0xea   : > { %1735 = vmatpush3.bf16.msra.mxu1 %v1866_v6 }
  0xec   : > { %1415 = vmatmul.mubr.bf16.vlgmr.msra.gmra.mrb[4].mxu0 %v1581_v8 }
  0xed   : > { %1455 = vmatmul.mubr.bf16.vlgmr.msra.gmra.mrb[4].mxu1 %v1583_v11 }
 0x19f   : > { %v1670_v13 = vpop.f32.mrb[0].mxu0 }
 0x1a0   : > { %v1692_v14 = vpop.f32.mrb[0].mxu1  ;;  %v1671_v15 = vpop.f32.mrb[1].mxu0 }
 0x1a1   : > { %v1693_v16 = vpop.f32.mrb[1].mxu1  ;;  %v1672_v17 = vadd.f32 %v1671_v15, %v1670_v13  ;;  %v1673_v19 = vpop.f32.mrb[2].mxu0 }
 0x1a2   : > { %v1694_v18 = vadd.f32 %v1693_v16, %v1692_v14  ;;  %v1695_v20 = vpop.f32.mrb[2].mxu1  ;;  %v1674_v21 = vpop.f32.mrb[3].mxu0 }
 0x1a3   : > { %v1696_v22 = vpop.f32.mrb[3].mxu1 }
 0x1a4   : > { %v1377_v23 = vadd.f32 %v1694_v18, %v1672_v17 }
 0x1bf   : > { %v1714_v24 = vpop.f32.mrb[4].mxu0 }
 0x1c0   : > { %v1736_v25 = vpop.f32.mrb[4].mxu1  ;;  %v1715_v26 = vpop.f32.mrb[5].mxu0 }
 0x1c1   : > { %v1737_v27 = vpop.f32.mrb[5].mxu1  ;;  %v1716_v28 = vadd.f32 %v1715_v26, %v1714_v24  ;;  %v1717_v30 = vpop.f32.mrb[6].mxu0 }
 0x1c2   : > { %v1738_v29 = vadd.f32 %v1737_v27, %v1736_v25  ;;  %v1739_v31 = vpop.f32.mrb[6].mxu1  ;;  %v1718_v32 = vpop.f32.mrb[7].mxu0 }
 0x1c3   : > { %v1740_v33 = vpop.f32.mrb[7].mxu1  ;;  %v1417_v34 = vadd.f32 %v1716_v28, %v1377_v23  ;;  %1467 = sbr.rel (%p1649_p12) target bundleno = 474 (0x1da), region = 81 }
 0x1c5   : > { %v1457_v36 = vadd.f32 %v1738_v29, %v1417_v34 }
 0x1c7   : > { %v1462_v37 = vadd.f32 %v1457_v36, %v754_v35 }
 0x1c9   : > { %1463 = vst [vmem:[#allocation2] sm:$0xff] %v1462_v37 }
 0x1d0   : > { %v1468_v38 = vld [vmem:[#allocation2] sm:$0xff] }
 0x1d1   : > { %v1476_v40 = vadd.f32 %v1650_v39, %v1468_v38 }
 0x1d3   : > { %v1477_v41 = vmul.f32 0.2, %v1476_v40 }
 0x1d5   : > { %v1478_v42 = vmax.f32 %v1476_v40, %v1477_v41 }
 0x1d7   : > { %v1479_v43 = vpack.c.bf16 %v1478_v42, %v1478_v42 }
 0x1d9   : > { %1480 = vst [vmem:[%s2283_s26] sm:$0xf] %v1479_v43 }
 0x1da PF: > { %s13_s18 = sadd.s32 1, %s1925_s18   ;;  %s2394_s12 = smov %s1905_s13 }
 0x1db   : > { %p10_p13 = scmp.ge.s32.totalorder %s13_s18, 74   ;;  %s2395_s13 = smov %s1999_s25 }
 0x1dc   : > { %s2396_s14 = smov %s1917_s16  ;;  %s2397_s15 = smov %s1921_s17 }
 0x1dd   : > { %s2398_s16 = smov %s2401_s19  ;;  %s2399_s17 = smov %s2405_s20 }
 0x1de   :  { %12 = sbr.rel (!%p10_p13) target bundleno = 4 (0x4), region = 120 }

</bundles_post_ra>
